<compile_context>
chip_gen: v7x
topology: tpu7x:2x2x1
jax: 0.10.0
libtpu: 0.0.40
codegen_flags: <defaults>
</compile_context>

<pallas_src>
import jax
import jax.numpy as jnp
from jax.experimental import pallas as pl
from jax.experimental.pallas import tpu as pltpu


# --------------- Fused conv1x1+ReLU -> fc1 -> fc2 -> dueling head ------------
def _fused_net_kernel(x_ref, wcp_ref, bcp_ref, w1_ref, b1_ref, w2_ref, b2_ref,
                      wh_ref, bh_ref, o_ref, acc_ref):
    k = pl.program_id(0)
    n_cin = x_ref.shape[0]          # conv input channels
    group = w1_ref.shape[0]         # conv output channels handled this step

    @pl.when(k == 0)
    def _init():
        acc_ref[...] = jnp.zeros_like(acc_ref)

    # Hoisted loads of the (tiny) input feature planes: list of [B, HW].
    x_planes = [x_ref[i] for i in range(n_cin)]

    # conv1x1 + ReLU for this step's `group` output channels, fused directly
    # into the fc1 contraction (VPU FMAs -> bf16 MXU dot; h0 never materialized).
    for c in range(group):                               # static unroll
        w_pl = wcp_ref[c]                                # [Cin, HW]  f32
        pre = x_planes[0] * w_pl[0:1]
        for i in range(1, n_cin):
            pre = pre + x_planes[i] * w_pl[i:i + 1]
        y_c = jnp.maximum(pre + bcp_ref[c], 0.0)         # [B, HW]    f32
        acc_ref[...] += jnp.dot(y_c.astype(jnp.bfloat16), w1_ref[c],
                                preferred_element_type=jnp.float32)

    @pl.when(k == pl.num_programs(0) - 1)
    def _finalize():
        h1 = jnp.maximum(acc_ref[...] + b1_ref[...], 0.0)            # fc1+relu
        h2 = jnp.maximum(
            jnp.dot(h1, w2_ref[...], preferred_element_type=jnp.float32)
            + b2_ref[...], 0.0)                                      # fc2+relu
        head = jnp.dot(h2, wh_ref[...],
                       preferred_element_type=jnp.float32) + bh_ref[...]
        adv = head[:, :-1]                                           # [B, A]
        val = head[:, -1:]                                           # [B, 1]
        # dueling combine: val + (adv - adv.mean()) — mean over ALL elements,
        # matching the PyTorch module's advantage_function.mean().
        o_ref[...] = val + (adv - jnp.mean(adv))


def fused_net(x_cbs, kp, *, group=16):
    """x_cbs: [Cin, B, HW] f32; kp: dict produced by prepare_params()."""
    n_cin, b, hw = x_cbs.shape
    n_cout = kp["wcp"].shape[0]        # 32 conv output channels
    d1 = kp["w1p"].shape[2]            # 512
    d2 = kp["w2t"].shape[1]            # 256
    a1 = kp["wh"].shape[1]             # action_num + 1
    a = a1 - 1
    assert n_cout % group == 0
    n_k = n_cout // group              # fc1 contraction tiles (tk = group*hw)

    return pl.pallas_call(
        _fused_net_kernel,
        out_shape=jax.ShapeDtypeStruct((b, a), jnp.float32),
        grid_spec=pltpu.PrefetchScalarGridSpec(
            num_scalar_prefetch=0,
            grid=(n_k,),
            in_specs=[
                pl.BlockSpec((n_cin, b, hw), lambda k: (0, 0, 0)),      # x
                pl.BlockSpec((group, n_cin, hw), lambda k: (k, 0, 0)),  # conv W
                pl.BlockSpec((group, 1, hw), lambda k: (k, 0, 0)),      # conv b
                pl.BlockSpec((group, hw, d1), lambda k: (k, 0, 0)),     # fc1 W
                pl.BlockSpec((1, d1), lambda k: (0, 0)),                # fc1 b
                pl.BlockSpec((d1, d2), lambda k: (0, 0)),               # fc2 W
                pl.BlockSpec((1, d2), lambda k: (0, 0)),                # fc2 b
                pl.BlockSpec((d2, a1), lambda k: (0, 0)),               # adv|val W
                pl.BlockSpec((1, a1), lambda k: (0, 0)),                # adv|val b
            ],
            out_specs=pl.BlockSpec((b, a), lambda k: (0, 0)),
            scratch_shapes=[pltpu.VMEM((b, d1), jnp.float32)],
        ),
        compiler_params=pltpu.CompilerParams(
            dimension_semantics=("arbitrary",)),
    )(x_cbs, kp["wcp"], kp["bcp"], kp["w1p"], kp["b1"], kp["w2t"], kp["b2"],
      kp["wh"], kp["bh"])


# ----------------------------- Parameter init --------------------------------
def _xavier_normal(key, shape_out_in):
    fan_out, fan_in = shape_out_in
    std = (2.0 / (fan_in + fan_out)) ** 0.5
    return std * jax.random.normal(key, shape_out_in, dtype=jnp.float32)


def init_params(key, states_channel, action_num):
    ks = jax.random.split(key, 5)
    return {
        # conv1: nn.Conv2d(states_channel, 32, kernel_size=(1,1))
        "wc": _xavier_normal(ks[0], (32, states_channel)),
        "bc": jnp.zeros((32,), jnp.float32),
        # fc1: Linear(6272, 512)
        "w1": _xavier_normal(ks[1], (512, 6272)),
        "b1": jnp.zeros((512,), jnp.float32),
        # fc2: Linear(512, 256)
        "w2": _xavier_normal(ks[2], (256, 512)),
        "b2": jnp.zeros((256,), jnp.float32),
        # adv: Linear(256, action_num)
        "wa": _xavier_normal(ks[3], (action_num, 256)),
        "ba": jnp.zeros((action_num,), jnp.float32),
        # val: Linear(256, 1)
        "wv": _xavier_normal(ks[4], (1, 256)),
        "bv": jnp.zeros((1,), jnp.float32),
    }


def prepare_params(params):
    """One-time re-layout of the PyTorch-style parameters into kernel form.

    Done OUTSIDE the jitted forward so the big fc1 weight is never
    transposed / re-cast per call.
    """
    wc = params["wc"]                              # [32, Cin]
    n_cout, n_cin = wc.shape
    d1, k1 = params["w1"].shape                    # 512, 6272
    hw = k1 // n_cout                              # 196

    # conv weight/bias broadcast over the HW lanes -> pure VPU FMAs in-kernel.
    wcp = jnp.broadcast_to(wc[:, :, None], (n_cout, n_cin, hw)).astype(jnp.float32)
    bcp = jnp.broadcast_to(params["bc"][:, None, None],
                           (n_cout, 1, hw)).astype(jnp.float32)
    # fc1 weight [512, 6272] -> [32, 196, 512]; w1p[c, s, o] == w1[o, c*196+s],
    # i.e. PyTorch's channel-major NCHW flatten is folded into this static
    # permutation.  bf16 halves the dominant HBM stream (accumulation is f32).
    w1p = jnp.transpose(params["w1"].reshape(d1, n_cout, hw),
                        (1, 2, 0)).astype(jnp.bfloat16)
    # adv / val heads fused into a single [256, A+1] matmul.
    wh = jnp.concatenate([params["wa"].T, params["wv"].T], axis=1)
    bh = jnp.concatenate([params["ba"], params["bv"]]).reshape(1, -1)
    return {
        "wcp": wcp, "bcp": bcp,
        "w1p": w1p, "b1": params["b1"].reshape(1, -1),
        "w2t": params["w2"].T, "b2": params["b2"].reshape(1, -1),
        "wh": wh, "bh": bh,
    }


# ----------------------------- Forward wrapper -------------------------------
@jax.jit
def forward(kparams, x):
    # x: NCHW [B, Cin, H, W]
    b, c, h, w = x.shape
    hw = h * w
    # Only runtime layout glue: [B,Cin,H,W] -> [Cin,B,HW] (a few KiB).  All
    # heavy re-layout lives in prepare_params().
    x_cbs = jnp.transpose(x.reshape(b, c, hw), (1, 0, 2)).astype(jnp.float32)
    return fused_net(x_cbs, kparams)


# ----------------------------- Pure-JAX reference ----------------------------
def reference_forward(params, x):
    b, c, h, w = x.shape
    y = jnp.einsum("oc,bchw->bohw", params["wc"], x) + params["bc"][None, :, None, None]
    y = jnp.maximum(y, 0.0)
    h0 = y.reshape(b, -1)
    h1 = jnp.maximum(h0 @ params["w1"].T + params["b1"], 0.0)
    h2 = jnp.maximum(h1 @ params["w2"].T + params["b2"], 0.0)
    adv = h2 @ params["wa"].T + params["ba"]
    val = h2 @ params["wv"].T + params["bv"]
    return val + (adv - adv.mean())


if __name__ == "__main__":
    # fc1 input is 6272 = 32 * 14 * 14, so spatial size must be 14x14.
    B, C, H, W = 2, 4, 14, 14
    ACTION_NUM = 14

    key = jax.random.PRNGKey(0)
    k_param, k_x = jax.random.split(key)
    params = init_params(k_param, states_channel=C, action_num=ACTION_NUM)
    kparams = prepare_params(params)          # one-time weight re-layout
    x = jax.random.normal(k_x, (B, C, H, W), dtype=jnp.float32)

    out = forward(kparams, x)
    out = jax.block_until_ready(out)

    ref = reference_forward(params, x)
    assert out.shape == (B, ACTION_NUM)
    # Tolerance widened vs. a pure-f32 reference because the fc1 weight and its
    # activations are streamed/contracted in bfloat16 (f32 accumulation).
    assert jnp.allclose(out, ref, rtol=2e-2, atol=2e-2), (
        float(jnp.max(jnp.abs(out - ref))))

    print("KERNEL_OK")
</pallas_src>

<mosaic_0001>
module attributes {stable_mosaic.version = 11 : i64} {
  func.func @_fused_net_kernel(%arg0: i32, %arg1: memref<4x2x196xf32, #tpu.memory_space<vmem>>, %arg2: memref<16x4x196xf32, #tpu.memory_space<vmem>>, %arg3: memref<16x1x196xf32, #tpu.memory_space<vmem>>, %arg4: memref<16x196x512xbf16, #tpu.memory_space<vmem>>, %arg5: memref<1x512xf32, #tpu.memory_space<vmem>>, %arg6: memref<512x256xf32, #tpu.memory_space<vmem>>, %arg7: memref<1x256xf32, #tpu.memory_space<vmem>>, %arg8: memref<256x15xf32, #tpu.memory_space<vmem>>, %arg9: memref<1x15xf32, #tpu.memory_space<vmem>>, %arg10: memref<2x14xf32, #tpu.memory_space<vmem>>, %arg11: memref<2x512xf32, #tpu.memory_space<vmem>>) attributes {dimension_semantics = [#tpu.dimension_semantics<arbitrary>], iteration_bounds = array<i64: 2>, scalar_prefetch = 0 : i64, scratch_operands = 1 : i64, tpu.core_type = #tpu.core_type<tc>, window_params = [{pipeline_mode = #tpu.pipeline_mode<synchronous>, transform_indices = @transform_0, window_bounds = array<i64: 4, 2, 196>}, {transform_indices = @transform_1, window_bounds = array<i64: 16, 4, 196>}, {transform_indices = @transform_2, window_bounds = array<i64: 16, 1, 196>}, {transform_indices = @transform_3, window_bounds = array<i64: 16, 196, 512>}, {pipeline_mode = #tpu.pipeline_mode<synchronous>, transform_indices = @transform_4, window_bounds = array<i64: 1, 512>}, {pipeline_mode = #tpu.pipeline_mode<synchronous>, transform_indices = @transform_5, window_bounds = array<i64: 512, 256>}, {pipeline_mode = #tpu.pipeline_mode<synchronous>, transform_indices = @transform_6, window_bounds = array<i64: 1, 256>}, {pipeline_mode = #tpu.pipeline_mode<synchronous>, transform_indices = @transform_7, window_bounds = array<i64: 256, 15>}, {pipeline_mode = #tpu.pipeline_mode<synchronous>, transform_indices = @transform_8, window_bounds = array<i64: 1, 15>}, {pipeline_mode = #tpu.pipeline_mode<synchronous>, transform_indices = @transform_9, window_bounds = array<i64: 2, 14>}]} {
    %c0_i32 = arith.constant 0 : i32
    %0 = arith.cmpi eq, %arg0, %c0_i32 : i32
    %1 = arith.extui %0 : i1 to i32
    %c0_i32_0 = arith.constant 0 : i32
    %2 = arith.cmpi ne, %1, %c0_i32_0 : i32
    scf.if %2 {
      %cst_237 = arith.constant 0.000000e+00 : f32
      %494 = vector.broadcast %cst_237 : f32 to vector<2x512xf32>
      %c0_238 = arith.constant 0 : index
      %c0_239 = arith.constant 0 : index
      %495 = vector.load %arg11[%c0_238, %c0_239] : memref<2x512xf32, #tpu.memory_space<vmem>>, vector<2x512xf32>
      tpu.vector_store %arg11[%c0_238, %c0_239], %494 {strides = array<i32>} : memref<2x512xf32, #tpu.memory_space<vmem>>, vector<2x512xf32>,
    } else {
    }
    %c0 = arith.constant 0 : index
    %c0_1 = arith.constant 0 : index
    %c0_2 = arith.constant 0 : index
    %3 = vector.load %arg1[%c0, %c0_1, %c0_2] : memref<4x2x196xf32, #tpu.memory_space<vmem>>, vector<1x2x196xf32>
    %4 = vector.shape_cast %3 : vector<1x2x196xf32> to vector<2x196xf32>
    %c1 = arith.constant 1 : index
    %c0_3 = arith.constant 0 : index
    %c0_4 = arith.constant 0 : index
    %5 = vector.load %arg1[%c1, %c0_3, %c0_4] : memref<4x2x196xf32, #tpu.memory_space<vmem>>, vector<1x2x196xf32>
    %6 = vector.shape_cast %5 : vector<1x2x196xf32> to vector<2x196xf32>
    %c2 = arith.constant 2 : index
    %c0_5 = arith.constant 0 : index
    %c0_6 = arith.constant 0 : index
    %7 = vector.load %arg1[%c2, %c0_5, %c0_6] : memref<4x2x196xf32, #tpu.memory_space<vmem>>, vector<1x2x196xf32>
    %8 = vector.shape_cast %7 : vector<1x2x196xf32> to vector<2x196xf32>
    %c3 = arith.constant 3 : index
    %c0_7 = arith.constant 0 : index
    %c0_8 = arith.constant 0 : index
    %9 = vector.load %arg1[%c3, %c0_7, %c0_8] : memref<4x2x196xf32, #tpu.memory_space<vmem>>, vector<1x2x196xf32>
    %10 = vector.shape_cast %9 : vector<1x2x196xf32> to vector<2x196xf32>
    %c0_9 = arith.constant 0 : index
    %c0_10 = arith.constant 0 : index
    %c0_11 = arith.constant 0 : index
    %11 = vector.load %arg2[%c0_9, %c0_10, %c0_11] : memref<16x4x196xf32, #tpu.memory_space<vmem>>, vector<1x4x196xf32>
    %12 = vector.shape_cast %11 : vector<1x4x196xf32> to vector<4x196xf32>
    %13 = vector.extract_strided_slice %12 {offsets = [0, 0], sizes = [1, 196], strides = [1, 1]} : vector<4x196xf32> to vector<1x196xf32>
    %14 = vector.broadcast %13 : vector<1x196xf32> to vector<2x196xf32>
    %15 = arith.mulf %4, %14 : vector<2x196xf32>
    %16 = vector.extract_strided_slice %12 {offsets = [1, 0], sizes = [1, 196], strides = [1, 1]} : vector<4x196xf32> to vector<1x196xf32>
    %17 = vector.broadcast %16 : vector<1x196xf32> to vector<2x196xf32>
    %18 = arith.mulf %6, %17 : vector<2x196xf32>
    %19 = arith.addf %15, %18 : vector<2x196xf32>
    %20 = vector.extract_strided_slice %12 {offsets = [2, 0], sizes = [1, 196], strides = [1, 1]} : vector<4x196xf32> to vector<1x196xf32>
    %21 = vector.broadcast %20 : vector<1x196xf32> to vector<2x196xf32>
    %22 = arith.mulf %8, %21 : vector<2x196xf32>
    %23 = arith.addf %19, %22 : vector<2x196xf32>
    %24 = vector.extract_strided_slice %12 {offsets = [3, 0], sizes = [1, 196], strides = [1, 1]} : vector<4x196xf32> to vector<1x196xf32>
    %25 = vector.broadcast %24 : vector<1x196xf32> to vector<2x196xf32>
    %26 = arith.mulf %10, %25 : vector<2x196xf32>
    %27 = arith.addf %23, %26 : vector<2x196xf32>
    %c0_12 = arith.constant 0 : index
    %c0_13 = arith.constant 0 : index
    %c0_14 = arith.constant 0 : index
    %28 = vector.load %arg3[%c0_12, %c0_13, %c0_14] : memref<16x1x196xf32, #tpu.memory_space<vmem>>, vector<1x1x196xf32>
    %29 = vector.shape_cast %28 : vector<1x1x196xf32> to vector<1x196xf32>
    %30 = vector.broadcast %29 : vector<1x196xf32> to vector<2x196xf32>
    %31 = arith.addf %27, %30 : vector<2x196xf32>
    %cst = arith.constant 0.000000e+00 : f32
    %32 = vector.broadcast %cst : f32 to vector<2x196xf32>
    %33 = arith.maximumf %31, %32 : vector<2x196xf32>
    %c0_15 = arith.constant 0 : index
    %c0_16 = arith.constant 0 : index
    %34 = vector.load %arg11[%c0_15, %c0_16] : memref<2x512xf32, #tpu.memory_space<vmem>>, vector<2x512xf32>
    %35 = arith.truncf %33 : vector<2x196xf32> to vector<2x196xbf16>
    %c0_17 = arith.constant 0 : index
    %c0_18 = arith.constant 0 : index
    %c0_19 = arith.constant 0 : index
    %36 = vector.load %arg4[%c0_17, %c0_18, %c0_19] : memref<16x196x512xbf16, #tpu.memory_space<vmem>>, vector<1x196x512xbf16>
    %37 = vector.shape_cast %36 : vector<1x196x512xbf16> to vector<196x512xbf16>
    %cst_20 = arith.constant dense<0.000000e+00> : vector<2x512xf32>
    %38 = tpu.matmul %35, %37, %cst_20 {dimension_numbers = #tpu.dot_dimension_numbers<[1], [0], [0], [1], [0, 0, 1, 1], [], []>} : vector<2x196xbf16>, vector<196x512xbf16>, vector<2x512xf32> -> vector<2x512xf32>
    %39 = arith.addf %34, %38 : vector<2x512xf32>
    %c0_21 = arith.constant 0 : index
    %c0_22 = arith.constant 0 : index
    %40 = vector.load %arg11[%c0_21, %c0_22] : memref<2x512xf32, #tpu.memory_space<vmem>>, vector<2x512xf32>
    tpu.vector_store %arg11[%c0_21, %c0_22], %39 {strides = array<i32>} : memref<2x512xf32, #tpu.memory_space<vmem>>, vector<2x512xf32>,
    %c1_23 = arith.constant 1 : index
    %c0_24 = arith.constant 0 : index
    %c0_25 = arith.constant 0 : index
    %41 = vector.load %arg2[%c1_23, %c0_24, %c0_25] : memref<16x4x196xf32, #tpu.memory_space<vmem>>, vector<1x4x196xf32>
    %42 = vector.shape_cast %41 : vector<1x4x196xf32> to vector<4x196xf32>
    %43 = vector.extract_strided_slice %42 {offsets = [0, 0], sizes = [1, 196], strides = [1, 1]} : vector<4x196xf32> to vector<1x196xf32>
    %44 = vector.broadcast %43 : vector<1x196xf32> to vector<2x196xf32>
    %45 = arith.mulf %4, %44 : vector<2x196xf32>
    %46 = vector.extract_strided_slice %42 {offsets = [1, 0], sizes = [1, 196], strides = [1, 1]} : vector<4x196xf32> to vector<1x196xf32>
    %47 = vector.broadcast %46 : vector<1x196xf32> to vector<2x196xf32>
    %48 = arith.mulf %6, %47 : vector<2x196xf32>
    %49 = arith.addf %45, %48 : vector<2x196xf32>
    %50 = vector.extract_strided_slice %42 {offsets = [2, 0], sizes = [1, 196], strides = [1, 1]} : vector<4x196xf32> to vector<1x196xf32>
    %51 = vector.broadcast %50 : vector<1x196xf32> to vector<2x196xf32>
    %52 = arith.mulf %8, %51 : vector<2x196xf32>
    %53 = arith.addf %49, %52 : vector<2x196xf32>
    %54 = vector.extract_strided_slice %42 {offsets = [3, 0], sizes = [1, 196], strides = [1, 1]} : vector<4x196xf32> to vector<1x196xf32>
    %55 = vector.broadcast %54 : vector<1x196xf32> to vector<2x196xf32>
    %56 = arith.mulf %10, %55 : vector<2x196xf32>
    %57 = arith.addf %53, %56 : vector<2x196xf32>
    %c1_26 = arith.constant 1 : index
    %c0_27 = arith.constant 0 : index
    %c0_28 = arith.constant 0 : index
    %58 = vector.load %arg3[%c1_26, %c0_27, %c0_28] : memref<16x1x196xf32, #tpu.memory_space<vmem>>, vector<1x1x196xf32>
    %59 = vector.shape_cast %58 : vector<1x1x196xf32> to vector<1x196xf32>
    %60 = vector.broadcast %59 : vector<1x196xf32> to vector<2x196xf32>
    %61 = arith.addf %57, %60 : vector<2x196xf32>
    %cst_29 = arith.constant 0.000000e+00 : f32
    %62 = vector.broadcast %cst_29 : f32 to vector<2x196xf32>
    %63 = arith.maximumf %61, %62 : vector<2x196xf32>
    %c0_30 = arith.constant 0 : index
    %c0_31 = arith.constant 0 : index
    %64 = vector.load %arg11[%c0_30, %c0_31] : memref<2x512xf32, #tpu.memory_space<vmem>>, vector<2x512xf32>
    %65 = arith.truncf %63 : vector<2x196xf32> to vector<2x196xbf16>
    %c1_32 = arith.constant 1 : index
    %c0_33 = arith.constant 0 : index
    %c0_34 = arith.constant 0 : index
    %66 = vector.load %arg4[%c1_32, %c0_33, %c0_34] : memref<16x196x512xbf16, #tpu.memory_space<vmem>>, vector<1x196x512xbf16>
    %67 = vector.shape_cast %66 : vector<1x196x512xbf16> to vector<196x512xbf16>
    %cst_35 = arith.constant dense<0.000000e+00> : vector<2x512xf32>
    %68 = tpu.matmul %65, %67, %cst_35 {dimension_numbers = #tpu.dot_dimension_numbers<[1], [0], [0], [1], [0, 0, 1, 1], [], []>} : vector<2x196xbf16>, vector<196x512xbf16>, vector<2x512xf32> -> vector<2x512xf32>
    %69 = arith.addf %64, %68 : vector<2x512xf32>
    %c0_36 = arith.constant 0 : index
    %c0_37 = arith.constant 0 : index
    %70 = vector.load %arg11[%c0_36, %c0_37] : memref<2x512xf32, #tpu.memory_space<vmem>>, vector<2x512xf32>
    tpu.vector_store %arg11[%c0_36, %c0_37], %69 {strides = array<i32>} : memref<2x512xf32, #tpu.memory_space<vmem>>, vector<2x512xf32>,
    %c2_38 = arith.constant 2 : index
    %c0_39 = arith.constant 0 : index
    %c0_40 = arith.constant 0 : index
    %71 = vector.load %arg2[%c2_38, %c0_39, %c0_40] : memref<16x4x196xf32, #tpu.memory_space<vmem>>, vector<1x4x196xf32>
    %72 = vector.shape_cast %71 : vector<1x4x196xf32> to vector<4x196xf32>
    %73 = vector.extract_strided_slice %72 {offsets = [0, 0], sizes = [1, 196], strides = [1, 1]} : vector<4x196xf32> to vector<1x196xf32>
    %74 = vector.broadcast %73 : vector<1x196xf32> to vector<2x196xf32>
    %75 = arith.mulf %4, %74 : vector<2x196xf32>
    %76 = vector.extract_strided_slice %72 {offsets = [1, 0], sizes = [1, 196], strides = [1, 1]} : vector<4x196xf32> to vector<1x196xf32>
    %77 = vector.broadcast %76 : vector<1x196xf32> to vector<2x196xf32>
    %78 = arith.mulf %6, %77 : vector<2x196xf32>
    %79 = arith.addf %75, %78 : vector<2x196xf32>
    %80 = vector.extract_strided_slice %72 {offsets = [2, 0], sizes = [1, 196], strides = [1, 1]} : vector<4x196xf32> to vector<1x196xf32>
    %81 = vector.broadcast %80 : vector<1x196xf32> to vector<2x196xf32>
    %82 = arith.mulf %8, %81 : vector<2x196xf32>
    %83 = arith.addf %79, %82 : vector<2x196xf32>
    %84 = vector.extract_strided_slice %72 {offsets = [3, 0], sizes = [1, 196], strides = [1, 1]} : vector<4x196xf32> to vector<1x196xf32>
    %85 = vector.broadcast %84 : vector<1x196xf32> to vector<2x196xf32>
    %86 = arith.mulf %10, %85 : vector<2x196xf32>
    %87 = arith.addf %83, %86 : vector<2x196xf32>
    %c2_41 = arith.constant 2 : index
    %c0_42 = arith.constant 0 : index
    %c0_43 = arith.constant 0 : index
    %88 = vector.load %arg3[%c2_41, %c0_42, %c0_43] : memref<16x1x196xf32, #tpu.memory_space<vmem>>, vector<1x1x196xf32>
    %89 = vector.shape_cast %88 : vector<1x1x196xf32> to vector<1x196xf32>
    %90 = vector.broadcast %89 : vector<1x196xf32> to vector<2x196xf32>
    %91 = arith.addf %87, %90 : vector<2x196xf32>
    %cst_44 = arith.constant 0.000000e+00 : f32
    %92 = vector.broadcast %cst_44 : f32 to vector<2x196xf32>
    %93 = arith.maximumf %91, %92 : vector<2x196xf32>
    %c0_45 = arith.constant 0 : index
    %c0_46 = arith.constant 0 : index
    %94 = vector.load %arg11[%c0_45, %c0_46] : memref<2x512xf32, #tpu.memory_space<vmem>>, vector<2x512xf32>
    %95 = arith.truncf %93 : vector<2x196xf32> to vector<2x196xbf16>
    %c2_47 = arith.constant 2 : index
    %c0_48 = arith.constant 0 : index
    %c0_49 = arith.constant 0 : index
    %96 = vector.load %arg4[%c2_47, %c0_48, %c0_49] : memref<16x196x512xbf16, #tpu.memory_space<vmem>>, vector<1x196x512xbf16>
    %97 = vector.shape_cast %96 : vector<1x196x512xbf16> to vector<196x512xbf16>
    %cst_50 = arith.constant dense<0.000000e+00> : vector<2x512xf32>
    %98 = tpu.matmul %95, %97, %cst_50 {dimension_numbers = #tpu.dot_dimension_numbers<[1], [0], [0], [1], [0, 0, 1, 1], [], []>} : vector<2x196xbf16>, vector<196x512xbf16>, vector<2x512xf32> -> vector<2x512xf32>
    %99 = arith.addf %94, %98 : vector<2x512xf32>
    %c0_51 = arith.constant 0 : index
    %c0_52 = arith.constant 0 : index
    %100 = vector.load %arg11[%c0_51, %c0_52] : memref<2x512xf32, #tpu.memory_space<vmem>>, vector<2x512xf32>
    tpu.vector_store %arg11[%c0_51, %c0_52], %99 {strides = array<i32>} : memref<2x512xf32, #tpu.memory_space<vmem>>, vector<2x512xf32>,
    %c3_53 = arith.constant 3 : index
    %c0_54 = arith.constant 0 : index
    %c0_55 = arith.constant 0 : index
    %101 = vector.load %arg2[%c3_53, %c0_54, %c0_55] : memref<16x4x196xf32, #tpu.memory_space<vmem>>, vector<1x4x196xf32>
    %102 = vector.shape_cast %101 : vector<1x4x196xf32> to vector<4x196xf32>
    %103 = vector.extract_strided_slice %102 {offsets = [0, 0], sizes = [1, 196], strides = [1, 1]} : vector<4x196xf32> to vector<1x196xf32>
    %104 = vector.broadcast %103 : vector<1x196xf32> to vector<2x196xf32>
    %105 = arith.mulf %4, %104 : vector<2x196xf32>
    %106 = vector.extract_strided_slice %102 {offsets = [1, 0], sizes = [1, 196], strides = [1, 1]} : vector<4x196xf32> to vector<1x196xf32>
    %107 = vector.broadcast %106 : vector<1x196xf32> to vector<2x196xf32>
    %108 = arith.mulf %6, %107 : vector<2x196xf32>
    %109 = arith.addf %105, %108 : vector<2x196xf32>
    %110 = vector.extract_strided_slice %102 {offsets = [2, 0], sizes = [1, 196], strides = [1, 1]} : vector<4x196xf32> to vector<1x196xf32>
    %111 = vector.broadcast %110 : vector<1x196xf32> to vector<2x196xf32>
    %112 = arith.mulf %8, %111 : vector<2x196xf32>
    %113 = arith.addf %109, %112 : vector<2x196xf32>
    %114 = vector.extract_strided_slice %102 {offsets = [3, 0], sizes = [1, 196], strides = [1, 1]} : vector<4x196xf32> to vector<1x196xf32>
    %115 = vector.broadcast %114 : vector<1x196xf32> to vector<2x196xf32>
    %116 = arith.mulf %10, %115 : vector<2x196xf32>
    %117 = arith.addf %113, %116 : vector<2x196xf32>
    %c3_56 = arith.constant 3 : index
    %c0_57 = arith.constant 0 : index
    %c0_58 = arith.constant 0 : index
    %118 = vector.load %arg3[%c3_56, %c0_57, %c0_58] : memref<16x1x196xf32, #tpu.memory_space<vmem>>, vector<1x1x196xf32>
    %119 = vector.shape_cast %118 : vector<1x1x196xf32> to vector<1x196xf32>
    %120 = vector.broadcast %119 : vector<1x196xf32> to vector<2x196xf32>
    %121 = arith.addf %117, %120 : vector<2x196xf32>
    %cst_59 = arith.constant 0.000000e+00 : f32
    %122 = vector.broadcast %cst_59 : f32 to vector<2x196xf32>
    %123 = arith.maximumf %121, %122 : vector<2x196xf32>
    %c0_60 = arith.constant 0 : index
    %c0_61 = arith.constant 0 : index
    %124 = vector.load %arg11[%c0_60, %c0_61] : memref<2x512xf32, #tpu.memory_space<vmem>>, vector<2x512xf32>
    %125 = arith.truncf %123 : vector<2x196xf32> to vector<2x196xbf16>
    %c3_62 = arith.constant 3 : index
    %c0_63 = arith.constant 0 : index
    %c0_64 = arith.constant 0 : index
    %126 = vector.load %arg4[%c3_62, %c0_63, %c0_64] : memref<16x196x512xbf16, #tpu.memory_space<vmem>>, vector<1x196x512xbf16>
    %127 = vector.shape_cast %126 : vector<1x196x512xbf16> to vector<196x512xbf16>
    %cst_65 = arith.constant dense<0.000000e+00> : vector<2x512xf32>
    %128 = tpu.matmul %125, %127, %cst_65 {dimension_numbers = #tpu.dot_dimension_numbers<[1], [0], [0], [1], [0, 0, 1, 1], [], []>} : vector<2x196xbf16>, vector<196x512xbf16>, vector<2x512xf32> -> vector<2x512xf32>
    %129 = arith.addf %124, %128 : vector<2x512xf32>
    %c0_66 = arith.constant 0 : index
    %c0_67 = arith.constant 0 : index
    %130 = vector.load %arg11[%c0_66, %c0_67] : memref<2x512xf32, #tpu.memory_space<vmem>>, vector<2x512xf32>
    tpu.vector_store %arg11[%c0_66, %c0_67], %129 {strides = array<i32>} : memref<2x512xf32, #tpu.memory_space<vmem>>, vector<2x512xf32>,
    %c4 = arith.constant 4 : index
    %c0_68 = arith.constant 0 : index
    %c0_69 = arith.constant 0 : index
    %131 = vector.load %arg2[%c4, %c0_68, %c0_69] : memref<16x4x196xf32, #tpu.memory_space<vmem>>, vector<1x4x196xf32>
    %132 = vector.shape_cast %131 : vector<1x4x196xf32> to vector<4x196xf32>
    %133 = vector.extract_strided_slice %132 {offsets = [0, 0], sizes = [1, 196], strides = [1, 1]} : vector<4x196xf32> to vector<1x196xf32>
    %134 = vector.broadcast %133 : vector<1x196xf32> to vector<2x196xf32>
    %135 = arith.mulf %4, %134 : vector<2x196xf32>
    %136 = vector.extract_strided_slice %132 {offsets = [1, 0], sizes = [1, 196], strides = [1, 1]} : vector<4x196xf32> to vector<1x196xf32>
    %137 = vector.broadcast %136 : vector<1x196xf32> to vector<2x196xf32>
    %138 = arith.mulf %6, %137 : vector<2x196xf32>
    %139 = arith.addf %135, %138 : vector<2x196xf32>
    %140 = vector.extract_strided_slice %132 {offsets = [2, 0], sizes = [1, 196], strides = [1, 1]} : vector<4x196xf32> to vector<1x196xf32>
    %141 = vector.broadcast %140 : vector<1x196xf32> to vector<2x196xf32>
    %142 = arith.mulf %8, %141 : vector<2x196xf32>
    %143 = arith.addf %139, %142 : vector<2x196xf32>
    %144 = vector.extract_strided_slice %132 {offsets = [3, 0], sizes = [1, 196], strides = [1, 1]} : vector<4x196xf32> to vector<1x196xf32>
    %145 = vector.broadcast %144 : vector<1x196xf32> to vector<2x196xf32>
    %146 = arith.mulf %10, %145 : vector<2x196xf32>
    %147 = arith.addf %143, %146 : vector<2x196xf32>
    %c4_70 = arith.constant 4 : index
    %c0_71 = arith.constant 0 : index
    %c0_72 = arith.constant 0 : index
    %148 = vector.load %arg3[%c4_70, %c0_71, %c0_72] : memref<16x1x196xf32, #tpu.memory_space<vmem>>, vector<1x1x196xf32>
    %149 = vector.shape_cast %148 : vector<1x1x196xf32> to vector<1x196xf32>
    %150 = vector.broadcast %149 : vector<1x196xf32> to vector<2x196xf32>
    %151 = arith.addf %147, %150 : vector<2x196xf32>
    %cst_73 = arith.constant 0.000000e+00 : f32
    %152 = vector.broadcast %cst_73 : f32 to vector<2x196xf32>
    %153 = arith.maximumf %151, %152 : vector<2x196xf32>
    %c0_74 = arith.constant 0 : index
    %c0_75 = arith.constant 0 : index
    %154 = vector.load %arg11[%c0_74, %c0_75] : memref<2x512xf32, #tpu.memory_space<vmem>>, vector<2x512xf32>
    %155 = arith.truncf %153 : vector<2x196xf32> to vector<2x196xbf16>
    %c4_76 = arith.constant 4 : index
    %c0_77 = arith.constant 0 : index
    %c0_78 = arith.constant 0 : index
    %156 = vector.load %arg4[%c4_76, %c0_77, %c0_78] : memref<16x196x512xbf16, #tpu.memory_space<vmem>>, vector<1x196x512xbf16>
    %157 = vector.shape_cast %156 : vector<1x196x512xbf16> to vector<196x512xbf16>
    %cst_79 = arith.constant dense<0.000000e+00> : vector<2x512xf32>
    %158 = tpu.matmul %155, %157, %cst_79 {dimension_numbers = #tpu.dot_dimension_numbers<[1], [0], [0], [1], [0, 0, 1, 1], [], []>} : vector<2x196xbf16>, vector<196x512xbf16>, vector<2x512xf32> -> vector<2x512xf32>
    %159 = arith.addf %154, %158 : vector<2x512xf32>
    %c0_80 = arith.constant 0 : index
    %c0_81 = arith.constant 0 : index
    %160 = vector.load %arg11[%c0_80, %c0_81] : memref<2x512xf32, #tpu.memory_space<vmem>>, vector<2x512xf32>
    tpu.vector_store %arg11[%c0_80, %c0_81], %159 {strides = array<i32>} : memref<2x512xf32, #tpu.memory_space<vmem>>, vector<2x512xf32>,
    %c5 = arith.constant 5 : index
    %c0_82 = arith.constant 0 : index
    %c0_83 = arith.constant 0 : index
    %161 = vector.load %arg2[%c5, %c0_82, %c0_83] : memref<16x4x196xf32, #tpu.memory_space<vmem>>, vector<1x4x196xf32>
    %162 = vector.shape_cast %161 : vector<1x4x196xf32> to vector<4x196xf32>
    %163 = vector.extract_strided_slice %162 {offsets = [0, 0], sizes = [1, 196], strides = [1, 1]} : vector<4x196xf32> to vector<1x196xf32>
    %164 = vector.broadcast %163 : vector<1x196xf32> to vector<2x196xf32>
    %165 = arith.mulf %4, %164 : vector<2x196xf32>
    %166 = vector.extract_strided_slice %162 {offsets = [1, 0], sizes = [1, 196], strides = [1, 1]} : vector<4x196xf32> to vector<1x196xf32>
    %167 = vector.broadcast %166 : vector<1x196xf32> to vector<2x196xf32>
    %168 = arith.mulf %6, %167 : vector<2x196xf32>
    %169 = arith.addf %165, %168 : vector<2x196xf32>
    %170 = vector.extract_strided_slice %162 {offsets = [2, 0], sizes = [1, 196], strides = [1, 1]} : vector<4x196xf32> to vector<1x196xf32>
    %171 = vector.broadcast %170 : vector<1x196xf32> to vector<2x196xf32>
    %172 = arith.mulf %8, %171 : vector<2x196xf32>
    %173 = arith.addf %169, %172 : vector<2x196xf32>
    %174 = vector.extract_strided_slice %162 {offsets = [3, 0], sizes = [1, 196], strides = [1, 1]} : vector<4x196xf32> to vector<1x196xf32>
    %175 = vector.broadcast %174 : vector<1x196xf32> to vector<2x196xf32>
    %176 = arith.mulf %10, %175 : vector<2x196xf32>
    %177 = arith.addf %173, %176 : vector<2x196xf32>
    %c5_84 = arith.constant 5 : index
    %c0_85 = arith.constant 0 : index
    %c0_86 = arith.constant 0 : index
    %178 = vector.load %arg3[%c5_84, %c0_85, %c0_86] : memref<16x1x196xf32, #tpu.memory_space<vmem>>, vector<1x1x196xf32>
    %179 = vector.shape_cast %178 : vector<1x1x196xf32> to vector<1x196xf32>
    %180 = vector.broadcast %179 : vector<1x196xf32> to vector<2x196xf32>
    %181 = arith.addf %177, %180 : vector<2x196xf32>
    %cst_87 = arith.constant 0.000000e+00 : f32
    %182 = vector.broadcast %cst_87 : f32 to vector<2x196xf32>
    %183 = arith.maximumf %181, %182 : vector<2x196xf32>
    %c0_88 = arith.constant 0 : index
    %c0_89 = arith.constant 0 : index
    %184 = vector.load %arg11[%c0_88, %c0_89] : memref<2x512xf32, #tpu.memory_space<vmem>>, vector<2x512xf32>
    %185 = arith.truncf %183 : vector<2x196xf32> to vector<2x196xbf16>
    %c5_90 = arith.constant 5 : index
    %c0_91 = arith.constant 0 : index
    %c0_92 = arith.constant 0 : index
    %186 = vector.load %arg4[%c5_90, %c0_91, %c0_92] : memref<16x196x512xbf16, #tpu.memory_space<vmem>>, vector<1x196x512xbf16>
    %187 = vector.shape_cast %186 : vector<1x196x512xbf16> to vector<196x512xbf16>
    %cst_93 = arith.constant dense<0.000000e+00> : vector<2x512xf32>
    %188 = tpu.matmul %185, %187, %cst_93 {dimension_numbers = #tpu.dot_dimension_numbers<[1], [0], [0], [1], [0, 0, 1, 1], [], []>} : vector<2x196xbf16>, vector<196x512xbf16>, vector<2x512xf32> -> vector<2x512xf32>
    %189 = arith.addf %184, %188 : vector<2x512xf32>
    %c0_94 = arith.constant 0 : index
    %c0_95 = arith.constant 0 : index
    %190 = vector.load %arg11[%c0_94, %c0_95] : memref<2x512xf32, #tpu.memory_space<vmem>>, vector<2x512xf32>
    tpu.vector_store %arg11[%c0_94, %c0_95], %189 {strides = array<i32>} : memref<2x512xf32, #tpu.memory_space<vmem>>, vector<2x512xf32>,
    %c6 = arith.constant 6 : index
    %c0_96 = arith.constant 0 : index
    %c0_97 = arith.constant 0 : index
    %191 = vector.load %arg2[%c6, %c0_96, %c0_97] : memref<16x4x196xf32, #tpu.memory_space<vmem>>, vector<1x4x196xf32>
    %192 = vector.shape_cast %191 : vector<1x4x196xf32> to vector<4x196xf32>
    %193 = vector.extract_strided_slice %192 {offsets = [0, 0], sizes = [1, 196], strides = [1, 1]} : vector<4x196xf32> to vector<1x196xf32>
    %194 = vector.broadcast %193 : vector<1x196xf32> to vector<2x196xf32>
    %195 = arith.mulf %4, %194 : vector<2x196xf32>
    %196 = vector.extract_strided_slice %192 {offsets = [1, 0], sizes = [1, 196], strides = [1, 1]} : vector<4x196xf32> to vector<1x196xf32>
    %197 = vector.broadcast %196 : vector<1x196xf32> to vector<2x196xf32>
    %198 = arith.mulf %6, %197 : vector<2x196xf32>
    %199 = arith.addf %195, %198 : vector<2x196xf32>
    %200 = vector.extract_strided_slice %192 {offsets = [2, 0], sizes = [1, 196], strides = [1, 1]} : vector<4x196xf32> to vector<1x196xf32>
    %201 = vector.broadcast %200 : vector<1x196xf32> to vector<2x196xf32>
    %202 = arith.mulf %8, %201 : vector<2x196xf32>
    %203 = arith.addf %199, %202 : vector<2x196xf32>
    %204 = vector.extract_strided_slice %192 {offsets = [3, 0], sizes = [1, 196], strides = [1, 1]} : vector<4x196xf32> to vector<1x196xf32>
    %205 = vector.broadcast %204 : vector<1x196xf32> to vector<2x196xf32>
    %206 = arith.mulf %10, %205 : vector<2x196xf32>
    %207 = arith.addf %203, %206 : vector<2x196xf32>
    %c6_98 = arith.constant 6 : index
    %c0_99 = arith.constant 0 : index
    %c0_100 = arith.constant 0 : index
    %208 = vector.load %arg3[%c6_98, %c0_99, %c0_100] : memref<16x1x196xf32, #tpu.memory_space<vmem>>, vector<1x1x196xf32>
    %209 = vector.shape_cast %208 : vector<1x1x196xf32> to vector<1x196xf32>
    %210 = vector.broadcast %209 : vector<1x196xf32> to vector<2x196xf32>
    %211 = arith.addf %207, %210 : vector<2x196xf32>
    %cst_101 = arith.constant 0.000000e+00 : f32
    %212 = vector.broadcast %cst_101 : f32 to vector<2x196xf32>
    %213 = arith.maximumf %211, %212 : vector<2x196xf32>
    %c0_102 = arith.constant 0 : index
    %c0_103 = arith.constant 0 : index
    %214 = vector.load %arg11[%c0_102, %c0_103] : memref<2x512xf32, #tpu.memory_space<vmem>>, vector<2x512xf32>
    %215 = arith.truncf %213 : vector<2x196xf32> to vector<2x196xbf16>
    %c6_104 = arith.constant 6 : index
    %c0_105 = arith.constant 0 : index
    %c0_106 = arith.constant 0 : index
    %216 = vector.load %arg4[%c6_104, %c0_105, %c0_106] : memref<16x196x512xbf16, #tpu.memory_space<vmem>>, vector<1x196x512xbf16>
    %217 = vector.shape_cast %216 : vector<1x196x512xbf16> to vector<196x512xbf16>
    %cst_107 = arith.constant dense<0.000000e+00> : vector<2x512xf32>
    %218 = tpu.matmul %215, %217, %cst_107 {dimension_numbers = #tpu.dot_dimension_numbers<[1], [0], [0], [1], [0, 0, 1, 1], [], []>} : vector<2x196xbf16>, vector<196x512xbf16>, vector<2x512xf32> -> vector<2x512xf32>
    %219 = arith.addf %214, %218 : vector<2x512xf32>
    %c0_108 = arith.constant 0 : index
    %c0_109 = arith.constant 0 : index
    %220 = vector.load %arg11[%c0_108, %c0_109] : memref<2x512xf32, #tpu.memory_space<vmem>>, vector<2x512xf32>
    tpu.vector_store %arg11[%c0_108, %c0_109], %219 {strides = array<i32>} : memref<2x512xf32, #tpu.memory_space<vmem>>, vector<2x512xf32>,
    %c7 = arith.constant 7 : index
    %c0_110 = arith.constant 0 : index
    %c0_111 = arith.constant 0 : index
    %221 = vector.load %arg2[%c7, %c0_110, %c0_111] : memref<16x4x196xf32, #tpu.memory_space<vmem>>, vector<1x4x196xf32>
    %222 = vector.shape_cast %221 : vector<1x4x196xf32> to vector<4x196xf32>
    %223 = vector.extract_strided_slice %222 {offsets = [0, 0], sizes = [1, 196], strides = [1, 1]} : vector<4x196xf32> to vector<1x196xf32>
    %224 = vector.broadcast %223 : vector<1x196xf32> to vector<2x196xf32>
    %225 = arith.mulf %4, %224 : vector<2x196xf32>
    %226 = vector.extract_strided_slice %222 {offsets = [1, 0], sizes = [1, 196], strides = [1, 1]} : vector<4x196xf32> to vector<1x196xf32>
    %227 = vector.broadcast %226 : vector<1x196xf32> to vector<2x196xf32>
    %228 = arith.mulf %6, %227 : vector<2x196xf32>
    %229 = arith.addf %225, %228 : vector<2x196xf32>
    %230 = vector.extract_strided_slice %222 {offsets = [2, 0], sizes = [1, 196], strides = [1, 1]} : vector<4x196xf32> to vector<1x196xf32>
    %231 = vector.broadcast %230 : vector<1x196xf32> to vector<2x196xf32>
    %232 = arith.mulf %8, %231 : vector<2x196xf32>
    %233 = arith.addf %229, %232 : vector<2x196xf32>
    %234 = vector.extract_strided_slice %222 {offsets = [3, 0], sizes = [1, 196], strides = [1, 1]} : vector<4x196xf32> to vector<1x196xf32>
    %235 = vector.broadcast %234 : vector<1x196xf32> to vector<2x196xf32>
    %236 = arith.mulf %10, %235 : vector<2x196xf32>
    %237 = arith.addf %233, %236 : vector<2x196xf32>
    %c7_112 = arith.constant 7 : index
    %c0_113 = arith.constant 0 : index
    %c0_114 = arith.constant 0 : index
    %238 = vector.load %arg3[%c7_112, %c0_113, %c0_114] : memref<16x1x196xf32, #tpu.memory_space<vmem>>, vector<1x1x196xf32>
    %239 = vector.shape_cast %238 : vector<1x1x196xf32> to vector<1x196xf32>
    %240 = vector.broadcast %239 : vector<1x196xf32> to vector<2x196xf32>
    %241 = arith.addf %237, %240 : vector<2x196xf32>
    %cst_115 = arith.constant 0.000000e+00 : f32
    %242 = vector.broadcast %cst_115 : f32 to vector<2x196xf32>
    %243 = arith.maximumf %241, %242 : vector<2x196xf32>
    %c0_116 = arith.constant 0 : index
    %c0_117 = arith.constant 0 : index
    %244 = vector.load %arg11[%c0_116, %c0_117] : memref<2x512xf32, #tpu.memory_space<vmem>>, vector<2x512xf32>
    %245 = arith.truncf %243 : vector<2x196xf32> to vector<2x196xbf16>
    %c7_118 = arith.constant 7 : index
    %c0_119 = arith.constant 0 : index
    %c0_120 = arith.constant 0 : index
    %246 = vector.load %arg4[%c7_118, %c0_119, %c0_120] : memref<16x196x512xbf16, #tpu.memory_space<vmem>>, vector<1x196x512xbf16>
    %247 = vector.shape_cast %246 : vector<1x196x512xbf16> to vector<196x512xbf16>
    %cst_121 = arith.constant dense<0.000000e+00> : vector<2x512xf32>
    %248 = tpu.matmul %245, %247, %cst_121 {dimension_numbers = #tpu.dot_dimension_numbers<[1], [0], [0], [1], [0, 0, 1, 1], [], []>} : vector<2x196xbf16>, vector<196x512xbf16>, vector<2x512xf32> -> vector<2x512xf32>
    %249 = arith.addf %244, %248 : vector<2x512xf32>
    %c0_122 = arith.constant 0 : index
    %c0_123 = arith.constant 0 : index
    %250 = vector.load %arg11[%c0_122, %c0_123] : memref<2x512xf32, #tpu.memory_space<vmem>>, vector<2x512xf32>
    tpu.vector_store %arg11[%c0_122, %c0_123], %249 {strides = array<i32>} : memref<2x512xf32, #tpu.memory_space<vmem>>, vector<2x512xf32>,
    %c8 = arith.constant 8 : index
    %c0_124 = arith.constant 0 : index
    %c0_125 = arith.constant 0 : index
    %251 = vector.load %arg2[%c8, %c0_124, %c0_125] : memref<16x4x196xf32, #tpu.memory_space<vmem>>, vector<1x4x196xf32>
    %252 = vector.shape_cast %251 : vector<1x4x196xf32> to vector<4x196xf32>
    %253 = vector.extract_strided_slice %252 {offsets = [0, 0], sizes = [1, 196], strides = [1, 1]} : vector<4x196xf32> to vector<1x196xf32>
    %254 = vector.broadcast %253 : vector<1x196xf32> to vector<2x196xf32>
    %255 = arith.mulf %4, %254 : vector<2x196xf32>
    %256 = vector.extract_strided_slice %252 {offsets = [1, 0], sizes = [1, 196], strides = [1, 1]} : vector<4x196xf32> to vector<1x196xf32>
    %257 = vector.broadcast %256 : vector<1x196xf32> to vector<2x196xf32>
    %258 = arith.mulf %6, %257 : vector<2x196xf32>
    %259 = arith.addf %255, %258 : vector<2x196xf32>
    %260 = vector.extract_strided_slice %252 {offsets = [2, 0], sizes = [1, 196], strides = [1, 1]} : vector<4x196xf32> to vector<1x196xf32>
    %261 = vector.broadcast %260 : vector<1x196xf32> to vector<2x196xf32>
    %262 = arith.mulf %8, %261 : vector<2x196xf32>
    %263 = arith.addf %259, %262 : vector<2x196xf32>
    %264 = vector.extract_strided_slice %252 {offsets = [3, 0], sizes = [1, 196], strides = [1, 1]} : vector<4x196xf32> to vector<1x196xf32>
    %265 = vector.broadcast %264 : vector<1x196xf32> to vector<2x196xf32>
    %266 = arith.mulf %10, %265 : vector<2x196xf32>
    %267 = arith.addf %263, %266 : vector<2x196xf32>
    %c8_126 = arith.constant 8 : index
    %c0_127 = arith.constant 0 : index
    %c0_128 = arith.constant 0 : index
    %268 = vector.load %arg3[%c8_126, %c0_127, %c0_128] : memref<16x1x196xf32, #tpu.memory_space<vmem>>, vector<1x1x196xf32>
    %269 = vector.shape_cast %268 : vector<1x1x196xf32> to vector<1x196xf32>
    %270 = vector.broadcast %269 : vector<1x196xf32> to vector<2x196xf32>
    %271 = arith.addf %267, %270 : vector<2x196xf32>
    %cst_129 = arith.constant 0.000000e+00 : f32
    %272 = vector.broadcast %cst_129 : f32 to vector<2x196xf32>
    %273 = arith.maximumf %271, %272 : vector<2x196xf32>
    %c0_130 = arith.constant 0 : index
    %c0_131 = arith.constant 0 : index
    %274 = vector.load %arg11[%c0_130, %c0_131] : memref<2x512xf32, #tpu.memory_space<vmem>>, vector<2x512xf32>
    %275 = arith.truncf %273 : vector<2x196xf32> to vector<2x196xbf16>
    %c8_132 = arith.constant 8 : index
    %c0_133 = arith.constant 0 : index
    %c0_134 = arith.constant 0 : index
    %276 = vector.load %arg4[%c8_132, %c0_133, %c0_134] : memref<16x196x512xbf16, #tpu.memory_space<vmem>>, vector<1x196x512xbf16>
    %277 = vector.shape_cast %276 : vector<1x196x512xbf16> to vector<196x512xbf16>
    %cst_135 = arith.constant dense<0.000000e+00> : vector<2x512xf32>
    %278 = tpu.matmul %275, %277, %cst_135 {dimension_numbers = #tpu.dot_dimension_numbers<[1], [0], [0], [1], [0, 0, 1, 1], [], []>} : vector<2x196xbf16>, vector<196x512xbf16>, vector<2x512xf32> -> vector<2x512xf32>
    %279 = arith.addf %274, %278 : vector<2x512xf32>
    %c0_136 = arith.constant 0 : index
    %c0_137 = arith.constant 0 : index
    %280 = vector.load %arg11[%c0_136, %c0_137] : memref<2x512xf32, #tpu.memory_space<vmem>>, vector<2x512xf32>
    tpu.vector_store %arg11[%c0_136, %c0_137], %279 {strides = array<i32>} : memref<2x512xf32, #tpu.memory_space<vmem>>, vector<2x512xf32>,
    %c9 = arith.constant 9 : index
    %c0_138 = arith.constant 0 : index
    %c0_139 = arith.constant 0 : index
    %281 = vector.load %arg2[%c9, %c0_138, %c0_139] : memref<16x4x196xf32, #tpu.memory_space<vmem>>, vector<1x4x196xf32>
    %282 = vector.shape_cast %281 : vector<1x4x196xf32> to vector<4x196xf32>
    %283 = vector.extract_strided_slice %282 {offsets = [0, 0], sizes = [1, 196], strides = [1, 1]} : vector<4x196xf32> to vector<1x196xf32>
    %284 = vector.broadcast %283 : vector<1x196xf32> to vector<2x196xf32>
    %285 = arith.mulf %4, %284 : vector<2x196xf32>
    %286 = vector.extract_strided_slice %282 {offsets = [1, 0], sizes = [1, 196], strides = [1, 1]} : vector<4x196xf32> to vector<1x196xf32>
    %287 = vector.broadcast %286 : vector<1x196xf32> to vector<2x196xf32>
    %288 = arith.mulf %6, %287 : vector<2x196xf32>
    %289 = arith.addf %285, %288 : vector<2x196xf32>
    %290 = vector.extract_strided_slice %282 {offsets = [2, 0], sizes = [1, 196], strides = [1, 1]} : vector<4x196xf32> to vector<1x196xf32>
    %291 = vector.broadcast %290 : vector<1x196xf32> to vector<2x196xf32>
    %292 = arith.mulf %8, %291 : vector<2x196xf32>
    %293 = arith.addf %289, %292 : vector<2x196xf32>
    %294 = vector.extract_strided_slice %282 {offsets = [3, 0], sizes = [1, 196], strides = [1, 1]} : vector<4x196xf32> to vector<1x196xf32>
    %295 = vector.broadcast %294 : vector<1x196xf32> to vector<2x196xf32>
    %296 = arith.mulf %10, %295 : vector<2x196xf32>
    %297 = arith.addf %293, %296 : vector<2x196xf32>
    %c9_140 = arith.constant 9 : index
    %c0_141 = arith.constant 0 : index
    %c0_142 = arith.constant 0 : index
    %298 = vector.load %arg3[%c9_140, %c0_141, %c0_142] : memref<16x1x196xf32, #tpu.memory_space<vmem>>, vector<1x1x196xf32>
    %299 = vector.shape_cast %298 : vector<1x1x196xf32> to vector<1x196xf32>
    %300 = vector.broadcast %299 : vector<1x196xf32> to vector<2x196xf32>
    %301 = arith.addf %297, %300 : vector<2x196xf32>
    %cst_143 = arith.constant 0.000000e+00 : f32
    %302 = vector.broadcast %cst_143 : f32 to vector<2x196xf32>
    %303 = arith.maximumf %301, %302 : vector<2x196xf32>
    %c0_144 = arith.constant 0 : index
    %c0_145 = arith.constant 0 : index
    %304 = vector.load %arg11[%c0_144, %c0_145] : memref<2x512xf32, #tpu.memory_space<vmem>>, vector<2x512xf32>
    %305 = arith.truncf %303 : vector<2x196xf32> to vector<2x196xbf16>
    %c9_146 = arith.constant 9 : index
    %c0_147 = arith.constant 0 : index
    %c0_148 = arith.constant 0 : index
    %306 = vector.load %arg4[%c9_146, %c0_147, %c0_148] : memref<16x196x512xbf16, #tpu.memory_space<vmem>>, vector<1x196x512xbf16>
    %307 = vector.shape_cast %306 : vector<1x196x512xbf16> to vector<196x512xbf16>
    %cst_149 = arith.constant dense<0.000000e+00> : vector<2x512xf32>
    %308 = tpu.matmul %305, %307, %cst_149 {dimension_numbers = #tpu.dot_dimension_numbers<[1], [0], [0], [1], [0, 0, 1, 1], [], []>} : vector<2x196xbf16>, vector<196x512xbf16>, vector<2x512xf32> -> vector<2x512xf32>
    %309 = arith.addf %304, %308 : vector<2x512xf32>
    %c0_150 = arith.constant 0 : index
    %c0_151 = arith.constant 0 : index
    %310 = vector.load %arg11[%c0_150, %c0_151] : memref<2x512xf32, #tpu.memory_space<vmem>>, vector<2x512xf32>
    tpu.vector_store %arg11[%c0_150, %c0_151], %309 {strides = array<i32>} : memref<2x512xf32, #tpu.memory_space<vmem>>, vector<2x512xf32>,
    %c10 = arith.constant 10 : index
    %c0_152 = arith.constant 0 : index
    %c0_153 = arith.constant 0 : index
    %311 = vector.load %arg2[%c10, %c0_152, %c0_153] : memref<16x4x196xf32, #tpu.memory_space<vmem>>, vector<1x4x196xf32>
    %312 = vector.shape_cast %311 : vector<1x4x196xf32> to vector<4x196xf32>
    %313 = vector.extract_strided_slice %312 {offsets = [0, 0], sizes = [1, 196], strides = [1, 1]} : vector<4x196xf32> to vector<1x196xf32>
    %314 = vector.broadcast %313 : vector<1x196xf32> to vector<2x196xf32>
    %315 = arith.mulf %4, %314 : vector<2x196xf32>
    %316 = vector.extract_strided_slice %312 {offsets = [1, 0], sizes = [1, 196], strides = [1, 1]} : vector<4x196xf32> to vector<1x196xf32>
    %317 = vector.broadcast %316 : vector<1x196xf32> to vector<2x196xf32>
    %318 = arith.mulf %6, %317 : vector<2x196xf32>
    %319 = arith.addf %315, %318 : vector<2x196xf32>
    %320 = vector.extract_strided_slice %312 {offsets = [2, 0], sizes = [1, 196], strides = [1, 1]} : vector<4x196xf32> to vector<1x196xf32>
    %321 = vector.broadcast %320 : vector<1x196xf32> to vector<2x196xf32>
    %322 = arith.mulf %8, %321 : vector<2x196xf32>
    %323 = arith.addf %319, %322 : vector<2x196xf32>
    %324 = vector.extract_strided_slice %312 {offsets = [3, 0], sizes = [1, 196], strides = [1, 1]} : vector<4x196xf32> to vector<1x196xf32>
    %325 = vector.broadcast %324 : vector<1x196xf32> to vector<2x196xf32>
    %326 = arith.mulf %10, %325 : vector<2x196xf32>
    %327 = arith.addf %323, %326 : vector<2x196xf32>
    %c10_154 = arith.constant 10 : index
    %c0_155 = arith.constant 0 : index
    %c0_156 = arith.constant 0 : index
    %328 = vector.load %arg3[%c10_154, %c0_155, %c0_156] : memref<16x1x196xf32, #tpu.memory_space<vmem>>, vector<1x1x196xf32>
    %329 = vector.shape_cast %328 : vector<1x1x196xf32> to vector<1x196xf32>
    %330 = vector.broadcast %329 : vector<1x196xf32> to vector<2x196xf32>
    %331 = arith.addf %327, %330 : vector<2x196xf32>
    %cst_157 = arith.constant 0.000000e+00 : f32
    %332 = vector.broadcast %cst_157 : f32 to vector<2x196xf32>
    %333 = arith.maximumf %331, %332 : vector<2x196xf32>
    %c0_158 = arith.constant 0 : index
    %c0_159 = arith.constant 0 : index
    %334 = vector.load %arg11[%c0_158, %c0_159] : memref<2x512xf32, #tpu.memory_space<vmem>>, vector<2x512xf32>
    %335 = arith.truncf %333 : vector<2x196xf32> to vector<2x196xbf16>
    %c10_160 = arith.constant 10 : index
    %c0_161 = arith.constant 0 : index
    %c0_162 = arith.constant 0 : index
    %336 = vector.load %arg4[%c10_160, %c0_161, %c0_162] : memref<16x196x512xbf16, #tpu.memory_space<vmem>>, vector<1x196x512xbf16>
    %337 = vector.shape_cast %336 : vector<1x196x512xbf16> to vector<196x512xbf16>
    %cst_163 = arith.constant dense<0.000000e+00> : vector<2x512xf32>
    %338 = tpu.matmul %335, %337, %cst_163 {dimension_numbers = #tpu.dot_dimension_numbers<[1], [0], [0], [1], [0, 0, 1, 1], [], []>} : vector<2x196xbf16>, vector<196x512xbf16>, vector<2x512xf32> -> vector<2x512xf32>
    %339 = arith.addf %334, %338 : vector<2x512xf32>
    %c0_164 = arith.constant 0 : index
    %c0_165 = arith.constant 0 : index
    %340 = vector.load %arg11[%c0_164, %c0_165] : memref<2x512xf32, #tpu.memory_space<vmem>>, vector<2x512xf32>
    tpu.vector_store %arg11[%c0_164, %c0_165], %339 {strides = array<i32>} : memref<2x512xf32, #tpu.memory_space<vmem>>, vector<2x512xf32>,
    %c11 = arith.constant 11 : index
    %c0_166 = arith.constant 0 : index
    %c0_167 = arith.constant 0 : index
    %341 = vector.load %arg2[%c11, %c0_166, %c0_167] : memref<16x4x196xf32, #tpu.memory_space<vmem>>, vector<1x4x196xf32>
    %342 = vector.shape_cast %341 : vector<1x4x196xf32> to vector<4x196xf32>
    %343 = vector.extract_strided_slice %342 {offsets = [0, 0], sizes = [1, 196], strides = [1, 1]} : vector<4x196xf32> to vector<1x196xf32>
    %344 = vector.broadcast %343 : vector<1x196xf32> to vector<2x196xf32>
    %345 = arith.mulf %4, %344 : vector<2x196xf32>
    %346 = vector.extract_strided_slice %342 {offsets = [1, 0], sizes = [1, 196], strides = [1, 1]} : vector<4x196xf32> to vector<1x196xf32>
    %347 = vector.broadcast %346 : vector<1x196xf32> to vector<2x196xf32>
    %348 = arith.mulf %6, %347 : vector<2x196xf32>
    %349 = arith.addf %345, %348 : vector<2x196xf32>
    %350 = vector.extract_strided_slice %342 {offsets = [2, 0], sizes = [1, 196], strides = [1, 1]} : vector<4x196xf32> to vector<1x196xf32>
    %351 = vector.broadcast %350 : vector<1x196xf32> to vector<2x196xf32>
    %352 = arith.mulf %8, %351 : vector<2x196xf32>
    %353 = arith.addf %349, %352 : vector<2x196xf32>
    %354 = vector.extract_strided_slice %342 {offsets = [3, 0], sizes = [1, 196], strides = [1, 1]} : vector<4x196xf32> to vector<1x196xf32>
    %355 = vector.broadcast %354 : vector<1x196xf32> to vector<2x196xf32>
    %356 = arith.mulf %10, %355 : vector<2x196xf32>
    %357 = arith.addf %353, %356 : vector<2x196xf32>
    %c11_168 = arith.constant 11 : index
    %c0_169 = arith.constant 0 : index
    %c0_170 = arith.constant 0 : index
    %358 = vector.load %arg3[%c11_168, %c0_169, %c0_170] : memref<16x1x196xf32, #tpu.memory_space<vmem>>, vector<1x1x196xf32>
    %359 = vector.shape_cast %358 : vector<1x1x196xf32> to vector<1x196xf32>
    %360 = vector.broadcast %359 : vector<1x196xf32> to vector<2x196xf32>
    %361 = arith.addf %357, %360 : vector<2x196xf32>
    %cst_171 = arith.constant 0.000000e+00 : f32
    %362 = vector.broadcast %cst_171 : f32 to vector<2x196xf32>
    %363 = arith.maximumf %361, %362 : vector<2x196xf32>
    %c0_172 = arith.constant 0 : index
    %c0_173 = arith.constant 0 : index
    %364 = vector.load %arg11[%c0_172, %c0_173] : memref<2x512xf32, #tpu.memory_space<vmem>>, vector<2x512xf32>
    %365 = arith.truncf %363 : vector<2x196xf32> to vector<2x196xbf16>
    %c11_174 = arith.constant 11 : index
    %c0_175 = arith.constant 0 : index
    %c0_176 = arith.constant 0 : index
    %366 = vector.load %arg4[%c11_174, %c0_175, %c0_176] : memref<16x196x512xbf16, #tpu.memory_space<vmem>>, vector<1x196x512xbf16>
    %367 = vector.shape_cast %366 : vector<1x196x512xbf16> to vector<196x512xbf16>
    %cst_177 = arith.constant dense<0.000000e+00> : vector<2x512xf32>
    %368 = tpu.matmul %365, %367, %cst_177 {dimension_numbers = #tpu.dot_dimension_numbers<[1], [0], [0], [1], [0, 0, 1, 1], [], []>} : vector<2x196xbf16>, vector<196x512xbf16>, vector<2x512xf32> -> vector<2x512xf32>
    %369 = arith.addf %364, %368 : vector<2x512xf32>
    %c0_178 = arith.constant 0 : index
    %c0_179 = arith.constant 0 : index
    %370 = vector.load %arg11[%c0_178, %c0_179] : memref<2x512xf32, #tpu.memory_space<vmem>>, vector<2x512xf32>
    tpu.vector_store %arg11[%c0_178, %c0_179], %369 {strides = array<i32>} : memref<2x512xf32, #tpu.memory_space<vmem>>, vector<2x512xf32>,
    %c12 = arith.constant 12 : index
    %c0_180 = arith.constant 0 : index
    %c0_181 = arith.constant 0 : index
    %371 = vector.load %arg2[%c12, %c0_180, %c0_181] : memref<16x4x196xf32, #tpu.memory_space<vmem>>, vector<1x4x196xf32>
    %372 = vector.shape_cast %371 : vector<1x4x196xf32> to vector<4x196xf32>
    %373 = vector.extract_strided_slice %372 {offsets = [0, 0], sizes = [1, 196], strides = [1, 1]} : vector<4x196xf32> to vector<1x196xf32>
    %374 = vector.broadcast %373 : vector<1x196xf32> to vector<2x196xf32>
    %375 = arith.mulf %4, %374 : vector<2x196xf32>
    %376 = vector.extract_strided_slice %372 {offsets = [1, 0], sizes = [1, 196], strides = [1, 1]} : vector<4x196xf32> to vector<1x196xf32>
    %377 = vector.broadcast %376 : vector<1x196xf32> to vector<2x196xf32>
    %378 = arith.mulf %6, %377 : vector<2x196xf32>
    %379 = arith.addf %375, %378 : vector<2x196xf32>
    %380 = vector.extract_strided_slice %372 {offsets = [2, 0], sizes = [1, 196], strides = [1, 1]} : vector<4x196xf32> to vector<1x196xf32>
    %381 = vector.broadcast %380 : vector<1x196xf32> to vector<2x196xf32>
    %382 = arith.mulf %8, %381 : vector<2x196xf32>
    %383 = arith.addf %379, %382 : vector<2x196xf32>
    %384 = vector.extract_strided_slice %372 {offsets = [3, 0], sizes = [1, 196], strides = [1, 1]} : vector<4x196xf32> to vector<1x196xf32>
    %385 = vector.broadcast %384 : vector<1x196xf32> to vector<2x196xf32>
    %386 = arith.mulf %10, %385 : vector<2x196xf32>
    %387 = arith.addf %383, %386 : vector<2x196xf32>
    %c12_182 = arith.constant 12 : index
    %c0_183 = arith.constant 0 : index
    %c0_184 = arith.constant 0 : index
    %388 = vector.load %arg3[%c12_182, %c0_183, %c0_184] : memref<16x1x196xf32, #tpu.memory_space<vmem>>, vector<1x1x196xf32>
    %389 = vector.shape_cast %388 : vector<1x1x196xf32> to vector<1x196xf32>
    %390 = vector.broadcast %389 : vector<1x196xf32> to vector<2x196xf32>
    %391 = arith.addf %387, %390 : vector<2x196xf32>
    %cst_185 = arith.constant 0.000000e+00 : f32
    %392 = vector.broadcast %cst_185 : f32 to vector<2x196xf32>
    %393 = arith.maximumf %391, %392 : vector<2x196xf32>
    %c0_186 = arith.constant 0 : index
    %c0_187 = arith.constant 0 : index
    %394 = vector.load %arg11[%c0_186, %c0_187] : memref<2x512xf32, #tpu.memory_space<vmem>>, vector<2x512xf32>
    %395 = arith.truncf %393 : vector<2x196xf32> to vector<2x196xbf16>
    %c12_188 = arith.constant 12 : index
    %c0_189 = arith.constant 0 : index
    %c0_190 = arith.constant 0 : index
    %396 = vector.load %arg4[%c12_188, %c0_189, %c0_190] : memref<16x196x512xbf16, #tpu.memory_space<vmem>>, vector<1x196x512xbf16>
    %397 = vector.shape_cast %396 : vector<1x196x512xbf16> to vector<196x512xbf16>
    %cst_191 = arith.constant dense<0.000000e+00> : vector<2x512xf32>
    %398 = tpu.matmul %395, %397, %cst_191 {dimension_numbers = #tpu.dot_dimension_numbers<[1], [0], [0], [1], [0, 0, 1, 1], [], []>} : vector<2x196xbf16>, vector<196x512xbf16>, vector<2x512xf32> -> vector<2x512xf32>
    %399 = arith.addf %394, %398 : vector<2x512xf32>
    %c0_192 = arith.constant 0 : index
    %c0_193 = arith.constant 0 : index
    %400 = vector.load %arg11[%c0_192, %c0_193] : memref<2x512xf32, #tpu.memory_space<vmem>>, vector<2x512xf32>
    tpu.vector_store %arg11[%c0_192, %c0_193], %399 {strides = array<i32>} : memref<2x512xf32, #tpu.memory_space<vmem>>, vector<2x512xf32>,
    %c13 = arith.constant 13 : index
    %c0_194 = arith.constant 0 : index
    %c0_195 = arith.constant 0 : index
    %401 = vector.load %arg2[%c13, %c0_194, %c0_195] : memref<16x4x196xf32, #tpu.memory_space<vmem>>, vector<1x4x196xf32>
    %402 = vector.shape_cast %401 : vector<1x4x196xf32> to vector<4x196xf32>
    %403 = vector.extract_strided_slice %402 {offsets = [0, 0], sizes = [1, 196], strides = [1, 1]} : vector<4x196xf32> to vector<1x196xf32>
    %404 = vector.broadcast %403 : vector<1x196xf32> to vector<2x196xf32>
    %405 = arith.mulf %4, %404 : vector<2x196xf32>
    %406 = vector.extract_strided_slice %402 {offsets = [1, 0], sizes = [1, 196], strides = [1, 1]} : vector<4x196xf32> to vector<1x196xf32>
    %407 = vector.broadcast %406 : vector<1x196xf32> to vector<2x196xf32>
    %408 = arith.mulf %6, %407 : vector<2x196xf32>
    %409 = arith.addf %405, %408 : vector<2x196xf32>
    %410 = vector.extract_strided_slice %402 {offsets = [2, 0], sizes = [1, 196], strides = [1, 1]} : vector<4x196xf32> to vector<1x196xf32>
    %411 = vector.broadcast %410 : vector<1x196xf32> to vector<2x196xf32>
    %412 = arith.mulf %8, %411 : vector<2x196xf32>
    %413 = arith.addf %409, %412 : vector<2x196xf32>
    %414 = vector.extract_strided_slice %402 {offsets = [3, 0], sizes = [1, 196], strides = [1, 1]} : vector<4x196xf32> to vector<1x196xf32>
    %415 = vector.broadcast %414 : vector<1x196xf32> to vector<2x196xf32>
    %416 = arith.mulf %10, %415 : vector<2x196xf32>
    %417 = arith.addf %413, %416 : vector<2x196xf32>
    %c13_196 = arith.constant 13 : index
    %c0_197 = arith.constant 0 : index
    %c0_198 = arith.constant 0 : index
    %418 = vector.load %arg3[%c13_196, %c0_197, %c0_198] : memref<16x1x196xf32, #tpu.memory_space<vmem>>, vector<1x1x196xf32>
    %419 = vector.shape_cast %418 : vector<1x1x196xf32> to vector<1x196xf32>
    %420 = vector.broadcast %419 : vector<1x196xf32> to vector<2x196xf32>
    %421 = arith.addf %417, %420 : vector<2x196xf32>
    %cst_199 = arith.constant 0.000000e+00 : f32
    %422 = vector.broadcast %cst_199 : f32 to vector<2x196xf32>
    %423 = arith.maximumf %421, %422 : vector<2x196xf32>
    %c0_200 = arith.constant 0 : index
    %c0_201 = arith.constant 0 : index
    %424 = vector.load %arg11[%c0_200, %c0_201] : memref<2x512xf32, #tpu.memory_space<vmem>>, vector<2x512xf32>
    %425 = arith.truncf %423 : vector<2x196xf32> to vector<2x196xbf16>
    %c13_202 = arith.constant 13 : index
    %c0_203 = arith.constant 0 : index
    %c0_204 = arith.constant 0 : index
    %426 = vector.load %arg4[%c13_202, %c0_203, %c0_204] : memref<16x196x512xbf16, #tpu.memory_space<vmem>>, vector<1x196x512xbf16>
    %427 = vector.shape_cast %426 : vector<1x196x512xbf16> to vector<196x512xbf16>
    %cst_205 = arith.constant dense<0.000000e+00> : vector<2x512xf32>
    %428 = tpu.matmul %425, %427, %cst_205 {dimension_numbers = #tpu.dot_dimension_numbers<[1], [0], [0], [1], [0, 0, 1, 1], [], []>} : vector<2x196xbf16>, vector<196x512xbf16>, vector<2x512xf32> -> vector<2x512xf32>
    %429 = arith.addf %424, %428 : vector<2x512xf32>
    %c0_206 = arith.constant 0 : index
    %c0_207 = arith.constant 0 : index
    %430 = vector.load %arg11[%c0_206, %c0_207] : memref<2x512xf32, #tpu.memory_space<vmem>>, vector<2x512xf32>
    tpu.vector_store %arg11[%c0_206, %c0_207], %429 {strides = array<i32>} : memref<2x512xf32, #tpu.memory_space<vmem>>, vector<2x512xf32>,
    %c14 = arith.constant 14 : index
    %c0_208 = arith.constant 0 : index
    %c0_209 = arith.constant 0 : index
    %431 = vector.load %arg2[%c14, %c0_208, %c0_209] : memref<16x4x196xf32, #tpu.memory_space<vmem>>, vector<1x4x196xf32>
    %432 = vector.shape_cast %431 : vector<1x4x196xf32> to vector<4x196xf32>
    %433 = vector.extract_strided_slice %432 {offsets = [0, 0], sizes = [1, 196], strides = [1, 1]} : vector<4x196xf32> to vector<1x196xf32>
    %434 = vector.broadcast %433 : vector<1x196xf32> to vector<2x196xf32>
    %435 = arith.mulf %4, %434 : vector<2x196xf32>
    %436 = vector.extract_strided_slice %432 {offsets = [1, 0], sizes = [1, 196], strides = [1, 1]} : vector<4x196xf32> to vector<1x196xf32>
    %437 = vector.broadcast %436 : vector<1x196xf32> to vector<2x196xf32>
    %438 = arith.mulf %6, %437 : vector<2x196xf32>
    %439 = arith.addf %435, %438 : vector<2x196xf32>
    %440 = vector.extract_strided_slice %432 {offsets = [2, 0], sizes = [1, 196], strides = [1, 1]} : vector<4x196xf32> to vector<1x196xf32>
    %441 = vector.broadcast %440 : vector<1x196xf32> to vector<2x196xf32>
    %442 = arith.mulf %8, %441 : vector<2x196xf32>
    %443 = arith.addf %439, %442 : vector<2x196xf32>
    %444 = vector.extract_strided_slice %432 {offsets = [3, 0], sizes = [1, 196], strides = [1, 1]} : vector<4x196xf32> to vector<1x196xf32>
    %445 = vector.broadcast %444 : vector<1x196xf32> to vector<2x196xf32>
    %446 = arith.mulf %10, %445 : vector<2x196xf32>
    %447 = arith.addf %443, %446 : vector<2x196xf32>
    %c14_210 = arith.constant 14 : index
    %c0_211 = arith.constant 0 : index
    %c0_212 = arith.constant 0 : index
    %448 = vector.load %arg3[%c14_210, %c0_211, %c0_212] : memref<16x1x196xf32, #tpu.memory_space<vmem>>, vector<1x1x196xf32>
    %449 = vector.shape_cast %448 : vector<1x1x196xf32> to vector<1x196xf32>
    %450 = vector.broadcast %449 : vector<1x196xf32> to vector<2x196xf32>
    %451 = arith.addf %447, %450 : vector<2x196xf32>
    %cst_213 = arith.constant 0.000000e+00 : f32
    %452 = vector.broadcast %cst_213 : f32 to vector<2x196xf32>
    %453 = arith.maximumf %451, %452 : vector<2x196xf32>
    %c0_214 = arith.constant 0 : index
    %c0_215 = arith.constant 0 : index
    %454 = vector.load %arg11[%c0_214, %c0_215] : memref<2x512xf32, #tpu.memory_space<vmem>>, vector<2x512xf32>
    %455 = arith.truncf %453 : vector<2x196xf32> to vector<2x196xbf16>
    %c14_216 = arith.constant 14 : index
    %c0_217 = arith.constant 0 : index
    %c0_218 = arith.constant 0 : index
    %456 = vector.load %arg4[%c14_216, %c0_217, %c0_218] : memref<16x196x512xbf16, #tpu.memory_space<vmem>>, vector<1x196x512xbf16>
    %457 = vector.shape_cast %456 : vector<1x196x512xbf16> to vector<196x512xbf16>
    %cst_219 = arith.constant dense<0.000000e+00> : vector<2x512xf32>
    %458 = tpu.matmul %455, %457, %cst_219 {dimension_numbers = #tpu.dot_dimension_numbers<[1], [0], [0], [1], [0, 0, 1, 1], [], []>} : vector<2x196xbf16>, vector<196x512xbf16>, vector<2x512xf32> -> vector<2x512xf32>
    %459 = arith.addf %454, %458 : vector<2x512xf32>
    %c0_220 = arith.constant 0 : index
    %c0_221 = arith.constant 0 : index
    %460 = vector.load %arg11[%c0_220, %c0_221] : memref<2x512xf32, #tpu.memory_space<vmem>>, vector<2x512xf32>
    tpu.vector_store %arg11[%c0_220, %c0_221], %459 {strides = array<i32>} : memref<2x512xf32, #tpu.memory_space<vmem>>, vector<2x512xf32>,
    %c15 = arith.constant 15 : index
    %c0_222 = arith.constant 0 : index
    %c0_223 = arith.constant 0 : index
    %461 = vector.load %arg2[%c15, %c0_222, %c0_223] : memref<16x4x196xf32, #tpu.memory_space<vmem>>, vector<1x4x196xf32>
    %462 = vector.shape_cast %461 : vector<1x4x196xf32> to vector<4x196xf32>
    %463 = vector.extract_strided_slice %462 {offsets = [0, 0], sizes = [1, 196], strides = [1, 1]} : vector<4x196xf32> to vector<1x196xf32>
    %464 = vector.broadcast %463 : vector<1x196xf32> to vector<2x196xf32>
    %465 = arith.mulf %4, %464 : vector<2x196xf32>
    %466 = vector.extract_strided_slice %462 {offsets = [1, 0], sizes = [1, 196], strides = [1, 1]} : vector<4x196xf32> to vector<1x196xf32>
    %467 = vector.broadcast %466 : vector<1x196xf32> to vector<2x196xf32>
    %468 = arith.mulf %6, %467 : vector<2x196xf32>
    %469 = arith.addf %465, %468 : vector<2x196xf32>
    %470 = vector.extract_strided_slice %462 {offsets = [2, 0], sizes = [1, 196], strides = [1, 1]} : vector<4x196xf32> to vector<1x196xf32>
    %471 = vector.broadcast %470 : vector<1x196xf32> to vector<2x196xf32>
    %472 = arith.mulf %8, %471 : vector<2x196xf32>
    %473 = arith.addf %469, %472 : vector<2x196xf32>
    %474 = vector.extract_strided_slice %462 {offsets = [3, 0], sizes = [1, 196], strides = [1, 1]} : vector<4x196xf32> to vector<1x196xf32>
    %475 = vector.broadcast %474 : vector<1x196xf32> to vector<2x196xf32>
    %476 = arith.mulf %10, %475 : vector<2x196xf32>
    %477 = arith.addf %473, %476 : vector<2x196xf32>
    %c15_224 = arith.constant 15 : index
    %c0_225 = arith.constant 0 : index
    %c0_226 = arith.constant 0 : index
    %478 = vector.load %arg3[%c15_224, %c0_225, %c0_226] : memref<16x1x196xf32, #tpu.memory_space<vmem>>, vector<1x1x196xf32>
    %479 = vector.shape_cast %478 : vector<1x1x196xf32> to vector<1x196xf32>
    %480 = vector.broadcast %479 : vector<1x196xf32> to vector<2x196xf32>
    %481 = arith.addf %477, %480 : vector<2x196xf32>
    %cst_227 = arith.constant 0.000000e+00 : f32
    %482 = vector.broadcast %cst_227 : f32 to vector<2x196xf32>
    %483 = arith.maximumf %481, %482 : vector<2x196xf32>
    %c0_228 = arith.constant 0 : index
    %c0_229 = arith.constant 0 : index
    %484 = vector.load %arg11[%c0_228, %c0_229] : memref<2x512xf32, #tpu.memory_space<vmem>>, vector<2x512xf32>
    %485 = arith.truncf %483 : vector<2x196xf32> to vector<2x196xbf16>
    %c15_230 = arith.constant 15 : index
    %c0_231 = arith.constant 0 : index
    %c0_232 = arith.constant 0 : index
    %486 = vector.load %arg4[%c15_230, %c0_231, %c0_232] : memref<16x196x512xbf16, #tpu.memory_space<vmem>>, vector<1x196x512xbf16>
    %487 = vector.shape_cast %486 : vector<1x196x512xbf16> to vector<196x512xbf16>
    %cst_233 = arith.constant dense<0.000000e+00> : vector<2x512xf32>
    %488 = tpu.matmul %485, %487, %cst_233 {dimension_numbers = #tpu.dot_dimension_numbers<[1], [0], [0], [1], [0, 0, 1, 1], [], []>} : vector<2x196xbf16>, vector<196x512xbf16>, vector<2x512xf32> -> vector<2x512xf32>
    %489 = arith.addf %484, %488 : vector<2x512xf32>
    %c0_234 = arith.constant 0 : index
    %c0_235 = arith.constant 0 : index
    %490 = vector.load %arg11[%c0_234, %c0_235] : memref<2x512xf32, #tpu.memory_space<vmem>>, vector<2x512xf32>
    tpu.vector_store %arg11[%c0_234, %c0_235], %489 {strides = array<i32>} : memref<2x512xf32, #tpu.memory_space<vmem>>, vector<2x512xf32>,
    %c1_i32 = arith.constant 1 : i32
    %491 = arith.cmpi eq, %arg0, %c1_i32 : i32
    %492 = arith.extui %491 : i1 to i32
    %c0_i32_236 = arith.constant 0 : i32
    %493 = arith.cmpi ne, %492, %c0_i32_236 : i32
    scf.if %493 {
      %c0_237 = arith.constant 0 : index
      %c0_238 = arith.constant 0 : index
      %494 = vector.load %arg11[%c0_237, %c0_238] : memref<2x512xf32, #tpu.memory_space<vmem>>, vector<2x512xf32>
      %c0_239 = arith.constant 0 : index
      %c0_240 = arith.constant 0 : index
      %495 = vector.load %arg5[%c0_239, %c0_240] : memref<1x512xf32, #tpu.memory_space<vmem>>, vector<1x512xf32>
      %496 = vector.broadcast %495 : vector<1x512xf32> to vector<2x512xf32>
      %497 = arith.addf %494, %496 : vector<2x512xf32>
      %cst_241 = arith.constant 0.000000e+00 : f32
      %498 = vector.broadcast %cst_241 : f32 to vector<2x512xf32>
      %499 = arith.maximumf %497, %498 : vector<2x512xf32>
      %c0_242 = arith.constant 0 : index
      %c0_243 = arith.constant 0 : index
      %500 = vector.load %arg6[%c0_242, %c0_243] : memref<512x256xf32, #tpu.memory_space<vmem>>, vector<512x256xf32>
      %cst_244 = arith.constant dense<0.000000e+00> : vector<2x256xf32>
      %501 = tpu.matmul %499, %500, %cst_244 {dimension_numbers = #tpu.dot_dimension_numbers<[1], [0], [0], [1], [0, 0, 1, 1], [], []>} : vector<2x512xf32>, vector<512x256xf32>, vector<2x256xf32> -> vector<2x256xf32>
      %c0_245 = arith.constant 0 : index
      %c0_246 = arith.constant 0 : index
      %502 = vector.load %arg7[%c0_245, %c0_246] : memref<1x256xf32, #tpu.memory_space<vmem>>, vector<1x256xf32>
      %503 = vector.broadcast %502 : vector<1x256xf32> to vector<2x256xf32>
      %504 = arith.addf %501, %503 : vector<2x256xf32>
      %cst_247 = arith.constant 0.000000e+00 : f32
      %505 = vector.broadcast %cst_247 : f32 to vector<2x256xf32>
      %506 = arith.maximumf %504, %505 : vector<2x256xf32>
      %c0_248 = arith.constant 0 : index
      %c0_249 = arith.constant 0 : index
      %507 = vector.load %arg8[%c0_248, %c0_249] : memref<256x15xf32, #tpu.memory_space<vmem>>, vector<256x15xf32>
      %cst_250 = arith.constant dense<0.000000e+00> : vector<2x15xf32>
      %508 = tpu.matmul %506, %507, %cst_250 {dimension_numbers = #tpu.dot_dimension_numbers<[1], [0], [0], [1], [0, 0, 1, 1], [], []>} : vector<2x256xf32>, vector<256x15xf32>, vector<2x15xf32> -> vector<2x15xf32>
      %c0_251 = arith.constant 0 : index
      %c0_252 = arith.constant 0 : index
      %509 = vector.load %arg9[%c0_251, %c0_252] : memref<1x15xf32, #tpu.memory_space<vmem>>, vector<1x15xf32>
      %510 = vector.broadcast %509 : vector<1x15xf32> to vector<2x15xf32>
      %511 = arith.addf %508, %510 : vector<2x15xf32>
      %512 = vector.extract_strided_slice %511 {offsets = [0, 0], sizes = [2, 14], strides = [1, 1]} : vector<2x15xf32> to vector<2x14xf32>
      %513 = vector.extract_strided_slice %511 {offsets = [0, 14], sizes = [2, 1], strides = [1, 1]} : vector<2x15xf32> to vector<2x1xf32>
      %514 = vector.shape_cast %512 : vector<2x14xf32> to vector<1x2x14xf32>
      %cst_253 = arith.constant dense<0.000000e+00> : vector<1xf32>
      %515 = vector.multi_reduction <add>, %514, %cst_253 [1, 2] : vector<1x2x14xf32> to vector<1xf32>
      %516 = vector.shape_cast %515 : vector<1xf32> to vector<1x1x1xf32>
      %517 = vector.extract %516[0, 0, 0] : f32 from vector<1x1x1xf32>
      %cst_254 = arith.constant 2.800000e+01 : f32
      %518 = arith.divf %517, %cst_254 : f32
      %519 = vector.broadcast %518 : f32 to vector<2x14xf32>
      %520 = arith.subf %512, %519 : vector<2x14xf32>
      %521 = vector.broadcast %513 : vector<2x1xf32> to vector<2x14xf32>
      %522 = arith.addf %521, %520 : vector<2x14xf32>
      %c0_255 = arith.constant 0 : index
      %c0_256 = arith.constant 0 : index
      %523 = vector.load %arg10[%c0_255, %c0_256] : memref<2x14xf32, #tpu.memory_space<vmem>>, vector<2x14xf32>
      tpu.vector_store %arg10[%c0_255, %c0_256], %522 {strides = array<i32>} : memref<2x14xf32, #tpu.memory_space<vmem>>, vector<2x14xf32>,
    } else {
    }
    return
  }
  func.func @transform_0(%arg0: i32) -> (i32, i32, i32) {
    %c0_i32 = arith.constant 0 : i32
    %c0_i32_0 = arith.constant 0 : i32
    %c0_i32_1 = arith.constant 0 : i32
    %c0_i32_2 = arith.constant 0 : i32
    return %c0_i32, %c0_i32_0, %c0_i32_1 : i32, i32, i32
  }
  func.func @transform_1(%arg0: i32) -> (i32, i32, i32) {
    %c0_i32 = arith.constant 0 : i32
    %c0_i32_0 = arith.constant 0 : i32
    %c0_i32_1 = arith.constant 0 : i32
    return %arg0, %c0_i32, %c0_i32_0 : i32, i32, i32
  }
  func.func @transform_2(%arg0: i32) -> (i32, i32, i32) {
    %c0_i32 = arith.constant 0 : i32
    %c0_i32_0 = arith.constant 0 : i32
    %c0_i32_1 = arith.constant 0 : i32
    return %arg0, %c0_i32, %c0_i32_0 : i32, i32, i32
  }
  func.func @transform_3(%arg0: i32) -> (i32, i32, i32) {
    %c0_i32 = arith.constant 0 : i32
    %c0_i32_0 = arith.constant 0 : i32
    %c0_i32_1 = arith.constant 0 : i32
    return %arg0, %c0_i32, %c0_i32_0 : i32, i32, i32
  }
  func.func @transform_4(%arg0: i32) -> (i32, i32) {
    %c0_i32 = arith.constant 0 : i32
    %c0_i32_0 = arith.constant 0 : i32
    %c0_i32_1 = arith.constant 0 : i32
    return %c0_i32, %c0_i32_0 : i32, i32
  }
  func.func @transform_5(%arg0: i32) -> (i32, i32) {
    %c0_i32 = arith.constant 0 : i32
    %c0_i32_0 = arith.constant 0 : i32
    %c0_i32_1 = arith.constant 0 : i32
    return %c0_i32, %c0_i32_0 : i32, i32
  }
  func.func @transform_6(%arg0: i32) -> (i32, i32) {
    %c0_i32 = arith.constant 0 : i32
    %c0_i32_0 = arith.constant 0 : i32
    %c0_i32_1 = arith.constant 0 : i32
    return %c0_i32, %c0_i32_0 : i32, i32
  }
  func.func @transform_7(%arg0: i32) -> (i32, i32) {
    %c0_i32 = arith.constant 0 : i32
    %c0_i32_0 = arith.constant 0 : i32
    %c0_i32_1 = arith.constant 0 : i32
    return %c0_i32, %c0_i32_0 : i32, i32
  }
  func.func @transform_8(%arg0: i32) -> (i32, i32) {
    %c0_i32 = arith.constant 0 : i32
    %c0_i32_0 = arith.constant 0 : i32
    %c0_i32_1 = arith.constant 0 : i32
    return %c0_i32, %c0_i32_0 : i32, i32
  }
  func.func @transform_9(%arg0: i32) -> (i32, i32) {
    %c0_i32 = arith.constant 0 : i32
    %c0_i32_0 = arith.constant 0 : i32
    %c0_i32_1 = arith.constant 0 : i32
    return %c0_i32, %c0_i32_0 : i32, i32
  }
}

</mosaic_0001>

<bundles_post_ra>
// kernel: forward.1
= control target key start
LH: loop header
LB: loop body
LE: loop exit
PB: predicated region body
PF: predicated region fallthrough
CT: control target
= control target key end

     0   :  { %14 = vsyncpa [#allocation4], 0  ;;  %s13522_s30 = smov 0   ;;  %s15834_s0 = inlined_call_operand.vmem [shape: f32[4,2,196], index: 0, kind: input, shape index: {}]   ;;  %s15835_s1 = inlined_call_operand.vmem [shape: f32[32,4,196], index: 1, kind: input, shape index: {}]   ;;  %s15836_s2 = inlined_call_operand.vmem [shape: f32[32,1,196], index: 2, kind: input, shape index: {}]   ;;  %s15837_s3 = inlined_call_operand.vmem [shape: bf16[32,196,512], index: 3, kind: input, shape index: {}]   ;;  %s15838_s4 = inlined_call_operand.vmem [shape: f32[1,512], index: 4, kind: input, shape index: {}]   ;;  %s15839_s5 = inlined_call_operand.vmem [shape: f32[512,256], index: 5, kind: input, shape index: {}]   ;;  %s15840_s6 = inlined_call_operand.vmem [shape: f32[1,256], index: 6, kind: input, shape index: {}]   ;;  %s15841_s7 = inlined_call_operand.vmem [shape: f32[256,15], index: 7, kind: input, shape index: {}]   ;;  %s15842_s8 = inlined_call_operand.vmem [shape: f32[1,15], index: 8, kind: input, shape index: {}]   ;;  %s15843_s9 = inlined_call_operand.hbm [shape: f32[2,14], index: 9, kind: output, shape index: {}]  }
   0x1 LB: > { %s13528_s10 = sadd.s32 4294967295, %s13466_s30   ;;  %p10281_p0 = scmp.ge.s32.totalorder %s13466_s30, 1  ;;  %s13466_s30 = sphi %s13522_s30, %s20_s30  }
   0x2   : > { %p308_p1 = scmp.lt.s32.totalorder %s13466_s30, 3 }
   0x4   : > { %p309_p2 = pnand %p10281_p0, %p308_p1 }
   0x5   : > { %s10282_s11 = sshll.u32 (!%p309_p2), %s13528_s10, 4  ;;  %p10289_p4 = scmp.ne.s32.totalorder (!%p309_p2), %s13528_s10, 0 }
   0x6   : > { %312 = sbr.rel (%p309_p2) target bundleno = 1799 (0x707), region = 56  ;;  %p352_p3 = scmp.lt.s32.totalorder (!%p309_p2), %s10282_s11, 31 }
   0xd   : > { %s15845_s11 = smov (!%p352_p3, %s10282_s11), 31  ;;  %375 = sbr.rel (%p10289_p4) target bundleno = 20 (0x14), region = 60 }
   0xe   : > { %s11975_s12 = sshll.u32 %s15845_s11, 3  ;;  %s10286_s13 = sshll.u32 %s15845_s11, 1  ;;  %v13468_v0 = vmov (!%p10289_p4), 0.0  }
   0xf   : > { %s13536_s16 = scalar_lea.vmem %s15835_s1, %s11975_s12  ;;  %s13541_s19 = scalar_lea.vmem %s15836_s2, %s10286_s13  ;;  %376 = vst [vmem:[#allocation2] sm:$0xff] (!%p10289_p4), %v13468_v0 }
  0x10   : > { %s12175_s20 = smul.u32 400, %s15845_s11 }
  0x12   : > { %s13546_s23 = scalar_lea.vmem %s15837_s3, %s12175_s20 }
  0x14 PF: > { %v12196_v1 = vld [vmem:[%s13546_s23 + $0x4] ss:$16 sps:$4 sm:$0xff]   ;;  %v12198_v2 = vld [vmem:[%s13546_s23 + $0xc] ss:$16 sps:$4 sm:$0xff]   ;;  %v12200_v3 = vld [vmem:[%s13546_s23] ss:$16 sps:$4 sm:$0xff]   ;;  %v386_v29 = vlaneseq }
  0x15   : > { %861 = vmatprep.subr.bf16.mxu0 %v12196_v1  ;;  %v12201_v4 = vld [vmem:[%s13546_s23 + $0x8] ss:$16 sps:$4 sm:$0xff]   ;;  %902 = vmatprep.subr.bf16.mxu1 %v12198_v2  ;;  %v12202_v5 = vld [vmem:[%s13546_s23 + $0x24] ss:$16 sps:$4 sm:$0xff]   ;;  %v12204_v6 = vld [vmem:[%s13546_s23 + $0x2c] ss:$16 sps:$4 sm:$0xff]  }
  0x16   : > { %862 = vmatpush1.bf16.msra.mxu0 %v12200_v3  ;;  %903 = vmatpush1.bf16.msra.mxu1 %v12201_v4  ;;  %v12206_v7 = vld [vmem:[%s13546_s23 + $0x20] ss:$16 sps:$4 sm:$0xff]   ;;  %v12207_v8 = vld [vmem:[%s13546_s23 + $0x28] ss:$16 sps:$4 sm:$0xff]   ;;  %v12208_v9 = vld [vmem:[%s13546_s23 + $0x44] ss:$16 sps:$4 sm:$0xff]  }
  0x17   : > { %863 = vmatprep.subr.bf16.mxu0 %v12202_v5  ;;  %904 = vmatprep.subr.bf16.mxu1 %v12204_v6  ;;  %v12210_v10 = vld [vmem:[%s13546_s23 + $0x4c] ss:$16 sps:$4 sm:$0xff]   ;;  %v12212_v11 = vld [vmem:[%s13546_s23 + $0x40] ss:$16 sps:$4 sm:$0xff]   ;;  %v12213_v12 = vld [vmem:[%s13546_s23 + $0x48] ss:$16 sps:$4 sm:$0xff]  }
  0x18   : > { %v12214_v13 = vld [vmem:[%s13546_s23 + $0x64] ss:$16 sps:$4 sm:$0xff]   ;;  %v12216_v14 = vld [vmem:[%s13546_s23 + $0x6c] ss:$16 sps:$4 sm:$0xff]   ;;  %v12218_v15 = vld [vmem:[%s13546_s23 + $0x60] ss:$16 sps:$4 sm:$0xff]  }
  0x19   : > { %v12219_v16 = vld [vmem:[%s13546_s23 + $0x68] ss:$16 sps:$4 sm:$0xff]   ;;  %v12220_v17 = vld [vmem:[%s13546_s23 + $0x84] ss:$16 sps:$4 sm:$0xff]   ;;  %v12222_v18 = vld [vmem:[%s13546_s23 + $0x8c] ss:$16 sps:$4 sm:$0xff]  }
  0x1a   : > { %864 = vmatpush1.bf16.msra.mxu0 %v12206_v7  ;;  %905 = vmatpush1.bf16.msra.mxu1 %v12207_v8  ;;  %v12224_v19 = vld [vmem:[%s13546_s23 + $0x80] ss:$16 sps:$4 sm:$0xff]   ;;  %v12225_v20 = vld [vmem:[%s13546_s23 + $0x88] ss:$16 sps:$4 sm:$0xff]   ;;  %v12226_v21 = vld [vmem:[%s13546_s23 + $0xa4] ss:$16 sps:$4 sm:$0xff]  }
  0x1b   : > { %865 = vmatprep.subr.bf16.mxu0 %v12208_v9  ;;  %906 = vmatprep.subr.bf16.mxu1 %v12210_v10  ;;  %v12228_v22 = vld [vmem:[%s13546_s23 + $0xac] ss:$16 sps:$4 sm:$0xff]   ;;  %v12230_v23 = vld [vmem:[%s13546_s23 + $0xa0] ss:$16 sps:$4 sm:$0xff]   ;;  %v12231_v24 = vld [vmem:[%s13546_s23 + $0xa8] ss:$16 sps:$4 sm:$0xff]  }
  0x1c   : > { %v12232_v25 = vld [vmem:[%s13546_s23 + $0xc4] ss:$16 sps:$4 sm:$0xff]   ;;  %v12234_v26 = vld [vmem:[%s13546_s23 + $0xcc] ss:$16 sps:$4 sm:$0xff]   ;;  %v12236_v27 = vld [vmem:[%s13546_s23 + $0xc0] ss:$16 sps:$4 sm:$0xff]  }
  0x1d   : > { %v12237_v28 = vld [vmem:[%s13546_s23 + $0xc8] ss:$16 sps:$4 sm:$0xff]   ;;  %v12238_v30 = vld [vmem:[%s13546_s23 + $0xe4] ss:$16 sps:$4 sm:$0xff]   ;;  %v12240_v31 = vld [vmem:[%s13546_s23 + $0xec] ss:$16 sps:$4 sm:$0xff]  }
  0x1e   : > { %866 = vmatpush1.bf16.msra.mxu0 %v12212_v11  ;;  %907 = vmatpush1.bf16.msra.mxu1 %v12213_v12  ;;  %v13469_v32 = vmov 1983009808   ;;  %v12242_v34 = vld [vmem:[%s13546_s23 + $0xe0] ss:$16 sps:$4 sm:$0xff]   ;;  %v387_v35 = vshrl.u32 %v386_v29, 7  ;;  %vm848_vm0 = vcmask 1041408  }
  0x1f   : > { %867 = vmatprep.subr.bf16.mxu0 %v12214_v13  ;;  %908 = vmatprep.subr.bf16.mxu1 %v12216_v14  ;;  %v408_v33 = vunpack.c.l.s4 %v13469_v32  ;;  %v12243_v36 = vld [vmem:[%s13546_s23 + $0xe8] ss:$16 sps:$4 sm:$0xff]   ;;  %v12244_v37 = vld [vmem:[%s13546_s23 + $0x104] ss:$16 sps:$4 sm:$0xff]   ;;  %v12246_v38 = vld [vmem:[%s13546_s23 + $0x10c] ss:$16 sps:$4 sm:$0xff]  }
  0x20   : > { %v13583_v40 = vsub.s32 0, %v387_v35  ;;  %v13585_v41 = vsub.s32 4, %v387_v35  ;;  %v13587_v42 = vsub.s32 1, %v387_v35  ;;  %v13589_v43 = vsub.s32 5, %v387_v35  ;;  %v12248_v44 = vld [vmem:[%s13546_s23 + $0x100] ss:$16 sps:$4 sm:$0xff]  }
  0x21   : > { %v409_v39 = vunpack.c.0.s8 %v408_v33  ;;  %v12249_v45 = vld [vmem:[%s13546_s23 + $0x108] ss:$16 sps:$4 sm:$0xff]   ;;  %v13593_v46 = vsub.s32 2, %v387_v35  ;;  %v13595_v47 = vsub.s32 6, %v387_v35  ;;  %v12250_v48 = vld [vmem:[%s13546_s23 + $0x124] ss:$16 sps:$4 sm:$0xff]  }
  0x22   : > { %868 = vmatpush1.bf16.msra.mxu0 %v12218_v15  ;;  %909 = vmatpush1.bf16.msra.mxu1 %v12219_v16  ;;  %v12252_v49 = vld [vmem:[%s13546_s23 + $0x12c] ss:$16 sps:$4 sm:$0xff]   ;;  %v12254_v50 = vld [vmem:[%s13546_s23 + $0x120] ss:$16 sps:$4 sm:$0xff]   ;;  %v13603_v53 = vsub.s32 3, %v387_v35  ;;  %v13610_v59 = vsub.s32 7, %v387_v35 }
  0x23   : > { %869 = vmatprep.subr.bf16.mxu0 %v12220_v17  ;;  %910 = vmatprep.subr.bf16.mxu1 %v12222_v18  ;;  %v384_v51 = vld [vmem:[%s13536_s16] sm:$0xff]  ;;  %v13601_v52 = vsub.s32 %v409_v39, %v387_v35  ;;  %v12255_v54 = vld [vmem:[%s13546_s23 + $0x128] ss:$16 sps:$4 sm:$0xff]   ;;  %v12258_v0 = vld [vmem:[%s13546_s23 + $0x14c] ss:$16 sps:$4 sm:$0xff]   ;;  %vm844_vm1 = vcmask 556032  }
  0x24   : > { %v12256_v55 = vld [vmem:[%s13546_s23 + $0x144] ss:$16 sps:$4 sm:$0xff]   ;;  %v389_v56 = vrot.slane %v384_v51, %v13583_v40  ;;  %v393_v57 = vrot.slane %v384_v51, %v13585_v41  ;;  %v419_v58 = vrot.slane %v384_v51, %v13587_v42  ;;  %v423_v60 = vrot.slane %v384_v51, %v13589_v43  ;;  %v509_v63 = vld [vmem:[%s13541_s19] sm:$0x3]  ;;  %v12261_v5 = vld [vmem:[%s13546_s23 + $0x148] ss:$16 sps:$4 sm:$0xff]  }
  0x25   : > { %v450_v61 = vrot.slane %v384_v51, %v13593_v46  ;;  %v454_v62 = vrot.slane %v384_v51, %v13595_v47  ;;  %v12260_v4 = vld [vmem:[%s13546_s23 + $0x140] ss:$16 sps:$4 sm:$0xff]   ;;  %v481_v10 = vrot.slane %v384_v51, %v13603_v53  ;;  %v12262_v11 = vld [vmem:[%s13546_s23 + $0x164] ss:$16 sps:$4 sm:$0xff]   ;;  %v12264_v12 = vld [vmem:[%s13546_s23 + $0x16c] ss:$16 sps:$4 sm:$0xff]   ;;  %v485_v16 = vrot.slane %v384_v51, %v13610_v59 }
  0x26   : > { %870 = vmatpush1.bf16.msra.mxu0 %v12224_v19  ;;  %911 = vmatpush1.bf16.msra.mxu1 %v12225_v20  ;;  %v399_v1 = vrot.slane %v389_v56, %v13583_v40  ;;  %v403_v2 = vrot.slane %v393_v57, %v13583_v40  ;;  %v429_v3 = vrot.slane %v419_v58, %v13587_v42  ;;  %v592_v6 = vld [vmem:[%s13546_s23 + $0x180] sm:$0x33]  ;;  %v593_v13 = vld [vmem:[%s13546_s23 + $0x188] sm:$0x33]  ;;  %p11969_p5 = scmp.ne.s32.totalorder %s13528_s10, 1 }
  0x27   : > { %871 = vmatprep.subr.bf16.mxu0 %v12226_v21  ;;  %912 = vmatprep.subr.bf16.mxu1 %v12228_v22  ;;  %v433_v7 = vrot.slane %v423_v60, %v13587_v42  ;;  %v460_v8 = vrot.slane %v450_v61, %v13593_v46  ;;  %v464_v9 = vrot.slane %v454_v62, %v13593_v46  ;;  %v13633_v14 = vld [vmem:[%s15834_s0] sm:$0xf]  ;;  %v13641_v19 = vld [vmem:[%s15834_s0 + $0x4] sm:$0xf]  ;;  %v12267_v29 = vld [vmem:[%s13546_s23 + $0x168] ss:$16 sps:$4 sm:$0xff]  }
  0x28   : > { %v406_v15 = vcombine.low %v399_v1, %v403_v2  ;;  %v514_v17 = vrot.slane %v509_v63, %v13583_v40  ;;  %v518_v18 = vrot.slane %v509_v63, %v13587_v42  ;;  %v491_v22 = vrot.slane %v481_v10, %v13603_v53  ;;  %v12274_v51 = vld [vmem:[%s13546_s23 + $0x194] ss:$16 sps:$4 sm:$0xff]   ;;  %v12277_v56 = vld [vmem:[%s13546_s23 + $0x19c] ss:$16 sps:$4 sm:$0xff]   ;;  %v12275_v1 = vld [vmem:[%s13546_s23 + $0x198] ss:$16 sps:$4 sm:$0xff]  }
  0x29   : > { %v436_v20 = vcombine.low %v429_v3, %v433_v7  ;;  %v467_v21 = vcombine.low %v460_v8, %v464_v9  ;;  %v10343_v39 = vcombine.low %v593_v13, %v593_v13  ;;  %v12280_v3 = vld [vmem:[%s13546_s23 + $0x1b4] ss:$16 sps:$4 sm:$0xff]   ;;  %v12289_v8 = vld [vmem:[%s13546_s23 + $0x1dc] ss:$16 sps:$4 sm:$0xff]   ;;  %v12284_v9 = vld [vmem:[%s13546_s23 + $0x1d0] ss:$16 sps:$4 sm:$0xff]  }
  0x2a   : > { %872 = vmatpush1.bf16.msra.mxu0 %v12230_v23  ;;  %913 = vmatpush1.bf16.msra.mxu1 %v12231_v24  ;;  %v13647_v23 = vld [vmem:[%s15834_s0 + $0x8] sm:$0xf]  ;;  %v413_v24 = vrot.slane %v406_v15, %v13601_v52  ;;  %v12286_v7 = vld [vmem:[%s13546_s23 + $0x1d4] ss:$16 sps:$4 sm:$0xff]   ;;  %v12295_v15 = vld [vmem:[%s13546_s23 + $0x1fc] ss:$16 sps:$4 sm:$0xff]  }
  0x2b   : > { %873 = vmatprep.subr.bf16.mxu0 %v12232_v25  ;;  %914 = vmatprep.subr.bf16.mxu1 %v12234_v26  ;;  %v495_v25 = vrot.slane %v485_v16, %v13603_v53  ;;  %v443_v26 = vrot.slane %v436_v20, %v13601_v52  ;;  %v12287_v10 = vld [vmem:[%s13546_s23 + $0x1d8] ss:$16 sps:$4 sm:$0xff]   ;;  %v12290_v20 = vld [vmem:[%s13546_s23 + $0x1f0] ss:$16 sps:$4 sm:$0xff]   ;;  %vm10185_vm2 = vcmask (!%p11969_p5), 107520  }
  0x2c   : > { %v415_v32 = vmul.f32 %v413_v24, %v13633_v14 }
  0x2d   : > { %v498_v33 = vcombine.low %v491_v22, %v495_v25  ;;  %v445_v35 = vmul.f32 %v13641_v19, %v443_v26  ;;  %v12293_v25 = vld [vmem:[%s13546_s23 + $0x1f8] ss:$16 sps:$4 sm:$0xff]  }
  0x2e   : > { %874 = vmatpush1.bf16.msra.mxu0 %v12236_v27  ;;  %915 = vmatpush1.bf16.msra.mxu1 %v12237_v28  ;;  %v474_v27 = vrot.slane %v467_v21, %v13601_v52  ;;  %v12266_v28 = vld [vmem:[%s13546_s23 + $0x160] ss:$16 sps:$4 sm:$0xff]  }
  0x2f   : > { %875 = vmatprep.subr.bf16.mxu0 %v12238_v30  ;;  %916 = vmatprep.subr.bf16.mxu1 %v12240_v31  ;;  %v10342_v30 = vcombine.high %v592_v6, %v592_v6  ;;  %v10344_v31 = vcombine.high %v593_v13, %v593_v13 }
  0x32   : > { %876 = vmatpush1.bf16.msra.mxu0 %v12242_v34  ;;  %917 = vmatpush1.bf16.msra.mxu1 %v12243_v36  ;;  %v13659_v34 = vld [vmem:[%s15834_s0 + $0xc] sm:$0xf]  ;;  %v476_v36 = vmul.f32 %v13647_v23, %v474_v27 }
  0x33   : > { %877 = vmatprep.subr.bf16.mxu0 %v12244_v37  ;;  %918 = vmatprep.subr.bf16.mxu1 %v12246_v38  ;;  %v519_v37 = vcombine.low %v514_v17, %v518_v18  ;;  %v10341_v38 = vcombine.low %v592_v6, %v592_v6  ;;  %v12281_v6 = vld [vmem:[%s13546_s23 + $0x1b8] ss:$16 sps:$4 sm:$0xff]  }
  0x36   : > { %878 = vmatpush1.bf16.msra.mxu0 %v12248_v44  ;;  %919 = vmatpush1.bf16.msra.mxu1 %v12249_v45  ;;  %v505_v44 = vrot.slane %v498_v33, %v13601_v52  ;;  %v446_v45 = vadd.f32 %v445_v35, %v415_v32 }
  0x37   : > { %879 = vmatprep.subr.bf16.mxu0 %v12250_v48  ;;  %920 = vmatprep.subr.bf16.mxu1 %v12252_v49 }
  0x38   : > { %v507_v48 = vmul.f32 %v13659_v34, %v505_v44  ;;  %v477_v49 = vadd.f32 %v476_v36, %v446_v45  ;;  %v12301_v36 = vld [vmem:[%s13546_s23 + $0x21c] ss:$16 sps:$4 sm:$0xff]  }
  0x3a   : > { %880 = vmatpush1.bf16.msra.mxu0 %v12254_v50  ;;  %921 = vmatpush1.bf16.msra.mxu1 %v12255_v54  ;;  %v526_v50 = vrot.slane %v519_v37, %v13601_v52  ;;  %v850_v54 = vsel %vm848_vm0, %v10341_v38, 0  ;;  %v508_v57 = vadd.f32 %v507_v48, %v477_v49 }
  0x3b   : > { %881 = vmatprep.subr.bf16.mxu0 %v12256_v55  ;;  %922 = vmatprep.subr.bf16.mxu1 %v12258_v0  ;;  %v856_v55 = vsel %vm848_vm0, %v10343_v39, 0  ;;  %v12272_v0 = vld [vmem:[%s13546_s23 + $0x190] ss:$16 sps:$4 sm:$0xff]  }
  0x3c   : > { %v528_v58 = vadd.f32 %v526_v50, %v508_v57  ;;  %v12296_v50 = vld [vmem:[%s13546_s23 + $0x210] ss:$16 sps:$4 sm:$0xff]  }
  0x3e   : > { %882 = vmatpush1.bf16.msra.mxu0 %v12260_v4  ;;  %923 = vmatpush1.bf16.msra.mxu1 %v12261_v5  ;;  %v529_v60 = vmax.f32 %v528_v58, 0.0  ;;  %v12283_v4 = vld [vmem:[%s13546_s23 + $0x1bc] ss:$16 sps:$4 sm:$0xff]   ;;  %v12278_v5 = vld [vmem:[%s13546_s23 + $0x1b0] ss:$16 sps:$4 sm:$0xff]  }
  0x3f   : > { %883 = vmatprep.subr.bf16.mxu0 %v12262_v11  ;;  %924 = vmatprep.subr.bf16.mxu1 %v12264_v12  ;;  %v10349_v11 = vld [vmem:[%s13536_s16 + $0x8] sm:$0xff]  ;;  %v12292_v12 = vld [vmem:[%s13546_s23 + $0x1f4] ss:$16 sps:$4 sm:$0xff]  }
  0x40   : > { %v538_v61 = vrot.slane %v529_v60, %v13601_v52  ;;  %v973_v13 = vrot.slane %v10349_v11, %v13583_v40  ;;  %v977_v16 = vrot.slane %v10349_v11, %v13585_v41  ;;  %v1003_v17 = vrot.slane %v10349_v11, %v13587_v42  ;;  %v12307_v60 = vld [vmem:[%s13546_s23 + $0x23c] ss:$16 sps:$4 sm:$0xff]  }
  0x41   : > { %v1007_v18 = vrot.slane %v10349_v11, %v13589_v43  ;;  %v1034_v22 = vrot.slane %v10349_v11, %v13593_v46  ;;  %v1038_v24 = vrot.slane %v10349_v11, %v13595_v47  ;;  %v1069_v35 = vrot.slane %v10349_v11, %v13610_v59 }
  0x42   : > { %884 = vmatpush1.bf16.msra.mxu0 %v12266_v28  ;;  %925 = vmatpush1.bf16.msra.mxu1 %v12267_v29  ;;  %v539_v62 = vcombine.high %v538_v61, %v538_v61  ;;  %v542_v63 = vpack.c.bf16 %v538_v61, %v538_v61  ;;  %v983_v21 = vrot.slane %v973_v13, %v13583_v40  ;;  %v12316_v13 = vld [vmem:[%s13546_s23 + $0x274] ss:$16 sps:$4 sm:$0xff]  }
  0x43   : > { %10345 = vmatprep.subr.msk.bf16.mxu0 %vm848_vm0, %v10342_v30  ;;  %10347 = vmatprep.subr.msk.bf16.mxu1 %vm848_vm0, %v10344_v31  ;;  %v987_v26 = vrot.slane %v977_v16, %v13583_v40  ;;  %v1013_v27 = vrot.slane %v1003_v17, %v13587_v42  ;;  %v1017_v28 = vrot.slane %v1007_v18, %v13587_v42  ;;  %v10350_v30 = vld [vmem:[%s13541_s19 + $0x2] sm:$0x3]  ;;  %v12298_v31 = vld [vmem:[%s13546_s23 + $0x214] ss:$16 sps:$4 sm:$0xff]   ;;  %v12317_v18 = vld [vmem:[%s13546_s23 + $0x278] ss:$16 sps:$4 sm:$0xff]  }
  0x44   : > { %v543_v2 = vpack.c.bf16 %v539_v62, %v539_v62  ;;  %v1065_v29 = vrot.slane %v10349_v11, %v13603_v53  ;;  %v1044_v32 = vrot.slane %v1034_v22, %v13593_v46  ;;  %v1048_v33 = vrot.slane %v1038_v24, %v13593_v46  ;;  %v12311_v11 = vld [vmem:[%s13546_s23 + $0x258] ss:$16 sps:$4 sm:$0xff]   ;;  %v12314_v17 = vld [vmem:[%s13546_s23 + $0x270] ss:$16 sps:$4 sm:$0xff]   ;;  %v12325_v22 = vld [vmem:[%s13546_s23 + $0x29c] ss:$16 sps:$4 sm:$0xff]  }
  0x45   : > { %v990_v37 = vcombine.low %v983_v21, %v987_v26  ;;  %v1020_v38 = vcombine.low %v1013_v27, %v1017_v28  ;;  %v1079_v45 = vrot.slane %v1069_v35, %v13603_v53  ;;  %v1099_v48 = vrot.slane %v10350_v30, %v13583_v40  ;;  %v12322_v21 = vld [vmem:[%s13546_s23 + $0x294] ss:$16 sps:$4 sm:$0xff]   ;;  %v12323_v26 = vld [vmem:[%s13546_s23 + $0x298] ss:$16 sps:$4 sm:$0xff]   ;;  %v12337_v35 = vld [vmem:[%s13546_s23 + $0x2dc] ss:$16 sps:$4 sm:$0xff]  }
  0x46   : > { %886 = vmatpush1.bf16.msra.mxu0 %v850_v54  ;;  %927 = vmatpush1.bf16.msra.mxu1 %v856_v55  ;;  %v1075_v39 = vrot.slane %v1065_v29, %v13603_v53  ;;  %v1051_v44 = vcombine.low %v1044_v32, %v1048_v33  ;;  %v1103_v49 = vrot.slane %v10350_v30, %v13587_v42  ;;  %v12328_v28 = vld [vmem:[%s13546_s23 + $0x2b4] ss:$16 sps:$4 sm:$0xff]   ;;  %v12331_v29 = vld [vmem:[%s13546_s23 + $0x2bc] ss:$16 sps:$4 sm:$0xff]   ;;  %v12329_v32 = vld [vmem:[%s13546_s23 + $0x2b8] ss:$16 sps:$4 sm:$0xff]  }
  0x47   : > { %1445 = vmatprep.subr.bf16.mxu0 %v12274_v51  ;;  %1486 = vmatprep.subr.bf16.mxu1 %v12277_v56  ;;  %v12299_v51 = vld [vmem:[%s13546_s23 + $0x218] ss:$16 sps:$4 sm:$0xff]   ;;  %v997_v54 = vrot.slane %v990_v37, %v13601_v52  ;;  %v1027_v55 = vrot.slane %v1020_v38, %v13601_v52  ;;  %v12304_v56 = vld [vmem:[%s13546_s23 + $0x234] ss:$16 sps:$4 sm:$0xff]   ;;  %v12332_v37 = vld [vmem:[%s13546_s23 + $0x2d0] ss:$16 sps:$4 sm:$0xff]  }
  0x48   : > { %10346 = vmatprep.mubr.msk.bf16.mxu0 %vm844_vm1, %v543_v2  ;;  %10348 = vmatprep.mubr.msk.bf16.mxu1 %vm844_vm1, %v543_v2  ;;  %v1058_v57 = vrot.slane %v1051_v44, %v13601_v52  ;;  %v1082_v58 = vcombine.low %v1075_v39, %v1079_v45  ;;  %v12302_v2 = vld [vmem:[%s13546_s23 + $0x230] ss:$16 sps:$4 sm:$0xff]   ;;  %v12334_v33 = vld [vmem:[%s13546_s23 + $0x2d4] ss:$16 sps:$4 sm:$0xff]   ;;  %v10400_v38 = vld [vmem:[%s13546_s23 + $0x318] sm:$0x33] }
  0x49   : > { %894 = vmatmul.mubr.bf16.vlgmr.msra.gmra.mrb[0].mxu0 %v542_v63  ;;  %935 = vmatmul.mubr.bf16.vlgmr.msra.gmra.mrb[0].mxu1 %v542_v63  ;;  %v999_v61 = vmul.f32 %v997_v54, %v13633_v14  ;;  %v1029_v62 = vmul.f32 %v13641_v19, %v1027_v55  ;;  %v1104_v63 = vcombine.low %v1099_v48, %v1103_v49  ;;  %v12335_v39 = vld [vmem:[%s13546_s23 + $0x2d8] ss:$16 sps:$4 sm:$0xff]   ;;  %v12340_v44 = vld [vmem:[%s13546_s23 + $0x2f4] ss:$16 sps:$4 sm:$0xff]   ;;  %v12343_v48 = vld [vmem:[%s13546_s23 + $0x2fc] ss:$16 sps:$4 sm:$0xff]  }
  0x4a   : > { %1446 = vmatpush1.bf16.msra.mxu0 %v12272_v0  ;;  %1487 = vmatpush1.bf16.msra.mxu1 %v12275_v1  ;;  %v1060_v0 = vmul.f32 %v13647_v23, %v1058_v57  ;;  %v1089_v1 = vrot.slane %v1082_v58, %v13601_v52  ;;  %v10457_v45 = vld [vmem:[%s13536_s16 + $0x10] sm:$0xff]  ;;  %v12341_v58 = vld [vmem:[%s13546_s23 + $0x2f8] ss:$16 sps:$4 sm:$0xff]  }
  0x4b   : > { %1447 = vmatprep.subr.bf16.mxu0 %v12280_v3  ;;  %1488 = vmatprep.subr.bf16.mxu1 %v12283_v4  ;;  %v12305_v3 = vld [vmem:[%s13546_s23 + $0x238] ss:$16 sps:$4 sm:$0xff]   ;;  %v1030_v4 = vadd.f32 %v1029_v62, %v999_v61  ;;  %v1557_v54 = vrot.slane %v10457_v45, %v13583_v40  ;;  %v1561_v55 = vrot.slane %v10457_v45, %v13585_v41  ;;  %v12338_v57 = vld [vmem:[%s13546_s23 + $0x2f0] ss:$16 sps:$4 sm:$0xff]  }
  0x4c   : > { %v1591_v61 = vrot.slane %v10457_v45, %v13589_v43  ;;  %v1618_v62 = vrot.slane %v10457_v45, %v13593_v46 }
  0x4e   : > { %1448 = vmatpush1.bf16.msra.mxu0 %v12278_v5  ;;  %1489 = vmatpush1.bf16.msra.mxu1 %v12281_v6  ;;  %v12310_v5 = vld [vmem:[%s13546_s23 + $0x254] ss:$16 sps:$4 sm:$0xff]   ;;  %v1091_v6 = vmul.f32 %v13659_v34, %v1089_v1  ;;  %v1571_v1 = vrot.slane %v1561_v55, %v13583_v40  ;;  %v12360_v55 = vld [vmem:[%s13546_s23 + $0x360] ss:$16 sps:$4 sm:$0xff]  }
  0x4f   : > { %1449 = vmatprep.subr.bf16.mxu0 %v12286_v7  ;;  %1490 = vmatprep.subr.bf16.mxu1 %v12289_v8  ;;  %v12313_v7 = vld [vmem:[%s13546_s23 + $0x25c] ss:$16 sps:$4 sm:$0xff]   ;;  %v1061_v8 = vadd.f32 %v1060_v0, %v1030_v4  ;;  %v1567_v0 = vrot.slane %v1557_v54, %v13583_v40  ;;  %v1601_v4 = vrot.slane %v1591_v61, %v13587_v42 }
  0x52   : > { %1450 = vmatpush1.bf16.msra.mxu0 %v12284_v9  ;;  %1491 = vmatpush1.bf16.msra.mxu1 %v12287_v10  ;;  %v1111_v9 = vrot.slane %v1104_v63, %v13601_v52  ;;  %v12308_v10 = vld [vmem:[%s13546_s23 + $0x250] ss:$16 sps:$4 sm:$0xff]   ;;  %v1622_v63 = vrot.slane %v10457_v45, %v13595_v47 }
  0x53   : > { %1451 = vmatprep.subr.bf16.mxu0 %v12292_v12  ;;  %1492 = vmatprep.subr.bf16.mxu1 %v12295_v15  ;;  %v1092_v12 = vadd.f32 %v1091_v6, %v1061_v8  ;;  %v12319_v15 = vld [vmem:[%s13546_s23 + $0x27c] ss:$16 sps:$4 sm:$0xff]   ;;  %v1649_v8 = vrot.slane %v10457_v45, %v13603_v53 }
  0x54   : > { %v1632_v6 = vrot.slane %v1622_v63, %v13593_v46  ;;  %v12369_v63 = vld [vmem:[%s13546_s23 + $0x388] ss:$16 sps:$4 sm:$0xff]  }
  0x55   : > { %v1113_v16 = vadd.f32 %v1111_v9, %v1092_v12  ;;  %v1653_v9 = vrot.slane %v10457_v45, %v13610_v59 }
  0x56   : > { %1452 = vmatpush1.bf16.msra.mxu0 %v12290_v20  ;;  %1493 = vmatpush1.bf16.msra.mxu1 %v12293_v25  ;;  %v12320_v25 = vld [vmem:[%s13546_s23 + $0x290] ss:$16 sps:$4 sm:$0xff]  }
  0x57   : > { %1453 = vmatprep.subr.bf16.mxu0 %v12298_v31  ;;  %1494 = vmatprep.subr.bf16.mxu1 %v12301_v36  ;;  %v1114_v20 = vmax.f32 %v1113_v16, 0.0  ;;  %v12326_v31 = vld [vmem:[%s13546_s23 + $0x2b0] ss:$16 sps:$4 sm:$0xff]  }
  0x58   : > { %v10399_v36 = vld [vmem:[%s13546_s23 + $0x310] sm:$0x33] }
  0x59   : > { %v13737_v24 = vrot.slane %v1114_v20, %v13601_v52  ;;  %v10450_v49 = vcombine.high %v10399_v36, %v10399_v36 }
  0x5a   : > { %1454 = vmatpush1.bf16.msra.mxu0 %v12296_v50  ;;  %1495 = vmatpush1.bf16.msra.mxu1 %v12299_v51  ;;  %v10449_v50 = vcombine.low %v10399_v36, %v10399_v36  ;;  %v10452_v51 = vcombine.high %v10400_v38, %v10400_v38  ;;  %v12356_v36 = vld [vmem:[%s13546_s23 + $0x344] ss:$16 sps:$4 sm:$0xff]  }
  0x5b   : > { %1455 = vmatprep.subr.bf16.mxu0 %v12304_v56  ;;  %1496 = vmatprep.subr.bf16.mxu1 %v12307_v60  ;;  %v1124_v27 = vcombine.high %v13737_v24, %v13737_v24  ;;  %v1587_v56 = vrot.slane %v10457_v45, %v13587_v42  ;;  %v10451_v60 = vcombine.low %v10400_v38, %v10400_v38  ;;  %v12359_v38 = vld [vmem:[%s13546_s23 + $0x34c] ss:$16 sps:$4 sm:$0xff]   ;;  %v12357_v45 = vld [vmem:[%s13546_s23 + $0x348] ss:$16 sps:$4 sm:$0xff]  }
  0x5c   : > { %v1434_v20 = vsel %vm848_vm0, %v10449_v50, 0  ;;  %v12362_v50 = vld [vmem:[%s13546_s23 + $0x364] ss:$16 sps:$4 sm:$0xff]  }
  0x5d   : > { %v1128_v30 = vpack.c.bf16 %v1124_v27, %v1124_v27 }
  0x5e   : > { %1456 = vmatpush1.bf16.msra.mxu0 %v12302_v2  ;;  %1497 = vmatpush1.bf16.msra.mxu1 %v12305_v3  ;;  %v1597_v2 = vrot.slane %v1587_v56, %v13587_v42  ;;  %v10458_v3 = vld [vmem:[%s13541_s19 + $0x4] sm:$0x3]  ;;  %v12363_v56 = vld [vmem:[%s13546_s23 + $0x368] ss:$16 sps:$4 sm:$0xff]  }
  0x5f   : > { %1457 = vmatprep.subr.bf16.mxu0 %v12310_v5  ;;  %1498 = vmatprep.subr.bf16.mxu1 %v12313_v7  ;;  %v1628_v5 = vrot.slane %v1618_v62, %v13593_v46  ;;  %v1574_v7 = vcombine.low %v1567_v0, %v1571_v1  ;;  %v1683_v12 = vrot.slane %v10458_v3, %v13583_v40  ;;  %v12366_v62 = vld [vmem:[%s13546_s23 + $0x380] ss:$16 sps:$4 sm:$0xff]   ;;  %v12374_v1 = vld [vmem:[%s13546_s23 + $0x3a4] ss:$16 sps:$4 sm:$0xff]  }
  0x60   : > { %10454 = vmatprep.mubr.msk.bf16.mxu0 %vm844_vm1, %v1128_v30  ;;  %10456 = vmatprep.mubr.msk.bf16.mxu1 %vm844_vm1, %v1128_v30  ;;  %v12348_v30 = vld [vmem:[%s13546_s23 + $0x320] ss:$16 sps:$4 sm:$0xff]  }
  0x61   : > { %v1581_v16 = vrot.slane %v1574_v7, %v13601_v52  ;;  %v12380_v7 = vld [vmem:[%s13546_s23 + $0x3c4] ss:$16 sps:$4 sm:$0xff]  }
  0x62   : > { %1458 = vmatpush1.bf16.msra.mxu0 %v12308_v10  ;;  %1499 = vmatpush1.bf16.msra.mxu1 %v12311_v11  ;;  %v1604_v10 = vcombine.low %v1597_v2, %v1601_v4  ;;  %v1635_v11 = vcombine.low %v1628_v5, %v1632_v6  ;;  %v12377_v2 = vld [vmem:[%s13546_s23 + $0x3ac] ss:$16 sps:$4 sm:$0xff]   ;;  %v12372_v4 = vld [vmem:[%s13546_s23 + $0x3a0] ss:$16 sps:$4 sm:$0xff]   ;;  %v12375_v5 = vld [vmem:[%s13546_s23 + $0x3a8] ss:$16 sps:$4 sm:$0xff]  }
  0x63   : > { %1459 = vmatprep.subr.bf16.mxu0 %v12316_v13  ;;  %1500 = vmatprep.subr.bf16.mxu1 %v12319_v15  ;;  %v1687_v13 = vrot.slane %v10458_v3, %v13587_v42  ;;  %v12350_v15 = vld [vmem:[%s13546_s23 + $0x324] ss:$16 sps:$4 sm:$0xff]   ;;  %v1583_v27 = vmul.f32 %v1581_v16, %v13633_v14  ;;  %v12387_v16 = vld [vmem:[%s13546_s23 + $0x3e8] ss:$16 sps:$4 sm:$0xff]  }
  0x66   : > { %1460 = vmatpush1.bf16.msra.mxu0 %v12314_v17  ;;  %1501 = vmatpush1.bf16.msra.mxu1 %v12317_v18  ;;  %v1659_v17 = vrot.slane %v1649_v8, %v13603_v53  ;;  %v1663_v18 = vrot.slane %v1653_v9, %v13603_v53  ;;  %v12383_v8 = vld [vmem:[%s13546_s23 + $0x3cc] ss:$16 sps:$4 sm:$0xff]   ;;  %v12378_v9 = vld [vmem:[%s13546_s23 + $0x3c0] ss:$16 sps:$4 sm:$0xff]  }
  0x67   : > { %1461 = vmatprep.subr.bf16.mxu0 %v12322_v21  ;;  %1502 = vmatprep.subr.bf16.mxu1 %v12325_v22  ;;  %v1440_v21 = vsel %vm848_vm0, %v10451_v60, 0  ;;  %v12353_v22 = vld [vmem:[%s13546_s23 + $0x32c] ss:$16 sps:$4 sm:$0xff]  }
  0x68   : > { %v12371_v60 = vld [vmem:[%s13546_s23 + $0x38c] ss:$16 sps:$4 sm:$0xff]  }
  0x6a   : > { %1462 = vmatpush1.bf16.msra.mxu0 %v12320_v25  ;;  %1503 = vmatpush1.bf16.msra.mxu1 %v12323_v26  ;;  %v1611_v25 = vrot.slane %v1604_v10, %v13601_v52  ;;  %v1642_v26 = vrot.slane %v1635_v11, %v13601_v52  ;;  %v12381_v10 = vld [vmem:[%s13546_s23 + $0x3c8] ss:$16 sps:$4 sm:$0xff]   ;;  %v12386_v11 = vld [vmem:[%s13546_s23 + $0x3e4] ss:$16 sps:$4 sm:$0xff]  }
  0x6b   : > { %1463 = vmatprep.subr.bf16.mxu0 %v12328_v28  ;;  %1504 = vmatprep.subr.bf16.mxu1 %v12331_v29  ;;  %v1666_v28 = vcombine.low %v1659_v17, %v1663_v18  ;;  %v1127_v29 = vpack.c.bf16 %v13737_v24, %v13737_v24  ;;  %v12392_v17 = vld [vmem:[%s13546_s23 + $0x404] ss:$16 sps:$4 sm:$0xff]  }
  0x6e   : > { %1464 = vmatpush1.bf16.msra.mxu0 %v12326_v31  ;;  %1505 = vmatpush1.bf16.msra.mxu1 %v12329_v32  ;;  %v12351_v31 = vld [vmem:[%s13546_s23 + $0x328] ss:$16 sps:$4 sm:$0xff]   ;;  %v1613_v32 = vmul.f32 %v13641_v19, %v1611_v25 }
  0x6f   : > { %1465 = vmatprep.subr.bf16.mxu0 %v12334_v33  ;;  %1506 = vmatprep.subr.bf16.mxu1 %v12337_v35  ;;  %v1644_v33 = vmul.f32 %v13647_v23, %v1642_v26  ;;  %v1688_v35 = vcombine.low %v1683_v12, %v1687_v13  ;;  %v12389_v12 = vld [vmem:[%s13546_s23 + $0x3ec] ss:$16 sps:$4 sm:$0xff]   ;;  %v12384_v13 = vld [vmem:[%s13546_s23 + $0x3e0] ss:$16 sps:$4 sm:$0xff]  }
  0x70   : > { %v1614_v24 = vadd.f32 %v1613_v32, %v1583_v27  ;;  %v10566_v27 = vld [vmem:[%s13541_s19 + $0x6] sm:$0x3] }
  0x72   : > { %1466 = vmatpush1.bf16.msra.mxu0 %v12332_v37  ;;  %1507 = vmatpush1.bf16.msra.mxu1 %v12335_v39  ;;  %v1673_v37 = vrot.slane %v1666_v28, %v13601_v52  ;;  %v12395_v28 = vld [vmem:[%s13546_s23 + $0x40c] ss:$16 sps:$4 sm:$0xff]  }
  0x73   : > { %1467 = vmatprep.subr.bf16.mxu0 %v12340_v44  ;;  %1508 = vmatprep.subr.bf16.mxu1 %v12343_v48  ;;  %v12354_v44 = vld [vmem:[%s13546_s23 + $0x340] ss:$16 sps:$4 sm:$0xff]   ;;  %v1645_v48 = vadd.f32 %v1644_v33, %v1614_v24 }
  0x74   : > { %v1675_v39 = vmul.f32 %v13659_v34, %v1673_v37  ;;  %v12390_v37 = vld [vmem:[%s13546_s23 + $0x400] ss:$16 sps:$4 sm:$0xff]  }
  0x76   : > { %1468 = vmatpush1.bf16.msra.mxu0 %v12338_v57  ;;  %1509 = vmatpush1.bf16.msra.mxu1 %v12341_v58  ;;  %v1676_v54 = vadd.f32 %v1675_v39, %v1645_v48  ;;  %v12368_v58 = vld [vmem:[%s13546_s23 + $0x384] ss:$16 sps:$4 sm:$0xff]  }
  0x77   : > { %10453 = vmatprep.subr.msk.bf16.mxu0 %vm848_vm0, %v10450_v49  ;;  %10455 = vmatprep.subr.msk.bf16.mxu1 %vm848_vm0, %v10452_v51  ;;  %v1695_v49 = vrot.slane %v1688_v35, %v13601_v52  ;;  %v12365_v51 = vld [vmem:[%s13546_s23 + $0x36c] ss:$16 sps:$4 sm:$0xff]   ;;  %v12398_v48 = vld [vmem:[%s13546_s23 + $0x424] ss:$16 sps:$4 sm:$0xff]  }
  0x79   : > { %v1697_v57 = vadd.f32 %v1695_v49, %v1676_v54  ;;  %v12401_v54 = vld [vmem:[%s13546_s23 + $0x42c] ss:$16 sps:$4 sm:$0xff]  }
  0x7a   : > { %1470 = vmatpush1.bf16.msra.mxu0 %v1434_v20  ;;  %1511 = vmatpush1.bf16.msra.mxu1 %v1440_v21 }
  0x7b   : > { %2029 = vmatprep.subr.bf16.mxu0 %v12350_v15  ;;  %2070 = vmatprep.subr.bf16.mxu1 %v12353_v22  ;;  %v1698_v61 = vmax.f32 %v1697_v57, 0.0  ;;  %v10565_v15 = vld [vmem:[%s13536_s16 + $0x18] sm:$0xff] }
  0x7c   : > { %v2141_v18 = vrot.slane %v10565_v15, %v13583_v40  ;;  %v2145_v20 = vrot.slane %v10565_v15, %v13585_v41  ;;  %v2171_v21 = vrot.slane %v10565_v15, %v13587_v42  ;;  %v2175_v22 = vrot.slane %v10565_v15, %v13589_v43 }
  0x7d   : > { %1478 = vmatmul.mubr.bf16.vlgmr.msra.gmra.mrb[4].mxu0 %v1127_v29  ;;  %1519 = vmatmul.mubr.bf16.vlgmr.msra.gmra.mrb[4].mxu1 %v1127_v29  ;;  %v13811_v0 = vrot.slane %v1698_v61, %v13601_v52  ;;  %v2202_v25 = vrot.slane %v10565_v15, %v13593_v46  ;;  %v2206_v26 = vrot.slane %v10565_v15, %v13595_v47  ;;  %v12399_v61 = vld [vmem:[%s13546_s23 + $0x428] ss:$16 sps:$4 sm:$0xff]  }
  0x7e   : > { %2030 = vmatpush1.bf16.msra.mxu0 %v12348_v30  ;;  %2071 = vmatpush1.bf16.msra.mxu1 %v12351_v31  ;;  %v2151_v29 = vrot.slane %v2141_v18, %v13583_v40  ;;  %v2155_v30 = vrot.slane %v2145_v20, %v13583_v40  ;;  %v2181_v31 = vrot.slane %v2171_v21, %v13587_v42  ;;  %v10507_v18 = vld [vmem:[%s13546_s23 + $0x4a0] sm:$0x33]  ;;  %v10508_v20 = vld [vmem:[%s13546_s23 + $0x4a8] sm:$0x33] }
  0x7f   : > { %2031 = vmatprep.subr.bf16.mxu0 %v12356_v36  ;;  %2072 = vmatprep.subr.bf16.mxu1 %v12359_v38  ;;  %v1708_v3 = vcombine.high %v13811_v0, %v13811_v0  ;;  %v2185_v32 = vrot.slane %v2175_v22, %v13587_v42  ;;  %v2212_v33 = vrot.slane %v2202_v25, %v13593_v46  ;;  %v12393_v38 = vld [vmem:[%s13546_s23 + $0x408] ss:$16 sps:$4 sm:$0xff]   ;;  %v12414_v22 = vld [vmem:[%s13546_s23 + $0x480] ss:$16 sps:$4 sm:$0xff]  }
  0x80   : > { %v2216_v35 = vrot.slane %v2206_v26, %v13593_v46  ;;  %v2233_v36 = vrot.slane %v10565_v15, %v13603_v53  ;;  %v2158_v24 = vcombine.low %v2151_v29, %v2155_v30  ;;  %v2237_v39 = vrot.slane %v10565_v15, %v13610_v59  ;;  %v12411_v15 = vld [vmem:[%s13546_s23 + $0x468] ss:$16 sps:$4 sm:$0xff]  }
  0x81   : > { %v1712_v6 = vpack.c.bf16 %v1708_v3, %v1708_v3  ;;  %v2188_v49 = vcombine.low %v2181_v31, %v2185_v32  ;;  %v12417_v25 = vld [vmem:[%s13546_s23 + $0x488] ss:$16 sps:$4 sm:$0xff]   ;;  %v10558_v26 = vcombine.high %v10507_v18, %v10507_v18  ;;  %v10559_v29 = vcombine.low %v10508_v20, %v10508_v20  ;;  %v12426_v31 = vld [vmem:[%s13546_s23 + $0x4b4] ss:$16 sps:$4 sm:$0xff]  }
  0x82   : > { %2032 = vmatpush1.bf16.msra.mxu0 %v12354_v44  ;;  %2073 = vmatpush1.bf16.msra.mxu1 %v12357_v45  ;;  %v2267_v44 = vrot.slane %v10566_v27, %v13583_v40  ;;  %v2271_v45 = vrot.slane %v10566_v27, %v13587_v42  ;;  %v10560_v27 = vcombine.high %v10508_v20, %v10508_v20 }
  0x83   : > { %2033 = vmatprep.subr.bf16.mxu0 %v12362_v50  ;;  %2074 = vmatprep.subr.bf16.mxu1 %v12365_v51  ;;  %v2219_v50 = vcombine.low %v2212_v33, %v2216_v35  ;;  %v2243_v51 = vrot.slane %v2233_v36, %v13603_v53  ;;  %v2195_v57 = vrot.slane %v2188_v49, %v13601_v52  ;;  %v2024_v33 = vsel %vm848_vm0, %v10559_v29, 0  ;;  %v12429_v35 = vld [vmem:[%s13546_s23 + $0x4bc] ss:$16 sps:$4 sm:$0xff]   ;;  %v12433_v49 = vld [vmem:[%s13546_s23 + $0x4d8] ss:$16 sps:$4 sm:$0xff]  }
  0x84   : > { %10562 = vmatprep.mubr.msk.bf16.mxu0 %vm844_vm1, %v1712_v6  ;;  %10564 = vmatprep.mubr.msk.bf16.mxu1 %vm844_vm1, %v1712_v6  ;;  %v13941_v29 = vld [vmem:[%s15834_s0] sm:$0xf] }
  0x86   : > { %2034 = vmatpush1.bf16.msra.mxu0 %v12360_v55  ;;  %2075 = vmatpush1.bf16.msra.mxu1 %v12363_v56  ;;  %v2165_v55 = vrot.slane %v2158_v24, %v13601_v52  ;;  %v2247_v56 = vrot.slane %v2237_v39, %v13603_v53  ;;  %v12427_v24 = vld [vmem:[%s13546_s23 + $0x4b8] ss:$16 sps:$4 sm:$0xff]   ;;  %v12432_v39 = vld [vmem:[%s13546_s23 + $0x4d4] ss:$16 sps:$4 sm:$0xff]  }
  0x87   : > { %2035 = vmatprep.subr.bf16.mxu0 %v12368_v58  ;;  %2076 = vmatprep.subr.bf16.mxu1 %v12371_v60  ;;  %v2226_v58 = vrot.slane %v2219_v50, %v13601_v52  ;;  %v12396_v60 = vld [vmem:[%s13546_s23 + $0x420] ss:$16 sps:$4 sm:$0xff]  }
  0x88   : > { %v10673_v50 = vld [vmem:[%s13536_s16 + $0x20] sm:$0xff] }
  0x89   : > { %v2228_v3 = vmul.f32 %v13647_v23, %v2226_v58  ;;  %v12436_v58 = vld [vmem:[%s13546_s23 + $0x4f0] ss:$16 sps:$4 sm:$0xff]  }
  0x8a   : > { %2036 = vmatpush1.bf16.msra.mxu0 %v12366_v62  ;;  %2077 = vmatpush1.bf16.msra.mxu1 %v12369_v63  ;;  %v2167_v62 = vmul.f32 %v2165_v55, %v13633_v14  ;;  %v2250_v63 = vcombine.low %v2243_v51, %v2247_v56  ;;  %v12441_v51 = vld [vmem:[%s13546_s23 + $0x4fc] ss:$16 sps:$4 sm:$0xff]   ;;  %v2729_v55 = vrot.slane %v10673_v50, %v13585_v41 }
  0x8b   : > { %2037 = vmatprep.subr.bf16.mxu0 %v12374_v1  ;;  %2078 = vmatprep.subr.bf16.mxu1 %v12377_v2  ;;  %v12404_v1 = vld [vmem:[%s13546_s23 + $0x444] ss:$16 sps:$4 sm:$0xff]   ;;  %v2197_v2 = vmul.f32 %v13641_v19, %v2195_v57  ;;  %v2755_v56 = vrot.slane %v10673_v50, %v13587_v42  ;;  %v2759_v57 = vrot.slane %v10673_v50, %v13589_v43 }
  0x8c   : > { %v2257_v6 = vrot.slane %v2250_v63, %v13601_v52  ;;  %v12410_v19 = vld [vmem:[%s13546_s23 + $0x464] ss:$16 sps:$4 sm:$0xff]  }
  0x8d   : > { %v2198_v14 = vadd.f32 %v2197_v2, %v2167_v62  ;;  %v12447_v62 = vld [vmem:[%s13546_s23 + $0x51c] ss:$16 sps:$4 sm:$0xff]   ;;  %v2739_v2 = vrot.slane %v2729_v55, %v13583_v40  ;;  %v12469_v55 = vld [vmem:[%s13546_s23 + $0x598] ss:$16 sps:$4 sm:$0xff]  }
  0x8e   : > { %2038 = vmatpush1.bf16.msra.mxu0 %v12372_v4  ;;  %2079 = vmatpush1.bf16.msra.mxu1 %v12375_v5  ;;  %v2272_v4 = vcombine.low %v2267_v44, %v2271_v45  ;;  %v12407_v5 = vld [vmem:[%s13546_s23 + $0x44c] ss:$16 sps:$4 sm:$0xff]  }
  0x8f   : > { %2039 = vmatprep.subr.bf16.mxu0 %v12380_v7  ;;  %2080 = vmatprep.subr.bf16.mxu1 %v12383_v8  ;;  %v12402_v7 = vld [vmem:[%s13546_s23 + $0x440] ss:$16 sps:$4 sm:$0xff]   ;;  %v12405_v8 = vld [vmem:[%s13546_s23 + $0x448] ss:$16 sps:$4 sm:$0xff]   ;;  %v2229_v23 = vadd.f32 %v2228_v3, %v2198_v14  ;;  %v12435_v44 = vld [vmem:[%s13546_s23 + $0x4dc] ss:$16 sps:$4 sm:$0xff]   ;;  %v2765_v3 = vrot.slane %v2755_v56, %v13587_v42 }
  0x90   : > { %v12445_v14 = vld [vmem:[%s13546_s23 + $0x518] ss:$16 sps:$4 sm:$0xff]   ;;  %v12474_v56 = vld [vmem:[%s13546_s23 + $0x5b4] ss:$16 sps:$4 sm:$0xff]  }
  0x92   : > { %2040 = vmatpush1.bf16.msra.mxu0 %v12378_v9  ;;  %2081 = vmatpush1.bf16.msra.mxu1 %v12381_v10  ;;  %v2259_v9 = vmul.f32 %v13659_v34, %v2257_v6  ;;  %v2279_v10 = vrot.slane %v2272_v4, %v13601_v52  ;;  %v12419_v34 = vld [vmem:[%s13546_s23 + $0x48c] ss:$16 sps:$4 sm:$0xff]   ;;  %v2769_v4 = vrot.slane %v2759_v57, %v13587_v42  ;;  %v12442_v6 = vld [vmem:[%s13546_s23 + $0x510] ss:$16 sps:$4 sm:$0xff]  }
  0x93   : > { %2041 = vmatprep.subr.bf16.mxu0 %v12386_v11  ;;  %2082 = vmatprep.subr.bf16.mxu1 %v12389_v12  ;;  %v12413_v11 = vld [vmem:[%s13546_s23 + $0x46c] ss:$16 sps:$4 sm:$0xff]   ;;  %v12408_v12 = vld [vmem:[%s13546_s23 + $0x460] ss:$16 sps:$4 sm:$0xff]  }
  0x94   : > { %v12477_v57 = vld [vmem:[%s13546_s23 + $0x5bc] ss:$16 sps:$4 sm:$0xff]  }
  0x96   : > { %2042 = vmatpush1.bf16.msra.mxu0 %v12384_v13  ;;  %2083 = vmatpush1.bf16.msra.mxu1 %v12387_v16  ;;  %v2260_v13 = vadd.f32 %v2259_v9, %v2229_v23  ;;  %v12416_v16 = vld [vmem:[%s13546_s23 + $0x484] ss:$16 sps:$4 sm:$0xff]  }
  0x97   : > { %2043 = vmatprep.subr.bf16.mxu0 %v12392_v17  ;;  %2084 = vmatprep.subr.bf16.mxu1 %v12395_v28  ;;  %v10557_v28 = vcombine.low %v10507_v18, %v10507_v18 }
  0x98   : > { %v2281_v17 = vadd.f32 %v2279_v10, %v2260_v13  ;;  %v2772_v10 = vcombine.low %v2765_v3, %v2769_v4  ;;  %v12448_v13 = vld [vmem:[%s13546_s23 + $0x530] ss:$16 sps:$4 sm:$0xff]   ;;  %v12483_v3 = vld [vmem:[%s13546_s23 + $0x5dc] ss:$16 sps:$4 sm:$0xff]  }
  0x99   : > { %v2018_v32 = vsel %vm848_vm0, %v10557_v28, 0  ;;  %v12465_v28 = vld [vmem:[%s13546_s23 + $0x57c] ss:$16 sps:$4 sm:$0xff]  }
  0x9a   : > { %2044 = vmatpush1.bf16.msra.mxu0 %v12390_v37  ;;  %2085 = vmatpush1.bf16.msra.mxu1 %v12393_v38  ;;  %v2282_v21 = vmax.f32 %v2281_v17, 0.0  ;;  %v1711_v37 = vpack.c.bf16 %v13811_v0, %v13811_v0  ;;  %v12424_v38 = vld [vmem:[%s13546_s23 + $0x4b0] ss:$16 sps:$4 sm:$0xff]   ;;  %v12438_v0 = vld [vmem:[%s13546_s23 + $0x4f4] ss:$16 sps:$4 sm:$0xff]   ;;  %v2779_v20 = vrot.slane %v2772_v10, %v13601_v52 }
  0x9b   : > { %2045 = vmatprep.subr.bf16.mxu0 %v12398_v48  ;;  %2086 = vmatprep.subr.bf16.mxu1 %v12401_v54  ;;  %v12430_v48 = vld [vmem:[%s13546_s23 + $0x4d0] ss:$16 sps:$4 sm:$0xff]   ;;  %v2725_v54 = vrot.slane %v10673_v50, %v13583_v40  ;;  %v12492_v10 = vld [vmem:[%s13546_s23 + $0x614] ss:$16 sps:$4 sm:$0xff]  }
  0x9c   : > { %v13881_v30 = vrot.slane %v2282_v21, %v13601_v52 }
  0x9d   : > { %v2735_v63 = vrot.slane %v2725_v54, %v13583_v40  ;;  %v12466_v54 = vld [vmem:[%s13546_s23 + $0x590] ss:$16 sps:$4 sm:$0xff]  }
  0x9e   : > { %2046 = vmatpush1.bf16.msra.mxu0 %v12396_v60  ;;  %2087 = vmatpush1.bf16.msra.mxu1 %v12399_v61  ;;  %v2292_v36 = vcombine.high %v13881_v30, %v13881_v30  ;;  %v12439_v60 = vld [vmem:[%s13546_s23 + $0x4f8] ss:$16 sps:$4 sm:$0xff]   ;;  %v12444_v61 = vld [vmem:[%s13546_s23 + $0x514] ss:$16 sps:$4 sm:$0xff]  }
  0x9f   : > { %2047 = vmatprep.subr.bf16.mxu0 %v12404_v1  ;;  %2088 = vmatprep.subr.bf16.mxu1 %v12407_v5  ;;  %v2786_v1 = vrot.slane %v10673_v50, %v13593_v46  ;;  %v2790_v5 = vrot.slane %v10673_v50, %v13595_v47  ;;  %v2742_v23 = vcombine.low %v2735_v63, %v2739_v2  ;;  %v12472_v63 = vld [vmem:[%s13546_s23 + $0x5b0] ss:$16 sps:$4 sm:$0xff]   ;;  %v12480_v2 = vld [vmem:[%s13546_s23 + $0x5d4] ss:$16 sps:$4 sm:$0xff]  }
  0xa0   : > { %v2296_v45 = vpack.c.bf16 %v2292_v36, %v2292_v36 }
  0xa1   : > { %v2796_v9 = vrot.slane %v2786_v1, %v13593_v46  ;;  %v2749_v18 = vrot.slane %v2742_v23, %v13601_v52  ;;  %v12475_v1 = vld [vmem:[%s13546_s23 + $0x5b8] ss:$16 sps:$4 sm:$0xff]  }
  0xa2   : > { %2048 = vmatpush1.bf16.msra.mxu0 %v12402_v7  ;;  %2089 = vmatpush1.bf16.msra.mxu1 %v12405_v8  ;;  %v12450_v7 = vld [vmem:[%s13546_s23 + $0x534] ss:$16 sps:$4 sm:$0xff]   ;;  %v12453_v8 = vld [vmem:[%s13546_s23 + $0x53c] ss:$16 sps:$4 sm:$0xff]   ;;  %v12487_v23 = vld [vmem:[%s13546_s23 + $0x5f8] ss:$16 sps:$4 sm:$0xff]  }
  0xa3   : > { %2049 = vmatprep.subr.bf16.mxu0 %v12410_v19  ;;  %2090 = vmatprep.subr.bf16.mxu1 %v12413_v11  ;;  %v2817_v19 = vrot.slane %v10673_v50, %v13603_v53  ;;  %v2800_v11 = vrot.slane %v2790_v5, %v13593_v46 }
  0xa5   : > { %v2827_v17 = vrot.slane %v2817_v19, %v13603_v53  ;;  %v2803_v21 = vcombine.low %v2796_v9, %v2800_v11  ;;  %v12484_v9 = vld [vmem:[%s13546_s23 + $0x5f0] ss:$16 sps:$4 sm:$0xff]   ;;  %v12495_v11 = vld [vmem:[%s13546_s23 + $0x61c] ss:$16 sps:$4 sm:$0xff]  }
  0xa6   : > { %2050 = vmatpush1.bf16.msra.mxu0 %v12408_v12  ;;  %2091 = vmatpush1.bf16.msra.mxu1 %v12411_v15  ;;  %v2821_v12 = vrot.slane %v10673_v50, %v13610_v59  ;;  %v12451_v15 = vld [vmem:[%s13546_s23 + $0x538] ss:$16 sps:$4 sm:$0xff]  }
  0xa7   : > { %2051 = vmatprep.subr.bf16.mxu0 %v12416_v16  ;;  %2092 = vmatprep.subr.bf16.mxu1 %v12419_v34  ;;  %v12456_v16 = vld [vmem:[%s13546_s23 + $0x554] ss:$16 sps:$4 sm:$0xff]   ;;  %v12459_v34 = vld [vmem:[%s13546_s23 + $0x55c] ss:$16 sps:$4 sm:$0xff]  }
  0xaa   : > { %2052 = vmatpush1.bf16.msra.mxu0 %v12414_v22  ;;  %2093 = vmatpush1.bf16.msra.mxu1 %v12417_v25  ;;  %v2831_v22 = vrot.slane %v2821_v12, %v13603_v53  ;;  %v12454_v25 = vld [vmem:[%s13546_s23 + $0x550] ss:$16 sps:$4 sm:$0xff]  }
  0xab   : > { %10561 = vmatprep.subr.msk.bf16.mxu0 %vm848_vm0, %v10558_v26  ;;  %10563 = vmatprep.subr.msk.bf16.mxu1 %vm848_vm0, %v10560_v27  ;;  %v12457_v26 = vld [vmem:[%s13546_s23 + $0x558] ss:$16 sps:$4 sm:$0xff]   ;;  %v12462_v27 = vld [vmem:[%s13546_s23 + $0x574] ss:$16 sps:$4 sm:$0xff]  }
  0xac   : > { %v2834_v36 = vcombine.low %v2827_v17, %v2831_v22  ;;  %v10615_v12 = vld [vmem:[%s13546_s23 + $0x630] sm:$0x33] }
  0xad   : > { %v10666_v17 = vcombine.high %v10615_v12, %v10615_v12 }
  0xae   : > { %2054 = vmatpush1.bf16.msra.mxu0 %v2018_v32  ;;  %2095 = vmatpush1.bf16.msra.mxu1 %v2024_v33  ;;  %v13947_v32 = vld [vmem:[%s15834_s0 + $0x4] sm:$0xf] }
  0xaf   : > { %2613 = vmatprep.subr.bf16.mxu0 %v12426_v31  ;;  %2654 = vmatprep.subr.bf16.mxu1 %v12429_v35  ;;  %v2751_v31 = vmul.f32 %v13941_v29, %v2749_v18  ;;  %v2781_v33 = vmul.f32 %v13947_v32, %v2779_v20  ;;  %v2810_v35 = vrot.slane %v2803_v21, %v13601_v52 }
  0xb0   : > { %v10665_v20 = vcombine.low %v10615_v12, %v10615_v12  ;;  %v12527_v12 = vld [vmem:[%s13546_s23 + $0x6c8] ss:$16 sps:$4 sm:$0xff]  }
  0xb1   : > { %2062 = vmatmul.mubr.bf16.vlgmr.msra.gmra.mrb[8].mxu0 %v1711_v37  ;;  %2103 = vmatmul.mubr.bf16.vlgmr.msra.gmra.mrb[8].mxu1 %v1711_v37  ;;  %v10674_v37 = vld [vmem:[%s13541_s19 + $0x8] sm:$0x3] }
  0xb2   : > { %2614 = vmatpush1.bf16.msra.mxu0 %v12424_v38  ;;  %2655 = vmatpush1.bf16.msra.mxu1 %v12427_v24  ;;  %v12460_v38 = vld [vmem:[%s13546_s23 + $0x570] ss:$16 sps:$4 sm:$0xff]   ;;  %v12463_v24 = vld [vmem:[%s13546_s23 + $0x578] ss:$16 sps:$4 sm:$0xff]  }
  0xb3   : > { %2615 = vmatprep.subr.bf16.mxu0 %v12432_v39  ;;  %2656 = vmatprep.subr.bf16.mxu1 %v12435_v44  ;;  %v12468_v39 = vld [vmem:[%s13546_s23 + $0x594] ss:$16 sps:$4 sm:$0xff]   ;;  %v12471_v44 = vld [vmem:[%s13546_s23 + $0x59c] ss:$16 sps:$4 sm:$0xff]  }
  0xb4   : > { %10670 = vmatprep.mubr.msk.bf16.mxu0 %vm844_vm1, %v2296_v45  ;;  %10672 = vmatprep.mubr.msk.bf16.mxu1 %vm844_vm1, %v2296_v45  ;;  %v2851_v45 = vrot.slane %v10674_v37, %v13583_v40 }
  0xb6   : > { %2616 = vmatpush1.bf16.msra.mxu0 %v12430_v48  ;;  %2657 = vmatpush1.bf16.msra.mxu1 %v12433_v49  ;;  %v2782_v48 = vadd.f32 %v2781_v33, %v2751_v31  ;;  %v13960_v49 = vld [vmem:[%s15834_s0 + $0x8] sm:$0xf]  ;;  %v2295_v33 = vpack.c.bf16 %v13881_v30, %v13881_v30 }
  0xb7   : > { %2617 = vmatprep.subr.bf16.mxu0 %v12438_v0  ;;  %2658 = vmatprep.subr.bf16.mxu1 %v12441_v51  ;;  %v2812_v50 = vmul.f32 %v13960_v49, %v2810_v35  ;;  %v2841_v0 = vrot.slane %v2834_v36, %v13601_v52  ;;  %v2855_v51 = vrot.slane %v10674_v37, %v13587_v42  ;;  %v12500_v35 = vld [vmem:[%s13546_s23 + $0x640] ss:$16 sps:$4 sm:$0xff]   ;;  %v12503_v36 = vld [vmem:[%s13546_s23 + $0x648] ss:$16 sps:$4 sm:$0xff]   ;;  %v12508_v37 = vld [vmem:[%s13546_s23 + $0x664] ss:$16 sps:$4 sm:$0xff]  }
  0xb8   : > { %v12509_v30 = vld [vmem:[%s13546_s23 + $0x668] ss:$16 sps:$4 sm:$0xff]  }
  0xba   : > { %2618 = vmatpush1.bf16.msra.mxu0 %v12436_v58  ;;  %2659 = vmatpush1.bf16.msra.mxu1 %v12439_v60  ;;  %v2813_v58 = vadd.f32 %v2812_v50, %v2782_v48  ;;  %v13972_v60 = vld [vmem:[%s15834_s0 + $0xc] sm:$0xf] }
  0xbb   : > { %2619 = vmatprep.subr.bf16.mxu0 %v12444_v61  ;;  %2660 = vmatprep.subr.bf16.mxu1 %v12447_v62  ;;  %v2843_v61 = vmul.f32 %v13972_v60, %v2841_v0  ;;  %v2856_v62 = vcombine.low %v2851_v45, %v2855_v51  ;;  %v12514_v45 = vld [vmem:[%s13546_s23 + $0x684] ss:$16 sps:$4 sm:$0xff]   ;;  %v12517_v48 = vld [vmem:[%s13546_s23 + $0x68c] ss:$16 sps:$4 sm:$0xff]  }
  0xbd   : > { %v2844_v4 = vadd.f32 %v2843_v61, %v2813_v58  ;;  %v2863_v5 = vrot.slane %v2856_v62, %v13601_v52  ;;  %v12523_v58 = vld [vmem:[%s13546_s23 + $0x6ac] ss:$16 sps:$4 sm:$0xff]  }
  0xbe   : > { %2620 = vmatpush1.bf16.msra.mxu0 %v12442_v6  ;;  %2661 = vmatpush1.bf16.msra.mxu1 %v12445_v14  ;;  %v12478_v6 = vld [vmem:[%s13546_s23 + $0x5d0] ss:$16 sps:$4 sm:$0xff]   ;;  %v12481_v14 = vld [vmem:[%s13546_s23 + $0x5d8] ss:$16 sps:$4 sm:$0xff]  }
  0xbf   : > { %2621 = vmatprep.subr.bf16.mxu0 %v12450_v7  ;;  %2662 = vmatprep.subr.bf16.mxu1 %v12453_v8  ;;  %v12486_v7 = vld [vmem:[%s13546_s23 + $0x5f4] ss:$16 sps:$4 sm:$0xff]   ;;  %v12489_v8 = vld [vmem:[%s13546_s23 + $0x5fc] ss:$16 sps:$4 sm:$0xff]   ;;  %v2865_v19 = vadd.f32 %v2863_v5, %v2844_v4  ;;  %v12518_v4 = vld [vmem:[%s13546_s23 + $0x6a0] ss:$16 sps:$4 sm:$0xff]  }
  0xc0   : > { %v12521_v5 = vld [vmem:[%s13546_s23 + $0x6a8] ss:$16 sps:$4 sm:$0xff]  }
  0xc2   : > { %2622 = vmatpush1.bf16.msra.mxu0 %v12448_v13  ;;  %2663 = vmatpush1.bf16.msra.mxu1 %v12451_v15  ;;  %v10616_v13 = vld [vmem:[%s13546_s23 + $0x638] sm:$0x33]  ;;  %v2866_v15 = vmax.f32 %v2865_v19, 0.0 }
  0xc3   : > { %2623 = vmatprep.subr.bf16.mxu0 %v12456_v16  ;;  %2664 = vmatprep.subr.bf16.mxu1 %v12459_v34  ;;  %v12490_v16 = vld [vmem:[%s13546_s23 + $0x610] ss:$16 sps:$4 sm:$0xff]   ;;  %v12493_v34 = vld [vmem:[%s13546_s23 + $0x618] ss:$16 sps:$4 sm:$0xff]   ;;  %v10668_v18 = vcombine.high %v10616_v13, %v10616_v13  ;;  %v10667_v21 = vcombine.low %v10616_v13, %v10616_v13  ;;  %v12532_v13 = vld [vmem:[%s13546_s23 + $0x6e4] ss:$16 sps:$4 sm:$0xff]  }
  0xc4   : > { %v13993_v22 = vrot.slane %v2866_v15, %v13601_v52  ;;  %v12535_v15 = vld [vmem:[%s13546_s23 + $0x6ec] ss:$16 sps:$4 sm:$0xff]  }
  0xc6   : > { %2624 = vmatpush1.bf16.msra.mxu0 %v12454_v25  ;;  %2665 = vmatpush1.bf16.msra.mxu1 %v12457_v26  ;;  %v12502_v25 = vld [vmem:[%s13546_s23 + $0x644] ss:$16 sps:$4 sm:$0xff]   ;;  %v2602_v26 = vsel %vm848_vm0, %v10665_v20, 0  ;;  %v2876_v31 = vcombine.high %v13993_v22, %v13993_v22 }
  0xc7   : > { %2625 = vmatprep.subr.bf16.mxu0 %v12462_v27  ;;  %2666 = vmatprep.subr.bf16.mxu1 %v12465_v28  ;;  %v2608_v27 = vsel %vm848_vm0, %v10667_v21, 0  ;;  %v12505_v28 = vld [vmem:[%s13546_s23 + $0x64c] ss:$16 sps:$4 sm:$0xff]  }
  0xca   : > { %2626 = vmatpush1.bf16.msra.mxu0 %v12460_v38  ;;  %2667 = vmatpush1.bf16.msra.mxu1 %v12463_v24  ;;  %v12511_v38 = vld [vmem:[%s13546_s23 + $0x66c] ss:$16 sps:$4 sm:$0xff]   ;;  %v2880_v24 = vpack.c.bf16 %v2876_v31, %v2876_v31  ;;  %v12536_v31 = vld [vmem:[%s13546_s23 + $0x700] ss:$16 sps:$4 sm:$0xff]  }
  0xcb   : > { %2627 = vmatprep.subr.bf16.mxu0 %v12468_v39  ;;  %2668 = vmatprep.subr.bf16.mxu1 %v12471_v44  ;;  %v10781_v39 = vld [vmem:[%s13536_s16 + $0x28] sm:$0xff]  ;;  %v12506_v44 = vld [vmem:[%s13546_s23 + $0x660] ss:$16 sps:$4 sm:$0xff]  }
  0xcc   : > { %v3309_v50 = vrot.slane %v10781_v39, %v13583_v40  ;;  %v3313_v0 = vrot.slane %v10781_v39, %v13585_v41  ;;  %v3339_v51 = vrot.slane %v10781_v39, %v13587_v42  ;;  %v3370_v61 = vrot.slane %v10781_v39, %v13593_v46 }
  0xcd   : > { %v3374_v62 = vrot.slane %v10781_v39, %v13595_v47 }
  0xce   : > { %2628 = vmatpush1.bf16.msra.mxu0 %v12466_v54  ;;  %2669 = vmatpush1.bf16.msra.mxu1 %v12469_v55  ;;  %v3343_v54 = vrot.slane %v10781_v39, %v13589_v43  ;;  %v12512_v55 = vld [vmem:[%s13546_s23 + $0x680] ss:$16 sps:$4 sm:$0xff]  }
  0xcf   : > { %2629 = vmatprep.subr.bf16.mxu0 %v12474_v56  ;;  %2670 = vmatprep.subr.bf16.mxu1 %v12477_v57  ;;  %v12515_v56 = vld [vmem:[%s13546_s23 + $0x688] ss:$16 sps:$4 sm:$0xff]   ;;  %v12520_v57 = vld [vmem:[%s13546_s23 + $0x6a4] ss:$16 sps:$4 sm:$0xff]  }
  0xd2   : > { %2630 = vmatpush1.bf16.msra.mxu0 %v12472_v63  ;;  %2671 = vmatpush1.bf16.msra.mxu1 %v12475_v1  ;;  %v3319_v63 = vrot.slane %v3309_v50, %v13583_v40  ;;  %v3323_v1 = vrot.slane %v3313_v0, %v13583_v40 }
  0xd3   : > { %2631 = vmatprep.subr.bf16.mxu0 %v12480_v2  ;;  %2672 = vmatprep.subr.bf16.mxu1 %v12483_v3  ;;  %v3349_v2 = vrot.slane %v3339_v51, %v13587_v42  ;;  %v3353_v3 = vrot.slane %v3343_v54, %v13587_v42  ;;  %v12550_v54 = vld [vmem:[%s13546_s23 + $0x744] ss:$16 sps:$4 sm:$0xff]  }
  0xd5   : > { %v3356_v19 = vcombine.low %v3349_v2, %v3353_v3  ;;  %v12554_v2 = vld [vmem:[%s13546_s23 + $0x760] ss:$16 sps:$4 sm:$0xff]   ;;  %v12557_v3 = vld [vmem:[%s13546_s23 + $0x768] ss:$16 sps:$4 sm:$0xff]  }
  0xd6   : > { %2632 = vmatpush1.bf16.msra.mxu0 %v12478_v6  ;;  %2673 = vmatpush1.bf16.msra.mxu1 %v12481_v14  ;;  %v12526_v6 = vld [vmem:[%s13546_s23 + $0x6c4] ss:$16 sps:$4 sm:$0xff]   ;;  %v12529_v14 = vld [vmem:[%s13546_s23 + $0x6cc] ss:$16 sps:$4 sm:$0xff]  }
  0xd7   : > { %2633 = vmatprep.subr.bf16.mxu0 %v12486_v7  ;;  %2674 = vmatprep.subr.bf16.mxu1 %v12489_v8  ;;  %v3380_v7 = vrot.slane %v3370_v61, %v13593_v46  ;;  %v3384_v8 = vrot.slane %v3374_v62, %v13593_v46 }
  0xda   : > { %2634 = vmatpush1.bf16.msra.mxu0 %v12484_v9  ;;  %2675 = vmatpush1.bf16.msra.mxu1 %v12487_v23  ;;  %v3326_v9 = vcombine.low %v3319_v63, %v3323_v1  ;;  %v3401_v23 = vrot.slane %v10781_v39, %v13603_v53  ;;  %v12556_v63 = vld [vmem:[%s13546_s23 + $0x764] ss:$16 sps:$4 sm:$0xff]   ;;  %v12559_v1 = vld [vmem:[%s13546_s23 + $0x76c] ss:$16 sps:$4 sm:$0xff]  }
  0xdb   : > { %2635 = vmatprep.subr.bf16.mxu0 %v12492_v10  ;;  %2676 = vmatprep.subr.bf16.mxu1 %v12495_v11  ;;  %v3405_v10 = vrot.slane %v10781_v39, %v13610_v59  ;;  %v12524_v11 = vld [vmem:[%s13546_s23 + $0x6c0] ss:$16 sps:$4 sm:$0xff]   ;;  %v12547_v39 = vld [vmem:[%s13546_s23 + $0x72c] ss:$16 sps:$4 sm:$0xff]  }
  0xdc   : > { %v3411_v20 = vrot.slane %v3401_v23, %v13603_v53  ;;  %v10723_v23 = vld [vmem:[%s13546_s23 + $0x7c0] sm:$0x33] }
  0xdd   : > { %v3415_v21 = vrot.slane %v3405_v10, %v13603_v53  ;;  %v10724_v10 = vld [vmem:[%s13546_s23 + $0x7c8] sm:$0x33] }
  0xde   : > { %2636 = vmatpush1.bf16.msra.mxu0 %v12490_v16  ;;  %2677 = vmatpush1.bf16.msra.mxu1 %v12493_v34  ;;  %v3387_v16 = vcombine.low %v3380_v7, %v3384_v8  ;;  %v12530_v34 = vld [vmem:[%s13546_s23 + $0x6e0] ss:$16 sps:$4 sm:$0xff]   ;;  %v12563_v7 = vld [vmem:[%s13546_s23 + $0x788] ss:$16 sps:$4 sm:$0xff]  }
  0xdf   : > { %10669 = vmatprep.subr.msk.bf16.mxu0 %vm848_vm0, %v10666_v17  ;;  %10671 = vmatprep.subr.msk.bf16.mxu1 %vm848_vm0, %v10668_v18  ;;  %v3333_v17 = vrot.slane %v3326_v9, %v13601_v52  ;;  %v3363_v18 = vrot.slane %v3356_v19, %v13601_v52  ;;  %v12568_v9 = vld [vmem:[%s13546_s23 + $0x7a4] ss:$16 sps:$4 sm:$0xff]   ;;  %v12571_v19 = vld [vmem:[%s13546_s23 + $0x7ac] ss:$16 sps:$4 sm:$0xff]  }
  0xe2   : > { %2638 = vmatpush1.bf16.msra.mxu0 %v2602_v26  ;;  %2679 = vmatpush1.bf16.msra.mxu1 %v2608_v27  ;;  %v12538_v26 = vld [vmem:[%s13546_s23 + $0x704] ss:$16 sps:$4 sm:$0xff]   ;;  %v12541_v27 = vld [vmem:[%s13546_s23 + $0x70c] ss:$16 sps:$4 sm:$0xff]  }
  0xe3   : > { %3197 = vmatprep.subr.bf16.mxu0 %v12502_v25  ;;  %3238 = vmatprep.subr.bf16.mxu1 %v12505_v28  ;;  %v12533_v25 = vld [vmem:[%s13546_s23 + $0x6e8] ss:$16 sps:$4 sm:$0xff]  }
  0xe4   : > { %v10782_v28 = vld [vmem:[%s13541_s19 + $0xa] sm:$0x3] }
  0xe5   : > { %2646 = vmatmul.mubr.bf16.vlgmr.msra.gmra.mrb[12].mxu0 %v2295_v33  ;;  %2687 = vmatmul.mubr.bf16.vlgmr.msra.gmra.mrb[12].mxu1 %v2295_v33  ;;  %v12539_v33 = vld [vmem:[%s13546_s23 + $0x708] ss:$16 sps:$4 sm:$0xff]   ;;  %v3439_v51 = vrot.slane %v10782_v28, %v13587_v42 }
  0xe6   : > { %3198 = vmatpush1.bf16.msra.mxu0 %v12500_v35  ;;  %3239 = vmatpush1.bf16.msra.mxu1 %v12503_v36  ;;  %v3335_v35 = vmul.f32 %v13941_v29, %v3333_v17  ;;  %v3365_v36 = vmul.f32 %v13947_v32, %v3363_v18  ;;  %v10775_v17 = vcombine.low %v10724_v10, %v10724_v10 }
  0xe7   : > { %3199 = vmatprep.subr.bf16.mxu0 %v12508_v37  ;;  %3240 = vmatprep.subr.bf16.mxu1 %v12511_v38  ;;  %v3394_v37 = vrot.slane %v3387_v16, %v13601_v52  ;;  %v3418_v38 = vcombine.low %v3411_v20, %v3415_v21  ;;  %v10774_v16 = vcombine.high %v10723_v23, %v10723_v23 }
  0xe8   : > { %10778 = vmatprep.mubr.msk.bf16.mxu0 %vm844_vm1, %v2880_v24  ;;  %10780 = vmatprep.mubr.msk.bf16.mxu1 %vm844_vm1, %v2880_v24  ;;  %v12544_v24 = vld [vmem:[%s13546_s23 + $0x724] ss:$16 sps:$4 sm:$0xff]   ;;  %v3192_v21 = vsel %vm848_vm0, %v10775_v17, 0 }
  0xe9   : > { %v3396_v50 = vmul.f32 %v13960_v49, %v3394_v37  ;;  %v3425_v0 = vrot.slane %v3418_v38, %v13601_v52  ;;  %v14102_v37 = vld [vmem:[%s13536_s16 + $0x30] sm:$0xff] }
  0xea   : > { %3200 = vmatpush1.bf16.msra.mxu0 %v12506_v44  ;;  %3241 = vmatpush1.bf16.msra.mxu1 %v12509_v30  ;;  %v3435_v44 = vrot.slane %v10782_v28, %v13583_v40  ;;  %v12542_v30 = vld [vmem:[%s13546_s23 + $0x720] ss:$16 sps:$4 sm:$0xff]  }
  0xeb   : > { %3201 = vmatprep.subr.bf16.mxu0 %v12514_v45  ;;  %3242 = vmatprep.subr.bf16.mxu1 %v12517_v48  ;;  %v12545_v45 = vld [vmem:[%s13546_s23 + $0x728] ss:$16 sps:$4 sm:$0xff]   ;;  %v3366_v48 = vadd.f32 %v3365_v36, %v3335_v35  ;;  %v3427_v61 = vmul.f32 %v13972_v60, %v3425_v0  ;;  %v12562_v60 = vld [vmem:[%s13546_s23 + $0x784] ss:$16 sps:$4 sm:$0xff]   ;;  %v12587_v36 = vld [vmem:[%s13546_s23 + $0x7fc] ss:$16 sps:$4 sm:$0xff]   ;;  %v3923_v0 = vrot.slane %v14102_v37, %v13587_v42 }
  0xec   : > { %v3440_v62 = vcombine.low %v3435_v44, %v3439_v51  ;;  %v12584_v35 = vld [vmem:[%s13546_s23 + $0x7f4] ss:$16 sps:$4 sm:$0xff]   ;;  %v12593_v44 = vld [vmem:[%s13546_s23 + $0x81c] ss:$16 sps:$4 sm:$0xff]   ;;  %v3927_v51 = vrot.slane %v14102_v37, %v13589_v43 }
  0xee   : > { %3202 = vmatpush1.bf16.msra.mxu0 %v12512_v55  ;;  %3243 = vmatpush1.bf16.msra.mxu1 %v12515_v56  ;;  %v12553_v55 = vld [vmem:[%s13546_s23 + $0x74c] ss:$16 sps:$4 sm:$0xff]   ;;  %v12548_v56 = vld [vmem:[%s13546_s23 + $0x740] ss:$16 sps:$4 sm:$0xff]  }
  0xef   : > { %3203 = vmatprep.subr.bf16.mxu0 %v12520_v57  ;;  %3244 = vmatprep.subr.bf16.mxu1 %v12523_v58  ;;  %v12551_v57 = vld [vmem:[%s13546_s23 + $0x748] ss:$16 sps:$4 sm:$0xff]   ;;  %v3397_v58 = vadd.f32 %v3396_v50, %v3366_v48 }
  0xf2   : > { %3204 = vmatpush1.bf16.msra.mxu0 %v12518_v4  ;;  %3245 = vmatpush1.bf16.msra.mxu1 %v12521_v5  ;;  %v3428_v4 = vadd.f32 %v3427_v61, %v3397_v58  ;;  %v3447_v5 = vrot.slane %v3440_v62, %v13601_v52  ;;  %v12588_v62 = vld [vmem:[%s13546_s23 + $0x810] ss:$16 sps:$4 sm:$0xff]  }
  0xf3   : > { %3205 = vmatprep.subr.bf16.mxu0 %v12526_v6  ;;  %3246 = vmatprep.subr.bf16.mxu1 %v12529_v14  ;;  %v12565_v6 = vld [vmem:[%s13546_s23 + $0x78c] ss:$16 sps:$4 sm:$0xff]   ;;  %v12560_v14 = vld [vmem:[%s13546_s23 + $0x780] ss:$16 sps:$4 sm:$0xff]  }
  0xf4   : > { %v3449_v8 = vadd.f32 %v3447_v5, %v3428_v4  ;;  %v12596_v4 = vld [vmem:[%s13546_s23 + $0x834] ss:$16 sps:$4 sm:$0xff]   ;;  %v12599_v5 = vld [vmem:[%s13546_s23 + $0x83c] ss:$16 sps:$4 sm:$0xff]  }
  0xf6   : > { %3206 = vmatpush1.bf16.msra.mxu0 %v12524_v11  ;;  %3247 = vmatpush1.bf16.msra.mxu1 %v12527_v12  ;;  %v3450_v11 = vmax.f32 %v3449_v8, 0.0  ;;  %v12566_v12 = vld [vmem:[%s13546_s23 + $0x7a0] ss:$16 sps:$4 sm:$0xff]  }
  0xf7   : > { %3207 = vmatprep.subr.bf16.mxu0 %v12532_v13  ;;  %3248 = vmatprep.subr.bf16.mxu1 %v12535_v15  ;;  %v12569_v13 = vld [vmem:[%s13546_s23 + $0x7a8] ss:$16 sps:$4 sm:$0xff]   ;;  %v10773_v15 = vcombine.low %v10723_v23, %v10723_v23 }
  0xf8   : > { %v14085_v18 = vrot.slane %v3450_v11, %v13601_v52  ;;  %v12597_v11 = vld [vmem:[%s13546_s23 + $0x838] ss:$16 sps:$4 sm:$0xff]  }
  0xf9   : > { %v3186_v20 = vsel %vm848_vm0, %v10773_v15, 0 }
  0xfa   : > { %3208 = vmatpush1.bf16.msra.mxu0 %v12530_v34  ;;  %3249 = vmatpush1.bf16.msra.mxu1 %v12533_v25  ;;  %v10776_v34 = vcombine.high %v10724_v10, %v10724_v10  ;;  %v12578_v25 = vld [vmem:[%s13546_s23 + $0x7d4] ss:$16 sps:$4 sm:$0xff]   ;;  %v3460_v28 = vcombine.high %v14085_v18, %v14085_v18  ;;  %v12594_v10 = vld [vmem:[%s13546_s23 + $0x830] ss:$16 sps:$4 sm:$0xff]  }
  0xfb   : > { %3209 = vmatprep.subr.bf16.mxu0 %v12538_v26  ;;  %3250 = vmatprep.subr.bf16.mxu1 %v12541_v27  ;;  %v12581_v26 = vld [vmem:[%s13546_s23 + $0x7dc] ss:$16 sps:$4 sm:$0xff]   ;;  %v12576_v27 = vld [vmem:[%s13546_s23 + $0x7d0] ss:$16 sps:$4 sm:$0xff]  }
  0xfc   : > { %v3464_v38 = vpack.c.bf16 %v3460_v28, %v3460_v28  ;;  %v12611_v28 = vld [vmem:[%s13546_s23 + $0x87c] ss:$16 sps:$4 sm:$0xff]  }
  0xfe   : > { %3210 = vmatpush1.bf16.msra.mxu0 %v12536_v31  ;;  %3251 = vmatpush1.bf16.msra.mxu1 %v12539_v33  ;;  %v2879_v31 = vpack.c.bf16 %v13993_v22, %v13993_v22  ;;  %v12579_v33 = vld [vmem:[%s13546_s23 + $0x7d8] ss:$16 sps:$4 sm:$0xff]   ;;  %v12590_v22 = vld [vmem:[%s13546_s23 + $0x814] ss:$16 sps:$4 sm:$0xff]  }
  0xff   : > { %3211 = vmatprep.subr.bf16.mxu0 %v12544_v24  ;;  %3252 = vmatprep.subr.bf16.mxu1 %v12547_v39  ;;  %v12582_v24 = vld [vmem:[%s13546_s23 + $0x7f0] ss:$16 sps:$4 sm:$0xff]   ;;  %v12585_v39 = vld [vmem:[%s13546_s23 + $0x7f8] ss:$16 sps:$4 sm:$0xff]  }
 0x102   : > { %3212 = vmatpush1.bf16.msra.mxu0 %v12542_v30  ;;  %3253 = vmatpush1.bf16.msra.mxu1 %v12545_v45  ;;  %v3893_v30 = vrot.slane %v14102_v37, %v13583_v40  ;;  %v3897_v45 = vrot.slane %v14102_v37, %v13585_v41 }
 0x103   : > { %3213 = vmatprep.subr.bf16.mxu0 %v12550_v54  ;;  %3254 = vmatprep.subr.bf16.mxu1 %v12553_v55 }
 0x106   : > { %3214 = vmatpush1.bf16.msra.mxu0 %v12548_v56  ;;  %3255 = vmatpush1.bf16.msra.mxu1 %v12551_v57 }
 0x107   : > { %3215 = vmatprep.subr.bf16.mxu0 %v12556_v63  ;;  %3256 = vmatprep.subr.bf16.mxu1 %v12559_v1  ;;  %v12591_v63 = vld [vmem:[%s13546_s23 + $0x818] ss:$16 sps:$4 sm:$0xff]   ;;  %v3954_v1 = vrot.slane %v14102_v37, %v13593_v46 }
 0x109   : > { %v3964_v15 = vrot.slane %v3954_v1, %v13593_v46  ;;  %v12629_v1 = vld [vmem:[%s13546_s23 + $0x8dc] ss:$16 sps:$4 sm:$0xff]  }
 0x10a   : > { %3216 = vmatpush1.bf16.msra.mxu0 %v12554_v2  ;;  %3257 = vmatpush1.bf16.msra.mxu1 %v12557_v3 }
 0x10b   : > { %3217 = vmatprep.subr.bf16.mxu0 %v12562_v60  ;;  %3258 = vmatprep.subr.bf16.mxu1 %v12565_v6  ;;  %v3903_v60 = vrot.slane %v3893_v30, %v13583_v40  ;;  %v3907_v6 = vrot.slane %v3897_v45, %v13583_v40  ;;  %v12612_v30 = vld [vmem:[%s13546_s23 + $0x890] ss:$16 sps:$4 sm:$0xff]   ;;  %v12615_v45 = vld [vmem:[%s13546_s23 + $0x898] ss:$16 sps:$4 sm:$0xff]  }
 0x10e   : > { %3218 = vmatpush1.bf16.msra.mxu0 %v12560_v14  ;;  %3259 = vmatpush1.bf16.msra.mxu1 %v12563_v7  ;;  %v3958_v14 = vrot.slane %v14102_v37, %v13595_v47 }
 0x10f   : > { %3219 = vmatprep.subr.bf16.mxu0 %v12568_v9  ;;  %3260 = vmatprep.subr.bf16.mxu1 %v12571_v19  ;;  %v3933_v9 = vrot.slane %v3923_v0, %v13587_v42  ;;  %v3937_v19 = vrot.slane %v3927_v51, %v13587_v42 }
 0x111   : > { %v3940_v17 = vcombine.low %v3933_v9, %v3937_v19  ;;  %v12630_v9 = vld [vmem:[%s13546_s23 + $0x8f0] ss:$16 sps:$4 sm:$0xff]   ;;  %v12633_v19 = vld [vmem:[%s13546_s23 + $0x8f8] ss:$16 sps:$4 sm:$0xff]  }
 0x112   : > { %3220 = vmatpush1.bf16.msra.mxu0 %v12566_v12  ;;  %3261 = vmatpush1.bf16.msra.mxu1 %v12569_v13  ;;  %v12602_v12 = vld [vmem:[%s13546_s23 + $0x854] ss:$16 sps:$4 sm:$0xff]   ;;  %v12605_v13 = vld [vmem:[%s13546_s23 + $0x85c] ss:$16 sps:$4 sm:$0xff]  }
 0x113   : > { %10777 = vmatprep.subr.msk.bf16.mxu0 %vm848_vm0, %v10774_v16  ;;  %10779 = vmatprep.subr.msk.bf16.mxu1 %vm848_vm0, %v10776_v34  ;;  %v3985_v16 = vrot.slane %v14102_v37, %v13603_v53  ;;  %v3910_v34 = vcombine.low %v3903_v60, %v3907_v6  ;;  %v12632_v6 = vld [vmem:[%s13546_s23 + $0x8f4] ss:$16 sps:$4 sm:$0xff]  }
 0x116   : > { %3222 = vmatpush1.bf16.msra.mxu0 %v3186_v20  ;;  %3263 = vmatpush1.bf16.msra.mxu1 %v3192_v21  ;;  %v3968_v20 = vrot.slane %v3958_v14, %v13593_v46  ;;  %v3989_v21 = vrot.slane %v14102_v37, %v13610_v59  ;;  %v12635_v14 = vld [vmem:[%s13546_s23 + $0x8fc] ss:$16 sps:$4 sm:$0xff]  }
 0x117   : > { %3781 = vmatprep.subr.bf16.mxu0 %v12578_v25  ;;  %3822 = vmatprep.subr.bf16.mxu1 %v12581_v26  ;;  %v12600_v25 = vld [vmem:[%s13546_s23 + $0x850] ss:$16 sps:$4 sm:$0xff]   ;;  %v12603_v26 = vld [vmem:[%s13546_s23 + $0x858] ss:$16 sps:$4 sm:$0xff]  }
 0x118   : > { %v3971_v37 = vcombine.low %v3964_v15, %v3968_v20  ;;  %v12636_v15 = vld [vmem:[%s13546_s23 + $0x910] ss:$16 sps:$4 sm:$0xff]   ;;  %v12647_v20 = vld [vmem:[%s13546_s23 + $0x93c] ss:$16 sps:$4 sm:$0xff]  }
 0x119   : > { %3230 = vmatmul.mubr.bf16.vlgmr.msra.gmra.mrb[16].mxu0 %v2879_v31  ;;  %3271 = vmatmul.mubr.bf16.vlgmr.msra.gmra.mrb[16].mxu1 %v2879_v31  ;;  %v3995_v31 = vrot.slane %v3985_v16, %v13603_v53  ;;  %v12639_v16 = vld [vmem:[%s13546_s23 + $0x918] ss:$16 sps:$4 sm:$0xff]  }
 0x11a   : > { %3782 = vmatpush1.bf16.msra.mxu0 %v12576_v27  ;;  %3823 = vmatpush1.bf16.msra.mxu1 %v12579_v33  ;;  %v12608_v27 = vld [vmem:[%s13546_s23 + $0x874] ss:$16 sps:$4 sm:$0xff]   ;;  %v12606_v33 = vld [vmem:[%s13546_s23 + $0x870] ss:$16 sps:$4 sm:$0xff]   ;;  %v3978_v0 = vrot.slane %v3971_v37, %v13601_v52 }
 0x11b   : > { %3783 = vmatprep.subr.bf16.mxu0 %v12584_v35  ;;  %3824 = vmatprep.subr.bf16.mxu1 %v12587_v36  ;;  %v3917_v35 = vrot.slane %v3910_v34, %v13601_v52  ;;  %v3947_v36 = vrot.slane %v3940_v17, %v13601_v52  ;;  %v12644_v17 = vld [vmem:[%s13546_s23 + $0x934] ss:$16 sps:$4 sm:$0xff]  }
 0x11c   : > { %v895_v48 = vpop.f32.mrb[0].mxu0  ;;  %v936_v50 = vpop.f32.mrb[0].mxu1  ;;  %10886 = vmatprep.mubr.msk.bf16.mxu0 %vm844_vm1, %v3464_v38  ;;  %10888 = vmatprep.mubr.msk.bf16.mxu1 %vm844_vm1, %v3464_v38  ;;  %v3999_v38 = vrot.slane %v3989_v21, %v13603_v53  ;;  %v10831_v21 = vld [vmem:[%s13546_s23 + $0x950] sm:$0x33] }
 0x11d   : > { %v897_v54 = vpop.f32.mrb[1].mxu0  ;;  %v938_v55 = vpop.f32.mrb[1].mxu1 }
 0x11e   : > { %v947_v56 = vcombine.low %v895_v48, %v897_v54  ;;  %v948_v57 = vcombine.low %v936_v50, %v938_v55  ;;  %v899_v58 = vpop.f32.mrb[2].mxu0  ;;  %v940_v61 = vpop.f32.mrb[2].mxu1  ;;  %3784 = vmatpush1.bf16.msra.mxu0 %v12582_v24  ;;  %3825 = vmatpush1.bf16.msra.mxu1 %v12585_v39  ;;  %v12609_v24 = vld [vmem:[%s13546_s23 + $0x878] ss:$16 sps:$4 sm:$0xff]   ;;  %v12614_v39 = vld [vmem:[%s13546_s23 + $0x894] ss:$16 sps:$4 sm:$0xff]   ;;  %v3919_v48 = vmul.f32 %v13941_v29, %v3917_v35 }
 0x11f   : > { %v900_v2 = vpop.f32.mrb[3].mxu0  ;;  %v941_v3 = vpop.f32.mrb[3].mxu1  ;;  %3785 = vmatprep.subr.bf16.mxu0 %v12590_v22  ;;  %3826 = vmatprep.subr.bf16.mxu1 %v12593_v44  ;;  %v12617_v22 = vld [vmem:[%s13546_s23 + $0x89c] ss:$16 sps:$4 sm:$0xff]   ;;  %v3949_v50 = vmul.f32 %v13947_v32, %v3947_v36  ;;  %v4002_v51 = vcombine.low %v3995_v31, %v3999_v38  ;;  %v12620_v54 = vld [vmem:[%s13546_s23 + $0x8b4] ss:$16 sps:$4 sm:$0xff]   ;;  %v3980_v32 = vmul.f32 %v13960_v49, %v3978_v0 }
 0x120   : > { %v14129_v7 = vrot.slane %v947_v56, %v13601_v52  ;;  %v14132_v8 = vrot.slane %v948_v57, %v13601_v52  ;;  %v10890_v44 = vld [vmem:[%s13541_s19 + $0xc] sm:$0x3]  ;;  %v12618_v57 = vld [vmem:[%s13546_s23 + $0x8b0] ss:$16 sps:$4 sm:$0xff]   ;;  %v12621_v58 = vld [vmem:[%s13546_s23 + $0x8b8] ss:$16 sps:$4 sm:$0xff]   ;;  %v10882_v31 = vcombine.high %v10831_v21, %v10831_v21  ;;  %v10881_v35 = vcombine.low %v10831_v21, %v10831_v21 }
 0x121   : > { %v12623_v55 = vld [vmem:[%s13546_s23 + $0x8bc] ss:$16 sps:$4 sm:$0xff]   ;;  %v4019_v56 = vrot.slane %v10890_v44, %v13583_v40  ;;  %v3950_v29 = vadd.f32 %v3949_v50, %v3919_v48  ;;  %v4009_v61 = vrot.slane %v4002_v51, %v13601_v52  ;;  %v12624_v2 = vld [vmem:[%s13546_s23 + $0x8d0] ss:$16 sps:$4 sm:$0xff]   ;;  %v12627_v3 = vld [vmem:[%s13546_s23 + $0x8d8] ss:$16 sps:$4 sm:$0xff]  }
 0x122   : > { %v963_v23 = vcombine.low %v14129_v7, %v14132_v8  ;;  %3786 = vmatpush1.bf16.msra.mxu0 %v12588_v62  ;;  %3827 = vmatpush1.bf16.msra.mxu1 %v12591_v63  ;;  %v4023_v62 = vrot.slane %v10890_v44, %v13587_v42  ;;  %v12626_v63 = vld [vmem:[%s13546_s23 + $0x8d4] ss:$16 sps:$4 sm:$0xff]   ;;  %v14181_v49 = vld [vmem:[%s15834_s0 + $0xc] sm:$0xf]  ;;  %v12652_v44 = vld [vmem:[%s13546_s23 + $0x960] ss:$16 sps:$4 sm:$0xff]  }
 0x123   : > { %3787 = vmatprep.subr.bf16.mxu0 %v12596_v4  ;;  %3828 = vmatprep.subr.bf16.mxu1 %v12599_v5  ;;  %v3981_v4 = vadd.f32 %v3980_v32, %v3950_v29  ;;  %v4011_v5 = vmul.f32 %v14181_v49, %v4009_v61  ;;  %v12654_v38 = vld [vmem:[%s13546_s23 + $0x964] ss:$16 sps:$4 sm:$0xff]   ;;  %v12655_v48 = vld [vmem:[%s13546_s23 + $0x968] ss:$16 sps:$4 sm:$0xff]   ;;  %v12663_v51 = vld [vmem:[%s13546_s23 + $0x98c] ss:$16 sps:$4 sm:$0xff]  }
 0x124   : > { %v4024_v60 = vcombine.low %v4019_v56, %v4023_v62  ;;  %v14215_v50 = vld [vmem:[%s13536_s16 + $0x38] sm:$0xff]  ;;  %v12660_v0 = vld [vmem:[%s13546_s23 + $0x984] ss:$16 sps:$4 sm:$0xff]  }
 0x125   : > { %v12661_v56 = vld [vmem:[%s13546_s23 + $0x988] ss:$16 sps:$4 sm:$0xff]   ;;  %v12669_v29 = vld [vmem:[%s13546_s23 + $0x9ac] ss:$16 sps:$4 sm:$0xff]   ;;  %v4507_v32 = vrot.slane %v14215_v50, %v13587_v42  ;;  %v4511_v61 = vrot.slane %v14215_v50, %v13589_v43 }
 0x126   : > { %3788 = vmatpush1.bf16.msra.mxu0 %v12594_v10  ;;  %3829 = vmatpush1.bf16.msra.mxu1 %v12597_v11  ;;  %v4012_v10 = vadd.f32 %v4011_v5, %v3981_v4  ;;  %v4031_v11 = vrot.slane %v4024_v60, %v13601_v52 }
 0x127   : > { %3789 = vmatprep.subr.bf16.mxu0 %v12602_v12  ;;  %3830 = vmatprep.subr.bf16.mxu1 %v12605_v13  ;;  %v12638_v12 = vld [vmem:[%s13546_s23 + $0x914] ss:$16 sps:$4 sm:$0xff]   ;;  %v12641_v13 = vld [vmem:[%s13546_s23 + $0x91c] ss:$16 sps:$4 sm:$0xff]  }
 0x128   : > { %v4033_v34 = vadd.f32 %v4031_v11, %v4012_v10 }
 0x12a   : > { %3790 = vmatpush1.bf16.msra.mxu0 %v12600_v25  ;;  %3831 = vmatpush1.bf16.msra.mxu1 %v12603_v26  ;;  %v10832_v25 = vld [vmem:[%s13546_s23 + $0x958] sm:$0x33]  ;;  %v4034_v26 = vmax.f32 %v4033_v34, 0.0  ;;  %v4521_v34 = vrot.slane %v4511_v61, %v13587_v42  ;;  %v14280_v61 = vld [vmem:[%s15834_s0] sm:$0xf] }
 0x12b   : > { %3791 = vmatprep.subr.bf16.mxu0 %v12608_v27  ;;  %3832 = vmatprep.subr.bf16.mxu1 %v12611_v28  ;;  %v12642_v27 = vld [vmem:[%s13546_s23 + $0x930] ss:$16 sps:$4 sm:$0xff]   ;;  %v12645_v28 = vld [vmem:[%s13546_s23 + $0x938] ss:$16 sps:$4 sm:$0xff]   ;;  %v10883_v36 = vcombine.low %v10832_v25, %v10832_v25 }
 0x12c   : > { %v14200_v37 = vrot.slane %v4034_v26, %v13601_v52 }
 0x12e   : > { %3792 = vmatpush1.bf16.msra.mxu0 %v12606_v33  ;;  %3833 = vmatpush1.bf16.msra.mxu1 %v12609_v24  ;;  %v10884_v33 = vcombine.high %v10832_v25, %v10832_v25  ;;  %v3770_v24 = vsel %vm848_vm0, %v10881_v35, 0  ;;  %v4542_v25 = vrot.slane %v14215_v50, %v13595_v47  ;;  %v12681_v35 = vld [vmem:[%s13546_s23 + $0x9ec] ss:$16 sps:$4 sm:$0xff]  }
 0x12f   : > { %3793 = vmatprep.subr.bf16.mxu0 %v12614_v39  ;;  %3834 = vmatprep.subr.bf16.mxu1 %v12617_v22  ;;  %v3776_v39 = vsel %vm848_vm0, %v10883_v36, 0  ;;  %v12657_v22 = vld [vmem:[%s13546_s23 + $0x96c] ss:$16 sps:$4 sm:$0xff]  }
 0x130   : > { %v4552_v8 = vrot.slane %v4542_v25, %v13593_v46  ;;  %v12708_v25 = vld [vmem:[%s13546_s23 + $0xa84] ss:$16 sps:$4 sm:$0xff]  }
 0x132   : > { %3794 = vmatpush1.bf16.msra.mxu0 %v12612_v30  ;;  %3835 = vmatpush1.bf16.msra.mxu1 %v12615_v45  ;;  %v4044_v30 = vcombine.high %v14200_v37, %v14200_v37  ;;  %v3463_v45 = vpack.c.bf16 %v14085_v18, %v14085_v18  ;;  %v12658_v18 = vld [vmem:[%s13546_s23 + $0x980] ss:$16 sps:$4 sm:$0xff]  }
 0x133   : > { %3795 = vmatprep.subr.bf16.mxu0 %v12620_v54  ;;  %3836 = vmatprep.subr.bf16.mxu1 %v12623_v55  ;;  %v4477_v55 = vrot.slane %v14215_v50, %v13583_v40 }
 0x134   : > { %v4048_v54 = vpack.c.bf16 %v4044_v30, %v4044_v30  ;;  %v12684_v30 = vld [vmem:[%s13546_s23 + $0xa04] ss:$16 sps:$4 sm:$0xff]  }
 0x135   : > { %v4487_v4 = vrot.slane %v4477_v55, %v13583_v40 }
 0x136   : > { %3796 = vmatpush1.bf16.msra.mxu0 %v12618_v57  ;;  %3837 = vmatpush1.bf16.msra.mxu1 %v12621_v58  ;;  %v4481_v57 = vrot.slane %v14215_v50, %v13585_v41  ;;  %v12666_v58 = vld [vmem:[%s13546_s23 + $0x9a4] ss:$16 sps:$4 sm:$0xff]  }
 0x137   : > { %3797 = vmatprep.subr.bf16.mxu0 %v12626_v63  ;;  %3838 = vmatprep.subr.bf16.mxu1 %v12629_v1  ;;  %v530_v1 = vld [vmem:[#allocation2] sm:$0xff] }
 0x138   : > { %v4491_v10 = vrot.slane %v4481_v57, %v13583_v40  ;;  %v965_v26 = vadd.f32 %v963_v23, %v530_v1  ;;  %v4569_v23 = vrot.slane %v14215_v50, %v13603_v53  ;;  %v12693_v57 = vld [vmem:[%s13546_s23 + $0xa2c] ss:$16 sps:$4 sm:$0xff]  }
 0x13a   : > { %3798 = vmatpush1.bf16.msra.mxu0 %v12624_v2  ;;  %3839 = vmatpush1.bf16.msra.mxu1 %v12627_v3  ;;  %v4494_v36 = vcombine.low %v4487_v4, %v4491_v10  ;;  %v12696_v4 = vld [vmem:[%s13546_s23 + $0xa44] ss:$16 sps:$4 sm:$0xff]  }
 0x13b   : > { %3799 = vmatprep.subr.bf16.mxu0 %v12632_v6  ;;  %3840 = vmatprep.subr.bf16.mxu1 %v12635_v14 }
 0x13e   : > { %3800 = vmatpush1.bf16.msra.mxu0 %v12630_v9  ;;  %3841 = vmatpush1.bf16.msra.mxu1 %v12633_v19  ;;  %v12664_v9 = vld [vmem:[%s13546_s23 + $0x9a0] ss:$16 sps:$4 sm:$0xff]   ;;  %v12667_v19 = vld [vmem:[%s13546_s23 + $0x9a8] ss:$16 sps:$4 sm:$0xff]  }
 0x13f   : > { %3801 = vmatprep.subr.bf16.mxu0 %v12638_v12  ;;  %3842 = vmatprep.subr.bf16.mxu1 %v12641_v13  ;;  %v12672_v13 = vld [vmem:[%s13546_s23 + $0x9c4] ss:$16 sps:$4 sm:$0xff]  }
 0x142   : > { %3802 = vmatpush1.bf16.msra.mxu0 %v12636_v15  ;;  %3843 = vmatpush1.bf16.msra.mxu1 %v12639_v16  ;;  %v12675_v15 = vld [vmem:[%s13546_s23 + $0x9cc] ss:$16 sps:$4 sm:$0xff]   ;;  %v4517_v16 = vrot.slane %v4507_v32, %v13587_v42  ;;  %v12691_v32 = vld [vmem:[%s13546_s23 + $0xa28] ss:$16 sps:$4 sm:$0xff]  }
 0x143   : > { %3803 = vmatprep.subr.bf16.mxu0 %v12644_v17  ;;  %3844 = vmatprep.subr.bf16.mxu1 %v12647_v20  ;;  %v4538_v17 = vrot.slane %v14215_v50, %v13593_v46 }
 0x146   : > { %3804 = vmatpush1.bf16.msra.mxu0 %v12642_v27  ;;  %3845 = vmatpush1.bf16.msra.mxu1 %v12645_v28  ;;  %v12670_v28 = vld [vmem:[%s13546_s23 + $0x9c0] ss:$16 sps:$4 sm:$0xff]  }
 0x147   : > { %10885 = vmatprep.subr.msk.bf16.mxu0 %vm848_vm0, %v10882_v31  ;;  %10887 = vmatprep.subr.msk.bf16.mxu1 %vm848_vm0, %v10884_v33  ;;  %v12673_v31 = vld [vmem:[%s13546_s23 + $0x9c8] ss:$16 sps:$4 sm:$0xff]   ;;  %v12678_v33 = vld [vmem:[%s13546_s23 + $0x9e4] ss:$16 sps:$4 sm:$0xff]  }
 0x14a   : > { %3806 = vmatpush1.bf16.msra.mxu0 %v3770_v24  ;;  %3847 = vmatpush1.bf16.msra.mxu1 %v3776_v39  ;;  %v4548_v24 = vrot.slane %v4538_v17, %v13593_v46  ;;  %v4573_v39 = vrot.slane %v14215_v50, %v13610_v59 }
 0x14b   : > { %4365 = vmatprep.subr.bf16.mxu0 %v12654_v38  ;;  %4406 = vmatprep.subr.bf16.mxu1 %v12657_v22  ;;  %v4524_v38 = vcombine.low %v4517_v16, %v4521_v34  ;;  %v12676_v22 = vld [vmem:[%s13546_s23 + $0x9e0] ss:$16 sps:$4 sm:$0xff]   ;;  %v12703_v34 = vld [vmem:[%s13546_s23 + $0xa68] ss:$16 sps:$4 sm:$0xff]  }
 0x14c   : > { %v4555_v50 = vcombine.low %v4548_v24, %v4552_v8  ;;  %v4583_v55 = vrot.slane %v4573_v39, %v13603_v53  ;;  %v12700_v16 = vld [vmem:[%s13546_s23 + $0xa60] ss:$16 sps:$4 sm:$0xff]   ;;  %v12720_v8 = vld [vmem:[%s13546_s23 + $0xac4] ss:$16 sps:$4 sm:$0xff]  }
 0x14d   : > { %3814 = vmatmul.mubr.bf16.vlgmr.msra.gmra.mrb[20].mxu0 %v3463_v45  ;;  %3855 = vmatmul.mubr.bf16.vlgmr.msra.gmra.mrb[20].mxu1 %v3463_v45  ;;  %v12687_v45 = vld [vmem:[%s13546_s23 + $0xa0c] ss:$16 sps:$4 sm:$0xff]   ;;  %v10939_v39 = vld [vmem:[%s13546_s23 + $0xae0] sm:$0x33] }
 0x14e   : > { %4366 = vmatpush1.bf16.msra.mxu0 %v12652_v44  ;;  %4407 = vmatpush1.bf16.msra.mxu1 %v12655_v48  ;;  %v12679_v44 = vld [vmem:[%s13546_s23 + $0x9e8] ss:$16 sps:$4 sm:$0xff]   ;;  %v4501_v48 = vrot.slane %v4494_v36, %v13601_v52  ;;  %v12712_v36 = vld [vmem:[%s13546_s23 + $0xaa0] ss:$16 sps:$4 sm:$0xff]  }
 0x14f   : > { %4367 = vmatprep.subr.bf16.mxu0 %v12660_v0  ;;  %4408 = vmatprep.subr.bf16.mxu1 %v12663_v51  ;;  %v12682_v0 = vld [vmem:[%s13546_s23 + $0xa00] ss:$16 sps:$4 sm:$0xff]   ;;  %v4531_v51 = vrot.slane %v4524_v38, %v13601_v52  ;;  %v12715_v38 = vld [vmem:[%s13546_s23 + $0xaa8] ss:$16 sps:$4 sm:$0xff]  }
 0x150   : > { %v1479_v62 = vpop.f32.mrb[4].mxu0  ;;  %v1520_v63 = vpop.f32.mrb[4].mxu1  ;;  %10994 = vmatprep.mubr.msk.bf16.mxu0 %vm844_vm1, %v4048_v54  ;;  %10996 = vmatprep.mubr.msk.bf16.mxu1 %vm844_vm1, %v4048_v54  ;;  %v4579_v54 = vrot.slane %v4569_v23, %v13603_v53  ;;  %v12723_v23 = vld [vmem:[%s13546_s23 + $0xacc] ss:$16 sps:$4 sm:$0xff]  }
 0x151   : > { %v1481_v2 = vpop.f32.mrb[5].mxu0  ;;  %v1522_v3 = vpop.f32.mrb[5].mxu1 }
 0x152   : > { %v1531_v5 = vcombine.low %v1479_v62, %v1481_v2  ;;  %v1532_v60 = vcombine.low %v1520_v63, %v1522_v3  ;;  %v1483_v6 = vpop.f32.mrb[6].mxu0  ;;  %v1524_v14 = vpop.f32.mrb[6].mxu1  ;;  %4368 = vmatpush1.bf16.msra.mxu0 %v12658_v18  ;;  %4409 = vmatpush1.bf16.msra.mxu1 %v12661_v56  ;;  %v12685_v18 = vld [vmem:[%s13546_s23 + $0xa08] ss:$16 sps:$4 sm:$0xff]   ;;  %v12690_v56 = vld [vmem:[%s13546_s23 + $0xa24] ss:$16 sps:$4 sm:$0xff]   ;;  %v4503_v62 = vmul.f32 %v14280_v61, %v4501_v48 }
 0x153   : > { %v1484_v11 = vpop.f32.mrb[7].mxu0  ;;  %v1525_v12 = vpop.f32.mrb[7].mxu1  ;;  %4369 = vmatprep.subr.bf16.mxu0 %v12666_v58  ;;  %4410 = vmatprep.subr.bf16.mxu1 %v12669_v29  ;;  %v10998_v58 = vld [vmem:[%s13541_s19 + $0xe] sm:$0x3]  ;;  %v12688_v29 = vld [vmem:[%s13546_s23 + $0xa20] ss:$16 sps:$4 sm:$0xff]   ;;  %v4562_v2 = vrot.slane %v4555_v50, %v13601_v52  ;;  %v4586_v3 = vcombine.low %v4579_v54, %v4583_v55  ;;  %v10989_v48 = vcombine.low %v10939_v39, %v10939_v39 }
 0x154   : > { %v1539_v20 = vrot.slane %v1531_v5, %v13601_v52  ;;  %v1546_v21 = vrot.slane %v1532_v60, %v13601_v52  ;;  %v14286_v63 = vld [vmem:[%s15834_s0 + $0x4] sm:$0xf]  ;;  %v12699_v5 = vld [vmem:[%s13546_s23 + $0xa4c] ss:$16 sps:$4 sm:$0xff]   ;;  %v4603_v60 = vrot.slane %v10998_v58, %v13583_v40  ;;  %v12694_v6 = vld [vmem:[%s13546_s23 + $0xa40] ss:$16 sps:$4 sm:$0xff]   ;;  %v4607_v12 = vrot.slane %v10998_v58, %v13587_v42 }
 0x155   : > { %v4533_v1 = vmul.f32 %v14286_v63, %v4531_v51  ;;  %v12697_v14 = vld [vmem:[%s13546_s23 + $0xa48] ss:$16 sps:$4 sm:$0xff]   ;;  %v4593_v11 = vrot.slane %v4586_v3, %v13601_v52  ;;  %v4354_v55 = vsel %vm848_vm0, %v10989_v48, 0  ;;  %v12728_v58 = vld [vmem:[%s13546_s23 + $0xaf0] ss:$16 sps:$4 sm:$0xff]  }
 0x156   : > { %v1547_v27 = vcombine.low %v1539_v20, %v1546_v21  ;;  %4370 = vmatpush1.bf16.msra.mxu0 %v12664_v9  ;;  %4411 = vmatpush1.bf16.msra.mxu1 %v12667_v19  ;;  %v14298_v19 = vld [vmem:[%s15834_s0 + $0x8] sm:$0xf]  ;;  %v4608_v21 = vcombine.low %v4603_v60, %v4607_v12  ;;  %v12739_v3 = vld [vmem:[%s13546_s23 + $0xb1c] ss:$16 sps:$4 sm:$0xff]  }
 0x157   : > { %4371 = vmatprep.subr.bf16.mxu0 %v12672_v13  ;;  %4412 = vmatprep.subr.bf16.mxu1 %v12675_v15  ;;  %v4534_v9 = vadd.f32 %v4533_v1, %v4503_v62  ;;  %v4564_v10 = vmul.f32 %v14298_v19, %v4562_v2  ;;  %v12702_v13 = vld [vmem:[%s13546_s23 + $0xa64] ss:$16 sps:$4 sm:$0xff]   ;;  %v12705_v15 = vld [vmem:[%s13546_s23 + $0xa6c] ss:$16 sps:$4 sm:$0xff]   ;;  %v4595_v20 = vmul.f32 %v14181_v49, %v4593_v11  ;;  %v12731_v62 = vld [vmem:[%s13546_s23 + $0xaf8] ss:$16 sps:$4 sm:$0xff]  }
 0x158   : > { %v14255_v7 = vadd.f32 %v1547_v27, %v965_v26  ;;  %v12711_v26 = vld [vmem:[%s13546_s23 + $0xa8c] ss:$16 sps:$4 sm:$0xff]   ;;  %v12706_v27 = vld [vmem:[%s13546_s23 + $0xa80] ss:$16 sps:$4 sm:$0xff]   ;;  %v12714_v49 = vld [vmem:[%s13546_s23 + $0xaa4] ss:$16 sps:$4 sm:$0xff]  }
 0x159   : > { %v4565_v17 = vadd.f32 %v4564_v10, %v4534_v9  ;;  %v14339_v1 = vld [vmem:[%s13536_s16 + $0x40] sm:$0xff]  ;;  %v12737_v60 = vld [vmem:[%s13546_s23 + $0xb18] ss:$16 sps:$4 sm:$0xff]   ;;  %v12745_v9 = vld [vmem:[%s13546_s23 + $0xb3c] ss:$16 sps:$4 sm:$0xff]  }
 0x15a   : > { %4372 = vmatpush1.bf16.msra.mxu0 %v12670_v28  ;;  %4413 = vmatpush1.bf16.msra.mxu1 %v12673_v31  ;;  %v12709_v28 = vld [vmem:[%s13546_s23 + $0xa88] ss:$16 sps:$4 sm:$0xff]   ;;  %v12736_v2 = vld [vmem:[%s13546_s23 + $0xb14] ss:$16 sps:$4 sm:$0xff]   ;;  %v5091_v10 = vrot.slane %v14339_v1, %v13587_v42  ;;  %v5095_v11 = vrot.slane %v14339_v1, %v13589_v43  ;;  %v12757_v48 = vld [vmem:[%s13546_s23 + $0xb7c] ss:$16 sps:$4 sm:$0xff]  }
 0x15b   : > { %4373 = vmatprep.subr.bf16.mxu0 %v12678_v33  ;;  %4414 = vmatprep.subr.bf16.mxu1 %v12681_v35  ;;  %v4596_v31 = vadd.f32 %v4595_v20, %v4565_v17  ;;  %v4615_v33 = vrot.slane %v4608_v21, %v13601_v52  ;;  %v12717_v35 = vld [vmem:[%s13546_s23 + $0xaac] ss:$16 sps:$4 sm:$0xff]  }
 0x15d   : > { %v4617_v24 = vadd.f32 %v4615_v33, %v4596_v31 }
 0x15e   : > { %4374 = vmatpush1.bf16.msra.mxu0 %v12676_v22  ;;  %4415 = vmatpush1.bf16.msra.mxu1 %v12679_v44  ;;  %v10940_v22 = vld [vmem:[%s13546_s23 + $0xae8] sm:$0x33] }
 0x15f   : > { %4375 = vmatprep.subr.bf16.mxu0 %v12684_v30  ;;  %4416 = vmatprep.subr.bf16.mxu1 %v12687_v45  ;;  %v4618_v44 = vmax.f32 %v4617_v24, 0.0  ;;  %v12718_v30 = vld [vmem:[%s13546_s23 + $0xac0] ss:$16 sps:$4 sm:$0xff]   ;;  %v12721_v45 = vld [vmem:[%s13546_s23 + $0xac8] ss:$16 sps:$4 sm:$0xff]   ;;  %v10992_v51 = vcombine.high %v10940_v22, %v10940_v22  ;;  %v10991_v50 = vcombine.low %v10940_v22, %v10940_v22  ;;  %v5122_v24 = vrot.slane %v14339_v1, %v13593_v46 }
 0x161   : > { %v14324_v54 = vrot.slane %v4618_v44, %v13601_v52  ;;  %v12746_v44 = vld [vmem:[%s13546_s23 + $0xb50] ss:$16 sps:$4 sm:$0xff]  }
 0x162   : > { %4376 = vmatpush1.bf16.msra.mxu0 %v12682_v0  ;;  %4417 = vmatpush1.bf16.msra.mxu1 %v12685_v18  ;;  %v10990_v0 = vcombine.high %v10939_v39, %v10939_v39  ;;  %v4360_v18 = vsel %vm848_vm0, %v10991_v50, 0  ;;  %v5126_v39 = vrot.slane %v14339_v1, %v13595_v47  ;;  %v5132_v50 = vrot.slane %v5122_v24, %v13593_v46  ;;  %v12787_v24 = vld [vmem:[%s13546_s23 + $0xc1c] ss:$16 sps:$4 sm:$0xff]  }
 0x163   : > { %4377 = vmatprep.subr.bf16.mxu0 %v12690_v56  ;;  %4418 = vmatprep.subr.bf16.mxu1 %v12693_v57  ;;  %v12730_v56 = vld [vmem:[%s13546_s23 + $0xaf4] ss:$16 sps:$4 sm:$0xff]   ;;  %v12733_v57 = vld [vmem:[%s13546_s23 + $0xafc] ss:$16 sps:$4 sm:$0xff]  }
 0x166   : > { %4378 = vmatpush1.bf16.msra.mxu0 %v12688_v29  ;;  %4419 = vmatpush1.bf16.msra.mxu1 %v12691_v32  ;;  %v4628_v29 = vcombine.high %v14324_v54, %v14324_v54  ;;  %v4047_v32 = vpack.c.bf16 %v14200_v37, %v14200_v37  ;;  %v12734_v37 = vld [vmem:[%s13546_s23 + $0xb10] ss:$16 sps:$4 sm:$0xff]  }
 0x167   : > { %4379 = vmatprep.subr.bf16.mxu0 %v12696_v4  ;;  %4420 = vmatprep.subr.bf16.mxu1 %v12699_v5  ;;  %v5061_v5 = vrot.slane %v14339_v1, %v13583_v40 }
 0x168   : > { %v4632_v4 = vpack.c.bf16 %v4628_v29, %v4628_v29  ;;  %v12755_v29 = vld [vmem:[%s13546_s23 + $0xb78] ss:$16 sps:$4 sm:$0xff]  }
 0x16a   : > { %4380 = vmatpush1.bf16.msra.mxu0 %v12694_v6  ;;  %4421 = vmatpush1.bf16.msra.mxu1 %v12697_v14  ;;  %v5065_v6 = vrot.slane %v14339_v1, %v13585_v41  ;;  %v12742_v14 = vld [vmem:[%s13546_s23 + $0xb34] ss:$16 sps:$4 sm:$0xff]  }
 0x16b   : > { %4381 = vmatprep.subr.bf16.mxu0 %v12702_v13  ;;  %4422 = vmatprep.subr.bf16.mxu1 %v12705_v15 }
 0x16e   : > { %4382 = vmatpush1.bf16.msra.mxu0 %v12700_v16  ;;  %4423 = vmatpush1.bf16.msra.mxu1 %v12703_v34  ;;  %v5071_v34 = vrot.slane %v5061_v5, %v13583_v40 }
 0x16f   : > { %4383 = vmatprep.subr.bf16.mxu0 %v12708_v25  ;;  %4424 = vmatprep.subr.bf16.mxu1 %v12711_v26  ;;  %v12740_v26 = vld [vmem:[%s13546_s23 + $0xb30] ss:$16 sps:$4 sm:$0xff]  }
 0x172   : > { %4384 = vmatpush1.bf16.msra.mxu0 %v12706_v27  ;;  %4425 = vmatpush1.bf16.msra.mxu1 %v12709_v28  ;;  %v12743_v27 = vld [vmem:[%s13546_s23 + $0xb38] ss:$16 sps:$4 sm:$0xff]   ;;  %v5075_v28 = vrot.slane %v5065_v6, %v13583_v40  ;;  %v12769_v6 = vld [vmem:[%s13546_s23 + $0xbbc] ss:$16 sps:$4 sm:$0xff]  }
 0x173   : > { %4385 = vmatprep.subr.bf16.mxu0 %v12714_v49  ;;  %4426 = vmatprep.subr.bf16.mxu1 %v12717_v35  ;;  %v12748_v49 = vld [vmem:[%s13546_s23 + $0xb54] ss:$16 sps:$4 sm:$0xff]   ;;  %v12751_v35 = vld [vmem:[%s13546_s23 + $0xb5c] ss:$16 sps:$4 sm:$0xff]  }
 0x176   : > { %4386 = vmatpush1.bf16.msra.mxu0 %v12712_v36  ;;  %4427 = vmatpush1.bf16.msra.mxu1 %v12715_v38  ;;  %v5101_v36 = vrot.slane %v5091_v10, %v13587_v42  ;;  %v5105_v38 = vrot.slane %v5095_v11, %v13587_v42  ;;  %v12767_v10 = vld [vmem:[%s13546_s23 + $0xbb8] ss:$16 sps:$4 sm:$0xff]  }
 0x177   : > { %4387 = vmatprep.subr.bf16.mxu0 %v12720_v8  ;;  %4428 = vmatprep.subr.bf16.mxu1 %v12723_v23 }
 0x17a   : > { %4388 = vmatpush1.bf16.msra.mxu0 %v12718_v30  ;;  %4429 = vmatpush1.bf16.msra.mxu1 %v12721_v45  ;;  %v12749_v30 = vld [vmem:[%s13546_s23 + $0xb58] ss:$16 sps:$4 sm:$0xff]   ;;  %v12754_v45 = vld [vmem:[%s13546_s23 + $0xb74] ss:$16 sps:$4 sm:$0xff]  }
 0x17b   : > { %10993 = vmatprep.subr.msk.bf16.mxu0 %vm848_vm0, %v10990_v0  ;;  %10995 = vmatprep.subr.msk.bf16.mxu1 %vm848_vm0, %v10992_v51  ;;  %v5078_v0 = vcombine.low %v5071_v34, %v5075_v28  ;;  %v5108_v51 = vcombine.low %v5101_v36, %v5105_v38  ;;  %v12775_v34 = vld [vmem:[%s13546_s23 + $0xbdc] ss:$16 sps:$4 sm:$0xff]   ;;  %v12784_v38 = vld [vmem:[%s13546_s23 + $0xc14] ss:$16 sps:$4 sm:$0xff]  }
 0x17c   : > { %v12781_v28 = vld [vmem:[%s13546_s23 + $0xbfc] ss:$16 sps:$4 sm:$0xff]  }
 0x17e   : > { %4390 = vmatpush1.bf16.msra.mxu0 %v4354_v55  ;;  %4431 = vmatpush1.bf16.msra.mxu1 %v4360_v18  ;;  %v5136_v18 = vrot.slane %v5126_v39, %v13593_v46 }
 0x17f   : > { %4949 = vmatprep.subr.bf16.mxu0 %v12730_v56  ;;  %4990 = vmatprep.subr.bf16.mxu1 %v12733_v57  ;;  %v5153_v56 = vrot.slane %v14339_v1, %v13603_v53  ;;  %v5157_v57 = vrot.slane %v14339_v1, %v13610_v59 }
 0x180   : > { %v5139_v1 = vcombine.low %v5132_v50, %v5136_v18  ;;  %v12799_v50 = vld [vmem:[%s13546_s23 + $0xc5c] ss:$16 sps:$4 sm:$0xff]   ;;  %v11047_v18 = vld [vmem:[%s13546_s23 + $0xc70] sm:$0x33] }
 0x181   : > { %4398 = vmatmul.mubr.bf16.vlgmr.msra.gmra.mrb[24].mxu0 %v4047_v32  ;;  %4439 = vmatmul.mubr.bf16.vlgmr.msra.gmra.mrb[24].mxu1 %v4047_v32  ;;  %v12763_v32 = vld [vmem:[%s13546_s23 + $0xb9c] ss:$16 sps:$4 sm:$0xff]   ;;  %v5167_v5 = vrot.slane %v5157_v57, %v13603_v53 }
 0x182   : > { %4950 = vmatpush1.bf16.msra.mxu0 %v12728_v58  ;;  %4991 = vmatpush1.bf16.msra.mxu1 %v12731_v62  ;;  %v12752_v58 = vld [vmem:[%s13546_s23 + $0xb70] ss:$16 sps:$4 sm:$0xff]   ;;  %v5085_v62 = vrot.slane %v5078_v0, %v13601_v52 }
 0x183   : > { %4951 = vmatprep.subr.bf16.mxu0 %v12736_v2  ;;  %4992 = vmatprep.subr.bf16.mxu1 %v12739_v3  ;;  %v12758_v2 = vld [vmem:[%s13546_s23 + $0xb90] ss:$16 sps:$4 sm:$0xff]   ;;  %v5115_v3 = vrot.slane %v5108_v51, %v13601_v52  ;;  %v12796_v51 = vld [vmem:[%s13546_s23 + $0xc54] ss:$16 sps:$4 sm:$0xff]  }
 0x184   : > { %v2063_v12 = vpop.f32.mrb[8].mxu0  ;;  %v2104_v13 = vpop.f32.mrb[8].mxu1  ;;  %11102 = vmatprep.mubr.msk.bf16.mxu0 %vm844_vm1, %v4632_v4  ;;  %11104 = vmatprep.mubr.msk.bf16.mxu1 %vm844_vm1, %v4632_v4  ;;  %v5163_v4 = vrot.slane %v5153_v56, %v13603_v53  ;;  %v5087_v11 = vmul.f32 %v14280_v61, %v5085_v62  ;;  %v11048_v56 = vld [vmem:[%s13546_s23 + $0xc78] sm:$0x33] }
 0x185   : > { %v2065_v15 = vpop.f32.mrb[9].mxu0  ;;  %v2106_v16 = vpop.f32.mrb[9].mxu1  ;;  %v11100_v62 = vcombine.high %v11048_v56, %v11048_v56 }
 0x186   : > { %v2115_v17 = vcombine.low %v2063_v12, %v2065_v15  ;;  %v2116_v20 = vcombine.low %v2104_v13, %v2106_v16  ;;  %v2067_v21 = vpop.f32.mrb[10].mxu0  ;;  %v2108_v25 = vpop.f32.mrb[10].mxu1  ;;  %4952 = vmatpush1.bf16.msra.mxu0 %v12734_v37  ;;  %4993 = vmatpush1.bf16.msra.mxu1 %v12737_v60  ;;  %v12761_v37 = vld [vmem:[%s13546_s23 + $0xb98] ss:$16 sps:$4 sm:$0xff]   ;;  %v12766_v60 = vld [vmem:[%s13546_s23 + $0xbb4] ss:$16 sps:$4 sm:$0xff]   ;;  %v5117_v12 = vmul.f32 %v14286_v63, %v5115_v3 }
 0x187   : > { %v2068_v31 = vpop.f32.mrb[11].mxu0  ;;  %v2109_v33 = vpop.f32.mrb[11].mxu1  ;;  %4953 = vmatprep.subr.bf16.mxu0 %v12742_v14  ;;  %4994 = vmatprep.subr.bf16.mxu1 %v12745_v9  ;;  %v11106_v14 = vld [vmem:[%s13541_s19 + $0x10] sm:$0x3]  ;;  %v5146_v13 = vrot.slane %v5139_v1, %v13601_v52  ;;  %v5170_v15 = vcombine.low %v5163_v4, %v5167_v5  ;;  %v12772_v16 = vld [vmem:[%s13546_s23 + $0xbd4] ss:$16 sps:$4 sm:$0xff]  }
 0x188   : > { %v2123_v8 = vrot.slane %v2115_v17, %v13601_v52  ;;  %v2130_v23 = vrot.slane %v2116_v20, %v13601_v52  ;;  %v12764_v9 = vld [vmem:[%s13546_s23 + $0xbb0] ss:$16 sps:$4 sm:$0xff]   ;;  %v5187_v17 = vrot.slane %v11106_v14, %v13583_v40  ;;  %v12773_v21 = vld [vmem:[%s13546_s23 + $0xbd8] ss:$16 sps:$4 sm:$0xff]   ;;  %v5118_v61 = vadd.f32 %v5117_v12, %v5087_v11  ;;  %v12806_v5 = vld [vmem:[%s13546_s23 + $0xc84] ss:$16 sps:$4 sm:$0xff]  }
 0x189   : > { %v12770_v20 = vld [vmem:[%s13546_s23 + $0xbd0] ss:$16 sps:$4 sm:$0xff]   ;;  %v5148_v63 = vmul.f32 %v14298_v19, %v5146_v13  ;;  %v5177_v25 = vrot.slane %v5170_v15, %v13601_v52  ;;  %v12779_v33 = vld [vmem:[%s13546_s23 + $0xbf8] ss:$16 sps:$4 sm:$0xff]   ;;  %v14417_v19 = vld [vmem:[%s15834_s0 + $0xc] sm:$0xf] }
 0x18a   : > { %v2131_v22 = vcombine.low %v2123_v8, %v2130_v23  ;;  %4954 = vmatpush1.bf16.msra.mxu0 %v12740_v26  ;;  %4995 = vmatpush1.bf16.msra.mxu1 %v12743_v27  ;;  %v5191_v26 = vrot.slane %v11106_v14, %v13587_v42  ;;  %v12778_v27 = vld [vmem:[%s13546_s23 + $0xbf4] ss:$16 sps:$4 sm:$0xff]   ;;  %v12776_v31 = vld [vmem:[%s13546_s23 + $0xbf0] ss:$16 sps:$4 sm:$0xff]   ;;  %v12785_v23 = vld [vmem:[%s13546_s23 + $0xc18] ss:$16 sps:$4 sm:$0xff]   ;;  %v4631_v14 = vpack.c.bf16 %v14324_v54, %v14324_v54 }
 0x18b   : > { %4955 = vmatprep.subr.bf16.mxu0 %v12748_v49  ;;  %4996 = vmatprep.subr.bf16.mxu1 %v12751_v35  ;;  %v5149_v49 = vadd.f32 %v5148_v63, %v5118_v61  ;;  %v5179_v35 = vmul.f32 %v14417_v19, %v5177_v25  ;;  %v12782_v8 = vld [vmem:[%s13546_s23 + $0xc10] ss:$16 sps:$4 sm:$0xff]   ;;  %v12812_v11 = vld [vmem:[%s13546_s23 + $0xca4] ss:$16 sps:$4 sm:$0xff]   ;;  %v12815_v12 = vld [vmem:[%s13546_s23 + $0xcac] ss:$16 sps:$4 sm:$0xff]  }
 0x18c   : > { %v14377_v55 = vadd.f32 %v2131_v22, %v14255_v7  ;;  %v12760_v7 = vld [vmem:[%s13546_s23 + $0xb94] ss:$16 sps:$4 sm:$0xff]   ;;  %v5192_v36 = vcombine.low %v5187_v17, %v5191_v26  ;;  %v12810_v54 = vld [vmem:[%s13546_s23 + $0xca0] ss:$16 sps:$4 sm:$0xff]  }
 0x18d   : > { %v5180_v39 = vadd.f32 %v5179_v35, %v5149_v49  ;;  %v12818_v17 = vld [vmem:[%s13546_s23 + $0xcc4] ss:$16 sps:$4 sm:$0xff]  }
 0x18e   : > { %4956 = vmatpush1.bf16.msra.mxu0 %v12746_v44  ;;  %4997 = vmatpush1.bf16.msra.mxu1 %v12749_v30  ;;  %v5199_v22 = vrot.slane %v5192_v36, %v13601_v52  ;;  %v12790_v44 = vld [vmem:[%s13546_s23 + $0xc34] ss:$16 sps:$4 sm:$0xff]   ;;  %v12793_v30 = vld [vmem:[%s13546_s23 + $0xc3c] ss:$16 sps:$4 sm:$0xff]   ;;  %v12816_v36 = vld [vmem:[%s13546_s23 + $0xcc0] ss:$16 sps:$4 sm:$0xff]  }
 0x18f   : > { %4957 = vmatprep.subr.bf16.mxu0 %v12754_v45  ;;  %4998 = vmatprep.subr.bf16.mxu1 %v12757_v48  ;;  %v12788_v45 = vld [vmem:[%s13546_s23 + $0xc30] ss:$16 sps:$4 sm:$0xff]   ;;  %v12791_v48 = vld [vmem:[%s13546_s23 + $0xc38] ss:$16 sps:$4 sm:$0xff]  }
 0x190   : > { %v5201_v0 = vadd.f32 %v5199_v22, %v5180_v39  ;;  %v12824_v39 = vld [vmem:[%s13546_s23 + $0xce4] ss:$16 sps:$4 sm:$0xff]   ;;  %v12827_v22 = vld [vmem:[%s13546_s23 + $0xcec] ss:$16 sps:$4 sm:$0xff]  }
 0x192   : > { %4958 = vmatpush1.bf16.msra.mxu0 %v12752_v58  ;;  %4999 = vmatpush1.bf16.msra.mxu1 %v12755_v29  ;;  %v5202_v57 = vmax.f32 %v5201_v0, 0.0  ;;  %v12794_v58 = vld [vmem:[%s13546_s23 + $0xc50] ss:$16 sps:$4 sm:$0xff]   ;;  %v12797_v29 = vld [vmem:[%s13546_s23 + $0xc58] ss:$16 sps:$4 sm:$0xff]  }
 0x193   : > { %4959 = vmatprep.subr.bf16.mxu0 %v12760_v7  ;;  %5000 = vmatprep.subr.bf16.mxu1 %v12763_v32  ;;  %v11097_v7 = vcombine.low %v11047_v18, %v11047_v18  ;;  %v11098_v32 = vcombine.high %v11047_v18, %v11047_v18  ;;  %v12822_v18 = vld [vmem:[%s13546_s23 + $0xce0] ss:$16 sps:$4 sm:$0xff]  }
 0x194   : > { %v14436_v3 = vrot.slane %v5202_v57, %v13601_v52  ;;  %v12830_v57 = vld [vmem:[%s13546_s23 + $0xd04] ss:$16 sps:$4 sm:$0xff]  }
 0x195   : > { %v4938_v1 = vsel %vm848_vm0, %v11097_v7, 0 }
 0x196   : > { %4960 = vmatpush1.bf16.msra.mxu0 %v12758_v2  ;;  %5001 = vmatpush1.bf16.msra.mxu1 %v12761_v37  ;;  %v11099_v2 = vcombine.low %v11048_v56, %v11048_v56  ;;  %v12809_v37 = vld [vmem:[%s13546_s23 + $0xc8c] ss:$16 sps:$4 sm:$0xff]   ;;  %v12825_v56 = vld [vmem:[%s13546_s23 + $0xce8] ss:$16 sps:$4 sm:$0xff]  }
 0x197   : > { %4961 = vmatprep.subr.bf16.mxu0 %v12766_v60  ;;  %5002 = vmatprep.subr.bf16.mxu1 %v12769_v6  ;;  %v12804_v60 = vld [vmem:[%s13546_s23 + $0xc80] ss:$16 sps:$4 sm:$0xff]   ;;  %v5212_v6 = vcombine.high %v14436_v3, %v14436_v3 }
 0x198   : > { %v4944_v4 = vsel %vm848_vm0, %v11099_v2, 0 }
 0x199   : > { %v5216_v13 = vpack.c.bf16 %v5212_v6, %v5212_v6 }
 0x19a   : > { %4962 = vmatpush1.bf16.msra.mxu0 %v12764_v9  ;;  %5003 = vmatpush1.bf16.msra.mxu1 %v12767_v10  ;;  %v12807_v9 = vld [vmem:[%s13546_s23 + $0xc88] ss:$16 sps:$4 sm:$0xff]  }
 0x19b   : > { %4963 = vmatprep.subr.bf16.mxu0 %v12772_v16  ;;  %5004 = vmatprep.subr.bf16.mxu1 %v12775_v34  ;;  %v14451_v10 = vld [vmem:[%s13536_s16 + $0x48] sm:$0xff] }
 0x19c   : > { %v5645_v15 = vrot.slane %v14451_v10, %v13583_v40  ;;  %v12813_v16 = vld [vmem:[%s13546_s23 + $0xca8] ss:$16 sps:$4 sm:$0xff]   ;;  %v5649_v34 = vrot.slane %v14451_v10, %v13585_v41  ;;  %v5679_v61 = vrot.slane %v14451_v10, %v13589_v43 }
 0x19e   : > { %4964 = vmatpush1.bf16.msra.mxu0 %v12770_v20  ;;  %5005 = vmatpush1.bf16.msra.mxu1 %v12773_v21  ;;  %v12821_v20 = vld [vmem:[%s13546_s23 + $0xccc] ss:$16 sps:$4 sm:$0xff]   ;;  %v5675_v21 = vrot.slane %v14451_v10, %v13587_v42 }
 0x19f   : > { %4965 = vmatprep.subr.bf16.mxu0 %v12778_v27  ;;  %5006 = vmatprep.subr.bf16.mxu1 %v12781_v28  ;;  %v5655_v28 = vrot.slane %v5645_v15, %v13583_v40  ;;  %v12842_v15 = vld [vmem:[%s13546_s23 + $0xd44] ss:$16 sps:$4 sm:$0xff]  }
 0x1a2   : > { %4966 = vmatpush1.bf16.msra.mxu0 %v12776_v31  ;;  %5007 = vmatpush1.bf16.msra.mxu1 %v12779_v33 }
 0x1a3   : > { %4967 = vmatprep.subr.bf16.mxu0 %v12784_v38  ;;  %5008 = vmatprep.subr.bf16.mxu1 %v12787_v24  ;;  %v12819_v38 = vld [vmem:[%s13546_s23 + $0xcc8] ss:$16 sps:$4 sm:$0xff]   ;;  %v5659_v24 = vrot.slane %v5649_v34, %v13583_v40  ;;  %v12840_v34 = vld [vmem:[%s13546_s23 + $0xd40] ss:$16 sps:$4 sm:$0xff]  }
 0x1a6   : > { %4968 = vmatpush1.bf16.msra.mxu0 %v12782_v8  ;;  %5009 = vmatpush1.bf16.msra.mxu1 %v12785_v23 }
 0x1a7   : > { %4969 = vmatprep.subr.bf16.mxu0 %v12790_v44  ;;  %5010 = vmatprep.subr.bf16.mxu1 %v12793_v30  ;;  %v5685_v44 = vrot.slane %v5675_v21, %v13587_v42  ;;  %v5689_v30 = vrot.slane %v5679_v61, %v13587_v42  ;;  %v14520_v61 = vld [vmem:[%s15834_s0 + $0x4] sm:$0xf] }
 0x1a9   : > { %v5692_v7 = vcombine.low %v5685_v44, %v5689_v30 }
 0x1aa   : > { %4970 = vmatpush1.bf16.msra.mxu0 %v12788_v45  ;;  %5011 = vmatpush1.bf16.msra.mxu1 %v12791_v48  ;;  %v5706_v45 = vrot.slane %v14451_v10, %v13593_v46 }
 0x1ab   : > { %4971 = vmatprep.subr.bf16.mxu0 %v12796_v51  ;;  %5012 = vmatprep.subr.bf16.mxu1 %v12799_v50  ;;  %v5710_v51 = vrot.slane %v14451_v10, %v13595_v47 }
 0x1ad   : > { %v5720_v2 = vrot.slane %v5710_v51, %v13593_v46  ;;  %v12863_v51 = vld [vmem:[%s13546_s23 + $0xdac] ss:$16 sps:$4 sm:$0xff]  }
 0x1ae   : > { %4972 = vmatpush1.bf16.msra.mxu0 %v12794_v58  ;;  %5013 = vmatpush1.bf16.msra.mxu1 %v12797_v29  ;;  %v12833_v58 = vld [vmem:[%s13546_s23 + $0xd0c] ss:$16 sps:$4 sm:$0xff]   ;;  %v5662_v29 = vcombine.low %v5655_v28, %v5659_v24  ;;  %v12846_v24 = vld [vmem:[%s13546_s23 + $0xd60] ss:$16 sps:$4 sm:$0xff]  }
 0x1af   : > { %11101 = vmatprep.subr.msk.bf16.mxu0 %vm848_vm0, %v11098_v32  ;;  %11103 = vmatprep.subr.msk.bf16.mxu1 %vm848_vm0, %v11100_v62  ;;  %v5716_v32 = vrot.slane %v5706_v45, %v13593_v46  ;;  %v12851_v28 = vld [vmem:[%s13546_s23 + $0xd6c] ss:$16 sps:$4 sm:$0xff]   ;;  %v12852_v45 = vld [vmem:[%s13546_s23 + $0xd80] ss:$16 sps:$4 sm:$0xff]  }
 0x1b0   : > { %v5669_v6 = vrot.slane %v5662_v29, %v13601_v52  ;;  %v12869_v29 = vld [vmem:[%s13546_s23 + $0xdcc] ss:$16 sps:$4 sm:$0xff]  }
 0x1b2   : > { %4974 = vmatpush1.bf16.msra.mxu0 %v4938_v1  ;;  %5015 = vmatpush1.bf16.msra.mxu1 %v4944_v4  ;;  %v5737_v1 = vrot.slane %v14451_v10, %v13603_v53  ;;  %v5741_v4 = vrot.slane %v14451_v10, %v13610_v59  ;;  %v5723_v10 = vcombine.low %v5716_v32, %v5720_v2  ;;  %v12864_v32 = vld [vmem:[%s13546_s23 + $0xdc0] ss:$16 sps:$4 sm:$0xff]   ;;  %v12867_v2 = vld [vmem:[%s13546_s23 + $0xdc8] ss:$16 sps:$4 sm:$0xff]  }
 0x1b3   : > { %5533 = vmatprep.subr.bf16.mxu0 %v12806_v5  ;;  %5574 = vmatprep.subr.bf16.mxu1 %v12809_v37  ;;  %v12828_v5 = vld [vmem:[%s13546_s23 + $0xd00] ss:$16 sps:$4 sm:$0xff]   ;;  %v12831_v37 = vld [vmem:[%s13546_s23 + $0xd08] ss:$16 sps:$4 sm:$0xff]  }
 0x1b5   : > { %4982 = vmatmul.mubr.bf16.vlgmr.msra.gmra.mrb[28].mxu0 %v4631_v14  ;;  %5023 = vmatmul.mubr.bf16.vlgmr.msra.gmra.mrb[28].mxu1 %v4631_v14  ;;  %v12834_v14 = vld [vmem:[%s13546_s23 + $0xd20] ss:$16 sps:$4 sm:$0xff]  }
 0x1b6   : > { %5534 = vmatpush1.bf16.msra.mxu0 %v12804_v60  ;;  %5575 = vmatpush1.bf16.msra.mxu1 %v12807_v9  ;;  %v12839_v60 = vld [vmem:[%s13546_s23 + $0xd2c] ss:$16 sps:$4 sm:$0xff]   ;;  %v5699_v9 = vrot.slane %v5692_v7, %v13601_v52 }
 0x1b7   : > { %5535 = vmatprep.subr.bf16.mxu0 %v12812_v11  ;;  %5576 = vmatprep.subr.bf16.mxu1 %v12815_v12  ;;  %v5747_v11 = vrot.slane %v5737_v1, %v13603_v53  ;;  %v5751_v12 = vrot.slane %v5741_v4, %v13603_v53  ;;  %v12872_v1 = vld [vmem:[%s13546_s23 + $0xde4] ss:$16 sps:$4 sm:$0xff]   ;;  %v12875_v4 = vld [vmem:[%s13546_s23 + $0xdec] ss:$16 sps:$4 sm:$0xff]  }
 0x1b8   : > { %v2647_v63 = vpop.f32.mrb[12].mxu0  ;;  %v2688_v25 = vpop.f32.mrb[12].mxu1  ;;  %11210 = vmatprep.mubr.msk.bf16.mxu0 %vm844_vm1, %v5216_v13  ;;  %11212 = vmatprep.mubr.msk.bf16.mxu1 %vm844_vm1, %v5216_v13  ;;  %v12837_v13 = vld [vmem:[%s13546_s23 + $0xd28] ss:$16 sps:$4 sm:$0xff]  }
 0x1b9   : > { %v2649_v26 = vpop.f32.mrb[13].mxu0  ;;  %v2690_v27 = vpop.f32.mrb[13].mxu1 }
 0x1ba   : > { %v2699_v31 = vcombine.low %v2647_v63, %v2649_v26  ;;  %v2700_v33 = vcombine.low %v2688_v25, %v2690_v27  ;;  %v2651_v49 = vpop.f32.mrb[14].mxu0  ;;  %v2692_v35 = vpop.f32.mrb[14].mxu1  ;;  %5536 = vmatpush1.bf16.msra.mxu0 %v12810_v54  ;;  %5577 = vmatpush1.bf16.msra.mxu1 %v12813_v16  ;;  %v12845_v54 = vld [vmem:[%s13546_s23 + $0xd4c] ss:$16 sps:$4 sm:$0xff]   ;;  %v11214_v16 = vld [vmem:[%s13541_s19 + $0x12] sm:$0x3]  ;;  %v5701_v63 = vmul.f32 %v14520_v61, %v5699_v9 }
 0x1bb   : > { %v2652_v8 = vpop.f32.mrb[15].mxu0  ;;  %v2693_v23 = vpop.f32.mrb[15].mxu1  ;;  %5537 = vmatprep.subr.bf16.mxu0 %v12818_v17  ;;  %5578 = vmatprep.subr.bf16.mxu1 %v12821_v20  ;;  %v12843_v17 = vld [vmem:[%s13546_s23 + $0xd48] ss:$16 sps:$4 sm:$0xff]   ;;  %v14514_v20 = vld [vmem:[%s15834_s0] sm:$0xf]  ;;  %v5730_v25 = vrot.slane %v5723_v10, %v13601_v52  ;;  %v5754_v26 = vcombine.low %v5747_v11, %v5751_v12 }
 0x1bc   : > { %v2707_v48 = vrot.slane %v2699_v31, %v13601_v52  ;;  %v2714_v0 = vrot.slane %v2700_v33, %v13601_v52  ;;  %v5671_v21 = vmul.f32 %v14514_v20, %v5669_v6  ;;  %v12848_v27 = vld [vmem:[%s13546_s23 + $0xd64] ss:$16 sps:$4 sm:$0xff]   ;;  %v5771_v31 = vrot.slane %v11214_v16, %v13583_v40  ;;  %v14530_v49 = vld [vmem:[%s15834_s0 + $0x8] sm:$0xf] }
 0x1bd   : > { %v5732_v35 = vmul.f32 %v14530_v49, %v5730_v25  ;;  %v12849_v8 = vld [vmem:[%s13546_s23 + $0xd68] ss:$16 sps:$4 sm:$0xff]   ;;  %v12854_v23 = vld [vmem:[%s13546_s23 + $0xd84] ss:$16 sps:$4 sm:$0xff]  }
 0x1be   : > { %v2715_v50 = vcombine.low %v2707_v48, %v2714_v0  ;;  %5538 = vmatpush1.bf16.msra.mxu0 %v12816_v36  ;;  %5579 = vmatpush1.bf16.msra.mxu1 %v12819_v38  ;;  %v5702_v33 = vadd.f32 %v5701_v63, %v5671_v21  ;;  %v5761_v36 = vrot.slane %v5754_v26, %v13601_v52  ;;  %v12855_v48 = vld [vmem:[%s13546_s23 + $0xd88] ss:$16 sps:$4 sm:$0xff]   ;;  %v12860_v0 = vld [vmem:[%s13546_s23 + $0xda4] ss:$16 sps:$4 sm:$0xff]   ;;  %v12880_v21 = vld [vmem:[%s13546_s23 + $0xe10] ss:$16 sps:$4 sm:$0xff]  }
 0x1bf   : > { %5539 = vmatprep.subr.bf16.mxu0 %v12824_v39  ;;  %5580 = vmatprep.subr.bf16.mxu1 %v12827_v22  ;;  %v5775_v38 = vrot.slane %v11214_v16, %v13587_v42  ;;  %v12857_v39 = vld [vmem:[%s13546_s23 + $0xd8c] ss:$16 sps:$4 sm:$0xff]   ;;  %v12873_v6 = vld [vmem:[%s13546_s23 + $0xde8] ss:$16 sps:$4 sm:$0xff]   ;;  %v14573_v25 = vld [vmem:[%s13536_s16 + $0x50] sm:$0xff] }
 0x1c0   : > { %v14489_v62 = vadd.f32 %v2715_v50, %v14377_v55  ;;  %v12836_v55 = vld [vmem:[%s13546_s23 + $0xd24] ss:$16 sps:$4 sm:$0xff]   ;;  %v5733_v22 = vadd.f32 %v5732_v35, %v5702_v33  ;;  %v5763_v44 = vmul.f32 %v14417_v19, %v5761_v36  ;;  %v12885_v16 = vld [vmem:[%s13546_s23 + $0xe1c] ss:$16 sps:$4 sm:$0xff]   ;;  %v12883_v63 = vld [vmem:[%s13546_s23 + $0xe18] ss:$16 sps:$4 sm:$0xff]   ;;  %v6233_v35 = vrot.slane %v14573_v25, %v13585_v41 }
 0x1c1   : > { %v5776_v30 = vcombine.low %v5771_v31, %v5775_v38  ;;  %v12888_v26 = vld [vmem:[%s13546_s23 + $0xe34] ss:$16 sps:$4 sm:$0xff]   ;;  %v12886_v31 = vld [vmem:[%s13546_s23 + $0xe30] ss:$16 sps:$4 sm:$0xff]   ;;  %v12889_v33 = vld [vmem:[%s13546_s23 + $0xe38] ss:$16 sps:$4 sm:$0xff]  }
 0x1c2   : > { %5540 = vmatpush1.bf16.msra.mxu0 %v12822_v18  ;;  %5581 = vmatpush1.bf16.msra.mxu1 %v12825_v56  ;;  %v5764_v50 = vadd.f32 %v5763_v44, %v5733_v22  ;;  %v12858_v56 = vld [vmem:[%s13546_s23 + $0xda0] ss:$16 sps:$4 sm:$0xff]   ;;  %v12894_v36 = vld [vmem:[%s13546_s23 + $0xe54] ss:$16 sps:$4 sm:$0xff]   ;;  %v12897_v38 = vld [vmem:[%s13546_s23 + $0xe5c] ss:$16 sps:$4 sm:$0xff]  }
 0x1c3   : > { %5541 = vmatprep.subr.bf16.mxu0 %v12830_v57  ;;  %5582 = vmatprep.subr.bf16.mxu1 %v12833_v58  ;;  %v5783_v18 = vrot.slane %v5776_v30, %v13601_v52  ;;  %v12861_v57 = vld [vmem:[%s13546_s23 + $0xda8] ss:$16 sps:$4 sm:$0xff]   ;;  %v12866_v58 = vld [vmem:[%s13546_s23 + $0xdc4] ss:$16 sps:$4 sm:$0xff]  }
 0x1c5   : > { %v5785_v7 = vadd.f32 %v5783_v18, %v5764_v50  ;;  %v12892_v50 = vld [vmem:[%s13546_s23 + $0xe50] ss:$16 sps:$4 sm:$0xff]   ;;  %v12895_v18 = vld [vmem:[%s13546_s23 + $0xe58] ss:$16 sps:$4 sm:$0xff]  }
 0x1c6   : > { %5542 = vmatpush1.bf16.msra.mxu0 %v12828_v5  ;;  %5583 = vmatpush1.bf16.msra.mxu1 %v12831_v37  ;;  %v11155_v5 = vld [vmem:[%s13546_s23 + $0xe00] sm:$0x33]  ;;  %v11156_v37 = vld [vmem:[%s13546_s23 + $0xe08] sm:$0x33] }
 0x1c7   : > { %5543 = vmatprep.subr.bf16.mxu0 %v12836_v55  ;;  %5584 = vmatprep.subr.bf16.mxu1 %v12839_v60  ;;  %v5786_v55 = vmax.f32 %v5785_v7, 0.0  ;;  %v12870_v60 = vld [vmem:[%s13546_s23 + $0xde0] ss:$16 sps:$4 sm:$0xff]   ;;  %v11208_v9 = vcombine.high %v11156_v37, %v11156_v37  ;;  %v11205_v10 = vcombine.low %v11155_v5, %v11155_v5  ;;  %v11207_v11 = vcombine.low %v11156_v37, %v11156_v37  ;;  %v12903_v7 = vld [vmem:[%s13546_s23 + $0xe7c] ss:$16 sps:$4 sm:$0xff]  }
 0x1c8   : > { %v6294_v37 = vrot.slane %v14573_v25, %v13595_v47 }
 0x1c9   : > { %v14558_v12 = vrot.slane %v5786_v55, %v13601_v52 }
 0x1ca   : > { %5544 = vmatpush1.bf16.msra.mxu0 %v12834_v14  ;;  %5585 = vmatpush1.bf16.msra.mxu1 %v12837_v13  ;;  %v11206_v14 = vcombine.high %v11155_v5, %v11155_v5  ;;  %v5522_v13 = vsel %vm848_vm0, %v11205_v10, 0 }
 0x1cb   : > { %5545 = vmatprep.subr.bf16.mxu0 %v12842_v15  ;;  %5586 = vmatprep.subr.bf16.mxu1 %v12845_v54  ;;  %v5528_v15 = vsel %vm848_vm0, %v11207_v11, 0  ;;  %v12882_v54 = vld [vmem:[%s13546_s23 + $0xe14] ss:$16 sps:$4 sm:$0xff]  }
 0x1ce   : > { %5546 = vmatpush1.bf16.msra.mxu0 %v12840_v34  ;;  %5587 = vmatpush1.bf16.msra.mxu1 %v12843_v17  ;;  %v5796_v34 = vcombine.high %v14558_v12, %v14558_v12  ;;  %v5215_v17 = vpack.c.bf16 %v14436_v3, %v14436_v3  ;;  %v6229_v3 = vrot.slane %v14573_v25, %v13583_v40 }
 0x1cf   : > { %5547 = vmatprep.subr.bf16.mxu0 %v12848_v27  ;;  %5588 = vmatprep.subr.bf16.mxu1 %v12851_v28  ;;  %v12891_v27 = vld [vmem:[%s13546_s23 + $0xe3c] ss:$16 sps:$4 sm:$0xff]  }
 0x1d0   : > { %v5800_v28 = vpack.c.bf16 %v5796_v34, %v5796_v34  ;;  %v6239_v30 = vrot.slane %v6229_v3, %v13583_v40  ;;  %v6325_v34 = vrot.slane %v14573_v25, %v13610_v59 }
 0x1d2   : > { %5548 = vmatpush1.bf16.msra.mxu0 %v12846_v24  ;;  %5589 = vmatpush1.bf16.msra.mxu1 %v12849_v8  ;;  %v6259_v24 = vrot.slane %v14573_v25, %v13587_v42  ;;  %v6263_v8 = vrot.slane %v14573_v25, %v13589_v43  ;;  %v6335_v3 = vrot.slane %v6325_v34, %v13603_v53  ;;  %v11263_v34 = vld [vmem:[%s13546_s23 + $0xf90] sm:$0x33] }
 0x1d3   : > { %5549 = vmatprep.subr.bf16.mxu0 %v12854_v23  ;;  %5590 = vmatprep.subr.bf16.mxu1 %v12857_v39 }
 0x1d6   : > { %5550 = vmatpush1.bf16.msra.mxu0 %v12852_v45  ;;  %5591 = vmatpush1.bf16.msra.mxu1 %v12855_v48 }
 0x1d7   : > { %5551 = vmatprep.subr.bf16.mxu0 %v12860_v0  ;;  %5592 = vmatprep.subr.bf16.mxu1 %v12863_v51 }
 0x1da   : > { %5552 = vmatpush1.bf16.msra.mxu0 %v12858_v56  ;;  %5593 = vmatpush1.bf16.msra.mxu1 %v12861_v57  ;;  %v6243_v56 = vrot.slane %v6233_v35, %v13583_v40  ;;  %v12918_v35 = vld [vmem:[%s13546_s23 + $0xed4] ss:$16 sps:$4 sm:$0xff]  }
 0x1db   : > { %5553 = vmatprep.subr.bf16.mxu0 %v12866_v58  ;;  %5594 = vmatprep.subr.bf16.mxu1 %v12869_v29  ;;  %v12900_v29 = vld [vmem:[%s13546_s23 + $0xe74] ss:$16 sps:$4 sm:$0xff]  }
 0x1dc   : > { %v6246_v10 = vcombine.low %v6239_v30, %v6243_v56  ;;  %v12924_v30 = vld [vmem:[%s13546_s23 + $0xef4] ss:$16 sps:$4 sm:$0xff]   ;;  %v12922_v56 = vld [vmem:[%s13546_s23 + $0xef0] ss:$16 sps:$4 sm:$0xff]  }
 0x1de   : > { %5554 = vmatpush1.bf16.msra.mxu0 %v12864_v32  ;;  %5595 = vmatpush1.bf16.msra.mxu1 %v12867_v2  ;;  %v6269_v32 = vrot.slane %v6259_v24, %v13587_v42  ;;  %v6273_v2 = vrot.slane %v6263_v8, %v13587_v42 }
 0x1df   : > { %5555 = vmatprep.subr.bf16.mxu0 %v12872_v1  ;;  %5596 = vmatprep.subr.bf16.mxu1 %v12875_v4  ;;  %v6290_v1 = vrot.slane %v14573_v25, %v13593_v46 }
 0x1e0   : > { %v6276_v11 = vcombine.low %v6269_v32, %v6273_v2 }
 0x1e2   : > { %5556 = vmatpush1.bf16.msra.mxu0 %v12870_v60  ;;  %5597 = vmatpush1.bf16.msra.mxu1 %v12873_v6  ;;  %v12898_v60 = vld [vmem:[%s13546_s23 + $0xe70] ss:$16 sps:$4 sm:$0xff]   ;;  %v12901_v6 = vld [vmem:[%s13546_s23 + $0xe78] ss:$16 sps:$4 sm:$0xff]  }
 0x1e3   : > { %11209 = vmatprep.subr.msk.bf16.mxu0 %vm848_vm0, %v11206_v14  ;;  %11211 = vmatprep.subr.msk.bf16.mxu1 %vm848_vm0, %v11208_v9  ;;  %v12906_v14 = vld [vmem:[%s13546_s23 + $0xe94] ss:$16 sps:$4 sm:$0xff]   ;;  %v12909_v9 = vld [vmem:[%s13546_s23 + $0xe9c] ss:$16 sps:$4 sm:$0xff]  }
 0x1e6   : > { %5558 = vmatpush1.bf16.msra.mxu0 %v5522_v13  ;;  %5599 = vmatpush1.bf16.msra.mxu1 %v5528_v15  ;;  %v6300_v13 = vrot.slane %v6290_v1, %v13593_v46  ;;  %v12928_v1 = vld [vmem:[%s13546_s23 + $0xf10] ss:$16 sps:$4 sm:$0xff]  }
 0x1e7   : > { %6117 = vmatprep.subr.bf16.mxu0 %v12882_v54  ;;  %6158 = vmatprep.subr.bf16.mxu1 %v12885_v16  ;;  %v6304_v54 = vrot.slane %v6294_v37, %v13593_v46  ;;  %v6321_v16 = vrot.slane %v14573_v25, %v13603_v53  ;;  %v12939_v37 = vld [vmem:[%s13546_s23 + $0xf3c] ss:$16 sps:$4 sm:$0xff]  }
 0x1e9   : > { %5566 = vmatmul.mubr.bf16.vlgmr.msra.gmra.mrb[32].mxu0 %v5215_v17  ;;  %5607 = vmatmul.mubr.bf16.vlgmr.msra.gmra.mrb[32].mxu1 %v5215_v17  ;;  %v12904_v17 = vld [vmem:[%s13546_s23 + $0xe90] ss:$16 sps:$4 sm:$0xff]   ;;  %v6331_v25 = vrot.slane %v6321_v16, %v13603_v53  ;;  %v12951_v16 = vld [vmem:[%s13546_s23 + $0xf7c] ss:$16 sps:$4 sm:$0xff]  }
 0x1ea   : > { %6118 = vmatpush1.bf16.msra.mxu0 %v12880_v21  ;;  %6159 = vmatpush1.bf16.msra.mxu1 %v12883_v63  ;;  %v12907_v21 = vld [vmem:[%s13546_s23 + $0xe98] ss:$16 sps:$4 sm:$0xff]   ;;  %v12915_v63 = vld [vmem:[%s13546_s23 + $0xebc] ss:$16 sps:$4 sm:$0xff]  }
 0x1eb   : > { %6119 = vmatprep.subr.bf16.mxu0 %v12888_v26  ;;  %6160 = vmatprep.subr.bf16.mxu1 %v12891_v27  ;;  %v6253_v26 = vrot.slane %v6246_v10, %v13601_v52  ;;  %v6283_v27 = vrot.slane %v6276_v11, %v13601_v52  ;;  %v12940_v11 = vld [vmem:[%s13546_s23 + $0xf50] ss:$16 sps:$4 sm:$0xff]  }
 0x1ec   : > { %v3231_v23 = vpop.f32.mrb[16].mxu0  ;;  %v3272_v39 = vpop.f32.mrb[16].mxu1  ;;  %11318 = vmatprep.mubr.msk.bf16.mxu0 %vm844_vm1, %v5800_v28  ;;  %11320 = vmatprep.mubr.msk.bf16.mxu1 %vm844_vm1, %v5800_v28  ;;  %v6307_v28 = vcombine.low %v6300_v13, %v6304_v54  ;;  %v12943_v13 = vld [vmem:[%s13546_s23 + $0xf58] ss:$16 sps:$4 sm:$0xff]   ;;  %v12948_v54 = vld [vmem:[%s13546_s23 + $0xf74] ss:$16 sps:$4 sm:$0xff]  }
 0x1ed   : > { %v3233_v22 = vpop.f32.mrb[17].mxu0  ;;  %v3274_v44 = vpop.f32.mrb[17].mxu1  ;;  %v6285_v24 = vmul.f32 %v14520_v61, %v6283_v27 }
 0x1ee   : > { %v3283_v45 = vcombine.low %v3231_v23, %v3233_v22  ;;  %v3284_v48 = vcombine.low %v3272_v39, %v3274_v44  ;;  %v3235_v0 = vpop.f32.mrb[18].mxu0  ;;  %v3276_v51 = vpop.f32.mrb[18].mxu1  ;;  %6120 = vmatpush1.bf16.msra.mxu0 %v12886_v31  ;;  %6161 = vmatpush1.bf16.msra.mxu1 %v12889_v33  ;;  %v12910_v31 = vld [vmem:[%s13546_s23 + $0xeb0] ss:$16 sps:$4 sm:$0xff]   ;;  %v12913_v33 = vld [vmem:[%s13546_s23 + $0xeb8] ss:$16 sps:$4 sm:$0xff]   ;;  %v6314_v8 = vrot.slane %v6307_v28, %v13601_v52 }
 0x1ef   : > { %v3236_v57 = vpop.f32.mrb[19].mxu0  ;;  %v3277_v58 = vpop.f32.mrb[19].mxu1  ;;  %6121 = vmatprep.subr.bf16.mxu0 %v12894_v36  ;;  %6162 = vmatprep.subr.bf16.mxu1 %v12897_v38  ;;  %v12921_v36 = vld [vmem:[%s13546_s23 + $0xedc] ss:$16 sps:$4 sm:$0xff]   ;;  %v6255_v38 = vmul.f32 %v14514_v20, %v6253_v26  ;;  %v6338_v23 = vcombine.low %v6331_v25, %v6335_v3  ;;  %v11322_v39 = vld [vmem:[%s13541_s19 + $0x14] sm:$0x3]  ;;  %v11314_v26 = vcombine.high %v11263_v34, %v11263_v34 }
 0x1f0   : > { %v3291_v4 = vrot.slane %v3283_v45, %v13601_v52  ;;  %v3298_v5 = vrot.slane %v3284_v48, %v13601_v52  ;;  %v12916_v22 = vld [vmem:[%s13546_s23 + $0xed0] ss:$16 sps:$4 sm:$0xff]   ;;  %v12919_v44 = vld [vmem:[%s13546_s23 + $0xed8] ss:$16 sps:$4 sm:$0xff]   ;;  %v12927_v45 = vld [vmem:[%s13546_s23 + $0xefc] ss:$16 sps:$4 sm:$0xff]   ;;  %v6355_v48 = vrot.slane %v11322_v39, %v13583_v40  ;;  %v6316_v51 = vmul.f32 %v14530_v49, %v6314_v8 }
 0x1f1   : > { %v6286_v0 = vadd.f32 %v6285_v24, %v6255_v38  ;;  %v12925_v57 = vld [vmem:[%s13546_s23 + $0xef8] ss:$16 sps:$4 sm:$0xff]   ;;  %v12930_v58 = vld [vmem:[%s13546_s23 + $0xf14] ss:$16 sps:$4 sm:$0xff]   ;;  %v11313_v28 = vcombine.low %v11263_v34, %v11263_v34  ;;  %v5799_v24 = vpack.c.bf16 %v14558_v12, %v14558_v12  ;;  %v12956_v8 = vld [vmem:[%s13546_s23 + $0xfa0] ss:$16 sps:$4 sm:$0xff]  }
 0x1f2   : > { %v3299_v55 = vcombine.low %v3291_v4, %v3298_v5  ;;  %6122 = vmatpush1.bf16.msra.mxu0 %v12892_v50  ;;  %6163 = vmatpush1.bf16.msra.mxu1 %v12895_v18  ;;  %v6345_v50 = vrot.slane %v6338_v23, %v13601_v52  ;;  %v6359_v18 = vrot.slane %v11322_v39, %v13587_v42  ;;  %v12931_v4 = vld [vmem:[%s13546_s23 + $0xf18] ss:$16 sps:$4 sm:$0xff]   ;;  %v12936_v5 = vld [vmem:[%s13546_s23 + $0xf34] ss:$16 sps:$4 sm:$0xff]  }
 0x1f3   : > { %6123 = vmatprep.subr.bf16.mxu0 %v12900_v29  ;;  %6164 = vmatprep.subr.bf16.mxu1 %v12903_v7  ;;  %v12933_v29 = vld [vmem:[%s13546_s23 + $0xf1c] ss:$16 sps:$4 sm:$0xff]   ;;  %v6317_v7 = vadd.f32 %v6316_v51, %v6286_v0  ;;  %v12959_v23 = vld [vmem:[%s13546_s23 + $0xfa8] ss:$16 sps:$4 sm:$0xff]   ;;  %v12970_v51 = vld [vmem:[%s13546_s23 + $0xfe4] ss:$16 sps:$4 sm:$0xff]  }
 0x1f4   : > { %v14611_v15 = vadd.f32 %v3299_v55, %v14489_v62  ;;  %v12912_v62 = vld [vmem:[%s13546_s23 + $0xeb4] ss:$16 sps:$4 sm:$0xff]   ;;  %v6347_v32 = vmul.f32 %v14417_v19, %v6345_v50  ;;  %v6360_v2 = vcombine.low %v6355_v48, %v6359_v18  ;;  %v12934_v19 = vld [vmem:[%s13546_s23 + $0xf30] ss:$16 sps:$4 sm:$0xff]   ;;  %v14680_v39 = vld [vmem:[%s13536_s16 + $0x58] sm:$0xff] }
 0x1f5   : > { %v6813_v12 = vrot.slane %v14680_v39, %v13583_v40  ;;  %v12965_v48 = vld [vmem:[%s13546_s23 + $0xfc8] ss:$16 sps:$4 sm:$0xff]   ;;  %v6817_v0 = vrot.slane %v14680_v39, %v13585_v41  ;;  %v12973_v50 = vld [vmem:[%s13546_s23 + $0xfec] ss:$16 sps:$4 sm:$0xff]   ;;  %v6843_v18 = vrot.slane %v14680_v39, %v13587_v42  ;;  %v6878_v34 = vrot.slane %v14680_v39, %v13595_v47 }
 0x1f6   : > { %6124 = vmatpush1.bf16.msra.mxu0 %v12898_v60  ;;  %6165 = vmatpush1.bf16.msra.mxu1 %v12901_v6  ;;  %v6348_v55 = vadd.f32 %v6347_v32, %v6317_v7  ;;  %v6367_v60 = vrot.slane %v6360_v2, %v13601_v52  ;;  %v12937_v6 = vld [vmem:[%s13546_s23 + $0xf38] ss:$16 sps:$4 sm:$0xff]  }
 0x1f7   : > { %6125 = vmatprep.subr.bf16.mxu0 %v12906_v14  ;;  %6166 = vmatprep.subr.bf16.mxu1 %v12909_v9  ;;  %v12942_v14 = vld [vmem:[%s13546_s23 + $0xf54] ss:$16 sps:$4 sm:$0xff]   ;;  %v12945_v9 = vld [vmem:[%s13546_s23 + $0xf5c] ss:$16 sps:$4 sm:$0xff]   ;;  %v6823_v32 = vrot.slane %v6813_v12, %v13583_v40  ;;  %v12986_v12 = vld [vmem:[%s13546_s23 + $0x1040] ss:$16 sps:$4 sm:$0xff]  }
 0x1f8   : > { %v6369_v10 = vadd.f32 %v6367_v60, %v6348_v55  ;;  %v12971_v55 = vld [vmem:[%s13546_s23 + $0xfe8] ss:$16 sps:$4 sm:$0xff]   ;;  %v6827_v60 = vrot.slane %v6817_v0, %v13583_v40  ;;  %v12997_v0 = vld [vmem:[%s13546_s23 + $0x106c] ss:$16 sps:$4 sm:$0xff]  }
 0x1fa   : > { %6126 = vmatpush1.bf16.msra.mxu0 %v12904_v17  ;;  %6167 = vmatpush1.bf16.msra.mxu1 %v12907_v21  ;;  %v11264_v17 = vld [vmem:[%s13546_s23 + $0xf98] sm:$0x33]  ;;  %v6370_v21 = vmax.f32 %v6369_v10, 0.0  ;;  %v6853_v10 = vrot.slane %v6843_v18, %v13587_v42 }
 0x1fb   : > { %6127 = vmatprep.subr.bf16.mxu0 %v12912_v62  ;;  %6168 = vmatprep.subr.bf16.mxu1 %v12915_v63  ;;  %v12946_v62 = vld [vmem:[%s13546_s23 + $0xf70] ss:$16 sps:$4 sm:$0xff]   ;;  %v12949_v63 = vld [vmem:[%s13546_s23 + $0xf78] ss:$16 sps:$4 sm:$0xff]   ;;  %v11316_v27 = vcombine.high %v11264_v17, %v11264_v17  ;;  %v11315_v25 = vcombine.low %v11264_v17, %v11264_v17 }
 0x1fc   : > { %v14665_v3 = vrot.slane %v6370_v21, %v13601_v52  ;;  %v12974_v21 = vld [vmem:[%s13546_s23 + $0x1000] ss:$16 sps:$4 sm:$0xff]  }
 0x1fe   : > { %6128 = vmatpush1.bf16.msra.mxu0 %v12910_v31  ;;  %6169 = vmatpush1.bf16.msra.mxu1 %v12913_v33  ;;  %v6106_v31 = vsel %vm848_vm0, %v11313_v28, 0  ;;  %v6112_v33 = vsel %vm848_vm0, %v11315_v25, 0  ;;  %v6380_v38 = vcombine.high %v14665_v3, %v14665_v3 }
 0x1ff   : > { %6129 = vmatprep.subr.bf16.mxu0 %v12918_v35  ;;  %6170 = vmatprep.subr.bf16.mxu1 %v12921_v36  ;;  %v12958_v35 = vld [vmem:[%s13546_s23 + $0xfa4] ss:$16 sps:$4 sm:$0xff]   ;;  %v12961_v36 = vld [vmem:[%s13546_s23 + $0xfac] ss:$16 sps:$4 sm:$0xff]  }
 0x202   : > { %6130 = vmatpush1.bf16.msra.mxu0 %v12916_v22  ;;  %6171 = vmatpush1.bf16.msra.mxu1 %v12919_v44  ;;  %v12964_v22 = vld [vmem:[%s13546_s23 + $0xfc4] ss:$16 sps:$4 sm:$0xff]   ;;  %v12967_v44 = vld [vmem:[%s13546_s23 + $0xfcc] ss:$16 sps:$4 sm:$0xff]  }
 0x203   : > { %6131 = vmatprep.subr.bf16.mxu0 %v12924_v30  ;;  %6172 = vmatprep.subr.bf16.mxu1 %v12927_v45  ;;  %v6384_v30 = vpack.c.bf16 %v6380_v38, %v6380_v38  ;;  %v12962_v45 = vld [vmem:[%s13546_s23 + $0xfc0] ss:$16 sps:$4 sm:$0xff]  }
 0x204   : > { %v12980_v38 = vld [vmem:[%s13546_s23 + $0x1020] ss:$16 sps:$4 sm:$0xff]  }
 0x206   : > { %6132 = vmatpush1.bf16.msra.mxu0 %v12922_v56  ;;  %6173 = vmatpush1.bf16.msra.mxu1 %v12925_v57  ;;  %v6847_v56 = vrot.slane %v14680_v39, %v13589_v43 }
 0x207   : > { %6133 = vmatprep.subr.bf16.mxu0 %v12930_v58  ;;  %6174 = vmatprep.subr.bf16.mxu1 %v12933_v29 }
 0x20a   : > { %6134 = vmatpush1.bf16.msra.mxu0 %v12928_v1  ;;  %6175 = vmatpush1.bf16.msra.mxu1 %v12931_v4 }
 0x20b   : > { %6135 = vmatprep.subr.bf16.mxu0 %v12936_v5  ;;  %6176 = vmatprep.subr.bf16.mxu1 %v12939_v37  ;;  %v12968_v37 = vld [vmem:[%s13546_s23 + $0xfe0] ss:$16 sps:$4 sm:$0xff]  }
 0x20e   : > { %6136 = vmatpush1.bf16.msra.mxu0 %v12934_v19  ;;  %6177 = vmatpush1.bf16.msra.mxu1 %v12937_v6 }
 0x20f   : > { %6137 = vmatprep.subr.bf16.mxu0 %v12942_v14  ;;  %6178 = vmatprep.subr.bf16.mxu1 %v12945_v9  ;;  %v12976_v14 = vld [vmem:[%s13546_s23 + $0x1004] ss:$16 sps:$4 sm:$0xff]   ;;  %v12979_v9 = vld [vmem:[%s13546_s23 + $0x100c] ss:$16 sps:$4 sm:$0xff]  }
 0x212   : > { %6138 = vmatpush1.bf16.msra.mxu0 %v12940_v11  ;;  %6179 = vmatpush1.bf16.msra.mxu1 %v12943_v13  ;;  %v6857_v11 = vrot.slane %v6847_v56, %v13587_v42  ;;  %v6874_v13 = vrot.slane %v14680_v39, %v13593_v46 }
 0x213   : > { %6139 = vmatprep.subr.bf16.mxu0 %v12948_v54  ;;  %6180 = vmatprep.subr.bf16.mxu1 %v12951_v16 }
 0x214   : > { %v6860_v28 = vcombine.low %v6853_v10, %v6857_v11  ;;  %v6884_v25 = vrot.slane %v6874_v13, %v13593_v46  ;;  %v13004_v10 = vld [vmem:[%s13546_s23 + $0x10a0] ss:$16 sps:$4 sm:$0xff]   ;;  %v13007_v11 = vld [vmem:[%s13546_s23 + $0x10a8] ss:$16 sps:$4 sm:$0xff]   ;;  %v13012_v13 = vld [vmem:[%s13546_s23 + $0x10c4] ss:$16 sps:$4 sm:$0xff]  }
 0x216   : > { %6140 = vmatpush1.bf16.msra.mxu0 %v12946_v62  ;;  %6181 = vmatpush1.bf16.msra.mxu1 %v12949_v63  ;;  %v12977_v62 = vld [vmem:[%s13546_s23 + $0x1008] ss:$16 sps:$4 sm:$0xff]   ;;  %v12982_v63 = vld [vmem:[%s13546_s23 + $0x1024] ss:$16 sps:$4 sm:$0xff]  }
 0x217   : > { %11317 = vmatprep.subr.msk.bf16.mxu0 %vm848_vm0, %v11314_v26  ;;  %11319 = vmatprep.subr.msk.bf16.mxu1 %vm848_vm0, %v11316_v27  ;;  %v12985_v26 = vld [vmem:[%s13546_s23 + $0x102c] ss:$16 sps:$4 sm:$0xff]   ;;  %v6830_v27 = vcombine.low %v6823_v32, %v6827_v60 }
 0x218   : > { %v13003_v32 = vld [vmem:[%s13546_s23 + $0x108c] ss:$16 sps:$4 sm:$0xff]  }
 0x219   : > { %v13009_v60 = vld [vmem:[%s13546_s23 + $0x10ac] ss:$16 sps:$4 sm:$0xff]  }
 0x21a   : > { %6142 = vmatpush1.bf16.msra.mxu0 %v6106_v31  ;;  %6183 = vmatpush1.bf16.msra.mxu1 %v6112_v33  ;;  %v6888_v33 = vrot.slane %v6878_v34, %v13593_v46 }
 0x21b   : > { %6701 = vmatprep.subr.bf16.mxu0 %v12958_v35  ;;  %6742 = vmatprep.subr.bf16.mxu1 %v12961_v36  ;;  %v6905_v35 = vrot.slane %v14680_v39, %v13603_v53  ;;  %v6909_v36 = vrot.slane %v14680_v39, %v13610_v59 }
 0x21d   : > { %6150 = vmatmul.mubr.bf16.vlgmr.msra.gmra.mrb[36].mxu0 %v5799_v24  ;;  %6191 = vmatmul.mubr.bf16.vlgmr.msra.gmra.mrb[36].mxu1 %v5799_v24  ;;  %v12983_v24 = vld [vmem:[%s13546_s23 + $0x1028] ss:$16 sps:$4 sm:$0xff]   ;;  %v6915_v39 = vrot.slane %v6905_v35, %v13603_v53  ;;  %v11371_v35 = vld [vmem:[%s13546_s23 + $0x1120] sm:$0x33] }
 0x21e   : > { %6702 = vmatpush1.bf16.msra.mxu0 %v12956_v8  ;;  %6743 = vmatpush1.bf16.msra.mxu1 %v12959_v23  ;;  %v12991_v8 = vld [vmem:[%s13546_s23 + $0x104c] ss:$16 sps:$4 sm:$0xff]   ;;  %v6837_v23 = vrot.slane %v6830_v27, %v13601_v52  ;;  %v13016_v27 = vld [vmem:[%s13546_s23 + $0x10e0] ss:$16 sps:$4 sm:$0xff]  }
 0x21f   : > { %6703 = vmatprep.subr.bf16.mxu0 %v12964_v22  ;;  %6744 = vmatprep.subr.bf16.mxu1 %v12967_v44  ;;  %v6867_v22 = vrot.slane %v6860_v28, %v13601_v52  ;;  %v6891_v44 = vcombine.low %v6884_v25, %v6888_v33  ;;  %v13019_v28 = vld [vmem:[%s13546_s23 + $0x10e8] ss:$16 sps:$4 sm:$0xff]   ;;  %v13024_v25 = vld [vmem:[%s13546_s23 + $0x1104] ss:$16 sps:$4 sm:$0xff]   ;;  %v13027_v33 = vld [vmem:[%s13546_s23 + $0x110c] ss:$16 sps:$4 sm:$0xff]  }
 0x220   : > { %v3815_v57 = vpop.f32.mrb[20].mxu0  ;;  %v3856_v58 = vpop.f32.mrb[20].mxu1  ;;  %11426 = vmatprep.mubr.msk.bf16.mxu0 %vm844_vm1, %v6384_v30  ;;  %11428 = vmatprep.mubr.msk.bf16.mxu1 %vm844_vm1, %v6384_v30  ;;  %v6919_v30 = vrot.slane %v6909_v36, %v13603_v53  ;;  %v11372_v36 = vld [vmem:[%s13546_s23 + $0x1128] sm:$0x33] }
 0x221   : > { %v3817_v29 = vpop.f32.mrb[21].mxu0  ;;  %v3858_v7 = vpop.f32.mrb[21].mxu1  ;;  %v6898_v18 = vrot.slane %v6891_v44, %v13601_v52  ;;  %v11423_v44 = vcombine.low %v11372_v36, %v11372_v36 }
 0x222   : > { %v3867_v2 = vcombine.low %v3815_v57, %v3817_v29  ;;  %v3868_v1 = vcombine.low %v3856_v58, %v3858_v7  ;;  %v3819_v4 = vpop.f32.mrb[22].mxu0  ;;  %v3860_v5 = vpop.f32.mrb[22].mxu1  ;;  %6704 = vmatpush1.bf16.msra.mxu0 %v12962_v45  ;;  %6745 = vmatpush1.bf16.msra.mxu1 %v12965_v48  ;;  %v12989_v45 = vld [vmem:[%s13546_s23 + $0x1048] ss:$16 sps:$4 sm:$0xff]   ;;  %v12994_v48 = vld [vmem:[%s13546_s23 + $0x1064] ss:$16 sps:$4 sm:$0xff]   ;;  %v6922_v56 = vcombine.low %v6915_v39, %v6919_v30 }
 0x223   : > { %v3820_v19 = vpop.f32.mrb[23].mxu0  ;;  %v3861_v6 = vpop.f32.mrb[23].mxu1  ;;  %6705 = vmatprep.subr.bf16.mxu0 %v12970_v51  ;;  %6746 = vmatprep.subr.bf16.mxu1 %v12973_v50  ;;  %v6839_v51 = vmul.f32 %v14514_v20, %v6837_v23  ;;  %v6869_v50 = vmul.f32 %v14520_v61, %v6867_v22  ;;  %v11430_v57 = vld [vmem:[%s13541_s19 + $0x16] sm:$0x3]  ;;  %v12992_v58 = vld [vmem:[%s13546_s23 + $0x1060] ss:$16 sps:$4 sm:$0xff]   ;;  %v6900_v61 = vmul.f32 %v14530_v49, %v6898_v18 }
 0x224   : > { %v3875_v54 = vrot.slane %v3867_v2, %v13601_v52  ;;  %v3882_v16 = vrot.slane %v3868_v1, %v13601_v52  ;;  %v12995_v29 = vld [vmem:[%s13546_s23 + $0x1068] ss:$16 sps:$4 sm:$0xff]   ;;  %v13000_v7 = vld [vmem:[%s13546_s23 + $0x1084] ss:$16 sps:$4 sm:$0xff]   ;;  %v6939_v20 = vrot.slane %v11430_v57, %v13583_v40  ;;  %v6929_v1 = vrot.slane %v6922_v56, %v13601_v52  ;;  %v12998_v5 = vld [vmem:[%s13546_s23 + $0x1080] ss:$16 sps:$4 sm:$0xff]  }
 0x225   : > { %v6870_v2 = vadd.f32 %v6869_v50, %v6839_v51  ;;  %v6943_v4 = vrot.slane %v11430_v57, %v13587_v42  ;;  %v14756_v6 = vld [vmem:[%s15834_s0 + $0xc] sm:$0xf]  ;;  %v11424_v23 = vcombine.high %v11372_v36, %v11372_v36  ;;  %v11421_v22 = vcombine.low %v11371_v35, %v11371_v35  ;;  %v13032_v50 = vld [vmem:[%s13546_s23 + $0x1130] ss:$16 sps:$4 sm:$0xff]   ;;  %v13035_v18 = vld [vmem:[%s13546_s23 + $0x1138] ss:$16 sps:$4 sm:$0xff]  }
 0x226   : > { %v3883_v17 = vcombine.low %v3875_v54, %v3882_v16  ;;  %6706 = vmatpush1.bf16.msra.mxu0 %v12968_v37  ;;  %6747 = vmatpush1.bf16.msra.mxu1 %v12971_v55  ;;  %v13001_v37 = vld [vmem:[%s13546_s23 + $0x1088] ss:$16 sps:$4 sm:$0xff]   ;;  %v13006_v55 = vld [vmem:[%s13546_s23 + $0x10a4] ss:$16 sps:$4 sm:$0xff]   ;;  %v13015_v54 = vld [vmem:[%s13546_s23 + $0x10cc] ss:$16 sps:$4 sm:$0xff]   ;;  %v6383_v51 = vpack.c.bf16 %v14665_v3, %v14665_v3 }
 0x227   : > { %6707 = vmatprep.subr.bf16.mxu0 %v12976_v14  ;;  %6748 = vmatprep.subr.bf16.mxu1 %v12979_v9  ;;  %v6901_v19 = vadd.f32 %v6900_v61, %v6870_v2  ;;  %v6931_v14 = vmul.f32 %v14756_v6, %v6929_v1  ;;  %v6944_v9 = vcombine.low %v6939_v20, %v6943_v4  ;;  %v6690_v30 = vsel %vm848_vm0, %v11421_v22, 0  ;;  %v14792_v56 = vld [vmem:[%s13536_s16 + $0x60] sm:$0xff]  ;;  %v13049_v61 = vld [vmem:[%s13546_s23 + $0x117c] ss:$16 sps:$4 sm:$0xff]  }
 0x228   : > { %v14718_v31 = vadd.f32 %v3883_v17, %v14611_v15  ;;  %v12988_v15 = vld [vmem:[%s13546_s23 + $0x1044] ss:$16 sps:$4 sm:$0xff]   ;;  %v13010_v17 = vld [vmem:[%s13546_s23 + $0x10c0] ss:$16 sps:$4 sm:$0xff]   ;;  %v7397_v3 = vrot.slane %v14792_v56, %v13583_v40  ;;  %v7401_v20 = vrot.slane %v14792_v56, %v13585_v41  ;;  %v7427_v1 = vrot.slane %v14792_v56, %v13587_v42 }
 0x229   : > { %v6932_v16 = vadd.f32 %v6931_v14, %v6901_v19  ;;  %v6951_v34 = vrot.slane %v6944_v9, %v13601_v52  ;;  %v13040_v57 = vld [vmem:[%s13546_s23 + $0x1154] ss:$16 sps:$4 sm:$0xff]   ;;  %v7431_v4 = vrot.slane %v14792_v56, %v13589_v43  ;;  %v13050_v36 = vld [vmem:[%s13546_s23 + $0x1190] ss:$16 sps:$4 sm:$0xff]  }
 0x22a   : > { %6708 = vmatpush1.bf16.msra.mxu0 %v12974_v21  ;;  %6749 = vmatpush1.bf16.msra.mxu1 %v12977_v62  ;;  %v13013_v21 = vld [vmem:[%s13546_s23 + $0x10c8] ss:$16 sps:$4 sm:$0xff]   ;;  %v13018_v62 = vld [vmem:[%s13546_s23 + $0x10e4] ss:$16 sps:$4 sm:$0xff]   ;;  %v7407_v19 = vrot.slane %v7397_v3, %v13583_v40 }
 0x22b   : > { %6709 = vmatprep.subr.bf16.mxu0 %v12982_v63  ;;  %6750 = vmatprep.subr.bf16.mxu1 %v12985_v26  ;;  %v13021_v63 = vld [vmem:[%s13546_s23 + $0x10ec] ss:$16 sps:$4 sm:$0xff]   ;;  %v6953_v26 = vadd.f32 %v6951_v34, %v6932_v16  ;;  %v13046_v2 = vld [vmem:[%s13546_s23 + $0x1174] ss:$16 sps:$4 sm:$0xff]   ;;  %v7411_v16 = vrot.slane %v7401_v20, %v13583_v40  ;;  %v13065_v3 = vld [vmem:[%s13546_s23 + $0x11d8] ss:$16 sps:$4 sm:$0xff]  }
 0x22c   : > { %v14852_v20 = vld [vmem:[%s15834_s0] sm:$0xf] }
 0x22e   : > { %6710 = vmatpush1.bf16.msra.mxu0 %v12980_v38  ;;  %6751 = vmatpush1.bf16.msra.mxu1 %v12983_v24  ;;  %v6954_v38 = vmax.f32 %v6953_v26, 0.0  ;;  %v13022_v24 = vld [vmem:[%s13546_s23 + $0x1100] ss:$16 sps:$4 sm:$0xff]   ;;  %v7441_v26 = vrot.slane %v7431_v4, %v13587_v42 }
 0x22f   : > { %6711 = vmatprep.subr.bf16.mxu0 %v12988_v15  ;;  %6752 = vmatprep.subr.bf16.mxu1 %v12991_v8  ;;  %v13025_v15 = vld [vmem:[%s13546_s23 + $0x1108] ss:$16 sps:$4 sm:$0xff]   ;;  %v11422_v8 = vcombine.high %v11371_v35, %v11371_v35 }
 0x230   : > { %v14777_v39 = vrot.slane %v6954_v38, %v13601_v52  ;;  %v13053_v38 = vld [vmem:[%s13546_s23 + $0x1198] ss:$16 sps:$4 sm:$0xff]  }
 0x232   : > { %6712 = vmatpush1.bf16.msra.mxu0 %v12986_v12  ;;  %6753 = vmatpush1.bf16.msra.mxu1 %v12989_v45  ;;  %v6696_v12 = vsel %vm848_vm0, %v11423_v44, 0  ;;  %v13034_v45 = vld [vmem:[%s13546_s23 + $0x1134] ss:$16 sps:$4 sm:$0xff]  }
 0x233   : > { %6713 = vmatprep.subr.bf16.mxu0 %v12994_v48  ;;  %6754 = vmatprep.subr.bf16.mxu1 %v12997_v0  ;;  %v13037_v48 = vld [vmem:[%s13546_s23 + $0x113c] ss:$16 sps:$4 sm:$0xff]   ;;  %v6964_v0 = vcombine.high %v14777_v39, %v14777_v39 }
 0x236   : > { %6714 = vmatpush1.bf16.msra.mxu0 %v12992_v58  ;;  %6755 = vmatpush1.bf16.msra.mxu1 %v12995_v29  ;;  %v13043_v58 = vld [vmem:[%s13546_s23 + $0x115c] ss:$16 sps:$4 sm:$0xff]   ;;  %v6968_v29 = vpack.c.bf16 %v6964_v0, %v6964_v0  ;;  %v13059_v0 = vld [vmem:[%s13546_s23 + $0x11b8] ss:$16 sps:$4 sm:$0xff]  }
 0x237   : > { %6715 = vmatprep.subr.bf16.mxu0 %v13000_v7  ;;  %6756 = vmatprep.subr.bf16.mxu1 %v13003_v32  ;;  %v13038_v7 = vld [vmem:[%s13546_s23 + $0x1150] ss:$16 sps:$4 sm:$0xff]   ;;  %v13041_v32 = vld [vmem:[%s13546_s23 + $0x1158] ss:$16 sps:$4 sm:$0xff]  }
 0x23a   : > { %6716 = vmatpush1.bf16.msra.mxu0 %v12998_v5  ;;  %6757 = vmatpush1.bf16.msra.mxu1 %v13001_v37 }
 0x23b   : > { %6717 = vmatprep.subr.bf16.mxu0 %v13006_v55  ;;  %6758 = vmatprep.subr.bf16.mxu1 %v13009_v60 }
 0x23e   : > { %6718 = vmatpush1.bf16.msra.mxu0 %v13004_v10  ;;  %6759 = vmatpush1.bf16.msra.mxu1 %v13007_v11 }
 0x23f   : > { %6719 = vmatprep.subr.bf16.mxu0 %v13012_v13  ;;  %6760 = vmatprep.subr.bf16.mxu1 %v13015_v54  ;;  %v13044_v13 = vld [vmem:[%s13546_s23 + $0x1170] ss:$16 sps:$4 sm:$0xff]   ;;  %v13047_v54 = vld [vmem:[%s13546_s23 + $0x1178] ss:$16 sps:$4 sm:$0xff]  }
 0x242   : > { %6720 = vmatpush1.bf16.msra.mxu0 %v13010_v17  ;;  %6761 = vmatpush1.bf16.msra.mxu1 %v13013_v21  ;;  %v13052_v21 = vld [vmem:[%s13546_s23 + $0x1194] ss:$16 sps:$4 sm:$0xff]  }
 0x243   : > { %6721 = vmatprep.subr.bf16.mxu0 %v13018_v62  ;;  %6762 = vmatprep.subr.bf16.mxu1 %v13021_v63  ;;  %v13055_v62 = vld [vmem:[%s13546_s23 + $0x119c] ss:$16 sps:$4 sm:$0xff]   ;;  %v7437_v63 = vrot.slane %v7427_v1, %v13587_v42 }
 0x246   : > { %6722 = vmatpush1.bf16.msra.mxu0 %v13016_v27  ;;  %6763 = vmatpush1.bf16.msra.mxu1 %v13019_v28  ;;  %v7458_v27 = vrot.slane %v14792_v56, %v13593_v46 }
 0x247   : > { %6723 = vmatprep.subr.bf16.mxu0 %v13024_v25  ;;  %6764 = vmatprep.subr.bf16.mxu1 %v13027_v33  ;;  %v7462_v33 = vrot.slane %v14792_v56, %v13595_v47 }
 0x248   : > { %v7468_v22 = vrot.slane %v7458_v27, %v13593_v46  ;;  %v13083_v27 = vld [vmem:[%s13546_s23 + $0x1238] ss:$16 sps:$4 sm:$0xff]  }
 0x24a   : > { %6724 = vmatpush1.bf16.msra.mxu0 %v13022_v24  ;;  %6765 = vmatpush1.bf16.msra.mxu1 %v13025_v15  ;;  %v13058_v24 = vld [vmem:[%s13546_s23 + $0x11b4] ss:$16 sps:$4 sm:$0xff]   ;;  %v13061_v15 = vld [vmem:[%s13546_s23 + $0x11bc] ss:$16 sps:$4 sm:$0xff]  }
 0x24b   : > { %11425 = vmatprep.subr.msk.bf16.mxu0 %vm848_vm0, %v11422_v8  ;;  %11427 = vmatprep.subr.msk.bf16.mxu1 %vm848_vm0, %v11424_v23  ;;  %v7414_v8 = vcombine.low %v7407_v19, %v7411_v16  ;;  %v7444_v23 = vcombine.low %v7437_v63, %v7441_v26  ;;  %v13076_v19 = vld [vmem:[%s13546_s23 + $0x1214] ss:$16 sps:$4 sm:$0xff]   ;;  %v13074_v16 = vld [vmem:[%s13546_s23 + $0x1210] ss:$16 sps:$4 sm:$0xff]  }
 0x24c   : > { %v13080_v26 = vld [vmem:[%s13546_s23 + $0x1230] ss:$16 sps:$4 sm:$0xff]  }
 0x24e   : > { %6726 = vmatpush1.bf16.msra.mxu0 %v6690_v30  ;;  %6767 = vmatpush1.bf16.msra.mxu1 %v6696_v12  ;;  %v7472_v30 = vrot.slane %v7462_v33, %v13593_v46  ;;  %v7489_v12 = vrot.slane %v14792_v56, %v13603_v53 }
 0x24f   : > { %7285 = vmatprep.subr.bf16.mxu0 %v13034_v45  ;;  %7326 = vmatprep.subr.bf16.mxu1 %v13037_v48  ;;  %v7493_v45 = vrot.slane %v14792_v56, %v13610_v59  ;;  %v13056_v48 = vld [vmem:[%s13546_s23 + $0x11b0] ss:$16 sps:$4 sm:$0xff]  }
 0x251   : > { %6734 = vmatmul.mubr.bf16.vlgmr.msra.gmra.mrb[40].mxu0 %v6383_v51  ;;  %6775 = vmatmul.mubr.bf16.vlgmr.msra.gmra.mrb[40].mxu1 %v6383_v51  ;;  %v13067_v51 = vld [vmem:[%s13546_s23 + $0x11dc] ss:$16 sps:$4 sm:$0xff]   ;;  %v7503_v56 = vrot.slane %v7493_v45, %v13603_v53  ;;  %v11479_v45 = vld [vmem:[%s13546_s23 + $0x12b0] sm:$0x33] }
 0x252   : > { %7286 = vmatpush1.bf16.msra.mxu0 %v13032_v50  ;;  %7327 = vmatpush1.bf16.msra.mxu1 %v13035_v18  ;;  %v7421_v50 = vrot.slane %v7414_v8, %v13601_v52  ;;  %v7451_v18 = vrot.slane %v7444_v23, %v13601_v52  ;;  %v13092_v23 = vld [vmem:[%s13546_s23 + $0x1270] ss:$16 sps:$4 sm:$0xff]  }
 0x253   : > { %7287 = vmatprep.subr.bf16.mxu0 %v13040_v57  ;;  %7328 = vmatprep.subr.bf16.mxu1 %v13043_v58  ;;  %v7475_v57 = vcombine.low %v7468_v22, %v7472_v30  ;;  %v7499_v58 = vrot.slane %v7489_v12, %v13603_v53  ;;  %v13095_v22 = vld [vmem:[%s13546_s23 + $0x1278] ss:$16 sps:$4 sm:$0xff]   ;;  %v13100_v30 = vld [vmem:[%s13546_s23 + $0x1294] ss:$16 sps:$4 sm:$0xff]   ;;  %v13103_v12 = vld [vmem:[%s13546_s23 + $0x129c] ss:$16 sps:$4 sm:$0xff]  }
 0x254   : > { %v4399_v5 = vpop.f32.mrb[24].mxu0  ;;  %v4440_v37 = vpop.f32.mrb[24].mxu1  ;;  %11534 = vmatprep.mubr.msk.bf16.mxu0 %vm844_vm1, %v6968_v29  ;;  %11536 = vmatprep.mubr.msk.bf16.mxu1 %vm844_vm1, %v6968_v29  ;;  %v13062_v29 = vld [vmem:[%s13546_s23 + $0x11d0] ss:$16 sps:$4 sm:$0xff]  }
 0x255   : > { %v4401_v55 = vpop.f32.mrb[25].mxu0  ;;  %v4442_v60 = vpop.f32.mrb[25].mxu1  ;;  %v7482_v4 = vrot.slane %v7475_v57, %v13601_v52  ;;  %v11529_v57 = vcombine.low %v11479_v45, %v11479_v45 }
 0x256   : > { %v4451_v14 = vcombine.low %v4399_v5, %v4401_v55  ;;  %v4452_v9 = vcombine.low %v4440_v37, %v4442_v60  ;;  %v4403_v10 = vpop.f32.mrb[26].mxu0  ;;  %v4444_v11 = vpop.f32.mrb[26].mxu1  ;;  %7288 = vmatpush1.bf16.msra.mxu0 %v13038_v7  ;;  %7329 = vmatpush1.bf16.msra.mxu1 %v13041_v32  ;;  %v13070_v7 = vld [vmem:[%s13546_s23 + $0x11f4] ss:$16 sps:$4 sm:$0xff]   ;;  %v13073_v32 = vld [vmem:[%s13546_s23 + $0x11fc] ss:$16 sps:$4 sm:$0xff]   ;;  %v7506_v5 = vcombine.low %v7499_v58, %v7503_v56 }
 0x257   : > { %v4404_v34 = vpop.f32.mrb[27].mxu0  ;;  %v4445_v17 = vpop.f32.mrb[27].mxu1  ;;  %7289 = vmatprep.subr.bf16.mxu0 %v13046_v2  ;;  %7330 = vmatprep.subr.bf16.mxu1 %v13049_v61  ;;  %v7423_v2 = vmul.f32 %v14852_v20, %v7421_v50  ;;  %v14858_v61 = vld [vmem:[%s15834_s0 + $0x4] sm:$0xf]  ;;  %v11538_v37 = vld [vmem:[%s13541_s19 + $0x18] sm:$0x3]  ;;  %v7484_v11 = vmul.f32 %v14530_v49, %v7482_v4  ;;  %v11530_v50 = vcombine.high %v11479_v45, %v11479_v45 }
 0x258   : > { %v4459_v28 = vrot.slane %v4451_v14, %v13601_v52  ;;  %v4466_v25 = vrot.slane %v4452_v9, %v13601_v52  ;;  %v7453_v1 = vmul.f32 %v14858_v61, %v7451_v18  ;;  %v13068_v55 = vld [vmem:[%s13546_s23 + $0x11f0] ss:$16 sps:$4 sm:$0xff]   ;;  %v13071_v60 = vld [vmem:[%s13546_s23 + $0x11f8] ss:$16 sps:$4 sm:$0xff]   ;;  %v13079_v14 = vld [vmem:[%s13546_s23 + $0x121c] ss:$16 sps:$4 sm:$0xff]   ;;  %v7523_v9 = vrot.slane %v11538_v37, %v13583_v40 }
 0x259   : > { %v13077_v34 = vld [vmem:[%s13546_s23 + $0x1218] ss:$16 sps:$4 sm:$0xff]   ;;  %v13082_v17 = vld [vmem:[%s13546_s23 + $0x1234] ss:$16 sps:$4 sm:$0xff]   ;;  %v13108_v4 = vld [vmem:[%s13546_s23 + $0x12c0] ss:$16 sps:$4 sm:$0xff]  }
 0x25a   : > { %v4467_v35 = vcombine.low %v4459_v28, %v4466_v25  ;;  %7290 = vmatpush1.bf16.msra.mxu0 %v13044_v13  ;;  %7331 = vmatpush1.bf16.msra.mxu1 %v13047_v54  ;;  %v7454_v10 = vadd.f32 %v7453_v1, %v7423_v2  ;;  %v7513_v13 = vrot.slane %v7506_v5, %v13601_v52  ;;  %v13088_v28 = vld [vmem:[%s13546_s23 + $0x1254] ss:$16 sps:$4 sm:$0xff]   ;;  %v13091_v25 = vld [vmem:[%s13546_s23 + $0x125c] ss:$16 sps:$4 sm:$0xff]   ;;  %v13111_v5 = vld [vmem:[%s13546_s23 + $0x12c8] ss:$16 sps:$4 sm:$0xff]  }
 0x25b   : > { %7291 = vmatprep.subr.bf16.mxu0 %v13052_v21  ;;  %7332 = vmatprep.subr.bf16.mxu1 %v13055_v62  ;;  %v7527_v54 = vrot.slane %v11538_v37, %v13587_v42  ;;  %v13085_v21 = vld [vmem:[%s13546_s23 + $0x123c] ss:$16 sps:$4 sm:$0xff]   ;;  %v6967_v1 = vpack.c.bf16 %v14777_v39, %v14777_v39 }
 0x25c   : > { %v14830_v44 = vadd.f32 %v4467_v35, %v14718_v31  ;;  %v13064_v31 = vld [vmem:[%s13546_s23 + $0x11d4] ss:$16 sps:$4 sm:$0xff]   ;;  %v7485_v62 = vadd.f32 %v7484_v11, %v7454_v10  ;;  %v7515_v49 = vmul.f32 %v14756_v6, %v7513_v13  ;;  %v14909_v37 = vld [vmem:[%s13536_s16 + $0x68] sm:$0xff] }
 0x25d   : > { %v7528_v63 = vcombine.low %v7523_v9, %v7527_v54  ;;  %v7981_v39 = vrot.slane %v14909_v37, %v13583_v40  ;;  %v13117_v9 = vld [vmem:[%s13546_s23 + $0x12e8] ss:$16 sps:$4 sm:$0xff]   ;;  %v7985_v10 = vrot.slane %v14909_v37, %v13585_v41  ;;  %v13122_v11 = vld [vmem:[%s13546_s23 + $0x1304] ss:$16 sps:$4 sm:$0xff]   ;;  %v13125_v13 = vld [vmem:[%s13546_s23 + $0x130c] ss:$16 sps:$4 sm:$0xff]   ;;  %v8011_v54 = vrot.slane %v14909_v37, %v13587_v42 }
 0x25e   : > { %7292 = vmatpush1.bf16.msra.mxu0 %v13050_v36  ;;  %7333 = vmatpush1.bf16.msra.mxu1 %v13053_v38  ;;  %v7516_v33 = vadd.f32 %v7515_v49, %v7485_v62  ;;  %v13086_v36 = vld [vmem:[%s13546_s23 + $0x1250] ss:$16 sps:$4 sm:$0xff]   ;;  %v13089_v38 = vld [vmem:[%s13546_s23 + $0x1258] ss:$16 sps:$4 sm:$0xff]   ;;  %v8046_v45 = vrot.slane %v14909_v37, %v13595_v47 }
 0x25f   : > { %7293 = vmatprep.subr.bf16.mxu0 %v13058_v24  ;;  %7334 = vmatprep.subr.bf16.mxu1 %v13061_v15  ;;  %v7535_v35 = vrot.slane %v7528_v63, %v13601_v52  ;;  %v13094_v24 = vld [vmem:[%s13546_s23 + $0x1274] ss:$16 sps:$4 sm:$0xff]   ;;  %v13097_v15 = vld [vmem:[%s13546_s23 + $0x127c] ss:$16 sps:$4 sm:$0xff]   ;;  %v7991_v49 = vrot.slane %v7981_v39, %v13583_v40  ;;  %v13138_v39 = vld [vmem:[%s13546_s23 + $0x1360] ss:$16 sps:$4 sm:$0xff]  }
 0x261   : > { %v7537_v8 = vadd.f32 %v7535_v35, %v7516_v33  ;;  %v13123_v33 = vld [vmem:[%s13546_s23 + $0x1308] ss:$16 sps:$4 sm:$0xff]   ;;  %v7995_v35 = vrot.slane %v7985_v10, %v13583_v40  ;;  %v13149_v10 = vld [vmem:[%s13546_s23 + $0x138c] ss:$16 sps:$4 sm:$0xff]  }
 0x262   : > { %7294 = vmatpush1.bf16.msra.mxu0 %v13056_v48  ;;  %7335 = vmatpush1.bf16.msra.mxu1 %v13059_v0  ;;  %v11480_v48 = vld [vmem:[%s13546_s23 + $0x12b8] sm:$0x33] }
 0x263   : > { %7295 = vmatprep.subr.bf16.mxu0 %v13064_v31  ;;  %7336 = vmatprep.subr.bf16.mxu1 %v13067_v51  ;;  %v7538_v0 = vmax.f32 %v7537_v8, 0.0  ;;  %v13098_v31 = vld [vmem:[%s13546_s23 + $0x1290] ss:$16 sps:$4 sm:$0xff]   ;;  %v13101_v51 = vld [vmem:[%s13546_s23 + $0x1298] ss:$16 sps:$4 sm:$0xff]   ;;  %v11532_v18 = vcombine.high %v11480_v48, %v11480_v48  ;;  %v11531_v58 = vcombine.low %v11480_v48, %v11480_v48  ;;  %v8021_v8 = vrot.slane %v8011_v54, %v13587_v42 }
 0x265   : > { %v14894_v56 = vrot.slane %v7538_v0, %v13601_v52  ;;  %v13126_v0 = vld [vmem:[%s13546_s23 + $0x1320] ss:$16 sps:$4 sm:$0xff]  }
 0x266   : > { %7296 = vmatpush1.bf16.msra.mxu0 %v13062_v29  ;;  %7337 = vmatpush1.bf16.msra.mxu1 %v13065_v3  ;;  %v7274_v29 = vsel %vm848_vm0, %v11529_v57, 0  ;;  %v7280_v3 = vsel %vm848_vm0, %v11531_v58, 0 }
 0x267   : > { %7297 = vmatprep.subr.bf16.mxu0 %v13070_v7  ;;  %7338 = vmatprep.subr.bf16.mxu1 %v13073_v32  ;;  %v13110_v7 = vld [vmem:[%s13546_s23 + $0x12c4] ss:$16 sps:$4 sm:$0xff]   ;;  %v13113_v32 = vld [vmem:[%s13546_s23 + $0x12cc] ss:$16 sps:$4 sm:$0xff]   ;;  %v7548_v2 = vcombine.high %v14894_v56, %v14894_v56 }
 0x26a   : > { %7298 = vmatpush1.bf16.msra.mxu0 %v13068_v55  ;;  %7339 = vmatpush1.bf16.msra.mxu1 %v13071_v60  ;;  %v13116_v55 = vld [vmem:[%s13546_s23 + $0x12e4] ss:$16 sps:$4 sm:$0xff]   ;;  %v13119_v60 = vld [vmem:[%s13546_s23 + $0x12ec] ss:$16 sps:$4 sm:$0xff]  }
 0x26b   : > { %7299 = vmatprep.subr.bf16.mxu0 %v13076_v19  ;;  %7340 = vmatprep.subr.bf16.mxu1 %v13079_v14  ;;  %v7552_v19 = vpack.c.bf16 %v7548_v2, %v7548_v2  ;;  %v13114_v14 = vld [vmem:[%s13546_s23 + $0x12e0] ss:$16 sps:$4 sm:$0xff]  }
 0x26c   : > { %v13132_v2 = vld [vmem:[%s13546_s23 + $0x1340] ss:$16 sps:$4 sm:$0xff]  }
 0x26e   : > { %7300 = vmatpush1.bf16.msra.mxu0 %v13074_v16  ;;  %7341 = vmatpush1.bf16.msra.mxu1 %v13077_v34  ;;  %v8015_v16 = vrot.slane %v14909_v37, %v13589_v43 }
 0x26f   : > { %7301 = vmatprep.subr.bf16.mxu0 %v13082_v17  ;;  %7342 = vmatprep.subr.bf16.mxu1 %v13085_v21 }
 0x272   : > { %7302 = vmatpush1.bf16.msra.mxu0 %v13080_v26  ;;  %7343 = vmatpush1.bf16.msra.mxu1 %v13083_v27 }
 0x273   : > { %7303 = vmatprep.subr.bf16.mxu0 %v13088_v28  ;;  %7344 = vmatprep.subr.bf16.mxu1 %v13091_v25  ;;  %v13120_v25 = vld [vmem:[%s13546_s23 + $0x1300] ss:$16 sps:$4 sm:$0xff]  }
 0x276   : > { %7304 = vmatpush1.bf16.msra.mxu0 %v13086_v36  ;;  %7345 = vmatpush1.bf16.msra.mxu1 %v13089_v38 }
 0x277   : > { %7305 = vmatprep.subr.bf16.mxu0 %v13094_v24  ;;  %7346 = vmatprep.subr.bf16.mxu1 %v13097_v15  ;;  %v13128_v24 = vld [vmem:[%s13546_s23 + $0x1324] ss:$16 sps:$4 sm:$0xff]   ;;  %v13131_v15 = vld [vmem:[%s13546_s23 + $0x132c] ss:$16 sps:$4 sm:$0xff]  }
 0x27a   : > { %7306 = vmatpush1.bf16.msra.mxu0 %v13092_v23  ;;  %7347 = vmatpush1.bf16.msra.mxu1 %v13095_v22  ;;  %v8025_v23 = vrot.slane %v8015_v16, %v13587_v42  ;;  %v8042_v22 = vrot.slane %v14909_v37, %v13593_v46 }
 0x27b   : > { %7307 = vmatprep.subr.bf16.mxu0 %v13100_v30  ;;  %7348 = vmatprep.subr.bf16.mxu1 %v13103_v12 }
 0x27c   : > { %v8028_v57 = vcombine.low %v8021_v8, %v8025_v23  ;;  %v8052_v58 = vrot.slane %v8042_v22, %v13593_v46  ;;  %v13156_v22 = vld [vmem:[%s13546_s23 + $0x13c0] ss:$16 sps:$4 sm:$0xff]  }
 0x27e   : > { %7308 = vmatpush1.bf16.msra.mxu0 %v13098_v31  ;;  %7349 = vmatpush1.bf16.msra.mxu1 %v13101_v51  ;;  %v13129_v31 = vld [vmem:[%s13546_s23 + $0x1328] ss:$16 sps:$4 sm:$0xff]   ;;  %v13134_v51 = vld [vmem:[%s13546_s23 + $0x1344] ss:$16 sps:$4 sm:$0xff]  }
 0x27f   : > { %11533 = vmatprep.subr.msk.bf16.mxu0 %vm848_vm0, %v11530_v50  ;;  %11535 = vmatprep.subr.msk.bf16.mxu1 %vm848_vm0, %v11532_v18  ;;  %v13137_v50 = vld [vmem:[%s13546_s23 + $0x134c] ss:$16 sps:$4 sm:$0xff]   ;;  %v7998_v18 = vcombine.low %v7991_v49, %v7995_v35  ;;  %v13150_v35 = vld [vmem:[%s13546_s23 + $0x13a0] ss:$16 sps:$4 sm:$0xff]  }
 0x280   : > { %v13155_v49 = vld [vmem:[%s13546_s23 + $0x13ac] ss:$16 sps:$4 sm:$0xff]  }
 0x282   : > { %7310 = vmatpush1.bf16.msra.mxu0 %v7274_v29  ;;  %7351 = vmatpush1.bf16.msra.mxu1 %v7280_v3  ;;  %v8056_v3 = vrot.slane %v8046_v45, %v13593_v46  ;;  %v13167_v45 = vld [vmem:[%s13546_s23 + $0x13ec] ss:$16 sps:$4 sm:$0xff]  }
 0x283   : > { %7869 = vmatprep.subr.bf16.mxu0 %v13110_v7  ;;  %7910 = vmatprep.subr.bf16.mxu1 %v13113_v32  ;;  %v8073_v7 = vrot.slane %v14909_v37, %v13603_v53  ;;  %v8077_v32 = vrot.slane %v14909_v37, %v13610_v59 }
 0x285   : > { %7318 = vmatmul.mubr.bf16.vlgmr.msra.gmra.mrb[44].mxu0 %v6967_v1  ;;  %7359 = vmatmul.mubr.bf16.vlgmr.msra.gmra.mrb[44].mxu1 %v6967_v1  ;;  %v13135_v1 = vld [vmem:[%s13546_s23 + $0x1348] ss:$16 sps:$4 sm:$0xff]   ;;  %v8083_v37 = vrot.slane %v8073_v7, %v13603_v53  ;;  %v13176_v7 = vld [vmem:[%s13546_s23 + $0x1424] ss:$16 sps:$4 sm:$0xff]  }
 0x286   : > { %7870 = vmatpush1.bf16.msra.mxu0 %v13108_v4  ;;  %7911 = vmatpush1.bf16.msra.mxu1 %v13111_v5  ;;  %v13143_v4 = vld [vmem:[%s13546_s23 + $0x136c] ss:$16 sps:$4 sm:$0xff]   ;;  %v8005_v5 = vrot.slane %v7998_v18, %v13601_v52 }
 0x287   : > { %7871 = vmatprep.subr.bf16.mxu0 %v13116_v55  ;;  %7912 = vmatprep.subr.bf16.mxu1 %v13119_v60  ;;  %v8035_v55 = vrot.slane %v8028_v57, %v13601_v52  ;;  %v8059_v60 = vcombine.low %v8052_v58, %v8056_v3  ;;  %v13173_v18 = vld [vmem:[%s13546_s23 + $0x140c] ss:$16 sps:$4 sm:$0xff]   ;;  %v13168_v58 = vld [vmem:[%s13546_s23 + $0x1400] ss:$16 sps:$4 sm:$0xff]   ;;  %v13171_v3 = vld [vmem:[%s13546_s23 + $0x1408] ss:$16 sps:$4 sm:$0xff]  }
 0x288   : > { %v4983_v34 = vpop.f32.mrb[28].mxu0  ;;  %v5024_v17 = vpop.f32.mrb[28].mxu1  ;;  %11642 = vmatprep.mubr.msk.bf16.mxu0 %vm844_vm1, %v7552_v19  ;;  %11644 = vmatprep.mubr.msk.bf16.mxu1 %vm844_vm1, %v7552_v19  ;;  %v8087_v19 = vrot.slane %v8077_v32, %v13603_v53  ;;  %v13179_v32 = vld [vmem:[%s13546_s23 + $0x142c] ss:$16 sps:$4 sm:$0xff]  }
 0x289   : > { %v4985_v21 = vpop.f32.mrb[29].mxu0  ;;  %v5026_v62 = vpop.f32.mrb[29].mxu1  ;;  %v8066_v54 = vrot.slane %v8059_v60, %v13601_v52 }
 0x28a   : > { %v5035_v63 = vcombine.low %v4983_v34, %v4985_v21  ;;  %v5036_v26 = vcombine.low %v5024_v17, %v5026_v62  ;;  %v4987_v27 = vpop.f32.mrb[30].mxu0  ;;  %v5028_v28 = vpop.f32.mrb[30].mxu1  ;;  %7872 = vmatpush1.bf16.msra.mxu0 %v13114_v14  ;;  %7913 = vmatpush1.bf16.msra.mxu1 %v13117_v9  ;;  %v13141_v14 = vld [vmem:[%s13546_s23 + $0x1368] ss:$16 sps:$4 sm:$0xff]   ;;  %v13146_v9 = vld [vmem:[%s13546_s23 + $0x1384] ss:$16 sps:$4 sm:$0xff]   ;;  %v8090_v16 = vcombine.low %v8083_v37, %v8087_v19 }
 0x28b   : > { %v4988_v36 = vpop.f32.mrb[31].mxu0  ;;  %v5029_v38 = vpop.f32.mrb[31].mxu1  ;;  %7873 = vmatprep.subr.bf16.mxu0 %v13122_v11  ;;  %7914 = vmatprep.subr.bf16.mxu1 %v13125_v13  ;;  %v8007_v11 = vmul.f32 %v14852_v20, %v8005_v5  ;;  %v8037_v13 = vmul.f32 %v14858_v61, %v8035_v55  ;;  %v11646_v34 = vld [vmem:[%s13541_s19 + $0x1a] sm:$0x3]  ;;  %v13144_v17 = vld [vmem:[%s13546_s23 + $0x1380] ss:$16 sps:$4 sm:$0xff]  }
 0x28c   : > { %v5043_v30 = vrot.slane %v5035_v63, %v13601_v52  ;;  %v5050_v12 = vrot.slane %v5036_v26, %v13601_v52  ;;  %v13147_v21 = vld [vmem:[%s13546_s23 + $0x1388] ss:$16 sps:$4 sm:$0xff]   ;;  %v13152_v62 = vld [vmem:[%s13546_s23 + $0x13a4] ss:$16 sps:$4 sm:$0xff]   ;;  %v8107_v63 = vrot.slane %v11646_v34, %v13583_v40 }
 0x28d   : > { %v8038_v26 = vadd.f32 %v8037_v13, %v8007_v11  ;;  %v14978_v27 = vld [vmem:[%s15834_s0 + $0x8] sm:$0xf]  ;;  %v13158_v38 = vld [vmem:[%s13546_s23 + $0x13c4] ss:$16 sps:$4 sm:$0xff]   ;;  %v13189_v11 = vld [vmem:[%s13546_s23 + $0x145c] ss:$16 sps:$4 sm:$0xff]  }
 0x28e   : > { %v5051_v48 = vcombine.low %v5043_v30, %v5050_v12  ;;  %7874 = vmatpush1.bf16.msra.mxu0 %v13120_v25  ;;  %7915 = vmatpush1.bf16.msra.mxu1 %v13123_v33  ;;  %v8068_v28 = vmul.f32 %v14978_v27, %v8066_v54  ;;  %v8097_v25 = vrot.slane %v8090_v16, %v13601_v52  ;;  %v13153_v36 = vld [vmem:[%s13546_s23 + $0x13a8] ss:$16 sps:$4 sm:$0xff]   ;;  %v13164_v12 = vld [vmem:[%s13546_s23 + $0x13e4] ss:$16 sps:$4 sm:$0xff]   ;;  %v13184_v16 = vld [vmem:[%s13546_s23 + $0x1450] ss:$16 sps:$4 sm:$0xff]  }
 0x28f   : > { %7875 = vmatprep.subr.bf16.mxu0 %v13128_v24  ;;  %7916 = vmatprep.subr.bf16.mxu1 %v13131_v15  ;;  %v8111_v33 = vrot.slane %v11646_v34, %v13587_v42  ;;  %v13161_v24 = vld [vmem:[%s13546_s23 + $0x13cc] ss:$16 sps:$4 sm:$0xff]   ;;  %v13159_v30 = vld [vmem:[%s13546_s23 + $0x13c8] ss:$16 sps:$4 sm:$0xff]   ;;  %v7551_v54 = vpack.c.bf16 %v14894_v56, %v14894_v56 }
 0x290   : > { %v14947_v29 = vadd.f32 %v5051_v48, %v14830_v44  ;;  %v13140_v44 = vld [vmem:[%s13546_s23 + $0x1364] ss:$16 sps:$4 sm:$0xff]   ;;  %v8069_v15 = vadd.f32 %v8068_v28, %v8038_v26  ;;  %v8099_v8 = vmul.f32 %v14756_v6, %v8097_v25  ;;  %v13177_v5 = vld [vmem:[%s13546_s23 + $0x1428] ss:$16 sps:$4 sm:$0xff]  }
 0x291   : > { %v8112_v23 = vcombine.low %v8107_v63, %v8111_v33  ;;  %v13187_v34 = vld [vmem:[%s13546_s23 + $0x1458] ss:$16 sps:$4 sm:$0xff]   ;;  %v13190_v63 = vld [vmem:[%s13546_s23 + $0x1470] ss:$16 sps:$4 sm:$0xff]   ;;  %v13198_v25 = vld [vmem:[%s13546_s23 + $0x1494] ss:$16 sps:$4 sm:$0xff]  }
 0x292   : > { %7876 = vmatpush1.bf16.msra.mxu0 %v13126_v0  ;;  %7917 = vmatpush1.bf16.msra.mxu1 %v13129_v31  ;;  %v8100_v48 = vadd.f32 %v8099_v8, %v8069_v15  ;;  %v13162_v31 = vld [vmem:[%s13546_s23 + $0x13e0] ss:$16 sps:$4 sm:$0xff]   ;;  %v13193_v26 = vld [vmem:[%s13546_s23 + $0x1478] ss:$16 sps:$4 sm:$0xff]   ;;  %v13201_v33 = vld [vmem:[%s13546_s23 + $0x149c] ss:$16 sps:$4 sm:$0xff]  }
 0x293   : > { %7877 = vmatprep.subr.bf16.mxu0 %v13134_v51  ;;  %7918 = vmatprep.subr.bf16.mxu1 %v13137_v50  ;;  %v8119_v0 = vrot.slane %v8112_v23, %v13601_v52  ;;  %v13165_v51 = vld [vmem:[%s13546_s23 + $0x13e8] ss:$16 sps:$4 sm:$0xff]   ;;  %v13170_v50 = vld [vmem:[%s13546_s23 + $0x1404] ss:$16 sps:$4 sm:$0xff]  }
 0x295   : > { %v8121_v57 = vadd.f32 %v8119_v0, %v8100_v48  ;;  %v13196_v48 = vld [vmem:[%s13546_s23 + $0x1490] ss:$16 sps:$4 sm:$0xff]   ;;  %v13199_v0 = vld [vmem:[%s13546_s23 + $0x1498] ss:$16 sps:$4 sm:$0xff]  }
 0x296   : > { %7878 = vmatpush1.bf16.msra.mxu0 %v13132_v2  ;;  %7919 = vmatpush1.bf16.msra.mxu1 %v13135_v1  ;;  %v11587_v2 = vld [vmem:[%s13546_s23 + $0x1440] sm:$0x33]  ;;  %v11588_v1 = vld [vmem:[%s13546_s23 + $0x1448] sm:$0x33] }
 0x297   : > { %7879 = vmatprep.subr.bf16.mxu0 %v13140_v44  ;;  %7920 = vmatprep.subr.bf16.mxu1 %v13143_v4  ;;  %v8122_v44 = vmax.f32 %v8121_v57, 0.0  ;;  %v13174_v4 = vld [vmem:[%s13546_s23 + $0x1420] ss:$16 sps:$4 sm:$0xff]   ;;  %v11638_v55 = vcombine.high %v11587_v2, %v11587_v2  ;;  %v11640_v60 = vcombine.high %v11588_v1, %v11588_v1  ;;  %v11637_v37 = vcombine.low %v11587_v2, %v11587_v2  ;;  %v13207_v57 = vld [vmem:[%s13546_s23 + $0x14bc] ss:$16 sps:$4 sm:$0xff]  }
 0x298   : > { %v11639_v19 = vcombine.low %v11588_v1, %v11588_v1 }
 0x29a   : > { %7880 = vmatpush1.bf16.msra.mxu0 %v13138_v39  ;;  %7921 = vmatpush1.bf16.msra.mxu1 %v13141_v14  ;;  %v15006_v39 = vrot.slane %v8122_v44, %v13601_v52  ;;  %v7858_v14 = vsel %vm848_vm0, %v11637_v37, 0 }
 0x29b   : > { %7881 = vmatprep.subr.bf16.mxu0 %v13146_v9  ;;  %7922 = vmatprep.subr.bf16.mxu1 %v13149_v10  ;;  %v7864_v9 = vsel %vm848_vm0, %v11639_v19, 0  ;;  %v13186_v10 = vld [vmem:[%s13546_s23 + $0x1454] ss:$16 sps:$4 sm:$0xff]  }
 0x29c   : > { %v8132_v13 = vcombine.high %v15006_v39, %v15006_v39 }
 0x29e   : > { %7882 = vmatpush1.bf16.msra.mxu0 %v13144_v17  ;;  %7923 = vmatpush1.bf16.msra.mxu1 %v13147_v21  ;;  %v15021_v17 = vld [vmem:[%s13536_s16 + $0x70] sm:$0xff] }
 0x29f   : > { %7883 = vmatprep.subr.bf16.mxu0 %v13152_v62  ;;  %7924 = vmatprep.subr.bf16.mxu1 %v13155_v49  ;;  %v13192_v21 = vld [vmem:[%s13546_s23 + $0x1474] ss:$16 sps:$4 sm:$0xff]   ;;  %v13195_v62 = vld [vmem:[%s13546_s23 + $0x147c] ss:$16 sps:$4 sm:$0xff]   ;;  %v8136_v49 = vpack.c.bf16 %v8132_v13, %v8132_v13  ;;  %v8565_v56 = vrot.slane %v15021_v17, %v13583_v40  ;;  %v8569_v28 = vrot.slane %v15021_v17, %v13585_v41 }
 0x2a0   : > { %v8630_v1 = vrot.slane %v15021_v17, %v13595_v47  ;;  %v8661_v13 = vrot.slane %v15021_v17, %v13610_v59 }
 0x2a1   : > { %v8575_v23 = vrot.slane %v8565_v56, %v13583_v40 }
 0x2a2   : > { %7884 = vmatpush1.bf16.msra.mxu0 %v13150_v35  ;;  %7925 = vmatpush1.bf16.msra.mxu1 %v13153_v36  ;;  %v8595_v35 = vrot.slane %v15021_v17, %v13587_v42  ;;  %v8599_v36 = vrot.slane %v15021_v17, %v13589_v43  ;;  %v8671_v56 = vrot.slane %v8661_v13, %v13603_v53  ;;  %v11695_v13 = vld [vmem:[%s13546_s23 + $0x15d0] sm:$0x33] }
 0x2a3   : > { %7885 = vmatprep.subr.bf16.mxu0 %v13158_v38  ;;  %7926 = vmatprep.subr.bf16.mxu1 %v13161_v24 }
 0x2a6   : > { %7886 = vmatpush1.bf16.msra.mxu0 %v13156_v22  ;;  %7927 = vmatpush1.bf16.msra.mxu1 %v13159_v30 }
 0x2a7   : > { %7887 = vmatprep.subr.bf16.mxu0 %v13164_v12  ;;  %7928 = vmatprep.subr.bf16.mxu1 %v13167_v45 }
 0x2aa   : > { %7888 = vmatpush1.bf16.msra.mxu0 %v13162_v31  ;;  %7929 = vmatpush1.bf16.msra.mxu1 %v13165_v51  ;;  %v8579_v31 = vrot.slane %v8569_v28, %v13583_v40  ;;  %v13222_v28 = vld [vmem:[%s13546_s23 + $0x1514] ss:$16 sps:$4 sm:$0xff]  }
 0x2ab   : > { %7889 = vmatprep.subr.bf16.mxu0 %v13170_v50  ;;  %7930 = vmatprep.subr.bf16.mxu1 %v13173_v18  ;;  %v13204_v18 = vld [vmem:[%s13546_s23 + $0x14b4] ss:$16 sps:$4 sm:$0xff]  }
 0x2ac   : > { %v8582_v37 = vcombine.low %v8575_v23, %v8579_v31  ;;  %v13228_v23 = vld [vmem:[%s13546_s23 + $0x1534] ss:$16 sps:$4 sm:$0xff]   ;;  %v13226_v31 = vld [vmem:[%s13546_s23 + $0x1530] ss:$16 sps:$4 sm:$0xff]  }
 0x2ae   : > { %7890 = vmatpush1.bf16.msra.mxu0 %v13168_v58  ;;  %7931 = vmatpush1.bf16.msra.mxu1 %v13171_v3  ;;  %v8605_v58 = vrot.slane %v8595_v35, %v13587_v42  ;;  %v8609_v3 = vrot.slane %v8599_v36, %v13587_v42 }
 0x2af   : > { %7891 = vmatprep.subr.bf16.mxu0 %v13176_v7  ;;  %7932 = vmatprep.subr.bf16.mxu1 %v13179_v32  ;;  %v8626_v7 = vrot.slane %v15021_v17, %v13593_v46 }
 0x2b0   : > { %v8612_v19 = vcombine.low %v8605_v58, %v8609_v3 }
 0x2b2   : > { %7892 = vmatpush1.bf16.msra.mxu0 %v13174_v4  ;;  %7933 = vmatpush1.bf16.msra.mxu1 %v13177_v5  ;;  %v13202_v4 = vld [vmem:[%s13546_s23 + $0x14b0] ss:$16 sps:$4 sm:$0xff]   ;;  %v13205_v5 = vld [vmem:[%s13546_s23 + $0x14b8] ss:$16 sps:$4 sm:$0xff]  }
 0x2b3   : > { %11641 = vmatprep.subr.msk.bf16.mxu0 %vm848_vm0, %v11638_v55  ;;  %11643 = vmatprep.subr.msk.bf16.mxu1 %vm848_vm0, %v11640_v60  ;;  %v13210_v55 = vld [vmem:[%s13546_s23 + $0x14d4] ss:$16 sps:$4 sm:$0xff]   ;;  %v13213_v60 = vld [vmem:[%s13546_s23 + $0x14dc] ss:$16 sps:$4 sm:$0xff]  }
 0x2b6   : > { %7894 = vmatpush1.bf16.msra.mxu0 %v7858_v14  ;;  %7935 = vmatpush1.bf16.msra.mxu1 %v7864_v9  ;;  %v8636_v14 = vrot.slane %v8626_v7, %v13593_v46  ;;  %v13232_v7 = vld [vmem:[%s13546_s23 + $0x1550] ss:$16 sps:$4 sm:$0xff]  }
 0x2b7   : > { %8453 = vmatprep.subr.bf16.mxu0 %v13186_v10  ;;  %8494 = vmatprep.subr.bf16.mxu1 %v13189_v11  ;;  %v8640_v10 = vrot.slane %v8630_v1, %v13593_v46  ;;  %v8657_v11 = vrot.slane %v15021_v17, %v13603_v53  ;;  %v13243_v1 = vld [vmem:[%s13546_s23 + $0x157c] ss:$16 sps:$4 sm:$0xff]  }
 0x2b9   : > { %7902 = vmatmul.mubr.bf16.vlgmr.msra.gmra.mrb[48].mxu0 %v7551_v54  ;;  %7943 = vmatmul.mubr.bf16.vlgmr.msra.gmra.mrb[48].mxu1 %v7551_v54  ;;  %v13208_v54 = vld [vmem:[%s13546_s23 + $0x14d0] ss:$16 sps:$4 sm:$0xff]   ;;  %v8667_v17 = vrot.slane %v8657_v11, %v13603_v53  ;;  %v13255_v11 = vld [vmem:[%s13546_s23 + $0x15bc] ss:$16 sps:$4 sm:$0xff]  }
 0x2ba   : > { %8454 = vmatpush1.bf16.msra.mxu0 %v13184_v16  ;;  %8495 = vmatpush1.bf16.msra.mxu1 %v13187_v34  ;;  %v13211_v16 = vld [vmem:[%s13546_s23 + $0x14d8] ss:$16 sps:$4 sm:$0xff]   ;;  %v13219_v34 = vld [vmem:[%s13546_s23 + $0x14fc] ss:$16 sps:$4 sm:$0xff]  }
 0x2bb   : > { %8455 = vmatprep.subr.bf16.mxu0 %v13192_v21  ;;  %8496 = vmatprep.subr.bf16.mxu1 %v13195_v62  ;;  %v8589_v21 = vrot.slane %v8582_v37, %v13601_v52  ;;  %v8619_v62 = vrot.slane %v8612_v19, %v13601_v52  ;;  %v13244_v19 = vld [vmem:[%s13546_s23 + $0x1590] ss:$16 sps:$4 sm:$0xff]  }
 0x2bc   : > { %v5567_v38 = vpop.f32.mrb[32].mxu0  ;;  %v5608_v24 = vpop.f32.mrb[32].mxu1  ;;  %11750 = vmatprep.mubr.msk.bf16.mxu0 %vm844_vm1, %v8136_v49  ;;  %11752 = vmatprep.mubr.msk.bf16.mxu1 %vm844_vm1, %v8136_v49  ;;  %v8643_v49 = vcombine.low %v8636_v14, %v8640_v10  ;;  %v13247_v14 = vld [vmem:[%s13546_s23 + $0x1598] ss:$16 sps:$4 sm:$0xff]   ;;  %v13252_v10 = vld [vmem:[%s13546_s23 + $0x15b4] ss:$16 sps:$4 sm:$0xff]  }
 0x2bd   : > { %v5569_v15 = vpop.f32.mrb[33].mxu0  ;;  %v5610_v8 = vpop.f32.mrb[33].mxu1  ;;  %v8621_v35 = vmul.f32 %v14858_v61, %v8619_v62 }
 0x2be   : > { %v5619_v22 = vcombine.low %v5567_v38, %v5569_v15  ;;  %v5620_v30 = vcombine.low %v5608_v24, %v5610_v8  ;;  %v5571_v12 = vpop.f32.mrb[34].mxu0  ;;  %v5612_v45 = vpop.f32.mrb[34].mxu1  ;;  %8456 = vmatpush1.bf16.msra.mxu0 %v13190_v63  ;;  %8497 = vmatpush1.bf16.msra.mxu1 %v13193_v26  ;;  %v13214_v63 = vld [vmem:[%s13546_s23 + $0x14f0] ss:$16 sps:$4 sm:$0xff]   ;;  %v13217_v26 = vld [vmem:[%s13546_s23 + $0x14f8] ss:$16 sps:$4 sm:$0xff]   ;;  %v8650_v36 = vrot.slane %v8643_v49, %v13601_v52 }
 0x2bf   : > { %v5572_v51 = vpop.f32.mrb[35].mxu0  ;;  %v5613_v50 = vpop.f32.mrb[35].mxu1  ;;  %8457 = vmatprep.subr.bf16.mxu0 %v13198_v25  ;;  %8498 = vmatprep.subr.bf16.mxu1 %v13201_v33  ;;  %v13225_v25 = vld [vmem:[%s13546_s23 + $0x151c] ss:$16 sps:$4 sm:$0xff]   ;;  %v8591_v33 = vmul.f32 %v14852_v20, %v8589_v21  ;;  %v8674_v38 = vcombine.low %v8667_v17, %v8671_v56  ;;  %v13220_v15 = vld [vmem:[%s13546_s23 + $0x1510] ss:$16 sps:$4 sm:$0xff]   ;;  %v11746_v21 = vcombine.high %v11695_v13, %v11695_v13 }
 0x2c0   : > { %v5627_v32 = vrot.slane %v5619_v22, %v13601_v52  ;;  %v5634_v2 = vrot.slane %v5620_v30, %v13601_v52  ;;  %v11754_v24 = vld [vmem:[%s13541_s19 + $0x1c] sm:$0x3]  ;;  %v13223_v8 = vld [vmem:[%s13546_s23 + $0x1518] ss:$16 sps:$4 sm:$0xff]   ;;  %v8652_v45 = vmul.f32 %v14978_v27, %v8650_v36  ;;  %v13234_v50 = vld [vmem:[%s13546_s23 + $0x1554] ss:$16 sps:$4 sm:$0xff]   ;;  %v11745_v49 = vcombine.low %v11695_v13, %v11695_v13 }
 0x2c1   : > { %v13231_v22 = vld [vmem:[%s13546_s23 + $0x153c] ss:$16 sps:$4 sm:$0xff]   ;;  %v8691_v30 = vrot.slane %v11754_v24, %v13583_v40  ;;  %v8622_v12 = vadd.f32 %v8621_v35, %v8591_v33  ;;  %v13229_v51 = vld [vmem:[%s13546_s23 + $0x1538] ss:$16 sps:$4 sm:$0xff]   ;;  %v8135_v35 = vpack.c.bf16 %v15006_v39, %v15006_v39  ;;  %v13260_v36 = vld [vmem:[%s13546_s23 + $0x15e0] ss:$16 sps:$4 sm:$0xff]  }
 0x2c2   : > { %v5635_v44 = vcombine.low %v5627_v32, %v5634_v2  ;;  %8458 = vmatpush1.bf16.msra.mxu0 %v13196_v48  ;;  %8499 = vmatpush1.bf16.msra.mxu1 %v13199_v0  ;;  %v8681_v48 = vrot.slane %v8674_v38, %v13601_v52  ;;  %v8695_v0 = vrot.slane %v11754_v24, %v13587_v42  ;;  %v13235_v32 = vld [vmem:[%s13546_s23 + $0x1558] ss:$16 sps:$4 sm:$0xff]   ;;  %v13240_v2 = vld [vmem:[%s13546_s23 + $0x1574] ss:$16 sps:$4 sm:$0xff]   ;;  %v13278_v13 = vld [vmem:[%s13546_s23 + $0x1640] ss:$16 sps:$4 sm:$0xff]  }
 0x2c3   : > { %8459 = vmatprep.subr.bf16.mxu0 %v13204_v18  ;;  %8500 = vmatprep.subr.bf16.mxu1 %v13207_v57  ;;  %v13237_v18 = vld [vmem:[%s13546_s23 + $0x155c] ss:$16 sps:$4 sm:$0xff]   ;;  %v8653_v57 = vadd.f32 %v8652_v45, %v8622_v12  ;;  %v13263_v38 = vld [vmem:[%s13546_s23 + $0x15e8] ss:$16 sps:$4 sm:$0xff]   ;;  %v13274_v45 = vld [vmem:[%s13546_s23 + $0x1624] ss:$16 sps:$4 sm:$0xff]  }
 0x2c4   : > { %v15059_v9 = vadd.f32 %v5635_v44, %v14947_v29  ;;  %v13216_v29 = vld [vmem:[%s13546_s23 + $0x14f4] ss:$16 sps:$4 sm:$0xff]   ;;  %v8683_v58 = vmul.f32 %v14756_v6, %v8681_v48  ;;  %v8696_v3 = vcombine.low %v8691_v30, %v8695_v0  ;;  %v13238_v6 = vld [vmem:[%s13546_s23 + $0x1570] ss:$16 sps:$4 sm:$0xff]   ;;  %v15128_v24 = vld [vmem:[%s13536_s16 + $0x78] sm:$0xff] }
 0x2c5   : > { %v9149_v39 = vrot.slane %v15128_v24, %v13583_v40  ;;  %v13269_v30 = vld [vmem:[%s13546_s23 + $0x1608] ss:$16 sps:$4 sm:$0xff]   ;;  %v9153_v12 = vrot.slane %v15128_v24, %v13585_v41  ;;  %v13277_v48 = vld [vmem:[%s13546_s23 + $0x162c] ss:$16 sps:$4 sm:$0xff]   ;;  %v9179_v0 = vrot.slane %v15128_v24, %v13587_v42 }
 0x2c6   : > { %8460 = vmatpush1.bf16.msra.mxu0 %v13202_v4  ;;  %8501 = vmatpush1.bf16.msra.mxu1 %v13205_v5  ;;  %v8684_v44 = vadd.f32 %v8683_v58, %v8653_v57  ;;  %v8703_v4 = vrot.slane %v8696_v3, %v13601_v52  ;;  %v13241_v5 = vld [vmem:[%s13546_s23 + $0x1578] ss:$16 sps:$4 sm:$0xff]  }
 0x2c7   : > { %8461 = vmatprep.subr.bf16.mxu0 %v13210_v55  ;;  %8502 = vmatprep.subr.bf16.mxu1 %v13213_v60  ;;  %v13246_v55 = vld [vmem:[%s13546_s23 + $0x1594] ss:$16 sps:$4 sm:$0xff]   ;;  %v13249_v60 = vld [vmem:[%s13546_s23 + $0x159c] ss:$16 sps:$4 sm:$0xff]   ;;  %v9159_v57 = vrot.slane %v9149_v39, %v13583_v40 }
 0x2c8   : > { %v8705_v37 = vadd.f32 %v8703_v4, %v8684_v44 }
 0x2ca   : > { %8462 = vmatpush1.bf16.msra.mxu0 %v13208_v54  ;;  %8503 = vmatpush1.bf16.msra.mxu1 %v13211_v16  ;;  %v11696_v54 = vld [vmem:[%s13546_s23 + $0x15d8] sm:$0x33]  ;;  %v8706_v16 = vmax.f32 %v8705_v37, 0.0  ;;  %v9210_v37 = vrot.slane %v15128_v24, %v13593_v46 }
 0x2cb   : > { %8463 = vmatprep.subr.bf16.mxu0 %v13216_v29  ;;  %8504 = vmatprep.subr.bf16.mxu1 %v13219_v34  ;;  %v13250_v29 = vld [vmem:[%s13546_s23 + $0x15b0] ss:$16 sps:$4 sm:$0xff]   ;;  %v13253_v34 = vld [vmem:[%s13546_s23 + $0x15b8] ss:$16 sps:$4 sm:$0xff]   ;;  %v11748_v62 = vcombine.high %v11696_v54, %v11696_v54  ;;  %v11747_v17 = vcombine.low %v11696_v54, %v11696_v54 }
 0x2cc   : > { %v15113_v56 = vrot.slane %v8706_v16, %v13601_v52  ;;  %v13281_v54 = vld [vmem:[%s13546_s23 + $0x1648] ss:$16 sps:$4 sm:$0xff]   ;;  %v13286_v16 = vld [vmem:[%s13546_s23 + $0x1664] ss:$16 sps:$4 sm:$0xff]  }
 0x2ce   : > { %8464 = vmatpush1.bf16.msra.mxu0 %v13214_v63  ;;  %8505 = vmatpush1.bf16.msra.mxu1 %v13217_v26  ;;  %v8442_v63 = vsel %vm848_vm0, %v11745_v49, 0  ;;  %v8448_v26 = vsel %vm848_vm0, %v11747_v17, 0  ;;  %v8716_v33 = vcombine.high %v15113_v56, %v15113_v56  ;;  %v9241_v17 = vrot.slane %v15128_v24, %v13603_v53 }
 0x2cf   : > { %8465 = vmatprep.subr.bf16.mxu0 %v13222_v28  ;;  %8506 = vmatprep.subr.bf16.mxu1 %v13225_v25  ;;  %v13262_v28 = vld [vmem:[%s13546_s23 + $0x15e4] ss:$16 sps:$4 sm:$0xff]   ;;  %v13265_v25 = vld [vmem:[%s13546_s23 + $0x15ec] ss:$16 sps:$4 sm:$0xff]  }
 0x2d2   : > { %8466 = vmatpush1.bf16.msra.mxu0 %v13220_v15  ;;  %8507 = vmatpush1.bf16.msra.mxu1 %v13223_v8  ;;  %v13268_v15 = vld [vmem:[%s13546_s23 + $0x1604] ss:$16 sps:$4 sm:$0xff]   ;;  %v13271_v8 = vld [vmem:[%s13546_s23 + $0x160c] ss:$16 sps:$4 sm:$0xff]  }
 0x2d3   : > { %8467 = vmatprep.subr.bf16.mxu0 %v13228_v23  ;;  %8508 = vmatprep.subr.bf16.mxu1 %v13231_v22  ;;  %v8720_v23 = vpack.c.bf16 %v8716_v33, %v8716_v33  ;;  %v13266_v22 = vld [vmem:[%s13546_s23 + $0x1600] ss:$16 sps:$4 sm:$0xff]  }
 0x2d6   : > { %8468 = vmatpush1.bf16.msra.mxu0 %v13226_v31  ;;  %8509 = vmatpush1.bf16.msra.mxu1 %v13229_v51  ;;  %v9183_v31 = vrot.slane %v15128_v24, %v13589_v43  ;;  %v13275_v43 = vld [vmem:[%s13546_s23 + $0x1628] ss:$16 sps:$4 sm:$0xff]  }
 0x2d7   : > { %8469 = vmatprep.subr.bf16.mxu0 %v13234_v50  ;;  %8510 = vmatprep.subr.bf16.mxu1 %v13237_v18 }
 0x2da   : > { %8470 = vmatpush1.bf16.msra.mxu0 %v13232_v7  ;;  %8511 = vmatpush1.bf16.msra.mxu1 %v13235_v32 }
 0x2db   : > { %8471 = vmatprep.subr.bf16.mxu0 %v13240_v2  ;;  %8512 = vmatprep.subr.bf16.mxu1 %v13243_v1  ;;  %v13272_v2 = vld [vmem:[%s13546_s23 + $0x1620] ss:$16 sps:$4 sm:$0xff]   ;;  %v9163_v1 = vrot.slane %v9153_v12, %v13583_v40 }
 0x2de   : > { %8472 = vmatpush1.bf16.msra.mxu0 %v13238_v6  ;;  %8513 = vmatpush1.bf16.msra.mxu1 %v13241_v5  ;;  %v13280_v6 = vld [vmem:[%s13546_s23 + $0x1644] ss:$16 sps:$4 sm:$0xff]   ;;  %v13283_v5 = vld [vmem:[%s13546_s23 + $0x164c] ss:$16 sps:$4 sm:$0xff]  }
 0x2df   : > { %8473 = vmatprep.subr.bf16.mxu0 %v13246_v55  ;;  %8514 = vmatprep.subr.bf16.mxu1 %v13249_v60  ;;  %v9189_v55 = vrot.slane %v9179_v0, %v13587_v42  ;;  %v9193_v60 = vrot.slane %v9183_v31, %v13587_v42  ;;  %v13299_v0 = vld [vmem:[%s13546_s23 + $0x16a8] ss:$16 sps:$4 sm:$0xff]   ;;  %v13304_v31 = vld [vmem:[%s13546_s23 + $0x16c4] ss:$16 sps:$4 sm:$0xff]  }
 0x2e2   : > { %8474 = vmatpush1.bf16.msra.mxu0 %v13244_v19  ;;  %8515 = vmatpush1.bf16.msra.mxu1 %v13247_v14 }
 0x2e3   : > { %8475 = vmatprep.subr.bf16.mxu0 %v13252_v10  ;;  %8516 = vmatprep.subr.bf16.mxu1 %v13255_v11  ;;  %v9214_v10 = vrot.slane %v15128_v24, %v13595_v47 }
 0x2e5   : > { %v9224_v47 = vrot.slane %v9214_v10, %v13593_v46 }
 0x2e6   : > { %8476 = vmatpush1.bf16.msra.mxu0 %v13250_v29  ;;  %8517 = vmatpush1.bf16.msra.mxu1 %v13253_v34  ;;  %v13289_v29 = vld [vmem:[%s13546_s23 + $0x166c] ss:$16 sps:$4 sm:$0xff]   ;;  %v9166_v34 = vcombine.low %v9159_v57, %v9163_v1  ;;  %v13302_v57 = vld [vmem:[%s13546_s23 + $0x16c0] ss:$16 sps:$4 sm:$0xff]  }
 0x2e7   : > { %11749 = vmatprep.subr.msk.bf16.mxu0 %vm848_vm0, %v11746_v21  ;;  %11751 = vmatprep.subr.msk.bf16.mxu1 %vm848_vm0, %v11748_v62  ;;  %v9196_v21 = vcombine.low %v9189_v55, %v9193_v60  ;;  %v9220_v62 = vrot.slane %v9210_v37, %v13593_v46  ;;  %v13308_v1 = vld [vmem:[%s13546_s23 + $0x16e0] ss:$16 sps:$4 sm:$0xff]   ;;  %v13317_v37 = vld [vmem:[%s13546_s23 + $0x1708] ss:$16 sps:$4 sm:$0xff]  }
 0x2e8   : > { %v9173_v33 = vrot.slane %v9166_v34, %v13601_v52  ;;  %v13314_v60 = vld [vmem:[%s13546_s23 + $0x1700] ss:$16 sps:$4 sm:$0xff]   ;;  %v11804_v34 = vld [vmem:[%s13546_s23 + $0x1768] sm:$0x33] }
 0x2ea   : > { %8478 = vmatpush1.bf16.msra.mxu0 %v8442_v63  ;;  %8519 = vmatpush1.bf16.msra.mxu1 %v8448_v26  ;;  %v9245_v63 = vrot.slane %v15128_v24, %v13610_v59  ;;  %v13284_v26 = vld [vmem:[%s13546_s23 + $0x1660] ss:$16 sps:$4 sm:$0xff]   ;;  %v9251_v59 = vrot.slane %v9241_v17, %v13603_v53  ;;  %v9175_v39 = vmul.f32 %v14852_v20, %v9173_v33 }
 0x2eb   : > { %9037 = vmatprep.subr.bf16.mxu0 %v13262_v28  ;;  %9078 = vmatprep.subr.bf16.mxu1 %v13265_v25  ;;  %v13287_v28 = vld [vmem:[%s13546_s23 + $0x1668] ss:$16 sps:$4 sm:$0xff]   ;;  %v13295_v25 = vld [vmem:[%s13546_s23 + $0x168c] ss:$16 sps:$4 sm:$0xff]   ;;  %v13290_v24 = vld [vmem:[%s13546_s23 + $0x1680] ss:$16 sps:$4 sm:$0xff]  }
 0x2ed   : > { %8486 = vmatmul.mubr.bf16.vlgmr.msra.gmra.mrb[52].mxu0 %v8135_v35  ;;  %8527 = vmatmul.mubr.bf16.vlgmr.msra.gmra.mrb[52].mxu1 %v8135_v35  ;;  %v9203_v35 = vrot.slane %v9196_v21, %v13601_v52 }
 0x2ee   : > { %9038 = vmatpush1.bf16.msra.mxu0 %v13260_v36  ;;  %9079 = vmatpush1.bf16.msra.mxu1 %v13263_v38  ;;  %v9227_v36 = vcombine.low %v9220_v62, %v9224_v47  ;;  %v9255_v38 = vrot.slane %v9245_v63, %v13603_v53  ;;  %v13326_v62 = vld [vmem:[%s13546_s23 + $0x1740] ss:$16 sps:$4 sm:$0xff]   ;;  %v13329_v47 = vld [vmem:[%s13546_s23 + $0x1748] ss:$16 sps:$4 sm:$0xff]   ;;  %v11856_v63 = vcombine.high %v11804_v34, %v11804_v34 }
 0x2ef   : > { %9039 = vmatprep.subr.bf16.mxu0 %v13268_v15  ;;  %9080 = vmatprep.subr.bf16.mxu1 %v13271_v8  ;;  %v13293_v15 = vld [vmem:[%s13546_s23 + $0x1688] ss:$16 sps:$4 sm:$0xff]   ;;  %v13298_v8 = vld [vmem:[%s13546_s23 + $0x16a4] ss:$16 sps:$4 sm:$0xff]  }
 0x2f0   : > { %v6151_v51 = vpop.f32.mrb[36].mxu0  ;;  %v6192_v50 = vpop.f32.mrb[36].mxu1  ;;  %11858 = vmatprep.mubr.msk.bf16.mxu0 %vm844_vm1, %v8720_v23  ;;  %11860 = vmatprep.mubr.msk.bf16.mxu1 %vm844_vm1, %v8720_v23  ;;  %v13301_v23 = vld [vmem:[%s13546_s23 + $0x16ac] ss:$16 sps:$4 sm:$0xff]   ;;  %v9258_v12 = vcombine.low %v9251_v59, %v9255_v38  ;;  %v8719_v38 = vpack.c.bf16 %v15113_v56, %v15113_v56  ;;  %v13350_v56 = vld [vmem:[%s13546_s23 + $0x17b4] ss:$16 sps:$4 sm:$0xff]  }
 0x2f1   : > { %v6153_v18 = vpop.f32.mrb[37].mxu0  ;;  %v6194_v41 = vpop.f32.mrb[37].mxu1 }
 0x2f2   : > { %v6203_v58 = vcombine.low %v6151_v51, %v6153_v18  ;;  %v6204_v3 = vcombine.low %v6192_v50, %v6194_v41  ;;  %v6155_v7 = vpop.f32.mrb[38].mxu0  ;;  %v6196_v32 = vpop.f32.mrb[38].mxu1  ;;  %9040 = vmatpush1.bf16.msra.mxu0 %v13266_v22  ;;  %9081 = vmatpush1.bf16.msra.mxu1 %v13269_v30  ;;  %v9205_v22 = vmul.f32 %v14858_v61, %v9203_v35  ;;  %v13307_v51 = vld [vmem:[%s13546_s23 + $0x16cc] ss:$16 sps:$4 sm:$0xff]   ;;  %v13338_v35 = vld [vmem:[%s13546_s23 + $0x1774] ss:$16 sps:$4 sm:$0xff]  }
 0x2f3   : > { %v6156_v44 = vpop.f32.mrb[39].mxu0  ;;  %v6197_v4 = vpop.f32.mrb[39].mxu1  ;;  %9041 = vmatprep.subr.bf16.mxu0 %v13274_v45  ;;  %9082 = vmatprep.subr.bf16.mxu1 %v13277_v48  ;;  %v9234_v30 = vrot.slane %v9227_v36, %v13601_v52  ;;  %v11862_v45 = vld [vmem:[%s13541_s19 + $0x1e] sm:$0x3]  ;;  %v13296_v48 = vld [vmem:[%s13546_s23 + $0x16a0] ss:$16 sps:$4 sm:$0xff]   ;;  %v9265_v18 = vrot.slane %v9258_v12, %v13601_v52 }
 0x2f4   : > { %v6211_v19 = vrot.slane %v6203_v58, %v13601_v52  ;;  %v6218_v14 = vrot.slane %v6204_v3, %v13601_v52  ;;  %v9275_v20 = vrot.slane %v11862_v45, %v13583_v40  ;;  %v9206_v50 = vadd.f32 %v9205_v22, %v9175_v39  ;;  %v13305_v58 = vld [vmem:[%s13546_s23 + $0x16c8] ss:$16 sps:$4 sm:$0xff]   ;;  %v13310_v3 = vld [vmem:[%s13546_s23 + $0x16e4] ss:$16 sps:$4 sm:$0xff]   ;;  %v13313_v7 = vld [vmem:[%s13546_s23 + $0x16ec] ss:$16 sps:$4 sm:$0xff]  }
 0x2f5   : > { %v9236_v61 = vmul.f32 %v14978_v27, %v9234_v30  ;;  %v9279_v41 = vrot.slane %v11862_v45, %v13587_v42  ;;  %v13428_v27 = vld [vmem:[%s15834_s0 + $0xc] sm:$0xf]  ;;  %v13311_v44 = vld [vmem:[%s13546_s23 + $0x16e8] ss:$16 sps:$4 sm:$0xff]   ;;  %v13316_v4 = vld [vmem:[%s13546_s23 + $0x1704] ss:$16 sps:$4 sm:$0xff]  }
 0x2f6   : > { %v6219_v11 = vcombine.low %v6211_v19, %v6218_v14  ;;  %9042 = vmatpush1.bf16.msra.mxu0 %v13272_v2  ;;  %9083 = vmatpush1.bf16.msra.mxu1 %v13275_v43  ;;  %v9267_v2 = vmul.f32 %v13428_v27, %v9265_v18  ;;  %v13322_v19 = vld [vmem:[%s13546_s23 + $0x1724] ss:$16 sps:$4 sm:$0xff]   ;;  %v13325_v14 = vld [vmem:[%s13546_s23 + $0x172c] ss:$16 sps:$4 sm:$0xff]   ;;  %v13342_v22 = vld [vmem:[%s13546_s23 + $0x1790] ss:$16 sps:$4 sm:$0xff]  }
 0x2f7   : > { %9043 = vmatprep.subr.bf16.mxu0 %v13280_v6  ;;  %9084 = vmatprep.subr.bf16.mxu1 %v13283_v5  ;;  %v9237_v32 = vadd.f32 %v9236_v61, %v9206_v50  ;;  %v9280_v43 = vcombine.low %v9275_v20, %v9279_v41  ;;  %v13319_v6 = vld [vmem:[%s13546_s23 + $0x170c] ss:$16 sps:$4 sm:$0xff]   ;;  %v13345_v30 = vld [vmem:[%s13546_s23 + $0x1798] ss:$16 sps:$4 sm:$0xff]   ;;  %v13348_v18 = vld [vmem:[%s13546_s23 + $0x17b0] ss:$16 sps:$4 sm:$0xff]  }
 0x2f8   : > { %v15166_v49 = vadd.f32 %v6219_v11, %v15059_v9  ;;  %v13292_v9 = vld [vmem:[%s13546_s23 + $0x1684] ss:$16 sps:$4 sm:$0xff]   ;;  %v13320_v11 = vld [vmem:[%s13546_s23 + $0x1720] ss:$16 sps:$4 sm:$0xff]   ;;  %v13341_v36 = vld [vmem:[%s13546_s23 + $0x177c] ss:$16 sps:$4 sm:$0xff]  }
 0x2f9   : > { %v9268_v5 = vadd.f32 %v9267_v2, %v9237_v32  ;;  %v9287_v55 = vrot.slane %v9280_v43, %v13601_v52  ;;  %v13353_v12 = vld [vmem:[%s13546_s23 + $0x17bc] ss:$16 sps:$4 sm:$0xff]   ;;  %v13351_v41 = vld [vmem:[%s13546_s23 + $0x17b8] ss:$16 sps:$4 sm:$0xff]   ;;  %v13354_v43 = vld [vmem:[%s13546_s23 + $0x17d0] ss:$16 sps:$4 sm:$0xff]  }
 0x2fa   : > { %9044 = vmatpush1.bf16.msra.mxu0 %v13278_v13  ;;  %9085 = vmatpush1.bf16.msra.mxu1 %v13281_v54  ;;  %v13323_v13 = vld [vmem:[%s13546_s23 + $0x1728] ss:$16 sps:$4 sm:$0xff]   ;;  %v13328_v54 = vld [vmem:[%s13546_s23 + $0x1744] ss:$16 sps:$4 sm:$0xff]  }
 0x2fb   : > { %9045 = vmatprep.subr.bf16.mxu0 %v13286_v16  ;;  %9086 = vmatprep.subr.bf16.mxu1 %v13289_v29  ;;  %v9289_v10 = vadd.f32 %v9287_v55, %v9268_v5  ;;  %v13331_v16 = vld [vmem:[%s13546_s23 + $0x174c] ss:$16 sps:$4 sm:$0xff]   ;;  %v11803_v29 = vld [vmem:[%s13546_s23 + $0x1760] sm:$0x33]  ;;  %v13363_v55 = vld [vmem:[%s13546_s23 + $0x17f8] ss:$16 sps:$4 sm:$0xff]  }
 0x2fc   : > { %v11854_v17 = vcombine.high %v11803_v29, %v11803_v29  ;;  %v13360_v5 = vld [vmem:[%s13546_s23 + $0x17f0] ss:$16 sps:$4 sm:$0xff]  }
 0x2fd   : > { %v9290_v21 = vmax.f32 %v9289_v10, 0.0  ;;  %v13377_v10 = vld [vmem:[%s13546_s23 + $0x183c] ss:$16 sps:$4 sm:$0xff]  }
 0x2fe   : > { %9046 = vmatpush1.bf16.msra.mxu0 %v13284_v26  ;;  %9087 = vmatpush1.bf16.msra.mxu1 %v13287_v28  ;;  %v11853_v26 = vcombine.low %v11803_v29, %v11803_v29  ;;  %v11855_v28 = vcombine.low %v11804_v34, %v11804_v34  ;;  %v13378_v29 = vld [vmem:[%s13546_s23 + $0x1850] ss:$16 sps:$4 sm:$0xff]   ;;  %v13381_v34 = vld [vmem:[%s13546_s23 + $0x1858] ss:$16 sps:$4 sm:$0xff]  }
 0x2ff   : > { %9047 = vmatprep.subr.bf16.mxu0 %v13292_v9  ;;  %9088 = vmatprep.subr.bf16.mxu1 %v13295_v25  ;;  %v15222_v9 = vrot.slane %v9290_v21, %v13601_v52  ;;  %v13386_v21 = vld [vmem:[%s13546_s23 + $0x1874] ss:$16 sps:$4 sm:$0xff]  }
 0x300   : > { %v9026_v25 = vsel %vm848_vm0, %v11853_v26, 0  ;;  %v9032_v33 = vsel %vm848_vm0, %v11855_v28, 0  ;;  %v13395_v26 = vld [vmem:[%s13546_s23 + $0x189c] ss:$16 sps:$4 sm:$0xff]   ;;  %v13390_v28 = vld [vmem:[%s13546_s23 + $0x1890] ss:$16 sps:$4 sm:$0xff]  }
 0x301   : > { %v9300_v59 = vcombine.high %v15222_v9, %v15222_v9 }
 0x302   : > { %9048 = vmatpush1.bf16.msra.mxu0 %v13290_v24  ;;  %9089 = vmatpush1.bf16.msra.mxu1 %v13293_v15  ;;  %v13336_v24 = vld [vmem:[%s13546_s23 + $0x1770] ss:$16 sps:$4 sm:$0xff]   ;;  %v13339_v15 = vld [vmem:[%s13546_s23 + $0x1778] ss:$16 sps:$4 sm:$0xff]  }
 0x303   : > { %9049 = vmatprep.subr.bf16.mxu0 %v13298_v8  ;;  %9090 = vmatprep.subr.bf16.mxu1 %v13301_v23  ;;  %v13344_v8 = vld [vmem:[%s13546_s23 + $0x1794] ss:$16 sps:$4 sm:$0xff]   ;;  %v13347_v23 = vld [vmem:[%s13546_s23 + $0x179c] ss:$16 sps:$4 sm:$0xff]   ;;  %v9304_v39 = vpack.c.bf16 %v9300_v59, %v9300_v59  ;;  %v13399_v59 = vld [vmem:[%s13546_s23 + $0x18b8] ss:$16 sps:$4 sm:$0xff]  }
 0x306   : > { %9050 = vmatpush1.bf16.msra.mxu0 %v13296_v48  ;;  %9091 = vmatpush1.bf16.msra.mxu1 %v13299_v0 }
 0x307   : > { %9051 = vmatprep.subr.bf16.mxu0 %v13304_v31  ;;  %9092 = vmatprep.subr.bf16.mxu1 %v13307_v51 }
 0x30a   : > { %9052 = vmatpush1.bf16.msra.mxu0 %v13302_v57  ;;  %9093 = vmatpush1.bf16.msra.mxu1 %v13305_v58 }
 0x30b   : > { %9053 = vmatprep.subr.bf16.mxu0 %v13310_v3  ;;  %9094 = vmatprep.subr.bf16.mxu1 %v13313_v7  ;;  %v13356_v3 = vld [vmem:[%s13546_s23 + $0x17d4] ss:$16 sps:$4 sm:$0xff]   ;;  %v13359_v7 = vld [vmem:[%s13546_s23 + $0x17dc] ss:$16 sps:$4 sm:$0xff]  }
 0x30e   : > { %9054 = vmatpush1.bf16.msra.mxu0 %v13308_v1  ;;  %9095 = vmatpush1.bf16.msra.mxu1 %v13311_v44  ;;  %v13357_v1 = vld [vmem:[%s13546_s23 + $0x17d8] ss:$16 sps:$4 sm:$0xff]   ;;  %v13362_v44 = vld [vmem:[%s13546_s23 + $0x17f4] ss:$16 sps:$4 sm:$0xff]  }
 0x30f   : > { %9055 = vmatprep.subr.bf16.mxu0 %v13316_v4  ;;  %9096 = vmatprep.subr.bf16.mxu1 %v13319_v6  ;;  %v13365_v4 = vld [vmem:[%s13546_s23 + $0x17fc] ss:$16 sps:$4 sm:$0xff]  }
 0x312   : > { %9056 = vmatpush1.bf16.msra.mxu0 %v13314_v60  ;;  %9097 = vmatpush1.bf16.msra.mxu1 %v13317_v37  ;;  %v13368_v60 = vld [vmem:[%s13546_s23 + $0x1814] ss:$16 sps:$4 sm:$0xff]   ;;  %v13371_v37 = vld [vmem:[%s13546_s23 + $0x181c] ss:$16 sps:$4 sm:$0xff]  }
 0x313   : > { %9057 = vmatprep.subr.bf16.mxu0 %v13322_v19  ;;  %9098 = vmatprep.subr.bf16.mxu1 %v13325_v14  ;;  %v13366_v19 = vld [vmem:[%s13546_s23 + $0x1810] ss:$16 sps:$4 sm:$0xff]   ;;  %v13369_v14 = vld [vmem:[%s13546_s23 + $0x1818] ss:$16 sps:$4 sm:$0xff]  }
 0x316   : > { %9058 = vmatpush1.bf16.msra.mxu0 %v13320_v11  ;;  %9099 = vmatpush1.bf16.msra.mxu1 %v13323_v13  ;;  %v13372_v11 = vld [vmem:[%s13546_s23 + $0x1830] ss:$16 sps:$4 sm:$0xff]   ;;  %v13375_v13 = vld [vmem:[%s13546_s23 + $0x1838] ss:$16 sps:$4 sm:$0xff]  }
 0x317   : > { %9059 = vmatprep.subr.bf16.mxu0 %v13328_v54  ;;  %9100 = vmatprep.subr.bf16.mxu1 %v13331_v16  ;;  %v13380_v54 = vld [vmem:[%s13546_s23 + $0x1854] ss:$16 sps:$4 sm:$0xff]   ;;  %v13383_v16 = vld [vmem:[%s13546_s23 + $0x185c] ss:$16 sps:$4 sm:$0xff]  }
 0x31a   : > { %9060 = vmatpush1.bf16.msra.mxu0 %v13326_v62  ;;  %9101 = vmatpush1.bf16.msra.mxu1 %v13329_v47  ;;  %v13389_v62 = vld [vmem:[%s13546_s23 + $0x187c] ss:$16 sps:$4 sm:$0xff]   ;;  %v13384_v47 = vld [vmem:[%s13546_s23 + $0x1870] ss:$16 sps:$4 sm:$0xff]  }
 0x31b   : > { %11857 = vmatprep.subr.msk.bf16.mxu0 %vm848_vm0, %v11854_v17  ;;  %11859 = vmatprep.subr.msk.bf16.mxu1 %vm848_vm0, %v11856_v63  ;;  %v13387_v17 = vld [vmem:[%s13546_s23 + $0x1878] ss:$16 sps:$4 sm:$0xff]   ;;  %v13392_v63 = vld [vmem:[%s13546_s23 + $0x1894] ss:$16 sps:$4 sm:$0xff]  }
 0x31e   : > { %9062 = vmatpush1.bf16.msra.mxu0 %v9026_v25  ;;  %9103 = vmatpush1.bf16.msra.mxu1 %v9032_v33  ;;  %v13393_v25 = vld [vmem:[%s13546_s23 + $0x1898] ss:$16 sps:$4 sm:$0xff]   ;;  %v13398_v33 = vld [vmem:[%s13546_s23 + $0x18b4] ss:$16 sps:$4 sm:$0xff]  }
 0x31f   : > { %9621 = vmatprep.subr.bf16.mxu0 %v13338_v35  ;;  %9662 = vmatprep.subr.bf16.mxu1 %v13341_v36  ;;  %v13401_v35 = vld [vmem:[%s13546_s23 + $0x18bc] ss:$16 sps:$4 sm:$0xff]   ;;  %v13396_v36 = vld [vmem:[%s13546_s23 + $0x18b0] ss:$16 sps:$4 sm:$0xff]  }
 0x321   : > { %9070 = vmatmul.mubr.bf16.vlgmr.msra.gmra.mrb[56].mxu0 %v8719_v38  ;;  %9111 = vmatmul.mubr.bf16.vlgmr.msra.gmra.mrb[56].mxu1 %v8719_v38  ;;  %v13404_v38 = vld [vmem:[%s13546_s23 + $0x18d4] ss:$16 sps:$4 sm:$0xff]  }
 0x322   : > { %9622 = vmatpush1.bf16.msra.mxu0 %v13336_v24  ;;  %9663 = vmatpush1.bf16.msra.mxu1 %v13339_v15  ;;  %v13407_v24 = vld [vmem:[%s13546_s23 + $0x18dc] ss:$16 sps:$4 sm:$0xff]   ;;  %v11911_v15 = vld [vmem:[%s13546_s23 + $0x18f0] sm:$0x33] }
 0x323   : > { %9623 = vmatprep.subr.bf16.mxu0 %v13344_v8  ;;  %9664 = vmatprep.subr.bf16.mxu1 %v13347_v23  ;;  %v11912_v8 = vld [vmem:[%s13546_s23 + $0x18f8] sm:$0x33]  ;;  %v13402_v23 = vld [vmem:[%s13546_s23 + $0x18d0] ss:$16 sps:$4 sm:$0xff]  }
 0x324   : > { %v6735_v45 = vpop.f32.mrb[40].mxu0  ;;  %v6776_v48 = vpop.f32.mrb[40].mxu1  ;;  %11966 = vmatprep.mubr.msk.bf16.mxu0 %vm844_vm1, %v9304_v39  ;;  %11968 = vmatprep.mubr.msk.bf16.mxu1 %vm844_vm1, %v9304_v39  ;;  %v13405_v39 = vld [vmem:[%s13546_s23 + $0x18d8] ss:$16 sps:$4 sm:$0xff]  }
 0x325   : > { %v6737_v0 = vpop.f32.mrb[41].mxu0  ;;  %v6778_v31 = vpop.f32.mrb[41].mxu1 }
 0x326   : > { %v6787_v51 = vcombine.low %v6735_v45, %v6737_v0  ;;  %v6788_v20 = vcombine.low %v6776_v48, %v6778_v31  ;;  %v6739_v50 = vpop.f32.mrb[42].mxu0  ;;  %v6780_v61 = vpop.f32.mrb[42].mxu1  ;;  %9624 = vmatpush1.bf16.msra.mxu0 %v13342_v22  ;;  %9665 = vmatpush1.bf16.msra.mxu1 %v13345_v30  ;;  %v11962_v22 = vcombine.high %v11911_v15, %v11911_v15 }
 0x327   : > { %v6740_v57 = vpop.f32.mrb[43].mxu0  ;;  %v6781_v58 = vpop.f32.mrb[43].mxu1  ;;  %9625 = vmatprep.subr.bf16.mxu0 %v13350_v56  ;;  %9666 = vmatprep.subr.bf16.mxu1 %v13353_v12  ;;  %v11964_v30 = vcombine.high %v11912_v8, %v11912_v8  ;;  %v11961_v56 = vcombine.low %v11911_v15, %v11911_v15  ;;  %v11963_v12 = vcombine.low %v11912_v8, %v11912_v8 }
 0x328   : > { %v6795_v32 = vrot.slane %v6787_v51, %v13601_v52  ;;  %v6802_v27 = vrot.slane %v6788_v20, %v13601_v52  ;;  %v9303_v0 = vpack.c.bf16 %v15222_v9, %v15222_v9 }
 0x329   : > { %v9610_v45 = vsel %vm848_vm0, %v11961_v56, 0  ;;  %v9616_v48 = vsel %vm848_vm0, %v11963_v12, 0 }
 0x32a   : > { %v6803_v2 = vcombine.low %v6795_v32, %v6802_v27  ;;  %9626 = vmatpush1.bf16.msra.mxu0 %v13348_v18  ;;  %9667 = vmatpush1.bf16.msra.mxu1 %v13351_v41 }
 0x32b   : > { %9627 = vmatprep.subr.bf16.mxu0 %v13356_v3  ;;  %9668 = vmatprep.subr.bf16.mxu1 %v13359_v7 }
 0x32c   : > { %v15255_v6 = vadd.f32 %v6803_v2, %v15166_v49  ;;  %v13374_v49 = vld [vmem:[%s13546_s23 + $0x1834] ss:$16 sps:$4 sm:$0xff]  }
 0x32e   : > { %9628 = vmatpush1.bf16.msra.mxu0 %v13354_v43  ;;  %9669 = vmatpush1.bf16.msra.mxu1 %v13357_v1 }
 0x32f   : > { %9629 = vmatprep.subr.bf16.mxu0 %v13362_v44  ;;  %9670 = vmatprep.subr.bf16.mxu1 %v13365_v4 }
 0x332   : > { %9630 = vmatpush1.bf16.msra.mxu0 %v13360_v5  ;;  %9671 = vmatpush1.bf16.msra.mxu1 %v13363_v55 }
 0x333   : > { %9631 = vmatprep.subr.bf16.mxu0 %v13368_v60  ;;  %9672 = vmatprep.subr.bf16.mxu1 %v13371_v37 }
 0x336   : > { %9632 = vmatpush1.bf16.msra.mxu0 %v13366_v19  ;;  %9673 = vmatpush1.bf16.msra.mxu1 %v13369_v14 }
 0x337   : > { %9633 = vmatprep.subr.bf16.mxu0 %v13374_v49  ;;  %9674 = vmatprep.subr.bf16.mxu1 %v13377_v10 }
 0x33a   : > { %9634 = vmatpush1.bf16.msra.mxu0 %v13372_v11  ;;  %9675 = vmatpush1.bf16.msra.mxu1 %v13375_v13 }
 0x33b   : > { %9635 = vmatprep.subr.bf16.mxu0 %v13380_v54  ;;  %9676 = vmatprep.subr.bf16.mxu1 %v13383_v16 }
 0x33e   : > { %9636 = vmatpush1.bf16.msra.mxu0 %v13378_v29  ;;  %9677 = vmatpush1.bf16.msra.mxu1 %v13381_v34 }
 0x33f   : > { %9637 = vmatprep.subr.bf16.mxu0 %v13386_v21  ;;  %9678 = vmatprep.subr.bf16.mxu1 %v13389_v62 }
 0x342   : > { %9638 = vmatpush1.bf16.msra.mxu0 %v13384_v47  ;;  %9679 = vmatpush1.bf16.msra.mxu1 %v13387_v17 }
 0x343   : > { %9639 = vmatprep.subr.bf16.mxu0 %v13392_v63  ;;  %9680 = vmatprep.subr.bf16.mxu1 %v13395_v26 }
 0x346   : > { %9640 = vmatpush1.bf16.msra.mxu0 %v13390_v28  ;;  %9681 = vmatpush1.bf16.msra.mxu1 %v13393_v25 }
 0x347   : > { %9641 = vmatprep.subr.bf16.mxu0 %v13398_v33  ;;  %9682 = vmatprep.subr.bf16.mxu1 %v13401_v35 }
 0x34a   : > { %9642 = vmatpush1.bf16.msra.mxu0 %v13396_v36  ;;  %9683 = vmatpush1.bf16.msra.mxu1 %v13399_v59 }
 0x34b   : > { %9643 = vmatprep.subr.bf16.mxu0 %v13404_v38  ;;  %9684 = vmatprep.subr.bf16.mxu1 %v13407_v24 }
 0x34e   : > { %9644 = vmatpush1.bf16.msra.mxu0 %v13402_v23  ;;  %9685 = vmatpush1.bf16.msra.mxu1 %v13405_v39 }
 0x34f   : > { %11965 = vmatprep.subr.msk.bf16.mxu0 %vm848_vm0, %v11962_v22  ;;  %11967 = vmatprep.subr.msk.bf16.mxu1 %vm848_vm0, %v11964_v30 }
 0x352   : > { %9646 = vmatpush1.bf16.msra.mxu0 %v9610_v45  ;;  %9687 = vmatpush1.bf16.msra.mxu1 %v9616_v48 }
 0x355   : > { %9654 = vmatmul.mubr.bf16.vlgmr.msra.gmra.mrb[60].mxu0 %v9303_v0  ;;  %9695 = vmatmul.mubr.bf16.vlgmr.msra.gmra.mrb[60].mxu1 %v9303_v0 }
 0x358   : > { %v7319_v31 = vpop.f32.mrb[44].mxu0  ;;  %v7360_v51 = vpop.f32.mrb[44].mxu1 }
 0x359   : > { %v7321_v20 = vpop.f32.mrb[45].mxu0  ;;  %v7362_v50 = vpop.f32.mrb[45].mxu1 }
 0x35a   : > { %v7371_v61 = vcombine.low %v7319_v31, %v7321_v20  ;;  %v7372_v18 = vcombine.low %v7360_v51, %v7362_v50  ;;  %v7323_v41 = vpop.f32.mrb[46].mxu0  ;;  %v7364_v57 = vpop.f32.mrb[46].mxu1 }
 0x35b   : > { %v7324_v58 = vpop.f32.mrb[47].mxu0  ;;  %v7365_v3 = vpop.f32.mrb[47].mxu1 }
 0x35c   : > { %v7379_v7 = vrot.slane %v7371_v61, %v13601_v52  ;;  %v7386_v32 = vrot.slane %v7372_v18, %v13601_v52 }
 0x35e   : > { %v7387_v27 = vcombine.low %v7379_v7, %v7386_v32  ;;  %v9771_v32 = vld [vmem:[%s15839_s5 + $0x8] sm:$0xff] (!%p11969_p5) }
 0x360   : > { %v7389_v9 = vadd.f32 %v7387_v27, %v15255_v6  ;;  %v9773_v27 = vld [vmem:[%s15839_s5 + $0x18] sm:$0xff] (!%p11969_p5) }
 0x38c   : > { %v7903_v2 = vpop.f32.mrb[48].mxu0  ;;  %v7944_v43 = vpop.f32.mrb[48].mxu1 }
 0x38d   : > { %v7905_v1 = vpop.f32.mrb[49].mxu0  ;;  %v7946_v44 = vpop.f32.mrb[49].mxu1 }
 0x38e   : > { %v7955_v4 = vcombine.low %v7903_v2, %v7905_v1  ;;  %v7956_v5 = vcombine.low %v7944_v43, %v7946_v44  ;;  %v7907_v55 = vpop.f32.mrb[50].mxu0  ;;  %v7948_v60 = vpop.f32.mrb[50].mxu1  ;;  %v12011_v2 = vpack.c.bf16 (!%p11969_p5), %v9773_v27, %v9771_v32  ;;  %v9772_v43 = vld [vmem:[%s15839_s5 + $0x10] sm:$0xff] (!%p11969_p5)  ;;  %v9835_v1 = vld [vmem:[%s15839_s5 + $0x208] sm:$0xff] (!%p11969_p5)  ;;  %v9837_v44 = vld [vmem:[%s15839_s5 + $0x218] sm:$0xff] (!%p11969_p5) }
 0x38f   : > { %v7908_v37 = vpop.f32.mrb[51].mxu0  ;;  %v7949_v19 = vpop.f32.mrb[51].mxu1  ;;  %v9834_v55 = vld [vmem:[%s15839_s5 + $0x200] sm:$0xff] (!%p11969_p5)  ;;  %v9836_v60 = vld [vmem:[%s15839_s5 + $0x210] sm:$0xff] (!%p11969_p5)  ;;  %v9793_v32 = vld [vmem:[%s15839_s5 + $0xb8] sm:$0xff] (!%p11969_p5) }
 0x390   : > { %v7963_v14 = vrot.slane %v7955_v4, %v13601_v52  ;;  %v7970_v49 = vrot.slane %v7956_v5, %v13601_v52  ;;  %v12075_v5 = vpack.c.bf16 (!%p11969_p5), %v9837_v44, %v9835_v1  ;;  %v9775_v37 = vld [vmem:[%s15839_s5 + $0x28] sm:$0xff] (!%p11969_p5)  ;;  %12012 = vmatprep.subr.bf16.mxu1 (!%p11969_p5), %v12011_v2  ;;  %v12077_v19 = vpack.c.bf16 (!%p11969_p5), %v9836_v60, %v9834_v55  ;;  %v9790_v44 = vld [vmem:[%s15839_s5 + $0xa0] sm:$0xff] (!%p11969_p5)  ;;  %v9856_v60 = vld [vmem:[%s15839_s5 + $0x2b0] sm:$0xff] (!%p11969_p5) }
 0x391   : > { %v9855_v27 = vld [vmem:[%s15839_s5 + $0x2a8] sm:$0xff] (!%p11969_p5) }
 0x392   : > { %v7971_v10 = vcombine.low %v7963_v14, %v7970_v49  ;;  %v9777_v14 = vld [vmem:[%s15839_s5 + $0x38] sm:$0xff] (!%p11969_p5)  ;;  %v9774_v49 = vld [vmem:[%s15839_s5 + $0x20] sm:$0xff] (!%p11969_p5)  ;;  %12076 = vmatprep.subr.bf16.mxu0 (!%p11969_p5), %v12075_v5 }
 0x393   : > { %12078 = vmatpush1.bf16.msra.mxu0 (!%p11969_p5), %v12077_v19  ;;  %v9854_v5 = vld [vmem:[%s15839_s5 + $0x2a0] sm:$0xff] (!%p11969_p5)  ;;  %v9797_v19 = vld [vmem:[%s15839_s5 + $0xd8] sm:$0xff] (!%p11969_p5) }
 0x394   : > { %v7973_v11 = vadd.f32 %v7971_v10, %v7389_v9  ;;  %v9770_v9 = vld [vmem:[%s15839_s5] sm:$0xff] (!%p11969_p5)  ;;  %v9776_v10 = vld [vmem:[%s15839_s5 + $0x30] sm:$0xff] (!%p11969_p5) }
 0x395   : > { %v12013_v4 = vpack.c.bf16 (!%p11969_p5), %v9772_v43, %v9770_v9  ;;  %v9857_v9 = vld [vmem:[%s15839_s5 + $0x2b8] sm:$0xff] (!%p11969_p5) }
 0x396   : > { %v12095_v55 = vpack.c.bf16 (!%p11969_p5), %v9857_v9, %v9855_v27  ;;  %v9813_v27 = vld [vmem:[%s15839_s5 + $0x158] sm:$0xff] (!%p11969_p5)  ;;  %v9875_v9 = vld [vmem:[%s15839_s5 + $0x348] sm:$0xff] (!%p11969_p5) }
 0x397   : > { %12014 = vmatpush1.bf16.msra.mxu1 (!%p11969_p5), %v12013_v4  ;;  %v9792_v4 = vld [vmem:[%s15839_s5 + $0xb0] sm:$0xff] (!%p11969_p5) }
 0x3c0   : > { %v8487_v13 = vpop.f32.mrb[52].mxu0  ;;  %v8528_v54 = vpop.f32.mrb[52].mxu1 }
 0x3c1   : > { %v8489_v16 = vpop.f32.mrb[53].mxu0  ;;  %v8530_v6 = vpop.f32.mrb[53].mxu1 }
 0x3c2   : > { %v8539_v29 = vcombine.low %v8487_v13, %v8489_v16  ;;  %v8540_v34 = vcombine.low %v8528_v54, %v8530_v6  ;;  %v8491_v21 = vpop.f32.mrb[54].mxu0  ;;  %v8532_v62 = vpop.f32.mrb[54].mxu1  ;;  %v12017_v13 = vpack.c.bf16 (!%p11969_p5), %v9776_v10, %v9774_v49  ;;  %v9839_v54 = vld [vmem:[%s15839_s5 + $0x228] sm:$0xff] (!%p11969_p5)  ;;  %v9841_v16 = vld [vmem:[%s15839_s5 + $0x238] sm:$0xff] (!%p11969_p5)  ;;  %v9838_v6 = vld [vmem:[%s15839_s5 + $0x220] sm:$0xff] (!%p11969_p5)  ;;  %v12033_v10 = vpack.c.bf16 (!%p11969_p5), %v9792_v4, %v9790_v44 }
 0x3c3   : > { %v8492_v47 = vpop.f32.mrb[55].mxu0  ;;  %v8533_v17 = vpop.f32.mrb[55].mxu1  ;;  %v9779_v21 = vld [vmem:[%s15839_s5 + $0x48] sm:$0xff] (!%p11969_p5)  ;;  %v9781_v62 = vld [vmem:[%s15839_s5 + $0x58] sm:$0xff] (!%p11969_p5)  ;;  %v9810_v4 = vld [vmem:[%s15839_s5 + $0x140] sm:$0xff] (!%p11969_p5) }
 0x3c4   : > { %v8547_v63 = vrot.slane %v8539_v29, %v13601_v52  ;;  %v8554_v26 = vrot.slane %v8540_v34, %v13601_v52  ;;  %v12079_v29 = vpack.c.bf16 (!%p11969_p5), %v9841_v16, %v9839_v54  ;;  %v9840_v34 = vld [vmem:[%s15839_s5 + $0x230] sm:$0xff] (!%p11969_p5)  ;;  %v12019_v17 = vpack.c.bf16 (!%p11969_p5), %v9781_v62, %v9779_v21  ;;  %v9861_v49 = vld [vmem:[%s15839_s5 + $0x2d8] sm:$0xff] (!%p11969_p5)  ;;  %v9794_v54 = vld [vmem:[%s15839_s5 + $0xc0] sm:$0xff] (!%p11969_p5) }
 0x3c5   : > { %v12081_v47 = vpack.c.bf16 (!%p11969_p5), %v9840_v34, %v9838_v6  ;;  %v9796_v16 = vld [vmem:[%s15839_s5 + $0xd0] sm:$0xff] (!%p11969_p5)  ;;  %v9858_v6 = vld [vmem:[%s15839_s5 + $0x2c0] sm:$0xff] (!%p11969_p5)  ;;  %v9799_v21 = vld [vmem:[%s15839_s5 + $0xe8] sm:$0xff] (!%p11969_p5) }
 0x3c6   : > { %v8555_v28 = vcombine.low %v8547_v63, %v8554_v26  ;;  %v9778_v63 = vld [vmem:[%s15839_s5 + $0x40] sm:$0xff] (!%p11969_p5)  ;;  %v9780_v26 = vld [vmem:[%s15839_s5 + $0x50] sm:$0xff] (!%p11969_p5)  ;;  %12080 = vmatprep.subr.bf16.mxu0 (!%p11969_p5), %v12079_v29  ;;  %v9801_v62 = vld [vmem:[%s15839_s5 + $0xf8] sm:$0xff] (!%p11969_p5) }
 0x3c7   : > { %12082 = vmatpush1.bf16.msra.mxu0 (!%p11969_p5), %v12081_v47  ;;  %v9860_v34 = vld [vmem:[%s15839_s5 + $0x2d0] sm:$0xff] (!%p11969_p5)  ;;  %v9863_v47 = vld [vmem:[%s15839_s5 + $0x2e8] sm:$0xff] (!%p11969_p5) }
 0x3c8   : > { %v8557_v25 = vadd.f32 %v8555_v28, %v7973_v11  ;;  %v12015_v11 = vpack.c.bf16 (!%p11969_p5), %v9777_v14, %v9775_v37  ;;  %v9843_v28 = vld [vmem:[%s15839_s5 + $0x248] sm:$0xff] (!%p11969_p5) }
 0x3c9   : > { %v9795_v37 = vld [vmem:[%s15839_s5 + $0xc8] sm:$0xff] (!%p11969_p5) }
 0x3ca   : > { %12016 = vmatprep.subr.bf16.mxu1 (!%p11969_p5), %v12015_v11  ;;  %v9859_v14 = vld [vmem:[%s15839_s5 + $0x2c8] sm:$0xff] (!%p11969_p5)  ;;  %v12097_v11 = vpack.c.bf16 (!%p11969_p5), %v9856_v60, %v9854_v5  ;;  %v9812_v5 = vld [vmem:[%s15839_s5 + $0x150] sm:$0xff] (!%p11969_p5) }
 0x3cb   : > { %12018 = vmatpush1.bf16.msra.mxu1 (!%p11969_p5), %v12017_v13  ;;  %v12035_v13 = vpack.c.bf16 (!%p11969_p5), %v9797_v19, %v9795_v37  ;;  %v12099_v29 = vpack.c.bf16 (!%p11969_p5), %v9861_v49, %v9859_v14  ;;  %v9876_v37 = vld [vmem:[%s15839_s5 + $0x350] sm:$0xff] (!%p11969_p5)  ;;  %v9815_v19 = vld [vmem:[%s15839_s5 + $0x168] sm:$0xff] (!%p11969_p5)  ;;  %v9817_v14 = vld [vmem:[%s15839_s5 + $0x178] sm:$0xff] (!%p11969_p5) }
 0x3cc   : > { %12020 = vmatprep.subr.bf16.mxu1 (!%p11969_p5), %v12019_v17  ;;  %v9865_v17 = vld [vmem:[%s15839_s5 + $0x2f8] sm:$0xff] (!%p11969_p5)  ;;  %v9879_v49 = vld [vmem:[%s15839_s5 + $0x368] sm:$0xff] (!%p11969_p5) }
 0x3f4   : > { %v9071_v33 = vpop.f32.mrb[56].mxu0  ;;  %v9112_v35 = vpop.f32.mrb[56].mxu1 }
 0x3f5   : > { %v9073_v36 = vpop.f32.mrb[57].mxu0  ;;  %v9114_v59 = vpop.f32.mrb[57].mxu1 }
 0x3f6   : > { %v9123_v38 = vcombine.low %v9071_v33, %v9073_v36  ;;  %v9124_v24 = vcombine.low %v9112_v35, %v9114_v59  ;;  %v9075_v15 = vpop.f32.mrb[58].mxu0  ;;  %v9116_v8 = vpop.f32.mrb[58].mxu1  ;;  %v9842_v33 = vld [vmem:[%s15839_s5 + $0x240] sm:$0xff] (!%p11969_p5)  ;;  %v9844_v35 = vld [vmem:[%s15839_s5 + $0x250] sm:$0xff] (!%p11969_p5)  ;;  %v12021_v36 = vpack.c.bf16 (!%p11969_p5), %v9780_v26, %v9778_v63  ;;  %v12037_v63 = vpack.c.bf16 (!%p11969_p5), %v9796_v16, %v9794_v54 }
 0x3f7   : > { %v9076_v23 = vpop.f32.mrb[59].mxu0  ;;  %v9117_v39 = vpop.f32.mrb[59].mxu1  ;;  %v9782_v15 = vld [vmem:[%s15839_s5 + $0x60] sm:$0xff] (!%p11969_p5)  ;;  %v12085_v8 = vpack.c.bf16 (!%p11969_p5), %v9844_v35, %v9842_v33  ;;  %v12101_v26 = vpack.c.bf16 (!%p11969_p5), %v9860_v34, %v9858_v6  ;;  %v9800_v33 = vld [vmem:[%s15839_s5 + $0xf0] sm:$0xff] (!%p11969_p5)  ;;  %v12055_v6 = vpack.c.bf16 (!%p11969_p5), %v9817_v14, %v9815_v19  ;;  %v9833_v19 = vld [vmem:[%s15839_s5 + $0x1f8] sm:$0xff] (!%p11969_p5) }
 0x3f8   : > { %v9131_v22 = vrot.slane %v9123_v38, %v13601_v52  ;;  %v9138_v30 = vrot.slane %v9124_v24, %v13601_v52  ;;  %v9783_v38 = vld [vmem:[%s15839_s5 + $0x68] sm:$0xff] (!%p11969_p5)  ;;  %v9785_v24 = vld [vmem:[%s15839_s5 + $0x78] sm:$0xff] (!%p11969_p5)  ;;  %v9784_v39 = vld [vmem:[%s15839_s5 + $0x70] sm:$0xff] (!%p11969_p5)  ;;  %12022 = vmatpush1.bf16.msra.mxu1 (!%p11969_p5), %v12021_v36  ;;  %v12103_v36 = vpack.c.bf16 (!%p11969_p5), %v9865_v17, %v9863_v47 }
 0x3f9   : > { %v12023_v23 = vpack.c.bf16 (!%p11969_p5), %v9785_v24, %v9783_v38  ;;  %v9862_v35 = vld [vmem:[%s15839_s5 + $0x2e0] sm:$0xff] (!%p11969_p5)  ;;  %v9803_v38 = vld [vmem:[%s15839_s5 + $0x108] sm:$0xff] (!%p11969_p5)  ;;  %v9805_v24 = vld [vmem:[%s15839_s5 + $0x118] sm:$0xff] (!%p11969_p5) }
 0x3fa   : > { %v9139_v56 = vcombine.low %v9131_v22, %v9138_v30  ;;  %v9847_v22 = vld [vmem:[%s15839_s5 + $0x268] sm:$0xff] (!%p11969_p5)  ;;  %v9849_v30 = vld [vmem:[%s15839_s5 + $0x278] sm:$0xff] (!%p11969_p5)  ;;  %v9816_v54 = vld [vmem:[%s15839_s5 + $0x170] sm:$0xff] (!%p11969_p5) }
 0x3fb   : > { %12024 = vmatprep.subr.bf16.mxu1 (!%p11969_p5), %v12023_v23  ;;  %v9821_v47 = vld [vmem:[%s15839_s5 + $0x198] sm:$0xff] (!%p11969_p5) }
 0x3fc   : > { %v9141_v12 = vadd.f32 %v9139_v56, %v8557_v25  ;;  %v9845_v25 = vld [vmem:[%s15839_s5 + $0x258] sm:$0xff] (!%p11969_p5)  ;;  %v12087_v56 = vpack.c.bf16 (!%p11969_p5), %v9849_v30, %v9847_v22  ;;  %v12043_v22 = vpack.c.bf16 (!%p11969_p5), %v9805_v24, %v9803_v38  ;;  %v9802_v30 = vld [vmem:[%s15839_s5 + $0x100] sm:$0xff] (!%p11969_p5) }
 0x3fd   : > { %v12083_v59 = vpack.c.bf16 (!%p11969_p5), %v9845_v25, %v9843_v28  ;;  %v12039_v28 = vpack.c.bf16 (!%p11969_p5), %v9801_v62, %v9799_v21  ;;  %v9798_v25 = vld [vmem:[%s15839_s5 + $0xe0] sm:$0xff] (!%p11969_p5)  ;;  %v9880_v21 = vld [vmem:[%s15839_s5 + $0x370] sm:$0xff] (!%p11969_p5)  ;;  %v9819_v62 = vld [vmem:[%s15839_s5 + $0x188] sm:$0xff] (!%p11969_p5) }
 0x3fe   : > { %v12041_v23 = vpack.c.bf16 (!%p11969_p5), %v9800_v33, %v9798_v25  ;;  %v12059_v38 = vpack.c.bf16 (!%p11969_p5), %v9821_v47, %v9819_v62  ;;  %v9818_v24 = vld [vmem:[%s15839_s5 + $0x180] sm:$0xff] (!%p11969_p5)  ;;  %v9896_v47 = vld [vmem:[%s15839_s5 + $0x3f0] sm:$0xff] (!%p11969_p5) }
 0x3ff   : > { %12084 = vmatprep.subr.bf16.mxu0 (!%p11969_p5), %v12083_v59  ;;  %v9864_v59 = vld [vmem:[%s15839_s5 + $0x2f0] sm:$0xff] (!%p11969_p5) }
 0x400   : > { %12086 = vmatpush1.bf16.msra.mxu0 (!%p11969_p5), %v12085_v8  ;;  %v9869_v8 = vld [vmem:[%s15839_s5 + $0x318] sm:$0xff] (!%p11969_p5) }
 0x401   : > { %12088 = vmatprep.subr.bf16.mxu0 (!%p11969_p5), %v12087_v56  ;;  %v9804_v56 = vld [vmem:[%s15839_s5 + $0x110] sm:$0xff] (!%p11969_p5) }
 0x428   : > { %v9655_v45 = vpop.f32.mrb[60].mxu0  ;;  %v9696_v48 = vpop.f32.mrb[60].mxu1 }
 0x429   : > { %v9657_v0 = vpop.f32.mrb[61].mxu0  ;;  %v9698_v31 = vpop.f32.mrb[61].mxu1 }
 0x42a   : > { %v9707_v51 = vcombine.low %v9655_v45, %v9657_v0  ;;  %v9708_v20 = vcombine.low %v9696_v48, %v9698_v31  ;;  %v9659_v50 = vpop.f32.mrb[62].mxu0  ;;  %v9700_v61 = vpop.f32.mrb[62].mxu1  ;;  %v9848_v45 = vld [vmem:[%s15839_s5 + $0x270] sm:$0xff] (!%p11969_p5)  ;;  %v9787_v48 = vld [vmem:[%s15839_s5 + $0x88] sm:$0xff] (!%p11969_p5)  ;;  %v9789_v0 = vld [vmem:[%s15839_s5 + $0x98] sm:$0xff] (!%p11969_p5)  ;;  %v12025_v31 = vpack.c.bf16 (!%p11969_p5), %v9784_v39, %v9782_v15  ;;  %v12105_v39 = vpack.c.bf16 (!%p11969_p5), %v9864_v59, %v9862_v35 }
 0x42b   : > { %v9660_v18 = vpop.f32.mrb[63].mxu0  ;;  %v9701_v41 = vpop.f32.mrb[63].mxu1  ;;  %v12027_v61 = vpack.c.bf16 (!%p11969_p5), %v9789_v0, %v9787_v48  ;;  %v9867_v15 = vld [vmem:[%s15839_s5 + $0x308] sm:$0xff] (!%p11969_p5)  ;;  %v9868_v48 = vld [vmem:[%s15839_s5 + $0x310] sm:$0xff] (!%p11969_p5) }
 0x42c   : > { %v9715_v57 = vrot.slane %v9707_v51, %v13601_v52  ;;  %v9722_v58 = vrot.slane %v9708_v20, %v13601_v52  ;;  %9730 = sbr.rel (%p11969_p5) target bundleno = 1774 (0x6ee), region = 64  ;;  %v9851_v51 = vld [vmem:[%s15839_s5 + $0x288] sm:$0xff] (!%p11969_p5)  ;;  %v9853_v20 = vld [vmem:[%s15839_s5 + $0x298] sm:$0xff] (!%p11969_p5)  ;;  %v9786_v18 = vld [vmem:[%s15839_s5 + $0x80] sm:$0xff] (!%p11969_p5)  ;;  %12026 = vmatpush1.bf16.msra.mxu1 (!%p11969_p5), %v12025_v31 }
 0x42d   : > { %v9788_v41 = vld [vmem:[%s15839_s5 + $0x90] sm:$0xff] (!%p11969_p5)  ;;  %12028 = vmatprep.subr.bf16.mxu1 (!%p11969_p5), %v12027_v61  ;;  %v9807_v0 = vld [vmem:[%s15839_s5 + $0x128] sm:$0xff] (!%p11969_p5)  ;;  %v9809_v31 = vld [vmem:[%s15839_s5 + $0x138] sm:$0xff] (!%p11969_p5) }
 0x42e   : > { %v9723_v3 = vcombine.low %v9715_v57, %v9722_v58  ;;  %v9850_v57 = vld [vmem:[%s15839_s5 + $0x280] sm:$0xff] (!%p11969_p5)  ;;  %v12091_v58 = vpack.c.bf16 (!%p11969_p5), %v9853_v20, %v9851_v51  ;;  %v12029_v2 = vpack.c.bf16 (!%p11969_p5), %v9788_v41, %v9786_v18  ;;  %v9871_v51 = vld [vmem:[%s15839_s5 + $0x328] sm:$0xff] (!%p11969_p5)  ;;  %v9873_v20 = vld [vmem:[%s15839_s5 + $0x338] sm:$0xff] (!%p11969_p5)  ;;  %v12047_v18 = vpack.c.bf16 (!%p11969_p5), %v9809_v31, %v9807_v0 }
 0x42f   : > { %v9806_v41 = vld [vmem:[%s15839_s5 + $0x120] sm:$0xff] (!%p11969_p5) }
 0x430   : > { %v9725_v7 = vadd.f32 %v9723_v3, %v9141_v12  ;;  %v9846_v12 = vld [vmem:[%s15839_s5 + $0x260] sm:$0xff] (!%p11969_p5)  ;;  %v9852_v3 = vld [vmem:[%s15839_s5 + $0x290] sm:$0xff] (!%p11969_p5)  ;;  %12030 = vmatpush1.bf16.msra.mxu1 (!%p11969_p5), %v12029_v2  ;;  %v9877_v2 = vld [vmem:[%s15839_s5 + $0x358] sm:$0xff] (!%p11969_p5) }
 0x431   : > { %v12089_v50 = vpack.c.bf16 (!%p11969_p5), %v9848_v45, %v9846_v12  ;;  %v12093_v43 = vpack.c.bf16 (!%p11969_p5), %v9852_v3, %v9850_v57  ;;  %v9866_v12 = vld [vmem:[%s15839_s5 + $0x300] sm:$0xff] (!%p11969_p5)  ;;  %v12107_v45 = vpack.c.bf16 (!%p11969_p5), %v9869_v8, %v9867_v15  ;;  %v9808_v57 = vld [vmem:[%s15839_s5 + $0x130] sm:$0xff] (!%p11969_p5)  ;;  %v12111_v3 = vpack.c.bf16 (!%p11969_p5), %v9873_v20, %v9871_v51 }
 0x432   : > { %9726 = vst [vmem:[#allocation2] sm:$0xff] %v9725_v7  ;;  %v9791_v7 = vld [vmem:[%s15839_s5 + $0xa8] sm:$0xff] (!%p11969_p5)  ;;  %v12109_v61 = vpack.c.bf16 (!%p11969_p5), %v9868_v48, %v9866_v12  ;;  %v12115_v60 = vpack.c.bf16 (!%p11969_p5), %v9877_v2, %v9875_v9  ;;  %v9820_v15 = vld [vmem:[%s15839_s5 + $0x190] sm:$0xff] (!%p11969_p5)  ;;  %v9882_v8 = vld [vmem:[%s15839_s5 + $0x380] sm:$0xff] (!%p11969_p5) }
 0x433   : > { %12090 = vmatpush1.bf16.msra.mxu0 %v12089_v50  ;;  %v12031_v1 = vpack.c.bf16 %v9793_v32, %v9791_v7  ;;  %v12045_v50 = vpack.c.bf16 %v9804_v56, %v9802_v30  ;;  %v9872_v7 = vld [vmem:[%s15839_s5 + $0x330] sm:$0xff]  ;;  %v9811_v32 = vld [vmem:[%s15839_s5 + $0x148] sm:$0xff]  ;;  %v9889_v12 = vld [vmem:[%s15839_s5 + $0x3b8] sm:$0xff] }
 0x434   : > { %12092 = vmatprep.subr.bf16.mxu0 %v12091_v58  ;;  %v9870_v58 = vld [vmem:[%s15839_s5 + $0x320] sm:$0xff]  ;;  %v12051_v44 = vpack.c.bf16 %v9813_v27, %v9811_v32  ;;  %v9887_v56 = vld [vmem:[%s15839_s5 + $0x3a8] sm:$0xff]  ;;  %v9893_v27 = vld [vmem:[%s15839_s5 + $0x3d8] sm:$0xff] }
 0x435   : > { %12032 = vmatprep.subr.bf16.mxu1 %v12031_v1  ;;  %v12113_v1 = vpack.c.bf16 %v9872_v7, %v9870_v58  ;;  %v9822_v48 = vld [vmem:[%s15839_s5 + $0x1a0] sm:$0xff]  ;;  %v9827_v58 = vld [vmem:[%s15839_s5 + $0x1c8] sm:$0xff] }
 0x436   : > { %12034 = vmatpush1.bf16.msra.mxu1 %v12033_v10  ;;  %v9881_v10 = vld [vmem:[%s15839_s5 + $0x378] sm:$0xff]  ;;  %v9891_v32 = vld [vmem:[%s15839_s5 + $0x3c8] sm:$0xff] }
 0x437   : > { %12094 = vmatpush1.bf16.msra.mxu0 %v12093_v43  ;;  %12036 = vmatprep.subr.bf16.mxu1 %v12035_v13  ;;  %v12049_v43 = vpack.c.bf16 %v9808_v57, %v9806_v41  ;;  %v9814_v13 = vld [vmem:[%s15839_s5 + $0x160] sm:$0xff]  ;;  %v12119_v34 = vpack.c.bf16 %v9881_v10, %v9879_v49  ;;  %v12127_v41 = vpack.c.bf16 %v9889_v12, %v9887_v56  ;;  %v9888_v57 = vld [vmem:[%s15839_s5 + $0x3b0] sm:$0xff]  ;;  %v9895_v49 = vld [vmem:[%s15839_s5 + $0x3e8] sm:$0xff] }
 0x438   : > { %12096 = vmatprep.subr.bf16.mxu0 %v12095_v55  ;;  %v9874_v55 = vld [vmem:[%s15839_s5 + $0x340] sm:$0xff]  ;;  %v12057_v17 = vpack.c.bf16 %v9816_v54, %v9814_v13  ;;  %v9897_v10 = vld [vmem:[%s15839_s5 + $0x3f8] sm:$0xff]  ;;  %v10081_v12 = vld [vmem:[%s15841_s7 + $0x28] sm:$0xff] }
 0x439   : > { %v12117_v16 = vpack.c.bf16 %v9876_v37, %v9874_v55  ;;  %v12131_v55 = vpack.c.bf16 %v9893_v27, %v9891_v32  ;;  %v9831_v37 = vld [vmem:[%s15839_s5 + $0x1e8] sm:$0xff]  ;;  %v12135_v62 = vpack.c.bf16 %v9897_v10, %v9895_v49  ;;  %v10080_v56 = vld [vmem:[%s15841_s7 + $0x20] sm:$0xff]  ;;  %v10090_v49 = vld [vmem:[%s15841_s7 + $0x70] sm:$0xff] }
 0x43a   : > { %12038 = vmatpush1.bf16.msra.mxu1 %v12037_v63  ;;  %v9883_v63 = vld [vmem:[%s15839_s5 + $0x388] sm:$0xff]  ;;  %v10091_v10 = vld [vmem:[%s15841_s7 + $0x78] sm:$0xff] }
 0x43b   : > { %12098 = vmatpush1.bf16.msra.mxu0 %v12097_v11  ;;  %12040 = vmatprep.subr.bf16.mxu1 %v12039_v28  ;;  %v12053_v11 = vpack.c.bf16 %v9812_v5, %v9810_v4  ;;  %v9732_v28 = vld [vmem:[%s15838_s4] sm:$0xf]  ;;  %v9828_v4 = vld [vmem:[%s15839_s5 + $0x1d0] sm:$0xff] }
 0x43c   : > { %12100 = vmatprep.subr.bf16.mxu0 %v12099_v29  ;;  %v9878_v29 = vld [vmem:[%s15839_s5 + $0x360] sm:$0xff]  ;;  %v9737_v25 = vrot.slane %v9732_v28, %v13583_v40  ;;  %v9741_v33 = vrot.slane %v9732_v28, %v13587_v42  ;;  %v9745_v35 = vrot.slane %v9732_v28, %v13593_v46 }
 0x43d   : > { %v12121_v59 = vpack.c.bf16 %v9880_v21, %v9878_v29  ;;  %v9890_v5 = vld [vmem:[%s15839_s5 + $0x3c0] sm:$0xff] }
 0x43e   : > { %12042 = vmatpush1.bf16.msra.mxu1 %v12041_v23  ;;  %v9823_v23 = vld [vmem:[%s15839_s5 + $0x1a8] sm:$0xff]  ;;  %v9830_v29 = vld [vmem:[%s15839_s5 + $0x1e0] sm:$0xff] }
 0x43f   : > { %12102 = vmatpush1.bf16.msra.mxu0 %v12101_v26  ;;  %12044 = vmatprep.subr.bf16.mxu1 %v12043_v22  ;;  %v9885_v26 = vld [vmem:[%s15839_s5 + $0x398] sm:$0xff]  ;;  %v9750_v22 = vcombine.low %v9737_v25, %v9741_v33  ;;  %v9894_v21 = vld [vmem:[%s15839_s5 + $0x3e0] sm:$0xff] }
 0x440   : > { %12104 = vmatprep.subr.bf16.mxu0 %v12103_v36  ;;  %v9749_v36 = vrot.slane %v9732_v28, %v13603_v53  ;;  %v12123_v46 = vpack.c.bf16 %v9885_v26, %v9883_v63  ;;  %v9884_v53 = vld [vmem:[%s15839_s5 + $0x390] sm:$0xff]  ;;  %v10092_v26 = vld [vmem:[%s15841_s7 + $0x80] sm:$0xff]  ;;  %v10093_v28 = vld [vmem:[%s15841_s7 + $0x88] sm:$0xff] }
 0x441   : > { %v9758_v0 = vrot.slane %v9750_v22, %v13601_v52  ;;  %v12125_v51 = vpack.c.bf16 %v9884_v53, %v9882_v8  ;;  %v10079_v53 = vld [vmem:[%s15841_s7 + $0x18] sm:$0xff] }
 0x442   : > { %12046 = vmatpush1.bf16.msra.mxu1 %v12045_v50  ;;  %v9751_v30 = vcombine.low %v9745_v35, %v9749_v36  ;;  %v9824_v50 = vld [vmem:[%s15839_s5 + $0x1b0] sm:$0xff]  ;;  %v12137_v35 = vpack.c.bf16 %v9896_v47, %v9894_v21  ;;  %v12139_v36 = vpack.c.bf16 %v10093_v28, %v10092_v26 }
 0x443   : > { %12106 = vmatpush1.bf16.msra.mxu0 %v12105_v39  ;;  %12048 = vmatprep.subr.bf16.mxu1 %v12047_v18  ;;  %v9825_v39 = vld [vmem:[%s15839_s5 + $0x1b8] sm:$0xff]  ;;  %v9731_v18 = vld [vmem:[#allocation2] sm:$0xff]  ;;  %v12065_v9 = vpack.c.bf16 %v9824_v50, %v9822_v48 }
 0x444   : > { %12108 = vmatprep.subr.bf16.mxu0 %v12107_v45  ;;  %v12061_v45 = vpack.c.bf16 %v9820_v15, %v9818_v24  ;;  %v9765_v31 = vrot.slane %v9751_v30, %v13601_v52  ;;  %v12063_v20 = vpack.c.bf16 %v9825_v39, %v9823_v23  ;;  %v10095_v24 = vld [vmem:[%s15841_s7 + $0x98] sm:$0xff]  ;;  %v10096_v23 = vld [vmem:[%s15841_s7 + $0xa0] sm:$0xff]  ;;  %v10097_v39 = vld [vmem:[%s15841_s7 + $0xa8] sm:$0xff] }
 0x445   : > { %v12147_v30 = vpack.c.bf16 %v10097_v39, %v10096_v23  ;;  %v10099_v48 = vld [vmem:[%s15841_s7 + $0xb8] sm:$0xff]  ;;  %v10100_v50 = vld [vmem:[%s15841_s7 + $0xc0] sm:$0xff] }
 0x446   : > { %12050 = vmatpush1.bf16.msra.mxu1 %v12049_v43  ;;  %v9766_v7 = vcombine.low %v9758_v0, %v9765_v31  ;;  %v12149_v0 = vpack.c.bf16 %v10081_v12, %v10080_v56 }
 0x447   : > { %12110 = vmatpush1.bf16.msra.mxu0 %v12109_v61  ;;  %12052 = vmatprep.subr.bf16.mxu1 %v12051_v44  ;;  %v9886_v61 = vld [vmem:[%s15839_s5 + $0x3a0] sm:$0xff] }
 0x448   : > { %12112 = vmatprep.subr.bf16.mxu0 %v12111_v3  ;;  %v9829_v3 = vld [vmem:[%s15839_s5 + $0x1d8] sm:$0xff]  ;;  %v9768_v2 = vadd.f32 %v9766_v7, %v9731_v18  ;;  %v12129_v43 = vpack.c.bf16 %v9888_v57, %v9886_v61  ;;  %v9826_v44 = vld [vmem:[%s15839_s5 + $0x1c0] sm:$0xff]  ;;  %v10101_v61 = vld [vmem:[%s15841_s7 + $0xc8] sm:$0xff] }
 0x449   : > { %v10084_v57 = vld [vmem:[%s15841_s7 + $0x40] sm:$0xff]  ;;  %v10103_v7 = vld [vmem:[%s15841_s7 + $0xd8] sm:$0xff] }
 0x44a   : > { %12054 = vmatpush1.bf16.msra.mxu1 %v12053_v11  ;;  %v9769_v14 = vmax.f32 %v9768_v2, 0.0  ;;  %v12069_v11 = vpack.c.bf16 %v9828_v4, %v9826_v44  ;;  %v10087_v2 = vld [vmem:[%s15841_s7 + $0x58] sm:$0xff]  ;;  %v10105_v44 = vld [vmem:[%s15841_s7 + $0xe8] sm:$0xff] }
 0x44b   : > { %12114 = vmatpush1.bf16.msra.mxu0 %v12113_v1  ;;  %12056 = vmatprep.subr.bf16.mxu1 %v12055_v6  ;;  %v12067_v1 = vpack.c.bf16 %v9829_v3, %v9827_v58  ;;  %v12071_v6 = vpack.c.bf16 %v9833_v19, %v9831_v37  ;;  %v10085_v58 = vld [vmem:[%s15841_s7 + $0x48] sm:$0xff]  ;;  %v10102_v3 = vld [vmem:[%s15841_s7 + $0xd0] sm:$0xff]  ;;  %v10107_v19 = vld [vmem:[%s15841_s7 + $0xf8] sm:$0xff] }
 0x44c   : > { %12116 = vmatprep.subr.bf16.mxu0 %v12115_v60  ;;  %v9892_v60 = vld [vmem:[%s15839_s5 + $0x3d0] sm:$0xff]  ;;  %v9918_v13 = vrot.slane %v9769_v14, %v13601_v52  ;;  %v9911_v54 = vcombine.high %v9769_v14, %v9769_v14  ;;  %v12157_v32 = vpack.c.bf16 %v10085_v58, %v10084_v57  ;;  %v12159_v27 = vpack.c.bf16 %v10103_v7, %v10102_v3 }
 0x44d   : > { %v10106_v37 = vld [vmem:[%s15841_s7 + $0xf0] sm:$0xff] }
 0x44e   : > { %12058 = vmatpush1.bf16.msra.mxu1 %v12057_v17  ;;  %v9926_v17 = vcombine.high %v9918_v13, %v9918_v13  ;;  %v9925_v63 = vrot.slane %v9911_v54, %v13601_v52  ;;  %v10076_v52 = vld [vmem:[%s15841_s7] sm:$0xff]  ;;  %v12167_v14 = vpack.c.bf16 %v10107_v19, %v10106_v37 }
 0x44f   : > { %12118 = vmatpush1.bf16.msra.mxu0 %v12117_v16  ;;  %12060 = vmatprep.subr.bf16.mxu1 %v12059_v38  ;;  %v12133_v16 = vpack.c.bf16 %v9892_v60, %v9890_v5  ;;  %v10094_v38 = vld [vmem:[%s15841_s7 + $0x90] sm:$0xff]  ;;  %v10088_v5 = vld [vmem:[%s15841_s7 + $0x60] sm:$0xff] }
 0x450   : > { %12120 = vmatprep.subr.bf16.mxu0 %v12119_v34  ;;  %v9832_v34 = vld [vmem:[%s15839_s5 + $0x1f0] sm:$0xff]  ;;  %9996 = vmatprep.mubr.f32.mxu1 %v9926_v17  ;;  %v9927_v33 = vcombine.high %v9925_v63, %v9925_v63  ;;  %v12143_v8 = vpack.c.bf16 %v10095_v24, %v10094_v38 }
 0x451   : > { %v12073_v25 = vpack.c.bf16 %v9832_v34, %v9830_v29 }
 0x452   : > { %12062 = vmatpush1.bf16.msra.mxu1 %v12061_v45  ;;  %10067 = vmatprep.mubr.f32.mxu0 %v9927_v33  ;;  %v10098_v45 = vld [vmem:[%s15841_s7 + $0xb0] sm:$0xff] }
 0x453   : > { %12122 = vmatpush1.bf16.msra.mxu0 %v12121_v59  ;;  %12064 = vmatprep.subr.bf16.mxu1 %v12063_v20  ;;  %v10077_v59 = vld [vmem:[%s15841_s7 + $0x8] sm:$0xff]  ;;  %v12151_v31 = vpack.c.bf16 %v10099_v48, %v10098_v45  ;;  %v10083_v20 = vld [vmem:[%s15841_s7 + $0x38] sm:$0xff] }
 0x454   : > { %12124 = vmatprep.subr.bf16.mxu0 %v12123_v46  ;;  %v12141_v15 = vpack.c.bf16 %v10077_v59, %v10076_v52  ;;  %v10078_v46 = vld [vmem:[%s15841_s7 + $0x10] sm:$0xff] }
 0x455   : > { %v12145_v22 = vpack.c.bf16 %v10079_v53, %v10078_v46 }
 0x456   : > { %12066 = vmatpush1.bf16.msra.mxu1 %v12065_v9  ;;  %v10086_v9 = vld [vmem:[%s15841_s7 + $0x50] sm:$0xff] }
 0x457   : > { %12126 = vmatpush1.bf16.msra.mxu0 %v12125_v51  ;;  %12068 = vmatprep.subr.bf16.mxu1 %v12067_v1  ;;  %v10082_v51 = vld [vmem:[%s15841_s7 + $0x30] sm:$0xff]  ;;  %v10104_v1 = vld [vmem:[%s15841_s7 + $0xe0] sm:$0xff] }
 0x458   : > { %12128 = vmatprep.subr.bf16.mxu0 %v12127_v41  ;;  %v12153_v18 = vpack.c.bf16 %v10083_v20, %v10082_v51  ;;  %v12155_v41 = vpack.c.bf16 %v10101_v61, %v10100_v50  ;;  %v12163_v4 = vpack.c.bf16 %v10105_v44, %v10104_v1 }
 0x45a   : > { %12070 = vmatpush1.bf16.msra.mxu1 %v12069_v11  ;;  %v12169_v11 = vpack.c.bf16 %v10091_v10, %v10090_v49 }
 0x45b   : > { %12130 = vmatpush1.bf16.msra.mxu0 %v12129_v43  ;;  %12072 = vmatprep.subr.bf16.mxu1 %v12071_v6  ;;  %v12161_v43 = vpack.c.bf16 %v10087_v2, %v10086_v9 }
 0x45c   : > { %12132 = vmatprep.subr.bf16.mxu0 %v12131_v55  ;;  %v10089_v55 = vld [vmem:[%s15841_s7 + $0x68] sm:$0xff] }
 0x45d   : > { %v12165_v60 = vpack.c.bf16 %v10089_v55, %v10088_v5 }
 0x45e   : > { %12074 = vmatpush1.bf16.msra.mxu1 %v12073_v25  ;;  %v13470_v25 = vmov 14  }
 0x45f   : > { %12134 = vmatpush1.bf16.msra.mxu0 %v12133_v16  ;;  %12140 = vmatprep.subr.bf16.mxu1 %v12139_v36 }
 0x460   : > { %12136 = vmatprep.subr.bf16.mxu0 %v12135_v62  ;;  %13429 = vset.pattern.permute.xlu0 %v13470_v25 }
 0x461   : > { %9997 = vmatmul.mubr.f32.vlgmr.msra.gmra.mrb[0].mxu1 %v9918_v13  ;;  %v9898_v13 = vld [vmem:[%s15840_s6] sm:$0x3] }
 0x462   : > { %12142 = vmatpush3.bf16.msra.mxu1 %v12141_v15  ;;  %v9903_v54 = vrot.slane %v9898_v13, %v13583_v40  ;;  %v9907_v16 = vrot.slane %v9898_v13, %v13587_v42  ;;  %v11970_v40 = vld [vmem:[%s15842_s8] ss:$0 sm:$0xff] }
 0x463   : > { %12138 = vmatpush1.bf16.msra.mxu0 %v12137_v35  ;;  %12144 = vmatprep.subr.bf16.mxu1 %v12143_v8 }
 0x466   : > { %10068 = vmatmul.mubr.f32.vlgmr.msra.gmra.mrb[0].mxu0 %v9925_v63  ;;  %12146 = vmatpush3.bf16.msra.mxu1 %v12145_v22 }
 0x467   : > { %12148 = vmatprep.subr.bf16.mxu1 %v12147_v30 }
 0x46a   : > { %12150 = vmatpush3.bf16.msra.mxu1 %v12149_v0 }
 0x46b   : > { %12152 = vmatprep.subr.bf16.mxu1 %v12151_v31 }
 0x46e   : > { %12154 = vmatpush3.bf16.msra.mxu1 %v12153_v18 }
 0x46f   : > { %12156 = vmatprep.subr.bf16.mxu1 %v12155_v41 }
 0x472   : > { %12158 = vmatpush3.bf16.msra.mxu1 %v12157_v32 }
 0x473   : > { %12160 = vmatprep.subr.bf16.mxu1 %v12159_v27 }
 0x476   : > { %12162 = vmatpush3.bf16.msra.mxu1 %v12161_v43 }
 0x477   : > { %12164 = vmatprep.subr.bf16.mxu1 %v12163_v4 }
 0x47a   : > { %12166 = vmatpush3.bf16.msra.mxu1 %v12165_v60 }
 0x47b   : > { %12168 = vmatprep.subr.bf16.mxu1 %v12167_v14 }
 0x47e   : > { %12170 = vmatpush3.bf16.msra.mxu1 %v12169_v11 }
 0x534   : > { %v9998_v6 = vpop.f32.mrb[0].mxu1 }
 0x535   : > { %v9999_v29 = vadd.f32 %v9998_v6, %v9903_v54  ;;  %v10000_v34 = vpop.f32.mrb[1].mxu1 }
 0x536   : > { %v10001_v62 = vadd.f32 %v10000_v34, %v9907_v16 }
 0x539   : > { %v10069_v21 = vpop.f32.mrb[0].mxu0 }
 0x53a   : > { %v10071_v47 = vpop.f32.mrb[1].mxu0  ;;  %v10070_v17 = vadd.f32 %v10069_v21, %v9999_v29 }
 0x53b   : > { %v10072_v63 = vadd.f32 %v10071_v47, %v10001_v62 }
 0x53c   : > { %v10074_v28 = vmax.f32 %v10070_v17, 0.0 }
 0x53d   : > { %v10075_v26 = vmax.f32 %v10072_v63, 0.0 }
 0x53f   : > { %10179 = vmatprep.mubr.f32.mxu1 %v10075_v26 }
 0x540   : > { %10180 = vmatmul.mubr.f32.vlgmr.msra.gmra.mrb[2].mxu1 %v10074_v28 }
 0x613   : > { %v12008_v33 = vpop.f32.mrb[2].mxu1 }
 0x614   : > { %v12009_v42 = vpop.f32.mrb[3].mxu1 }
 0x615   : > { %v12010_v35 = vadd.f32 %v12009_v42, %v12008_v33 }
 0x617   : > { %v10182_v36 = vadd.f32 %v12010_v35, %v11970_v40 }
 0x619   : > { %v10186_v52 = vsel %vm10185_vm2, %v10182_v36, 0.0 }
 0x61a   : > { %10187 = vadd.xlane.f32.xlu0 %v10186_v52 }
 0x630   : > { %10203 = vperm.xlu0 %13429, %v10182_v36  }
 0x6a7   : > { %v10188_v59 = vpop.xlane.xlu0 %10187 }
 0x6a8   : > { %v10189_v38 = vrot.slane %v10188_v59, 4 }
 0x6aa   : > { %v10190_v24 = vadd.f32 %v10189_v38, %v10188_v59 }
 0x6ac   : > { %v10191_v15 = vrot.slane %v10190_v24, 2 }
 0x6ae   : > { %v10192_v8 = vadd.f32 %v10191_v15, %v10190_v24 }
 0x6af   : > { %v10204_v22 = vpop.permute.xlu0 %10203 }
 0x6b0   : > { %v10193_v46 = vrot.slane %v10192_v8, 1 }
 0x6b2   : > { %v10194_v53 = vadd.f32 %v10193_v46, %v10192_v8 }
 0x6b4   : > { %12176 = vpush %v10194_v53 }
 0x6e5   : > { %s12177_s15 = spop %12176 }
 0x6e6   : > { %s10198_s17 = smul.f32 0.035714287, %s12177_s15 }
 0x6e8   : > { %v10199_v23 = vstv %s10198_s17 }
 0x6e9   : > { %v10200_v39 = vsub.f32 %v10182_v36, %v10199_v23 }
 0x6eb   : > { %v10206_v30 = vadd.f32 %v10204_v22, %v10200_v39 }
 0x6ed   : > { %10207 = vst.msk [vmem:[#allocation3] sm:$0x3] %vm10185_vm2, %v10206_v30 }
 0x6ee PF: > { %p12182_p6 = scmp.eq.s32.totalorder %s13528_s10, 1  ;;  %s13471_s18 = smov [#allocation3]  }
 0x6ef   : > { %s10215_s20 = sshll.u32 %s13471_s18, 4  ;;  %s10216_s20 = int_to_ptr.vmem [resolvable:$true] %s10215_s20 }
 0x6f0   : > { %s13430_s21 = scalar_lea.vmem %s10216_s20, 32  ;;  %p13437_p10 = scmp.lt.s32.totalorder %s10216_s20, %s10216_s20 }
 0x6f1   : > { %p13431_p7 = scmp.ne.s32.totalorder %s10216_s20, %s13430_s21  ;;  %p13438_p11 = scmp.lt.s32.totalorder %s13430_s21, %s13430_s21 }
 0x6f3   : > { %p13432_p8 = pnand %p13431_p7, %p12182_p6  ;;  %p13439_p12 = por %p13438_p11, %p13437_p10 }
 0x6f5   : > { %p13433_p9 = pneg %p13432_p8 }
 0x6f7   : > { %p13440_p13 = pnand %p13439_p12, %p13433_p9 }
 0x6f9   : > { %13443 = shalt.err (!%p13440_p13)
}
 0x6fa   : > { %s13444_s25 = scalar_lea.hbm %s15843_s9, 32 }
 0x6fb   : > { %p13445_p0 = scmp.ne.s32.totalorder %s15843_s9, %s13444_s25  ;;  %p13450_p3 = scmp.lt.u32.totalorder %s13444_s25, %s15843_s9 }
 0x6fd   : > { %p13446_p1 = pnand %p13445_p0, %p12182_p6 }
 0x6ff   : > { %p13447_p2 = pneg %p13446_p1 }
 0x701   : > { %p13452_p4 = pnand %p13450_p3, %p13447_p2 }
 0x703   : > { %13455 = shalt.err (!%p13452_p4)
}
 0x704   : > { %12179 = dma.vmem_to_hbm [thread:$0]  (%p12182_p6), %s10216_s20, 32, %s15843_s9, [#allocation4]  }
 0x705   : > { %13461 = dma.done.wait (%p12182_p6), [#allocation4], 32  }
 0x706   : > { %13463 = vsyncadd (%p12182_p6), [#allocation4], 4294967264 }
 0x707 PF: > { %s20_s30 = sadd.s32 1, %s13466_s30  }
 0x708   : > { %p17_p5 = scmp.ge.s32.totalorder %s20_s30, 4  }
 0x70a   :  { %19 = sbr.rel (!%p17_p5) target bundleno = 1 (0x1), region = 145 }
 0x711   :  { %10228 = vsyncpa [#allocation4], 1 }
 0x712   :  { %10230 = vsyncpa [#allocation4 + $0x1], 1 }

</bundles_post_ra>
